<compile_context>
chip_gen: v5e
topology: v5e:2x2
jax: 0.10.0
libtpu: 0.0.40
codegen_flags: <defaults>
</compile_context>

<pallas_src>
import jax
import jax.numpy as jnp
from jax.experimental import pallas as pl
from jax.experimental.pallas import tpu as pltpu

_LEAKY = 0.1


def _leaky(v):
    return jnp.where(v >= 0, v, _LEAKY * v)


def _row_plan(m):
    """Row tile for (M, C) slabs: multiple of 8, <=512, and >=2 blocks when possible
    (keeps both v7x TensorCores busy and enables pipelining). Returns (tm, m_padded)."""
    if m <= 8:
        return m, m
    cap = min(512, max(8, (m // 2) // 8 * 8))
    for tm in range(cap, 7, -8):
        if m % tm == 0:
            return tm, m
    tm = cap
    return tm, ((m + tm - 1) // tm) * tm


def _pad_rows(x, m_pad):
    m = x.shape[0]
    if m_pad == m:
        return x
    return jnp.pad(x, ((0, m_pad - m), (0, 0)))


def _cparams(est_bytes):
    lim = int(min(max(2 * est_bytes + (1 << 20), 4 << 20), 32 << 20))
    return pltpu.CompilerParams(dimension_semantics=("parallel",),
                                vmem_limit_bytes=lim)


# --------------------------------------------------------------------------
# Kernel A: 1x1 conv (matmul) + bias + optional LeakyReLU
# --------------------------------------------------------------------------
def _mm_kernel(act):
    def kernel(x_ref, w_ref, b_ref, o_ref):
        y = jnp.dot(x_ref[...], w_ref[...],
                    preferred_element_type=jnp.float32) + b_ref[...]
        if act == "leaky":
            y = _leaky(y)
        o_ref[...] = y.astype(o_ref.dtype)
    return kernel


def matmul_bias_act_pallas(x2d, w_bf16, b, act="leaky", out_dtype=jnp.bfloat16):
    m, k = x2d.shape
    n = w_bf16.shape[1]
    tm, m_pad = _row_plan(m)
    xp = _pad_rows(x2d, m_pad)
    osz = jnp.dtype(out_dtype).itemsize
    est = tm * k * 2 + k * n * 2 + n * 4 + tm * n * osz
    out = pl.pallas_call(
        _mm_kernel(act),
        out_shape=jax.ShapeDtypeStruct((m_pad, n), out_dtype),
        grid=(m_pad // tm,),
        in_specs=[pl.BlockSpec((tm, k), lambda i: (i, 0)),
                  pl.BlockSpec((k, n), lambda i: (0, 0)),
                  pl.BlockSpec((1, n), lambda i: (0, 0))],
        out_specs=pl.BlockSpec((tm, n), lambda i: (i, 0)),
        compiler_params=_cparams(est),
        cost_estimate=pl.CostEstimate(
            flops=2 * m_pad * k * n, transcendentals=0,
            bytes_accessed=m_pad * k * 2 + k * n * 2 + m_pad * n * osz),
    )(xp, w_bf16, b.reshape(1, n))
    return out[:m]


# --------------------------------------------------------------------------
# Kernel B: dual 1x1 conv (CSP cv1 [CBL] + cv2 [plain]) — weights packed along N,
# one matmul, result split in-kernel.
# --------------------------------------------------------------------------
def _dual_mm_kernel(x_ref, w_ref, b1_ref, o1_ref, o2_ref):
    y = jnp.dot(x_ref[...], w_ref[...], preferred_element_type=jnp.float32)
    n = o1_ref.shape[-1]
    o1_ref[...] = _leaky(y[:, :n] + b1_ref[...]).astype(o1_ref.dtype)
    o2_ref[...] = y[:, n:].astype(o2_ref.dtype)


def dual_matmul_pallas(x2d, w12, b1):
    m, k = x2d.shape
    n2 = w12.shape[1]
    n = n2 // 2
    tm, m_pad = _row_plan(m)
    xp = _pad_rows(x2d, m_pad)
    est = tm * k * 2 + k * n2 * 2 + n * 4 + 2 * tm * n * 2
    u, y2 = pl.pallas_call(
        _dual_mm_kernel,
        out_shape=(jax.ShapeDtypeStruct((m_pad, n), jnp.bfloat16),
                   jax.ShapeDtypeStruct((m_pad, n), jnp.bfloat16)),
        grid=(m_pad // tm,),
        in_specs=[pl.BlockSpec((tm, k), lambda i: (i, 0)),
                  pl.BlockSpec((k, n2), lambda i: (0, 0)),
                  pl.BlockSpec((1, n), lambda i: (0, 0))],
        out_specs=(pl.BlockSpec((tm, n), lambda i: (i, 0)),
                   pl.BlockSpec((tm, n), lambda i: (i, 0))),
        compiler_params=_cparams(est),
        cost_estimate=pl.CostEstimate(
            flops=2 * m_pad * k * n2, transcendentals=0,
            bytes_accessed=m_pad * k * 2 + k * n2 * 2 + 2 * m_pad * n * 2),
    )(xp, w12, b1.reshape(1, n))
    return u[:m], y2[:m]


# --------------------------------------------------------------------------
# Kernel C: SAM  —  out = x * sigmoid(x @ W + b)
# --------------------------------------------------------------------------
def _sam_kernel(x_ref, w_ref, b_ref, o_ref):
    x = x_ref[...]
    a = jnp.dot(x, w_ref[...], preferred_element_type=jnp.float32) + b_ref[...]
    sig = pl.reciprocal(1.0 + jnp.exp(-a), approx=True)     # EUP path
    o_ref[...] = (x.astype(jnp.float32) * sig).astype(o_ref.dtype)


def sam_pallas(x2d, w, b):
    m, c = x2d.shape
    tm, m_pad = _row_plan(m)
    xp = _pad_rows(x2d, m_pad)
    est = tm * c * 2 + c * c * 2 + c * 4 + tm * c * 2
    out = pl.pallas_call(
        _sam_kernel,
        out_shape=jax.ShapeDtypeStruct((m_pad, c), jnp.bfloat16),
        grid=(m_pad // tm,),
        in_specs=[pl.BlockSpec((tm, c), lambda i: (i, 0)),
                  pl.BlockSpec((c, c), lambda i: (0, 0)),
                  pl.BlockSpec((1, c), lambda i: (0, 0))],
        out_specs=pl.BlockSpec((tm, c), lambda i: (i, 0)),
        compiler_params=_cparams(est),
        cost_estimate=pl.CostEstimate(
            flops=2 * m_pad * c * c, transcendentals=m_pad * c,
            bytes_accessed=2 * m_pad * c * 2 + c * c * 2),
    )(xp, w, b.reshape(1, c))
    return out[:m]


# --------------------------------------------------------------------------
# Kernel D: CSP tail  —  cv3 -> BN -> LeakyReLU -> cv4(CBL); the 2c_ concat fused away
# --------------------------------------------------------------------------
def _csp_tail_kernel(xm_ref, y2_ref, w13_ref, bb1_ref, bb2_ref,
                     w4a_ref, w4b_ref, b4_ref, o_ref):
    z1 = _leaky(jnp.dot(xm_ref[...], w13_ref[...],
                        preferred_element_type=jnp.float32) + bb1_ref[...])
    z2 = _leaky(y2_ref[...].astype(jnp.float32) + bb2_ref[...])
    y = (jnp.dot(z1.astype(jnp.bfloat16), w4a_ref[...],
                 preferred_element_type=jnp.float32)
         + jnp.dot(z2.astype(jnp.bfloat16), w4b_ref[...],
                   preferred_element_type=jnp.float32)
         + b4_ref[...])
    o_ref[...] = _leaky(y).astype(o_ref.dtype)


def csp_tail_pallas(xm, y2, w13, bb1, bb2, w4a, w4b, b4):
    m, c_ = xm.shape
    n = w4a.shape[1]
    tm, m_pad = _row_plan(m)
    xp = _pad_rows(xm, m_pad)
    yp = _pad_rows(y2, m_pad)
    est = 2 * tm * c_ * 2 + (c_ * c_ + 2 * c_ * n) * 2 + tm * n * 2 + (2 * c_ + n) * 4
    out = pl.pallas_call(
        _csp_tail_kernel,
        out_shape=jax.ShapeDtypeStruct((m_pad, n), jnp.bfloat16),
        grid=(m_pad // tm,),
        in_specs=[pl.BlockSpec((tm, c_), lambda i: (i, 0)),
                  pl.BlockSpec((tm, c_), lambda i: (i, 0)),
                  pl.BlockSpec((c_, c_), lambda i: (0, 0)),
                  pl.BlockSpec((1, c_), lambda i: (0, 0)),
                  pl.BlockSpec((1, c_), lambda i: (0, 0)),
                  pl.BlockSpec((c_, n), lambda i: (0, 0)),
                  pl.BlockSpec((c_, n), lambda i: (0, 0)),
                  pl.BlockSpec((1, n), lambda i: (0, 0))],
        out_specs=pl.BlockSpec((tm, n), lambda i: (i, 0)),
        compiler_params=_cparams(est),
        cost_estimate=pl.CostEstimate(
            flops=2 * m_pad * c_ * c_ + 4 * m_pad * c_ * n, transcendentals=0,
            bytes_accessed=2 * m_pad * c_ * 2 + (c_ * c_ + 2 * c_ * n) * 2 + m_pad * n * 2),
    )(xp, yp, w13, bb1.reshape(1, c_), bb2.reshape(1, c_), w4a, w4b, b4.reshape(1, n))
    return out[:m]


# --------------------------------------------------------------------------
# Kernel E: fused Bottleneck — 1x1 CBL written straight into the padded bf16 scratch,
# then 3x3 CBL (stride 1, pad 1).  Interior at column offset 2 keeps the scratch store
# sublane-aligned for bf16; halo is refilled each step (megacore-safe).
# --------------------------------------------------------------------------
def _make_bottleneck_kernel(H, W, cin, ch, cout):
    def kernel(x_ref, w1_ref, b1_ref, w9_ref, b3_ref, o_ref, pad_ref):
        zr = jnp.zeros((1, W + 4, ch), jnp.bfloat16)
        pad_ref[0:1] = zr
        pad_ref[H + 1:H + 2] = zr
        zc = jnp.zeros((H + 2, 2, ch), jnp.bfloat16)
        pad_ref[:, 0:2] = zc
        pad_ref[:, W + 2:W + 4] = zc

        # fused 1x1 CBL
        u = jnp.dot(x_ref[0].reshape(H * W, cin), w1_ref[...],
                    preferred_element_type=jnp.float32) + b1_ref[...]
        pad_ref[1:H + 1, 2:W + 2, :] = _leaky(u).reshape(H, W, ch).astype(jnp.bfloat16)

        # 3x3 CBL
        acc = jnp.zeros((H * W, cout), jnp.float32)
        for dy in range(3):
            for dx in range(3):
                patch = pad_ref[dy:dy + H, dx + 1:dx + 1 + W, :].reshape(H * W, ch)
                acc = acc + jnp.dot(patch, w9_ref[dy * 3 + dx],
                                    preferred_element_type=jnp.float32)
        o_ref[0] = _leaky(acc + b3_ref[...]).reshape(H, W, cout).astype(o_ref.dtype)
    return kernel


def bottleneck_pallas(x, w1, b1, w9, b3):
    B, H, W, cin = x.shape
    ch = w1.shape[1]
    cout = w9.shape[-1]
    est = (H * W * cin * 2 + cin * ch * 2 + 9 * ch * cout * 2 +
           H * W * cout * 2 + (H + 2) * (W + 4) * ch * 2)
    return pl.pallas_call(
        _make_bottleneck_kernel(H, W, cin, ch, cout),
        out_shape=jax.ShapeDtypeStruct((B, H, W, cout), jnp.bfloat16),
        grid=(B,),
        in_specs=[pl.BlockSpec((1, H, W, cin), lambda bi: (bi, 0, 0, 0)),
                  pl.BlockSpec((cin, ch), lambda bi: (0, 0)),
                  pl.BlockSpec((1, ch), lambda bi: (0, 0)),
                  pl.BlockSpec((9, ch, cout), lambda bi: (0, 0, 0)),
                  pl.BlockSpec((1, cout), lambda bi: (0, 0))],
        out_specs=pl.BlockSpec((1, H, W, cout), lambda bi: (bi, 0, 0, 0)),
        scratch_shapes=[pltpu.VMEM((H + 2, W + 4, ch), jnp.bfloat16)],
        compiler_params=_cparams(est),
        cost_estimate=pl.CostEstimate(
            flops=2 * B * H * W * cin * ch + 18 * B * H * W * ch * cout,
            transcendentals=0,
            bytes_accessed=B * H * W * cin * 2 + (cin * ch + 9 * ch * cout) * 2 +
                           B * H * W * cout * 2),
    )(x, w1, b1.reshape(1, ch), w9, b3.reshape(1, cout))


# --------------------------------------------------------------------------
# Kernel F: fused SPPF (cascaded 5x5 maxpools -> effective 5/9/13) + CSP cv1(CBL) /
# cv2(plain) 1x1 convs with N-packed weights.  The 4C concat never leaves VMEM.
# --------------------------------------------------------------------------
def _make_spp_kernel(H, W, c, cout):
    P = 2  # halo per 5x5 stage

    def kernel(x_ref, w_ref, b1_ref, o1_ref, o2_ref, pad_ref):
        # -inf sentinel halo (Python literal, not a captured constant)
        nr = jnp.full((P, W + 2 * P, c), -1e30, jnp.bfloat16)
        pad_ref[0:P] = nr
        pad_ref[H + P:H + 2 * P] = nr
        nc = jnp.full((H + 2 * P, P, c), -1e30, jnp.bfloat16)
        pad_ref[:, 0:P] = nc
        pad_ref[:, W + P:W + 2 * P] = nc

        x = x_ref[0]
        pad_ref[P:P + H, P:P + W, :] = x

        def mp5():
            # separable 5x5 max: along W then along H
            r = pad_ref[:, 0:W, :]
            for d in range(1, 5):
                r = jnp.maximum(r, pad_ref[:, d:d + W, :])
            out = r[0:H]
            for d in range(1, 5):
                out = jnp.maximum(out, r[d:d + H])
            return out

        p5 = mp5()
        pad_ref[P:P + H, P:P + W, :] = p5
        p9 = mp5()
        pad_ref[P:P + H, P:P + W, :] = p9
        p13 = mp5()

        feats = (x, p5, p9, p13)                      # torch.cat order
        acc = jnp.zeros((H * W, 2 * cout), jnp.float32)
        for i in range(4):
            acc = acc + jnp.dot(feats[i].reshape(H * W, c), w_ref[i],
                                preferred_element_type=jnp.float32)
        o1_ref[0] = _leaky(acc[:, :cout] + b1_ref[...]).reshape(H, W, cout).astype(o1_ref.dtype)
        o2_ref[0] = acc[:, cout:].reshape(H, W, cout).astype(o2_ref.dtype)
    return kernel


def spp_dualconv_pallas(x, w12_4, b1):
    B, H, W, c = x.shape
    cout = w12_4.shape[-1] // 2
    est = (H * W * c * 2 + 4 * c * 2 * cout * 2 + 2 * H * W * cout * 2 +
           (H + 4) * (W + 4) * c * 2)
    return pl.pallas_call(
        _make_spp_kernel(H, W, c, cout),
        out_shape=(jax.ShapeDtypeStruct((B, H, W, cout), jnp.bfloat16),
                   jax.ShapeDtypeStruct((B, H, W, cout), jnp.bfloat16)),
        grid=(B,),
        in_specs=[pl.BlockSpec((1, H, W, c), lambda bi: (bi, 0, 0, 0)),
                  pl.BlockSpec((4, c, 2 * cout), lambda bi: (0, 0, 0)),
                  pl.BlockSpec((1, cout), lambda bi: (0, 0))],
        out_specs=(pl.BlockSpec((1, H, W, cout), lambda bi: (bi, 0, 0, 0)),
                   pl.BlockSpec((1, H, W, cout), lambda bi: (bi, 0, 0, 0))),
        scratch_shapes=[pltpu.VMEM((H + 4, W + 4, c), jnp.bfloat16)],
        compiler_params=_cparams(est),
        cost_estimate=pl.CostEstimate(
            flops=16 * B * H * W * c * cout, transcendentals=0,
            bytes_accessed=B * H * W * c * 2 + 8 * c * cout * 2 +
                           2 * B * H * W * cout * 2),
    )(x, w12_4, b1.reshape(1, cout))


# --------------------------------------------------------------------------
# Yolo_v2_Netv2 forward (neck + head), Pallas version.  ceng3: NHWC.
# --------------------------------------------------------------------------
def yolo_v2_netv2_pallas(ceng3, Q, head_c):
    B, H, W, _ = ceng3.shape
    M = B * H * W

    def to2d(a):
        return a.reshape(M, a.shape[-1])

    def to4d(a):
        return a.reshape(B, H, W, a.shape[-1])

    x2d = to2d(ceng3).astype(jnp.bfloat16)

    # spp: CBL 1x1 -> SPPF -> BottleneckCSP(n=1)
    t = matmul_bias_act_pallas(x2d, Q['spp_cbl_w'], Q['spp_cbl_b'])
    q1 = Q['csp1']
    u, y2 = spp_dualconv_pallas(to4d(t), q1['cv12_w4'], q1['cv1_b'])
    w1, b1, w9, b9 = q1['m'][0]                      # Bottleneck (shortcut=False)
    u = bottleneck_pallas(u, w1, b1, w9, b9)
    o = csp_tail_pallas(to2d(u), to2d(y2), q1['cv3_w'], q1['bn_b1'], q1['bn_b2'],
                        q1['cv4_wa'], q1['cv4_wb'], q1['cv4_b'])

    # SAM
    o = sam_pallas(o, Q['sam_w'], Q['sam_b'])

    # conv_set: BottleneckCSP(n=3, shortcut=False)
    q2 = Q['csp2']
    u2, y2b = dual_matmul_pallas(o, q2['cv12_w'], q2['cv1_b'])
    u4 = to4d(u2)
    for (w1, b1, w9, b9) in q2['m']:
        u4 = bottleneck_pallas(u4, w1, b1, w9, b9)
    o = csp_tail_pallas(to2d(u4), y2b, q2['cv3_w'], q2['bn_b1'], q2['bn_b2'],
                        q2['cv4_wa'], q2['cv4_wb'], q2['cv4_b'])

    # head: plain 1x1 conv, lane-padded to a multiple of 128, sliced back
    oh = matmul_bias_act_pallas(o, Q['head_w'], Q['head_b'], act="none",
                                out_dtype=jnp.float32)
    out = to4d(oh[:, :head_c])
    # TODO(synk): at real resolutions keep NHWC (or fuse the transpose into the head
    # kernel) instead of this extra XLA transpose pass.
    return jnp.transpose(out, (0, 3, 1, 2))          # NHWC -> NCHW (matches PyTorch)


# --------------------------------------------------------------------------
# Pure-JAX reference (f32, HIGHEST precision) for correctness check
# --------------------------------------------------------------------------
def yolo_v2_netv2_ref(ceng3, P):
    hp = jax.lax.Precision.HIGHEST

    def lk(v):
        return jnp.where(v >= 0, v, _LEAKY * v)

    def c1x1(x, w):
        return jnp.einsum('bhwc,cd->bhwd', x, w, precision=hp)

    def c3x3(x, w):
        return jax.lax.conv_general_dilated(
            x, w, (1, 1), ((1, 1), (1, 1)),
            dimension_numbers=('NHWC', 'HWIO', 'NHWC'), precision=hp)

    def mpool(x, k):
        p = k // 2
        return jax.lax.reduce_window(x, -jnp.inf, jax.lax.max, (1, k, k, 1),
                                     (1, 1, 1, 1), ((0, 0), (p, p), (p, p), (0, 0)))

    def csp(x, pp):
        u = lk(c1x1(x, pp['cv1_w']) + pp['cv1_b'])
        for m in pp['m']:
            u = lk(c1x1(u, m['w1']) + m['b1'])
            u = lk(c3x3(u, m['w3']) + m['b3'])
        z1 = lk(c1x1(u, pp['cv3_w']) + pp['bn_b1'])
        z2 = lk(c1x1(x, pp['cv2_w']) + pp['bn_b2'])
        z = jnp.concatenate([z1, z2], axis=-1)
        return lk(c1x1(z, pp['cv4_w']) + pp['cv4_b'])

    t = lk(c1x1(ceng3, P['spp_cbl']['w']) + P['spp_cbl']['b'])
    cat = jnp.concatenate([t, mpool(t, 5), mpool(t, 9), mpool(t, 13)], axis=-1)
    o = csp(cat, P['csp1'])
    att = jax.nn.sigmoid(c1x1(o, P['sam']['w']) + P['sam']['b'])
    o = o * att
    o = csp(o, P['csp2'])
    out = c1x1(o, P['head']['w']) + P['head']['b']
    return jnp.transpose(out, (0, 3, 1, 2))


# --------------------------------------------------------------------------
# Parameter construction: deployment form (BatchNorm eval-mode, already folded).
# --------------------------------------------------------------------------
def init_params(key, c2, c3, num_anc, num_classes):
    c_ = c3 // 2
    ks = iter(jax.random.split(key, 64))

    def w(shape):
        fan_in = 1
        for s in shape[:-1]:
            fan_in *= s
        return jax.random.normal(next(ks), shape, jnp.float32) * (2.0 / fan_in) ** 0.5

    def b(n):
        return 0.05 * jax.random.normal(next(ks), (n,), jnp.float32)

    def csp(c_in, c_out, ch, n):
        return dict(
            cv1_w=w((c_in, ch)), cv1_b=b(ch),            # CBL 1x1
            cv2_w=w((c_in, ch)),                         # plain conv, BN-scale half folded
            cv3_w=w((ch, ch)),                           # plain conv, BN-scale half folded
            bn_b1=b(ch), bn_b2=b(ch),                    # BN bias halves (y1 | y2)
            cv4_w=w((2 * ch, c_out)), cv4_b=b(c_out),    # CBL 1x1
            m=[dict(w1=w((ch, ch)), b1=b(ch),            # Bottleneck: 1x1 CBL ...
                    w3=w((3, 3, ch, ch)), b3=b(ch))      # ... then 3x3 CBL (no shortcut)
               for _ in range(n)])

    ch_head = num_anc * (1 + 4 + num_classes)
    return dict(
        spp_cbl=dict(w=w((c3, c2)), b=b(c2)),
        csp1=csp(4 * c2, c3, c_, 1),
        sam=dict(w=w((c3, c3)), b=b(c3)),
        csp2=csp(c3, c3, c_, 3),
        head=dict(w=w((c3, ch_head)), b=b(ch_head)),
    )


def prep_params(P):
    """f32 deployment params -> Pallas kernel form (bf16 weights, cv1|cv2 packed along N,
    SPP K-split, cv4 split, lane-padded head)."""
    bf = lambda a: a.astype(jnp.bfloat16)
    Q = {'spp_cbl_w': bf(P['spp_cbl']['w']), 'spp_cbl_b': P['spp_cbl']['b']}

    def csp(pp, split4):
        cin, ch = pp['cv1_w'].shape
        q = {'cv1_b': pp['cv1_b'], 'cv3_w': bf(pp['cv3_w']),
             'bn_b1': pp['bn_b1'], 'bn_b2': pp['bn_b2'],
             'cv4_wa': bf(pp['cv4_w'][:ch]), 'cv4_wb': bf(pp['cv4_w'][ch:]),
             'cv4_b': pp['cv4_b'],
             'm': [(bf(m['w1']), m['b1'], bf(m['w3'].reshape(9, ch, ch)), m['b3'])
                   for m in pp['m']]}
        if split4:   # K-split matching torch.cat([x, p5, p9, p13], dim=1), N-packed cv1|cv2
            w1 = pp['cv1_w'].reshape(4, cin // 4, ch)
            w2 = pp['cv2_w'].reshape(4, cin // 4, ch)
            q['cv12_w4'] = bf(jnp.concatenate([w1, w2], axis=-1))
        else:        # N-packed cv1|cv2
            q['cv12_w'] = bf(jnp.concatenate([pp['cv1_w'], pp['cv2_w']], axis=-1))
        return q

    Q['csp1'] = csp(P['csp1'], True)
    Q['csp2'] = csp(P['csp2'], False)
    Q['sam_w'] = bf(P['sam']['w'])
    Q['sam_b'] = P['sam']['b']

    cin, chd = P['head']['w'].shape
    npad = ((chd + 127) // 128) * 128
    Q['head_w'] = bf(jnp.zeros((cin, npad), jnp.float32).at[:, :chd].set(P['head']['w']))
    Q['head_b'] = jnp.zeros((npad,), jnp.float32).at[:chd].set(P['head']['b'])
    return Q


# --------------------------------------------------------------------------
if __name__ == "__main__":
    key = jax.random.PRNGKey(0)
    k_x, k_bb, k_p = jax.random.split(key, 3)

    B, C_IN, HX, WX = 2, 3, 32, 32
    C2, C3 = 32, 64                        # backbone.dims_out[1], dims_out[2]
    NUM_ANC, NUM_CLASSES = 5, 3
    CH = NUM_ANC * (1 + 4 + NUM_CLASSES)   # 40

    x = jax.random.normal(k_x, (B, C_IN, HX, WX), jnp.float32)   # NCHW like PyTorch

    # TODO(synk): the CSP/Darknet backbone is injected into Yolo_v2_Netv2 and is not part of
    # this module; replaced by a deterministic stub (avg-pool + 1x1 projection) producing
    # ceng3 only (ceng1/ceng2 are unused by this forward pass).
    x_nhwc = jnp.transpose(x, (0, 2, 3, 1))

    def avg_pool(a, s):
        b_, h_, w_, c_ = a.shape
        return a.reshape(b_, h_ // s, s, w_ // s, s, c_).mean(axis=(2, 4))

    wb3 = jax.random.normal(k_bb, (C_IN, C3), jnp.float32)
    ceng3 = jnp.einsum('bhwc,cd->bhwd', avg_pool(x_nhwc, 4), wb3)   # (B, 8, 8, C3)

    P = init_params(k_p, C2, C3, NUM_ANC, NUM_CLASSES)
    Q = prep_params(P)

    fwd = jax.jit(yolo_v2_netv2_pallas, static_argnums=(2,))
    out = jax.block_until_ready(fwd(ceng3, Q, CH))

    ref = yolo_v2_netv2_ref(ceng3, P)
    assert out.shape == (B, CH, 8, 8), out.shape
    rel = float(jnp.linalg.norm(out - ref) / (jnp.linalg.norm(ref) + 1e-6))
    max_diff = float(jnp.max(jnp.abs(out - ref)))
    if rel > 0.08:
        raise AssertionError(f"mismatch: rel L2 err = {rel}, max abs diff = {max_diff}")
    print("KERNEL_OK")
</pallas_src>

<mosaic_0001>
module attributes {stable_mosaic.version = 11 : i64} {
  func.func @kernel(%arg0: i32, %arg1: memref<1x8x8x32xbf16, #tpu.memory_space<vmem>>, %arg2: memref<4x32x64xbf16, #tpu.memory_space<vmem>>, %arg3: memref<1x32xf32, #tpu.memory_space<vmem>>, %arg4: memref<1x8x8x32xbf16, #tpu.memory_space<vmem>>, %arg5: memref<1x8x8x32xbf16, #tpu.memory_space<vmem>>, %arg6: memref<12x12x32xbf16, #tpu.memory_space<vmem>>) attributes {dimension_semantics = [#tpu.dimension_semantics<parallel>], iteration_bounds = array<i64: 2>, scalar_prefetch = 0 : i64, scratch_operands = 1 : i64, tpu.core_type = #tpu.core_type<tc>, window_params = [{transform_indices = @transform_0, window_bounds = array<i64: 1, 8, 8, 32>}, {pipeline_mode = #tpu.pipeline_mode<synchronous>, transform_indices = @transform_1, window_bounds = array<i64: 4, 32, 64>}, {pipeline_mode = #tpu.pipeline_mode<synchronous>, transform_indices = @transform_2, window_bounds = array<i64: 1, 32>}, {transform_indices = @transform_3, window_bounds = array<i64: 1, 8, 8, 32>}, {transform_indices = @transform_4, window_bounds = array<i64: 1, 8, 8, 32>}]} {
    %cst = arith.constant -1.000260e+30 : bf16
    %0 = vector.broadcast %cst : bf16 to vector<2x12x32xbf16>
    %c0 = arith.constant 0 : index
    %c0_0 = arith.constant 0 : index
    %c0_1 = arith.constant 0 : index
    %1 = vector.load %arg6[%c0, %c0_0, %c0_1] : memref<12x12x32xbf16, #tpu.memory_space<vmem>>, vector<2x12x32xbf16>
    tpu.vector_store %arg6[%c0, %c0_0, %c0_1], %0 {strides = array<i32>} : memref<12x12x32xbf16, #tpu.memory_space<vmem>>, vector<2x12x32xbf16>,
    %c10 = arith.constant 10 : index
    %c0_2 = arith.constant 0 : index
    %c0_3 = arith.constant 0 : index
    %2 = vector.load %arg6[%c10, %c0_2, %c0_3] : memref<12x12x32xbf16, #tpu.memory_space<vmem>>, vector<2x12x32xbf16>
    tpu.vector_store %arg6[%c10, %c0_2, %c0_3], %0 {strides = array<i32>} : memref<12x12x32xbf16, #tpu.memory_space<vmem>>, vector<2x12x32xbf16>,
    %cst_4 = arith.constant -1.000260e+30 : bf16
    %3 = vector.broadcast %cst_4 : bf16 to vector<12x2x32xbf16>
    %c0_5 = arith.constant 0 : index
    %c0_6 = arith.constant 0 : index
    %c0_7 = arith.constant 0 : index
    %4 = vector.load %arg6[%c0_5, %c0_6, %c0_7] : memref<12x12x32xbf16, #tpu.memory_space<vmem>>, vector<12x2x32xbf16>
    tpu.vector_store %arg6[%c0_5, %c0_6, %c0_7], %3 {strides = array<i32>} : memref<12x12x32xbf16, #tpu.memory_space<vmem>>, vector<12x2x32xbf16>,
    %c0_8 = arith.constant 0 : index
    %c10_9 = arith.constant 10 : index
    %c0_10 = arith.constant 0 : index
    %5 = vector.load %arg6[%c0_8, %c10_9, %c0_10] : memref<12x12x32xbf16, #tpu.memory_space<vmem>>, vector<12x2x32xbf16>
    tpu.vector_store %arg6[%c0_8, %c10_9, %c0_10], %3 {strides = array<i32>} : memref<12x12x32xbf16, #tpu.memory_space<vmem>>, vector<12x2x32xbf16>,
    %c0_11 = arith.constant 0 : index
    %c0_12 = arith.constant 0 : index
    %c0_13 = arith.constant 0 : index
    %c0_14 = arith.constant 0 : index
    %6 = vector.load %arg1[%c0_11, %c0_12, %c0_13, %c0_14] : memref<1x8x8x32xbf16, #tpu.memory_space<vmem>>, vector<1x8x8x32xbf16>
    %7 = vector.shape_cast %6 : vector<1x8x8x32xbf16> to vector<8x8x32xbf16>
    %c2 = arith.constant 2 : index
    %c2_15 = arith.constant 2 : index
    %c0_16 = arith.constant 0 : index
    %8 = vector.load %arg6[%c2, %c2_15, %c0_16] : memref<12x12x32xbf16, #tpu.memory_space<vmem>>, vector<8x8x32xbf16>
    tpu.vector_store %arg6[%c2, %c2_15, %c0_16], %7 {strides = array<i32>} : memref<12x12x32xbf16, #tpu.memory_space<vmem>>, vector<8x8x32xbf16>,
    %c0_17 = arith.constant 0 : index
    %c0_18 = arith.constant 0 : index
    %c0_19 = arith.constant 0 : index
    %9 = vector.load %arg6[%c0_17, %c0_18, %c0_19] : memref<12x12x32xbf16, #tpu.memory_space<vmem>>, vector<12x8x32xbf16>
    %c0_20 = arith.constant 0 : index
    %c1 = arith.constant 1 : index
    %c0_21 = arith.constant 0 : index
    %10 = vector.load %arg6[%c0_20, %c1, %c0_21] : memref<12x12x32xbf16, #tpu.memory_space<vmem>>, vector<12x8x32xbf16>
    %11 = arith.maximumf %9, %10 : vector<12x8x32xbf16>
    %c0_22 = arith.constant 0 : index
    %c2_23 = arith.constant 2 : index
    %c0_24 = arith.constant 0 : index
    %12 = vector.load %arg6[%c0_22, %c2_23, %c0_24] : memref<12x12x32xbf16, #tpu.memory_space<vmem>>, vector<12x8x32xbf16>
    %13 = arith.maximumf %11, %12 : vector<12x8x32xbf16>
    %c0_25 = arith.constant 0 : index
    %c3 = arith.constant 3 : index
    %c0_26 = arith.constant 0 : index
    %14 = vector.load %arg6[%c0_25, %c3, %c0_26] : memref<12x12x32xbf16, #tpu.memory_space<vmem>>, vector<12x8x32xbf16>
    %15 = arith.maximumf %13, %14 : vector<12x8x32xbf16>
    %c0_27 = arith.constant 0 : index
    %c4 = arith.constant 4 : index
    %c0_28 = arith.constant 0 : index
    %16 = vector.load %arg6[%c0_27, %c4, %c0_28] : memref<12x12x32xbf16, #tpu.memory_space<vmem>>, vector<12x8x32xbf16>
    %17 = arith.maximumf %15, %16 : vector<12x8x32xbf16>
    %18 = vector.extract_strided_slice %17 {offsets = [0, 0, 0], sizes = [8, 8, 32], strides = [1, 1, 1]} : vector<12x8x32xbf16> to vector<8x8x32xbf16>
    %19 = vector.extract_strided_slice %17 {offsets = [1, 0, 0], sizes = [8, 8, 32], strides = [1, 1, 1]} : vector<12x8x32xbf16> to vector<8x8x32xbf16>
    %20 = arith.maximumf %18, %19 : vector<8x8x32xbf16>
    %21 = vector.extract_strided_slice %17 {offsets = [2, 0, 0], sizes = [8, 8, 32], strides = [1, 1, 1]} : vector<12x8x32xbf16> to vector<8x8x32xbf16>
    %22 = arith.maximumf %20, %21 : vector<8x8x32xbf16>
    %23 = vector.extract_strided_slice %17 {offsets = [3, 0, 0], sizes = [8, 8, 32], strides = [1, 1, 1]} : vector<12x8x32xbf16> to vector<8x8x32xbf16>
    %24 = arith.maximumf %22, %23 : vector<8x8x32xbf16>
    %25 = vector.extract_strided_slice %17 {offsets = [4, 0, 0], sizes = [8, 8, 32], strides = [1, 1, 1]} : vector<12x8x32xbf16> to vector<8x8x32xbf16>
    %26 = arith.maximumf %24, %25 : vector<8x8x32xbf16>
    %c2_29 = arith.constant 2 : index
    %c2_30 = arith.constant 2 : index
    %c0_31 = arith.constant 0 : index
    %27 = vector.load %arg6[%c2_29, %c2_30, %c0_31] : memref<12x12x32xbf16, #tpu.memory_space<vmem>>, vector<8x8x32xbf16>
    tpu.vector_store %arg6[%c2_29, %c2_30, %c0_31], %26 {strides = array<i32>} : memref<12x12x32xbf16, #tpu.memory_space<vmem>>, vector<8x8x32xbf16>,
    %c0_32 = arith.constant 0 : index
    %c0_33 = arith.constant 0 : index
    %c0_34 = arith.constant 0 : index
    %28 = vector.load %arg6[%c0_32, %c0_33, %c0_34] : memref<12x12x32xbf16, #tpu.memory_space<vmem>>, vector<12x8x32xbf16>
    %c0_35 = arith.constant 0 : index
    %c1_36 = arith.constant 1 : index
    %c0_37 = arith.constant 0 : index
    %29 = vector.load %arg6[%c0_35, %c1_36, %c0_37] : memref<12x12x32xbf16, #tpu.memory_space<vmem>>, vector<12x8x32xbf16>
    %30 = arith.maximumf %28, %29 : vector<12x8x32xbf16>
    %c0_38 = arith.constant 0 : index
    %c2_39 = arith.constant 2 : index
    %c0_40 = arith.constant 0 : index
    %31 = vector.load %arg6[%c0_38, %c2_39, %c0_40] : memref<12x12x32xbf16, #tpu.memory_space<vmem>>, vector<12x8x32xbf16>
    %32 = arith.maximumf %30, %31 : vector<12x8x32xbf16>
    %c0_41 = arith.constant 0 : index
    %c3_42 = arith.constant 3 : index
    %c0_43 = arith.constant 0 : index
    %33 = vector.load %arg6[%c0_41, %c3_42, %c0_43] : memref<12x12x32xbf16, #tpu.memory_space<vmem>>, vector<12x8x32xbf16>
    %34 = arith.maximumf %32, %33 : vector<12x8x32xbf16>
    %c0_44 = arith.constant 0 : index
    %c4_45 = arith.constant 4 : index
    %c0_46 = arith.constant 0 : index
    %35 = vector.load %arg6[%c0_44, %c4_45, %c0_46] : memref<12x12x32xbf16, #tpu.memory_space<vmem>>, vector<12x8x32xbf16>
    %36 = arith.maximumf %34, %35 : vector<12x8x32xbf16>
    %37 = vector.extract_strided_slice %36 {offsets = [0, 0, 0], sizes = [8, 8, 32], strides = [1, 1, 1]} : vector<12x8x32xbf16> to vector<8x8x32xbf16>
    %38 = vector.extract_strided_slice %36 {offsets = [1, 0, 0], sizes = [8, 8, 32], strides = [1, 1, 1]} : vector<12x8x32xbf16> to vector<8x8x32xbf16>
    %39 = arith.maximumf %37, %38 : vector<8x8x32xbf16>
    %40 = vector.extract_strided_slice %36 {offsets = [2, 0, 0], sizes = [8, 8, 32], strides = [1, 1, 1]} : vector<12x8x32xbf16> to vector<8x8x32xbf16>
    %41 = arith.maximumf %39, %40 : vector<8x8x32xbf16>
    %42 = vector.extract_strided_slice %36 {offsets = [3, 0, 0], sizes = [8, 8, 32], strides = [1, 1, 1]} : vector<12x8x32xbf16> to vector<8x8x32xbf16>
    %43 = arith.maximumf %41, %42 : vector<8x8x32xbf16>
    %44 = vector.extract_strided_slice %36 {offsets = [4, 0, 0], sizes = [8, 8, 32], strides = [1, 1, 1]} : vector<12x8x32xbf16> to vector<8x8x32xbf16>
    %45 = arith.maximumf %43, %44 : vector<8x8x32xbf16>
    %c2_47 = arith.constant 2 : index
    %c2_48 = arith.constant 2 : index
    %c0_49 = arith.constant 0 : index
    %46 = vector.load %arg6[%c2_47, %c2_48, %c0_49] : memref<12x12x32xbf16, #tpu.memory_space<vmem>>, vector<8x8x32xbf16>
    tpu.vector_store %arg6[%c2_47, %c2_48, %c0_49], %45 {strides = array<i32>} : memref<12x12x32xbf16, #tpu.memory_space<vmem>>, vector<8x8x32xbf16>,
    %c0_50 = arith.constant 0 : index
    %c0_51 = arith.constant 0 : index
    %c0_52 = arith.constant 0 : index
    %47 = vector.load %arg6[%c0_50, %c0_51, %c0_52] : memref<12x12x32xbf16, #tpu.memory_space<vmem>>, vector<12x8x32xbf16>
    %c0_53 = arith.constant 0 : index
    %c1_54 = arith.constant 1 : index
    %c0_55 = arith.constant 0 : index
    %48 = vector.load %arg6[%c0_53, %c1_54, %c0_55] : memref<12x12x32xbf16, #tpu.memory_space<vmem>>, vector<12x8x32xbf16>
    %49 = arith.maximumf %47, %48 : vector<12x8x32xbf16>
    %c0_56 = arith.constant 0 : index
    %c2_57 = arith.constant 2 : index
    %c0_58 = arith.constant 0 : index
    %50 = vector.load %arg6[%c0_56, %c2_57, %c0_58] : memref<12x12x32xbf16, #tpu.memory_space<vmem>>, vector<12x8x32xbf16>
    %51 = arith.maximumf %49, %50 : vector<12x8x32xbf16>
    %c0_59 = arith.constant 0 : index
    %c3_60 = arith.constant 3 : index
    %c0_61 = arith.constant 0 : index
    %52 = vector.load %arg6[%c0_59, %c3_60, %c0_61] : memref<12x12x32xbf16, #tpu.memory_space<vmem>>, vector<12x8x32xbf16>
    %53 = arith.maximumf %51, %52 : vector<12x8x32xbf16>
    %c0_62 = arith.constant 0 : index
    %c4_63 = arith.constant 4 : index
    %c0_64 = arith.constant 0 : index
    %54 = vector.load %arg6[%c0_62, %c4_63, %c0_64] : memref<12x12x32xbf16, #tpu.memory_space<vmem>>, vector<12x8x32xbf16>
    %55 = arith.maximumf %53, %54 : vector<12x8x32xbf16>
    %56 = vector.extract_strided_slice %55 {offsets = [0, 0, 0], sizes = [8, 8, 32], strides = [1, 1, 1]} : vector<12x8x32xbf16> to vector<8x8x32xbf16>
    %57 = vector.extract_strided_slice %55 {offsets = [1, 0, 0], sizes = [8, 8, 32], strides = [1, 1, 1]} : vector<12x8x32xbf16> to vector<8x8x32xbf16>
    %58 = arith.maximumf %56, %57 : vector<8x8x32xbf16>
    %59 = vector.extract_strided_slice %55 {offsets = [2, 0, 0], sizes = [8, 8, 32], strides = [1, 1, 1]} : vector<12x8x32xbf16> to vector<8x8x32xbf16>
    %60 = arith.maximumf %58, %59 : vector<8x8x32xbf16>
    %61 = vector.extract_strided_slice %55 {offsets = [3, 0, 0], sizes = [8, 8, 32], strides = [1, 1, 1]} : vector<12x8x32xbf16> to vector<8x8x32xbf16>
    %62 = arith.maximumf %60, %61 : vector<8x8x32xbf16>
    %63 = vector.extract_strided_slice %55 {offsets = [4, 0, 0], sizes = [8, 8, 32], strides = [1, 1, 1]} : vector<12x8x32xbf16> to vector<8x8x32xbf16>
    %64 = arith.maximumf %62, %63 : vector<8x8x32xbf16>
    %cst_65 = arith.constant 0.000000e+00 : f32
    %65 = vector.broadcast %cst_65 : f32 to vector<64x64xf32>
    %66 = vector.shape_cast %7 : vector<8x8x32xbf16> to vector<64x32xbf16>
    %c0_66 = arith.constant 0 : index
    %c0_67 = arith.constant 0 : index
    %c0_68 = arith.constant 0 : index
    %67 = vector.load %arg2[%c0_66, %c0_67, %c0_68] : memref<4x32x64xbf16, #tpu.memory_space<vmem>>, vector<1x32x64xbf16>
    %68 = vector.shape_cast %67 : vector<1x32x64xbf16> to vector<32x64xbf16>
    %cst_69 = arith.constant dense<0.000000e+00> : vector<64x64xf32>
    %69 = tpu.matmul %66, %68, %cst_69 {dimension_numbers = #tpu.dot_dimension_numbers<[1], [0], [0], [1], [0, 0, 1, 1], [], []>} : vector<64x32xbf16>, vector<32x64xbf16>, vector<64x64xf32> -> vector<64x64xf32>
    %70 = arith.addf %65, %69 : vector<64x64xf32>
    %71 = vector.shape_cast %26 : vector<8x8x32xbf16> to vector<64x32xbf16>
    %c1_70 = arith.constant 1 : index
    %c0_71 = arith.constant 0 : index
    %c0_72 = arith.constant 0 : index
    %72 = vector.load %arg2[%c1_70, %c0_71, %c0_72] : memref<4x32x64xbf16, #tpu.memory_space<vmem>>, vector<1x32x64xbf16>
    %73 = vector.shape_cast %72 : vector<1x32x64xbf16> to vector<32x64xbf16>
    %cst_73 = arith.constant dense<0.000000e+00> : vector<64x64xf32>
    %74 = tpu.matmul %71, %73, %cst_73 {dimension_numbers = #tpu.dot_dimension_numbers<[1], [0], [0], [1], [0, 0, 1, 1], [], []>} : vector<64x32xbf16>, vector<32x64xbf16>, vector<64x64xf32> -> vector<64x64xf32>
    %75 = arith.addf %70, %74 : vector<64x64xf32>
    %76 = vector.shape_cast %45 : vector<8x8x32xbf16> to vector<64x32xbf16>
    %c2_74 = arith.constant 2 : index
    %c0_75 = arith.constant 0 : index
    %c0_76 = arith.constant 0 : index
    %77 = vector.load %arg2[%c2_74, %c0_75, %c0_76] : memref<4x32x64xbf16, #tpu.memory_space<vmem>>, vector<1x32x64xbf16>
    %78 = vector.shape_cast %77 : vector<1x32x64xbf16> to vector<32x64xbf16>
    %cst_77 = arith.constant dense<0.000000e+00> : vector<64x64xf32>
    %79 = tpu.matmul %76, %78, %cst_77 {dimension_numbers = #tpu.dot_dimension_numbers<[1], [0], [0], [1], [0, 0, 1, 1], [], []>} : vector<64x32xbf16>, vector<32x64xbf16>, vector<64x64xf32> -> vector<64x64xf32>
    %80 = arith.addf %75, %79 : vector<64x64xf32>
    %81 = vector.shape_cast %64 : vector<8x8x32xbf16> to vector<64x32xbf16>
    %c3_78 = arith.constant 3 : index
    %c0_79 = arith.constant 0 : index
    %c0_80 = arith.constant 0 : index
    %82 = vector.load %arg2[%c3_78, %c0_79, %c0_80] : memref<4x32x64xbf16, #tpu.memory_space<vmem>>, vector<1x32x64xbf16>
    %83 = vector.shape_cast %82 : vector<1x32x64xbf16> to vector<32x64xbf16>
    %cst_81 = arith.constant dense<0.000000e+00> : vector<64x64xf32>
    %84 = tpu.matmul %81, %83, %cst_81 {dimension_numbers = #tpu.dot_dimension_numbers<[1], [0], [0], [1], [0, 0, 1, 1], [], []>} : vector<64x32xbf16>, vector<32x64xbf16>, vector<64x64xf32> -> vector<64x64xf32>
    %85 = arith.addf %80, %84 : vector<64x64xf32>
    %86 = vector.extract_strided_slice %85 {offsets = [0, 0], sizes = [64, 32], strides = [1, 1]} : vector<64x64xf32> to vector<64x32xf32>
    %c0_82 = arith.constant 0 : index
    %c0_83 = arith.constant 0 : index
    %87 = vector.load %arg3[%c0_82, %c0_83] : memref<1x32xf32, #tpu.memory_space<vmem>>, vector<1x32xf32>
    %88 = vector.broadcast %87 : vector<1x32xf32> to vector<64x32xf32>
    %89 = arith.addf %86, %88 : vector<64x32xf32>
    %cst_84 = arith.constant 0.000000e+00 : f32
    %90 = vector.broadcast %cst_84 : f32 to vector<64x32xf32>
    %91 = arith.cmpf oge, %89, %90 : vector<64x32xf32>
    %cst_85 = arith.constant 1.000000e-01 : f32
    %92 = vector.broadcast %cst_85 : f32 to vector<64x32xf32>
    %93 = arith.mulf %92, %89 : vector<64x32xf32>
    %94 = arith.select %91, %89, %93 : vector<64x32xi1>, vector<64x32xf32>
    %95 = vector.shape_cast %94 : vector<64x32xf32> to vector<8x8x32xf32>
    %96 = arith.truncf %95 : vector<8x8x32xf32> to vector<8x8x32xbf16>
    %c0_86 = arith.constant 0 : index
    %c0_87 = arith.constant 0 : index
    %c0_88 = arith.constant 0 : index
    %c0_89 = arith.constant 0 : index
    %97 = vector.load %arg4[%c0_86, %c0_87, %c0_88, %c0_89] : memref<1x8x8x32xbf16, #tpu.memory_space<vmem>>, vector<1x8x8x32xbf16>
    %98 = vector.shape_cast %97 : vector<1x8x8x32xbf16> to vector<8x8x32xbf16>
    %99 = vector.shape_cast %96 : vector<8x8x32xbf16> to vector<1x8x8x32xbf16>
    tpu.vector_store %arg4[%c0_86, %c0_87, %c0_88, %c0_89], %99 {strides = array<i32>} : memref<1x8x8x32xbf16, #tpu.memory_space<vmem>>, vector<1x8x8x32xbf16>,
    %100 = vector.extract_strided_slice %85 {offsets = [0, 32], sizes = [64, 32], strides = [1, 1]} : vector<64x64xf32> to vector<64x32xf32>
    %101 = vector.shape_cast %100 : vector<64x32xf32> to vector<8x8x32xf32>
    %102 = arith.truncf %101 : vector<8x8x32xf32> to vector<8x8x32xbf16>
    %c0_90 = arith.constant 0 : index
    %c0_91 = arith.constant 0 : index
    %c0_92 = arith.constant 0 : index
    %c0_93 = arith.constant 0 : index
    %103 = vector.load %arg5[%c0_90, %c0_91, %c0_92, %c0_93] : memref<1x8x8x32xbf16, #tpu.memory_space<vmem>>, vector<1x8x8x32xbf16>
    %104 = vector.shape_cast %103 : vector<1x8x8x32xbf16> to vector<8x8x32xbf16>
    %105 = vector.shape_cast %102 : vector<8x8x32xbf16> to vector<1x8x8x32xbf16>
    tpu.vector_store %arg5[%c0_90, %c0_91, %c0_92, %c0_93], %105 {strides = array<i32>} : memref<1x8x8x32xbf16, #tpu.memory_space<vmem>>, vector<1x8x8x32xbf16>,
    return
  }
  func.func @transform_0(%arg0: i32) -> (i32, i32, i32, i32) {
    %c0_i32 = arith.constant 0 : i32
    %c0_i32_0 = arith.constant 0 : i32
    %c0_i32_1 = arith.constant 0 : i32
    %c0_i32_2 = arith.constant 0 : i32
    return %arg0, %c0_i32, %c0_i32_0, %c0_i32_1 : i32, i32, i32, i32
  }
  func.func @transform_1(%arg0: i32) -> (i32, i32, i32) {
    %c0_i32 = arith.constant 0 : i32
    %c0_i32_0 = arith.constant 0 : i32
    %c0_i32_1 = arith.constant 0 : i32
    %c0_i32_2 = arith.constant 0 : i32
    return %c0_i32, %c0_i32_0, %c0_i32_1 : i32, i32, i32
  }
  func.func @transform_2(%arg0: i32) -> (i32, i32) {
    %c0_i32 = arith.constant 0 : i32
    %c0_i32_0 = arith.constant 0 : i32
    %c0_i32_1 = arith.constant 0 : i32
    return %c0_i32, %c0_i32_0 : i32, i32
  }
  func.func @transform_3(%arg0: i32) -> (i32, i32, i32, i32) {
    %c0_i32 = arith.constant 0 : i32
    %c0_i32_0 = arith.constant 0 : i32
    %c0_i32_1 = arith.constant 0 : i32
    %c0_i32_2 = arith.constant 0 : i32
    return %arg0, %c0_i32, %c0_i32_0, %c0_i32_1 : i32, i32, i32, i32
  }
  func.func @transform_4(%arg0: i32) -> (i32, i32, i32, i32) {
    %c0_i32 = arith.constant 0 : i32
    %c0_i32_0 = arith.constant 0 : i32
    %c0_i32_1 = arith.constant 0 : i32
    %c0_i32_2 = arith.constant 0 : i32
    return %arg0, %c0_i32, %c0_i32_0, %c0_i32_1 : i32, i32, i32, i32
  }
}

module attributes {stable_mosaic.version = 11 : i64} {
  func.func @kernel(%arg0: i32, %arg1: memref<64x64xbf16, #tpu.memory_space<vmem>>, %arg2: memref<64x32xbf16, #tpu.memory_space<vmem>>, %arg3: memref<1x32xf32, #tpu.memory_space<vmem>>, %arg4: memref<64x32xbf16, #tpu.memory_space<vmem>>) attributes {dimension_semantics = [#tpu.dimension_semantics<parallel>], iteration_bounds = array<i64: 2>, scalar_prefetch = 0 : i64, scratch_operands = 0 : i64, tpu.core_type = #tpu.core_type<tc>, window_params = [{transform_indices = @transform_0, window_bounds = array<i64: 64, 64>}, {pipeline_mode = #tpu.pipeline_mode<synchronous>, transform_indices = @transform_1, window_bounds = array<i64: 64, 32>}, {pipeline_mode = #tpu.pipeline_mode<synchronous>, transform_indices = @transform_2, window_bounds = array<i64: 1, 32>}, {transform_indices = @transform_3, window_bounds = array<i64: 64, 32>}]} {
    %c0 = arith.constant 0 : index
    %c0_0 = arith.constant 0 : index
    %0 = vector.load %arg1[%c0, %c0_0] : memref<64x64xbf16, #tpu.memory_space<vmem>>, vector<64x64xbf16>
    %c0_1 = arith.constant 0 : index
    %c0_2 = arith.constant 0 : index
    %1 = vector.load %arg2[%c0_1, %c0_2] : memref<64x32xbf16, #tpu.memory_space<vmem>>, vector<64x32xbf16>
    %cst = arith.constant dense<0.000000e+00> : vector<64x32xf32>
    %2 = tpu.matmul %0, %1, %cst {dimension_numbers = #tpu.dot_dimension_numbers<[1], [0], [0], [1], [0, 0, 1, 1], [], []>} : vector<64x64xbf16>, vector<64x32xbf16>, vector<64x32xf32> -> vector<64x32xf32>
    %c0_3 = arith.constant 0 : index
    %c0_4 = arith.constant 0 : index
    %3 = vector.load %arg3[%c0_3, %c0_4] : memref<1x32xf32, #tpu.memory_space<vmem>>, vector<1x32xf32>
    %4 = vector.broadcast %3 : vector<1x32xf32> to vector<64x32xf32>
    %5 = arith.addf %2, %4 : vector<64x32xf32>
    %cst_5 = arith.constant 0.000000e+00 : f32
    %6 = vector.broadcast %cst_5 : f32 to vector<64x32xf32>
    %7 = arith.cmpf oge, %5, %6 : vector<64x32xf32>
    %cst_6 = arith.constant 1.000000e-01 : f32
    %8 = vector.broadcast %cst_6 : f32 to vector<64x32xf32>
    %9 = arith.mulf %8, %5 : vector<64x32xf32>
    %10 = arith.select %7, %5, %9 : vector<64x32xi1>, vector<64x32xf32>
    %11 = arith.truncf %10 : vector<64x32xf32> to vector<64x32xbf16>
    %c0_7 = arith.constant 0 : index
    %c0_8 = arith.constant 0 : index
    %12 = vector.load %arg4[%c0_7, %c0_8] : memref<64x32xbf16, #tpu.memory_space<vmem>>, vector<64x32xbf16>
    tpu.vector_store %arg4[%c0_7, %c0_8], %11 {strides = array<i32>} : memref<64x32xbf16, #tpu.memory_space<vmem>>, vector<64x32xbf16>,
    return
  }
  func.func @transform_0(%arg0: i32) -> (i32, i32) {
    %c0_i32 = arith.constant 0 : i32
    %c0_i32_0 = arith.constant 0 : i32
    return %arg0, %c0_i32 : i32, i32
  }
  func.func @transform_1(%arg0: i32) -> (i32, i32) {
    %c0_i32 = arith.constant 0 : i32
    %c0_i32_0 = arith.constant 0 : i32
    %c0_i32_1 = arith.constant 0 : i32
    return %c0_i32, %c0_i32_0 : i32, i32
  }
  func.func @transform_2(%arg0: i32) -> (i32, i32) {
    %c0_i32 = arith.constant 0 : i32
    %c0_i32_0 = arith.constant 0 : i32
    %c0_i32_1 = arith.constant 0 : i32
    return %c0_i32, %c0_i32_0 : i32, i32
  }
  func.func @transform_3(%arg0: i32) -> (i32, i32) {
    %c0_i32 = arith.constant 0 : i32
    %c0_i32_0 = arith.constant 0 : i32
    return %arg0, %c0_i32 : i32, i32
  }
}

module attributes {stable_mosaic.version = 11 : i64} {
  func.func @kernel(%arg0: i32, %arg1: memref<1x8x8x32xbf16, #tpu.memory_space<vmem>>, %arg2: memref<32x32xbf16, #tpu.memory_space<vmem>>, %arg3: memref<1x32xf32, #tpu.memory_space<vmem>>, %arg4: memref<9x32x32xbf16, #tpu.memory_space<vmem>>, %arg5: memref<1x32xf32, #tpu.memory_space<vmem>>, %arg6: memref<1x8x8x32xbf16, #tpu.memory_space<vmem>>, %arg7: memref<10x12x32xbf16, #tpu.memory_space<vmem>>) attributes {dimension_semantics = [#tpu.dimension_semantics<parallel>], iteration_bounds = array<i64: 2>, scalar_prefetch = 0 : i64, scratch_operands = 1 : i64, tpu.core_type = #tpu.core_type<tc>, window_params = [{transform_indices = @transform_0, window_bounds = array<i64: 1, 8, 8, 32>}, {pipeline_mode = #tpu.pipeline_mode<synchronous>, transform_indices = @transform_1, window_bounds = array<i64: 32, 32>}, {pipeline_mode = #tpu.pipeline_mode<synchronous>, transform_indices = @transform_2, window_bounds = array<i64: 1, 32>}, {pipeline_mode = #tpu.pipeline_mode<synchronous>, transform_indices = @transform_3, window_bounds = array<i64: 9, 32, 32>}, {pipeline_mode = #tpu.pipeline_mode<synchronous>, transform_indices = @transform_4, window_bounds = array<i64: 1, 32>}, {transform_indices = @transform_5, window_bounds = array<i64: 1, 8, 8, 32>}]} {
    %cst = arith.constant 0.000000e+00 : bf16
    %0 = vector.broadcast %cst : bf16 to vector<1x12x32xbf16>
    %c0 = arith.constant 0 : index
    %c0_0 = arith.constant 0 : index
    %c0_1 = arith.constant 0 : index
    %1 = vector.load %arg7[%c0, %c0_0, %c0_1] : memref<10x12x32xbf16, #tpu.memory_space<vmem>>, vector<1x12x32xbf16>
    tpu.vector_store %arg7[%c0, %c0_0, %c0_1], %0 {strides = array<i32>} : memref<10x12x32xbf16, #tpu.memory_space<vmem>>, vector<1x12x32xbf16>,
    %c9 = arith.constant 9 : index
    %c0_2 = arith.constant 0 : index
    %c0_3 = arith.constant 0 : index
    %2 = vector.load %arg7[%c9, %c0_2, %c0_3] : memref<10x12x32xbf16, #tpu.memory_space<vmem>>, vector<1x12x32xbf16>
    tpu.vector_store %arg7[%c9, %c0_2, %c0_3], %0 {strides = array<i32>} : memref<10x12x32xbf16, #tpu.memory_space<vmem>>, vector<1x12x32xbf16>,
    %cst_4 = arith.constant 0.000000e+00 : bf16
    %3 = vector.broadcast %cst_4 : bf16 to vector<10x2x32xbf16>
    %c0_5 = arith.constant 0 : index
    %c0_6 = arith.constant 0 : index
    %c0_7 = arith.constant 0 : index
    %4 = vector.load %arg7[%c0_5, %c0_6, %c0_7] : memref<10x12x32xbf16, #tpu.memory_space<vmem>>, vector<10x2x32xbf16>
    tpu.vector_store %arg7[%c0_5, %c0_6, %c0_7], %3 {strides = array<i32>} : memref<10x12x32xbf16, #tpu.memory_space<vmem>>, vector<10x2x32xbf16>,
    %c0_8 = arith.constant 0 : index
    %c10 = arith.constant 10 : index
    %c0_9 = arith.constant 0 : index
    %5 = vector.load %arg7[%c0_8, %c10, %c0_9] : memref<10x12x32xbf16, #tpu.memory_space<vmem>>, vector<10x2x32xbf16>
    tpu.vector_store %arg7[%c0_8, %c10, %c0_9], %3 {strides = array<i32>} : memref<10x12x32xbf16, #tpu.memory_space<vmem>>, vector<10x2x32xbf16>,
    %c0_10 = arith.constant 0 : index
    %c0_11 = arith.constant 0 : index
    %c0_12 = arith.constant 0 : index
    %c0_13 = arith.constant 0 : index
    %6 = vector.load %arg1[%c0_10, %c0_11, %c0_12, %c0_13] : memref<1x8x8x32xbf16, #tpu.memory_space<vmem>>, vector<1x8x8x32xbf16>
    %7 = vector.shape_cast %6 : vector<1x8x8x32xbf16> to vector<8x8x32xbf16>
    %8 = vector.shape_cast %7 : vector<8x8x32xbf16> to vector<64x32xbf16>
    %c0_14 = arith.constant 0 : index
    %c0_15 = arith.constant 0 : index
    %9 = vector.load %arg2[%c0_14, %c0_15] : memref<32x32xbf16, #tpu.memory_space<vmem>>, vector<32x32xbf16>
    %cst_16 = arith.constant dense<0.000000e+00> : vector<64x32xf32>
    %10 = tpu.matmul %8, %9, %cst_16 {dimension_numbers = #tpu.dot_dimension_numbers<[1], [0], [0], [1], [0, 0, 1, 1], [], []>} : vector<64x32xbf16>, vector<32x32xbf16>, vector<64x32xf32> -> vector<64x32xf32>
    %c0_17 = arith.constant 0 : index
    %c0_18 = arith.constant 0 : index
    %11 = vector.load %arg3[%c0_17, %c0_18] : memref<1x32xf32, #tpu.memory_space<vmem>>, vector<1x32xf32>
    %12 = vector.broadcast %11 : vector<1x32xf32> to vector<64x32xf32>
    %13 = arith.addf %10, %12 : vector<64x32xf32>
    %cst_19 = arith.constant 0.000000e+00 : f32
    %14 = vector.broadcast %cst_19 : f32 to vector<64x32xf32>
    %15 = arith.cmpf oge, %13, %14 : vector<64x32xf32>
    %cst_20 = arith.constant 1.000000e-01 : f32
    %16 = vector.broadcast %cst_20 : f32 to vector<64x32xf32>
    %17 = arith.mulf %16, %13 : vector<64x32xf32>
    %18 = arith.select %15, %13, %17 : vector<64x32xi1>, vector<64x32xf32>
    %19 = vector.shape_cast %18 : vector<64x32xf32> to vector<8x8x32xf32>
    %20 = arith.truncf %19 : vector<8x8x32xf32> to vector<8x8x32xbf16>
    %c1 = arith.constant 1 : index
    %c2 = arith.constant 2 : index
    %c0_21 = arith.constant 0 : index
    %21 = vector.load %arg7[%c1, %c2, %c0_21] : memref<10x12x32xbf16, #tpu.memory_space<vmem>>, vector<8x8x32xbf16>
    tpu.vector_store %arg7[%c1, %c2, %c0_21], %20 {strides = array<i32>} : memref<10x12x32xbf16, #tpu.memory_space<vmem>>, vector<8x8x32xbf16>,
    %cst_22 = arith.constant 0.000000e+00 : f32
    %22 = vector.broadcast %cst_22 : f32 to vector<64x32xf32>
    %c0_23 = arith.constant 0 : index
    %c1_24 = arith.constant 1 : index
    %c0_25 = arith.constant 0 : index
    %23 = vector.load %arg7[%c0_23, %c1_24, %c0_25] : memref<10x12x32xbf16, #tpu.memory_space<vmem>>, vector<8x8x32xbf16>
    %24 = vector.shape_cast %23 : vector<8x8x32xbf16> to vector<64x32xbf16>
    %c0_26 = arith.constant 0 : index
    %c0_27 = arith.constant 0 : index
    %c0_28 = arith.constant 0 : index
    %25 = vector.load %arg4[%c0_26, %c0_27, %c0_28] : memref<9x32x32xbf16, #tpu.memory_space<vmem>>, vector<1x32x32xbf16>
    %26 = vector.shape_cast %25 : vector<1x32x32xbf16> to vector<32x32xbf16>
    %cst_29 = arith.constant dense<0.000000e+00> : vector<64x32xf32>
    %27 = tpu.matmul %24, %26, %cst_29 {dimension_numbers = #tpu.dot_dimension_numbers<[1], [0], [0], [1], [0, 0, 1, 1], [], []>} : vector<64x32xbf16>, vector<32x32xbf16>, vector<64x32xf32> -> vector<64x32xf32>
    %28 = arith.addf %22, %27 : vector<64x32xf32>
    %c0_30 = arith.constant 0 : index
    %c2_31 = arith.constant 2 : index
    %c0_32 = arith.constant 0 : index
    %29 = vector.load %arg7[%c0_30, %c2_31, %c0_32] : memref<10x12x32xbf16, #tpu.memory_space<vmem>>, vector<8x8x32xbf16>
    %30 = vector.shape_cast %29 : vector<8x8x32xbf16> to vector<64x32xbf16>
    %c1_33 = arith.constant 1 : index
    %c0_34 = arith.constant 0 : index
    %c0_35 = arith.constant 0 : index
    %31 = vector.load %arg4[%c1_33, %c0_34, %c0_35] : memref<9x32x32xbf16, #tpu.memory_space<vmem>>, vector<1x32x32xbf16>
    %32 = vector.shape_cast %31 : vector<1x32x32xbf16> to vector<32x32xbf16>
    %cst_36 = arith.constant dense<0.000000e+00> : vector<64x32xf32>
    %33 = tpu.matmul %30, %32, %cst_36 {dimension_numbers = #tpu.dot_dimension_numbers<[1], [0], [0], [1], [0, 0, 1, 1], [], []>} : vector<64x32xbf16>, vector<32x32xbf16>, vector<64x32xf32> -> vector<64x32xf32>
    %34 = arith.addf %28, %33 : vector<64x32xf32>
    %c0_37 = arith.constant 0 : index
    %c3 = arith.constant 3 : index
    %c0_38 = arith.constant 0 : index
    %35 = vector.load %arg7[%c0_37, %c3, %c0_38] : memref<10x12x32xbf16, #tpu.memory_space<vmem>>, vector<8x8x32xbf16>
    %36 = vector.shape_cast %35 : vector<8x8x32xbf16> to vector<64x32xbf16>
    %c2_39 = arith.constant 2 : index
    %c0_40 = arith.constant 0 : index
    %c0_41 = arith.constant 0 : index
    %37 = vector.load %arg4[%c2_39, %c0_40, %c0_41] : memref<9x32x32xbf16, #tpu.memory_space<vmem>>, vector<1x32x32xbf16>
    %38 = vector.shape_cast %37 : vector<1x32x32xbf16> to vector<32x32xbf16>
    %cst_42 = arith.constant dense<0.000000e+00> : vector<64x32xf32>
    %39 = tpu.matmul %36, %38, %cst_42 {dimension_numbers = #tpu.dot_dimension_numbers<[1], [0], [0], [1], [0, 0, 1, 1], [], []>} : vector<64x32xbf16>, vector<32x32xbf16>, vector<64x32xf32> -> vector<64x32xf32>
    %40 = arith.addf %34, %39 : vector<64x32xf32>
    %c1_43 = arith.constant 1 : index
    %c1_44 = arith.constant 1 : index
    %c0_45 = arith.constant 0 : index
    %41 = vector.load %arg7[%c1_43, %c1_44, %c0_45] : memref<10x12x32xbf16, #tpu.memory_space<vmem>>, vector<8x8x32xbf16>
    %42 = vector.shape_cast %41 : vector<8x8x32xbf16> to vector<64x32xbf16>
    %c3_46 = arith.constant 3 : index
    %c0_47 = arith.constant 0 : index
    %c0_48 = arith.constant 0 : index
    %43 = vector.load %arg4[%c3_46, %c0_47, %c0_48] : memref<9x32x32xbf16, #tpu.memory_space<vmem>>, vector<1x32x32xbf16>
    %44 = vector.shape_cast %43 : vector<1x32x32xbf16> to vector<32x32xbf16>
    %cst_49 = arith.constant dense<0.000000e+00> : vector<64x32xf32>
    %45 = tpu.matmul %42, %44, %cst_49 {dimension_numbers = #tpu.dot_dimension_numbers<[1], [0], [0], [1], [0, 0, 1, 1], [], []>} : vector<64x32xbf16>, vector<32x32xbf16>, vector<64x32xf32> -> vector<64x32xf32>
    %46 = arith.addf %40, %45 : vector<64x32xf32>
    %c1_50 = arith.constant 1 : index
    %c2_51 = arith.constant 2 : index
    %c0_52 = arith.constant 0 : index
    %47 = vector.load %arg7[%c1_50, %c2_51, %c0_52] : memref<10x12x32xbf16, #tpu.memory_space<vmem>>, vector<8x8x32xbf16>
    %48 = vector.shape_cast %47 : vector<8x8x32xbf16> to vector<64x32xbf16>
    %c4 = arith.constant 4 : index
    %c0_53 = arith.constant 0 : index
    %c0_54 = arith.constant 0 : index
    %49 = vector.load %arg4[%c4, %c0_53, %c0_54] : memref<9x32x32xbf16, #tpu.memory_space<vmem>>, vector<1x32x32xbf16>
    %50 = vector.shape_cast %49 : vector<1x32x32xbf16> to vector<32x32xbf16>
    %cst_55 = arith.constant dense<0.000000e+00> : vector<64x32xf32>
    %51 = tpu.matmul %48, %50, %cst_55 {dimension_numbers = #tpu.dot_dimension_numbers<[1], [0], [0], [1], [0, 0, 1, 1], [], []>} : vector<64x32xbf16>, vector<32x32xbf16>, vector<64x32xf32> -> vector<64x32xf32>
    %52 = arith.addf %46, %51 : vector<64x32xf32>
    %c1_56 = arith.constant 1 : index
    %c3_57 = arith.constant 3 : index
    %c0_58 = arith.constant 0 : index
    %53 = vector.load %arg7[%c1_56, %c3_57, %c0_58] : memref<10x12x32xbf16, #tpu.memory_space<vmem>>, vector<8x8x32xbf16>
    %54 = vector.shape_cast %53 : vector<8x8x32xbf16> to vector<64x32xbf16>
    %c5 = arith.constant 5 : index
    %c0_59 = arith.constant 0 : index
    %c0_60 = arith.constant 0 : index
    %55 = vector.load %arg4[%c5, %c0_59, %c0_60] : memref<9x32x32xbf16, #tpu.memory_space<vmem>>, vector<1x32x32xbf16>
    %56 = vector.shape_cast %55 : vector<1x32x32xbf16> to vector<32x32xbf16>
    %cst_61 = arith.constant dense<0.000000e+00> : vector<64x32xf32>
    %57 = tpu.matmul %54, %56, %cst_61 {dimension_numbers = #tpu.dot_dimension_numbers<[1], [0], [0], [1], [0, 0, 1, 1], [], []>} : vector<64x32xbf16>, vector<32x32xbf16>, vector<64x32xf32> -> vector<64x32xf32>
    %58 = arith.addf %52, %57 : vector<64x32xf32>
    %c2_62 = arith.constant 2 : index
    %c1_63 = arith.constant 1 : index
    %c0_64 = arith.constant 0 : index
    %59 = vector.load %arg7[%c2_62, %c1_63, %c0_64] : memref<10x12x32xbf16, #tpu.memory_space<vmem>>, vector<8x8x32xbf16>
    %60 = vector.shape_cast %59 : vector<8x8x32xbf16> to vector<64x32xbf16>
    %c6 = arith.constant 6 : index
    %c0_65 = arith.constant 0 : index
    %c0_66 = arith.constant 0 : index
    %61 = vector.load %arg4[%c6, %c0_65, %c0_66] : memref<9x32x32xbf16, #tpu.memory_space<vmem>>, vector<1x32x32xbf16>
    %62 = vector.shape_cast %61 : vector<1x32x32xbf16> to vector<32x32xbf16>
    %cst_67 = arith.constant dense<0.000000e+00> : vector<64x32xf32>
    %63 = tpu.matmul %60, %62, %cst_67 {dimension_numbers = #tpu.dot_dimension_numbers<[1], [0], [0], [1], [0, 0, 1, 1], [], []>} : vector<64x32xbf16>, vector<32x32xbf16>, vector<64x32xf32> -> vector<64x32xf32>
    %64 = arith.addf %58, %63 : vector<64x32xf32>
    %c2_68 = arith.constant 2 : index
    %c2_69 = arith.constant 2 : index
    %c0_70 = arith.constant 0 : index
    %65 = vector.load %arg7[%c2_68, %c2_69, %c0_70] : memref<10x12x32xbf16, #tpu.memory_space<vmem>>, vector<8x8x32xbf16>
    %66 = vector.shape_cast %65 : vector<8x8x32xbf16> to vector<64x32xbf16>
    %c7 = arith.constant 7 : index
    %c0_71 = arith.constant 0 : index
    %c0_72 = arith.constant 0 : index
    %67 = vector.load %arg4[%c7, %c0_71, %c0_72] : memref<9x32x32xbf16, #tpu.memory_space<vmem>>, vector<1x32x32xbf16>
    %68 = vector.shape_cast %67 : vector<1x32x32xbf16> to vector<32x32xbf16>
    %cst_73 = arith.constant dense<0.000000e+00> : vector<64x32xf32>
    %69 = tpu.matmul %66, %68, %cst_73 {dimension_numbers = #tpu.dot_dimension_numbers<[1], [0], [0], [1], [0, 0, 1, 1], [], []>} : vector<64x32xbf16>, vector<32x32xbf16>, vector<64x32xf32> -> vector<64x32xf32>
    %70 = arith.addf %64, %69 : vector<64x32xf32>
    %c2_74 = arith.constant 2 : index
    %c3_75 = arith.constant 3 : index
    %c0_76 = arith.constant 0 : index
    %71 = vector.load %arg7[%c2_74, %c3_75, %c0_76] : memref<10x12x32xbf16, #tpu.memory_space<vmem>>, vector<8x8x32xbf16>
    %72 = vector.shape_cast %71 : vector<8x8x32xbf16> to vector<64x32xbf16>
    %c8 = arith.constant 8 : index
    %c0_77 = arith.constant 0 : index
    %c0_78 = arith.constant 0 : index
    %73 = vector.load %arg4[%c8, %c0_77, %c0_78] : memref<9x32x32xbf16, #tpu.memory_space<vmem>>, vector<1x32x32xbf16>
    %74 = vector.shape_cast %73 : vector<1x32x32xbf16> to vector<32x32xbf16>
    %cst_79 = arith.constant dense<0.000000e+00> : vector<64x32xf32>
    %75 = tpu.matmul %72, %74, %cst_79 {dimension_numbers = #tpu.dot_dimension_numbers<[1], [0], [0], [1], [0, 0, 1, 1], [], []>} : vector<64x32xbf16>, vector<32x32xbf16>, vector<64x32xf32> -> vector<64x32xf32>
    %76 = arith.addf %70, %75 : vector<64x32xf32>
    %c0_80 = arith.constant 0 : index
    %c0_81 = arith.constant 0 : index
    %77 = vector.load %arg5[%c0_80, %c0_81] : memref<1x32xf32, #tpu.memory_space<vmem>>, vector<1x32xf32>
    %78 = vector.broadcast %77 : vector<1x32xf32> to vector<64x32xf32>
    %79 = arith.addf %76, %78 : vector<64x32xf32>
    %cst_82 = arith.constant 0.000000e+00 : f32
    %80 = vector.broadcast %cst_82 : f32 to vector<64x32xf32>
    %81 = arith.cmpf oge, %79, %80 : vector<64x32xf32>
    %cst_83 = arith.constant 1.000000e-01 : f32
    %82 = vector.broadcast %cst_83 : f32 to vector<64x32xf32>
    %83 = arith.mulf %82, %79 : vector<64x32xf32>
    %84 = arith.select %81, %79, %83 : vector<64x32xi1>, vector<64x32xf32>
    %85 = vector.shape_cast %84 : vector<64x32xf32> to vector<8x8x32xf32>
    %86 = arith.truncf %85 : vector<8x8x32xf32> to vector<8x8x32xbf16>
    %c0_84 = arith.constant 0 : index
    %c0_85 = arith.constant 0 : index
    %c0_86 = arith.constant 0 : index
    %c0_87 = arith.constant 0 : index
    %87 = vector.load %arg6[%c0_84, %c0_85, %c0_86, %c0_87] : memref<1x8x8x32xbf16, #tpu.memory_space<vmem>>, vector<1x8x8x32xbf16>
    %88 = vector.shape_cast %87 : vector<1x8x8x32xbf16> to vector<8x8x32xbf16>
    %89 = vector.shape_cast %86 : vector<8x8x32xbf16> to vector<1x8x8x32xbf16>
    tpu.vector_store %arg6[%c0_84, %c0_85, %c0_86, %c0_87], %89 {strides = array<i32>} : memref<1x8x8x32xbf16, #tpu.memory_space<vmem>>, vector<1x8x8x32xbf16>,
    return
  }
  func.func @transform_0(%arg0: i32) -> (i32, i32, i32, i32) {
    %c0_i32 = arith.constant 0 : i32
    %c0_i32_0 = arith.constant 0 : i32
    %c0_i32_1 = arith.constant 0 : i32
    %c0_i32_2 = arith.constant 0 : i32
    return %arg0, %c0_i32, %c0_i32_0, %c0_i32_1 : i32, i32, i32, i32
  }
  func.func @transform_1(%arg0: i32) -> (i32, i32) {
    %c0_i32 = arith.constant 0 : i32
    %c0_i32_0 = arith.constant 0 : i32
    %c0_i32_1 = arith.constant 0 : i32
    return %c0_i32, %c0_i32_0 : i32, i32
  }
  func.func @transform_2(%arg0: i32) -> (i32, i32) {
    %c0_i32 = arith.constant 0 : i32
    %c0_i32_0 = arith.constant 0 : i32
    %c0_i32_1 = arith.constant 0 : i32
    return %c0_i32, %c0_i32_0 : i32, i32
  }
  func.func @transform_3(%arg0: i32) -> (i32, i32, i32) {
    %c0_i32 = arith.constant 0 : i32
    %c0_i32_0 = arith.constant 0 : i32
    %c0_i32_1 = arith.constant 0 : i32
    %c0_i32_2 = arith.constant 0 : i32
    return %c0_i32, %c0_i32_0, %c0_i32_1 : i32, i32, i32
  }
  func.func @transform_4(%arg0: i32) -> (i32, i32) {
    %c0_i32 = arith.constant 0 : i32
    %c0_i32_0 = arith.constant 0 : i32
    %c0_i32_1 = arith.constant 0 : i32
    return %c0_i32, %c0_i32_0 : i32, i32
  }
  func.func @transform_5(%arg0: i32) -> (i32, i32, i32, i32) {
    %c0_i32 = arith.constant 0 : i32
    %c0_i32_0 = arith.constant 0 : i32
    %c0_i32_1 = arith.constant 0 : i32
    %c0_i32_2 = arith.constant 0 : i32
    return %arg0, %c0_i32, %c0_i32_0, %c0_i32_1 : i32, i32, i32, i32
  }
}

module attributes {stable_mosaic.version = 11 : i64} {
  func.func @_csp_tail_kernel(%arg0: i32, %arg1: memref<64x32xbf16, #tpu.memory_space<vmem>>, %arg2: memref<64x32xbf16, #tpu.memory_space<vmem>>, %arg3: memref<32x32xbf16, #tpu.memory_space<vmem>>, %arg4: memref<1x32xf32, #tpu.memory_space<vmem>>, %arg5: memref<1x32xf32, #tpu.memory_space<vmem>>, %arg6: memref<32x64xbf16, #tpu.memory_space<vmem>>, %arg7: memref<32x64xbf16, #tpu.memory_space<vmem>>, %arg8: memref<1x64xf32, #tpu.memory_space<vmem>>, %arg9: memref<64x64xbf16, #tpu.memory_space<vmem>>) attributes {dimension_semantics = [#tpu.dimension_semantics<parallel>], iteration_bounds = array<i64: 2>, scalar_prefetch = 0 : i64, scratch_operands = 0 : i64, tpu.core_type = #tpu.core_type<tc>, window_params = [{transform_indices = @transform_0, window_bounds = array<i64: 64, 32>}, {transform_indices = @transform_1, window_bounds = array<i64: 64, 32>}, {pipeline_mode = #tpu.pipeline_mode<synchronous>, transform_indices = @transform_2, window_bounds = array<i64: 32, 32>}, {pipeline_mode = #tpu.pipeline_mode<synchronous>, transform_indices = @transform_3, window_bounds = array<i64: 1, 32>}, {pipeline_mode = #tpu.pipeline_mode<synchronous>, transform_indices = @transform_4, window_bounds = array<i64: 1, 32>}, {pipeline_mode = #tpu.pipeline_mode<synchronous>, transform_indices = @transform_5, window_bounds = array<i64: 32, 64>}, {pipeline_mode = #tpu.pipeline_mode<synchronous>, transform_indices = @transform_6, window_bounds = array<i64: 32, 64>}, {pipeline_mode = #tpu.pipeline_mode<synchronous>, transform_indices = @transform_7, window_bounds = array<i64: 1, 64>}, {transform_indices = @transform_8, window_bounds = array<i64: 64, 64>}]} {
    %c0 = arith.constant 0 : index
    %c0_0 = arith.constant 0 : index
    %0 = vector.load %arg1[%c0, %c0_0] : memref<64x32xbf16, #tpu.memory_space<vmem>>, vector<64x32xbf16>
    %c0_1 = arith.constant 0 : index
    %c0_2 = arith.constant 0 : index
    %1 = vector.load %arg3[%c0_1, %c0_2] : memref<32x32xbf16, #tpu.memory_space<vmem>>, vector<32x32xbf16>
    %cst = arith.constant dense<0.000000e+00> : vector<64x32xf32>
    %2 = tpu.matmul %0, %1, %cst {dimension_numbers = #tpu.dot_dimension_numbers<[1], [0], [0], [1], [0, 0, 1, 1], [], []>} : vector<64x32xbf16>, vector<32x32xbf16>, vector<64x32xf32> -> vector<64x32xf32>
    %c0_3 = arith.constant 0 : index
    %c0_4 = arith.constant 0 : index
    %3 = vector.load %arg4[%c0_3, %c0_4] : memref<1x32xf32, #tpu.memory_space<vmem>>, vector<1x32xf32>
    %4 = vector.broadcast %3 : vector<1x32xf32> to vector<64x32xf32>
    %5 = arith.addf %2, %4 : vector<64x32xf32>
    %cst_5 = arith.constant 0.000000e+00 : f32
    %6 = vector.broadcast %cst_5 : f32 to vector<64x32xf32>
    %7 = arith.cmpf oge, %5, %6 : vector<64x32xf32>
    %cst_6 = arith.constant 1.000000e-01 : f32
    %8 = vector.broadcast %cst_6 : f32 to vector<64x32xf32>
    %9 = arith.mulf %8, %5 : vector<64x32xf32>
    %10 = arith.select %7, %5, %9 : vector<64x32xi1>, vector<64x32xf32>
    %c0_7 = arith.constant 0 : index
    %c0_8 = arith.constant 0 : index
    %11 = vector.load %arg2[%c0_7, %c0_8] : memref<64x32xbf16, #tpu.memory_space<vmem>>, vector<64x32xbf16>
    %12 = arith.extf %11 : vector<64x32xbf16> to vector<64x32xf32>
    %c0_9 = arith.constant 0 : index
    %c0_10 = arith.constant 0 : index
    %13 = vector.load %arg5[%c0_9, %c0_10] : memref<1x32xf32, #tpu.memory_space<vmem>>, vector<1x32xf32>
    %14 = vector.broadcast %13 : vector<1x32xf32> to vector<64x32xf32>
    %15 = arith.addf %12, %14 : vector<64x32xf32>
    %cst_11 = arith.constant 0.000000e+00 : f32
    %16 = vector.broadcast %cst_11 : f32 to vector<64x32xf32>
    %17 = arith.cmpf oge, %15, %16 : vector<64x32xf32>
    %cst_12 = arith.constant 1.000000e-01 : f32
    %18 = vector.broadcast %cst_12 : f32 to vector<64x32xf32>
    %19 = arith.mulf %18, %15 : vector<64x32xf32>
    %20 = arith.select %17, %15, %19 : vector<64x32xi1>, vector<64x32xf32>
    %21 = arith.truncf %10 : vector<64x32xf32> to vector<64x32xbf16>
    %c0_13 = arith.constant 0 : index
    %c0_14 = arith.constant 0 : index
    %22 = vector.load %arg6[%c0_13, %c0_14] : memref<32x64xbf16, #tpu.memory_space<vmem>>, vector<32x64xbf16>
    %cst_15 = arith.constant dense<0.000000e+00> : vector<64x64xf32>
    %23 = tpu.matmul %21, %22, %cst_15 {dimension_numbers = #tpu.dot_dimension_numbers<[1], [0], [0], [1], [0, 0, 1, 1], [], []>} : vector<64x32xbf16>, vector<32x64xbf16>, vector<64x64xf32> -> vector<64x64xf32>
    %24 = arith.truncf %20 : vector<64x32xf32> to vector<64x32xbf16>
    %c0_16 = arith.constant 0 : index
    %c0_17 = arith.constant 0 : index
    %25 = vector.load %arg7[%c0_16, %c0_17] : memref<32x64xbf16, #tpu.memory_space<vmem>>, vector<32x64xbf16>
    %cst_18 = arith.constant dense<0.000000e+00> : vector<64x64xf32>
    %26 = tpu.matmul %24, %25, %cst_18 {dimension_numbers = #tpu.dot_dimension_numbers<[1], [0], [0], [1], [0, 0, 1, 1], [], []>} : vector<64x32xbf16>, vector<32x64xbf16>, vector<64x64xf32> -> vector<64x64xf32>
    %27 = arith.addf %23, %26 : vector<64x64xf32>
    %c0_19 = arith.constant 0 : index
    %c0_20 = arith.constant 0 : index
    %28 = vector.load %arg8[%c0_19, %c0_20] : memref<1x64xf32, #tpu.memory_space<vmem>>, vector<1x64xf32>
    %29 = vector.broadcast %28 : vector<1x64xf32> to vector<64x64xf32>
    %30 = arith.addf %27, %29 : vector<64x64xf32>
    %cst_21 = arith.constant 0.000000e+00 : f32
    %31 = vector.broadcast %cst_21 : f32 to vector<64x64xf32>
    %32 = arith.cmpf oge, %30, %31 : vector<64x64xf32>
    %cst_22 = arith.constant 1.000000e-01 : f32
    %33 = vector.broadcast %cst_22 : f32 to vector<64x64xf32>
    %34 = arith.mulf %33, %30 : vector<64x64xf32>
    %35 = arith.select %32, %30, %34 : vector<64x64xi1>, vector<64x64xf32>
    %36 = arith.truncf %35 : vector<64x64xf32> to vector<64x64xbf16>
    %c0_23 = arith.constant 0 : index
    %c0_24 = arith.constant 0 : index
    %37 = vector.load %arg9[%c0_23, %c0_24] : memref<64x64xbf16, #tpu.memory_space<vmem>>, vector<64x64xbf16>
    tpu.vector_store %arg9[%c0_23, %c0_24], %36 {strides = array<i32>} : memref<64x64xbf16, #tpu.memory_space<vmem>>, vector<64x64xbf16>,
    return
  }
  func.func @transform_0(%arg0: i32) -> (i32, i32) {
    %c0_i32 = arith.constant 0 : i32
    %c0_i32_0 = arith.constant 0 : i32
    return %arg0, %c0_i32 : i32, i32
  }
  func.func @transform_1(%arg0: i32) -> (i32, i32) {
    %c0_i32 = arith.constant 0 : i32
    %c0_i32_0 = arith.constant 0 : i32
    return %arg0, %c0_i32 : i32, i32
  }
  func.func @transform_2(%arg0: i32) -> (i32, i32) {
    %c0_i32 = arith.constant 0 : i32
    %c0_i32_0 = arith.constant 0 : i32
    %c0_i32_1 = arith.constant 0 : i32
    return %c0_i32, %c0_i32_0 : i32, i32
  }
  func.func @transform_3(%arg0: i32) -> (i32, i32) {
    %c0_i32 = arith.constant 0 : i32
    %c0_i32_0 = arith.constant 0 : i32
    %c0_i32_1 = arith.constant 0 : i32
    return %c0_i32, %c0_i32_0 : i32, i32
  }
  func.func @transform_4(%arg0: i32) -> (i32, i32) {
    %c0_i32 = arith.constant 0 : i32
    %c0_i32_0 = arith.constant 0 : i32
    %c0_i32_1 = arith.constant 0 : i32
    return %c0_i32, %c0_i32_0 : i32, i32
  }
  func.func @transform_5(%arg0: i32) -> (i32, i32) {
    %c0_i32 = arith.constant 0 : i32
    %c0_i32_0 = arith.constant 0 : i32
    %c0_i32_1 = arith.constant 0 : i32
    return %c0_i32, %c0_i32_0 : i32, i32
  }
  func.func @transform_6(%arg0: i32) -> (i32, i32) {
    %c0_i32 = arith.constant 0 : i32
    %c0_i32_0 = arith.constant 0 : i32
    %c0_i32_1 = arith.constant 0 : i32
    return %c0_i32, %c0_i32_0 : i32, i32
  }
  func.func @transform_7(%arg0: i32) -> (i32, i32) {
    %c0_i32 = arith.constant 0 : i32
    %c0_i32_0 = arith.constant 0 : i32
    %c0_i32_1 = arith.constant 0 : i32
    return %c0_i32, %c0_i32_0 : i32, i32
  }
  func.func @transform_8(%arg0: i32) -> (i32, i32) {
    %c0_i32 = arith.constant 0 : i32
    %c0_i32_0 = arith.constant 0 : i32
    return %arg0, %c0_i32 : i32, i32
  }
}

module attributes {stable_mosaic.version = 11 : i64} {
  func.func @_sam_kernel(%arg0: i32, %arg1: memref<64x64xbf16, #tpu.memory_space<vmem>>, %arg2: memref<64x64xbf16, #tpu.memory_space<vmem>>, %arg3: memref<1x64xf32, #tpu.memory_space<vmem>>, %arg4: memref<64x64xbf16, #tpu.memory_space<vmem>>) attributes {dimension_semantics = [#tpu.dimension_semantics<parallel>], iteration_bounds = array<i64: 2>, scalar_prefetch = 0 : i64, scratch_operands = 0 : i64, tpu.core_type = #tpu.core_type<tc>, window_params = [{transform_indices = @transform_0, window_bounds = array<i64: 64, 64>}, {pipeline_mode = #tpu.pipeline_mode<synchronous>, transform_indices = @transform_1, window_bounds = array<i64: 64, 64>}, {pipeline_mode = #tpu.pipeline_mode<synchronous>, transform_indices = @transform_2, window_bounds = array<i64: 1, 64>}, {transform_indices = @transform_3, window_bounds = array<i64: 64, 64>}]} {
    %c0 = arith.constant 0 : index
    %c0_0 = arith.constant 0 : index
    %0 = vector.load %arg1[%c0, %c0_0] : memref<64x64xbf16, #tpu.memory_space<vmem>>, vector<64x64xbf16>
    %c0_1 = arith.constant 0 : index
    %c0_2 = arith.constant 0 : index
    %1 = vector.load %arg2[%c0_1, %c0_2] : memref<64x64xbf16, #tpu.memory_space<vmem>>, vector<64x64xbf16>
    %cst = arith.constant dense<0.000000e+00> : vector<64x64xf32>
    %2 = tpu.matmul %0, %1, %cst {dimension_numbers = #tpu.dot_dimension_numbers<[1], [0], [0], [1], [0, 0, 1, 1], [], []>} : vector<64x64xbf16>, vector<64x64xbf16>, vector<64x64xf32> -> vector<64x64xf32>
    %c0_3 = arith.constant 0 : index
    %c0_4 = arith.constant 0 : index
    %3 = vector.load %arg3[%c0_3, %c0_4] : memref<1x64xf32, #tpu.memory_space<vmem>>, vector<1x64xf32>
    %4 = vector.broadcast %3 : vector<1x64xf32> to vector<64x64xf32>
    %5 = arith.addf %2, %4 : vector<64x64xf32>
    %cst_5 = arith.constant 0.000000e+00 : f32
    %6 = vector.broadcast %cst_5 : f32 to vector<64x64xf32>
    %7 = arith.subf %6, %5 : vector<64x64xf32>
    %8 = math.exp %7 : vector<64x64xf32>
    %cst_6 = arith.constant 1.000000e+00 : f32
    %9 = vector.broadcast %cst_6 : f32 to vector<64x64xf32>
    %10 = arith.addf %9, %8 : vector<64x64xf32>
    %11 = tpu.reciprocal %10 {approx = true} : vector<64x64xf32> -> vector<64x64xf32>
    %12 = arith.extf %0 : vector<64x64xbf16> to vector<64x64xf32>
    %13 = arith.mulf %12, %11 : vector<64x64xf32>
    %14 = arith.truncf %13 : vector<64x64xf32> to vector<64x64xbf16>
    %c0_7 = arith.constant 0 : index
    %c0_8 = arith.constant 0 : index
    %15 = vector.load %arg4[%c0_7, %c0_8] : memref<64x64xbf16, #tpu.memory_space<vmem>>, vector<64x64xbf16>
    tpu.vector_store %arg4[%c0_7, %c0_8], %14 {strides = array<i32>} : memref<64x64xbf16, #tpu.memory_space<vmem>>, vector<64x64xbf16>,
    return
  }
  func.func @transform_0(%arg0: i32) -> (i32, i32) {
    %c0_i32 = arith.constant 0 : i32
    %c0_i32_0 = arith.constant 0 : i32
    return %arg0, %c0_i32 : i32, i32
  }
  func.func @transform_1(%arg0: i32) -> (i32, i32) {
    %c0_i32 = arith.constant 0 : i32
    %c0_i32_0 = arith.constant 0 : i32
    %c0_i32_1 = arith.constant 0 : i32
    return %c0_i32, %c0_i32_0 : i32, i32
  }
  func.func @transform_2(%arg0: i32) -> (i32, i32) {
    %c0_i32 = arith.constant 0 : i32
    %c0_i32_0 = arith.constant 0 : i32
    %c0_i32_1 = arith.constant 0 : i32
    return %c0_i32, %c0_i32_0 : i32, i32
  }
  func.func @transform_3(%arg0: i32) -> (i32, i32) {
    %c0_i32 = arith.constant 0 : i32
    %c0_i32_0 = arith.constant 0 : i32
    return %arg0, %c0_i32 : i32, i32
  }
}

module attributes {stable_mosaic.version = 11 : i64} {
  func.func @_dual_mm_kernel(%arg0: i32, %arg1: memref<64x64xbf16, #tpu.memory_space<vmem>>, %arg2: memref<64x64xbf16, #tpu.memory_space<vmem>>, %arg3: memref<1x32xf32, #tpu.memory_space<vmem>>, %arg4: memref<64x32xbf16, #tpu.memory_space<vmem>>, %arg5: memref<64x32xbf16, #tpu.memory_space<vmem>>) attributes {dimension_semantics = [#tpu.dimension_semantics<parallel>], iteration_bounds = array<i64: 2>, scalar_prefetch = 0 : i64, scratch_operands = 0 : i64, tpu.core_type = #tpu.core_type<tc>, window_params = [{transform_indices = @transform_0, window_bounds = array<i64: 64, 64>}, {pipeline_mode = #tpu.pipeline_mode<synchronous>, transform_indices = @transform_1, window_bounds = array<i64: 64, 64>}, {pipeline_mode = #tpu.pipeline_mode<synchronous>, transform_indices = @transform_2, window_bounds = array<i64: 1, 32>}, {transform_indices = @transform_3, window_bounds = array<i64: 64, 32>}, {transform_indices = @transform_4, window_bounds = array<i64: 64, 32>}]} {
    %c0 = arith.constant 0 : index
    %c0_0 = arith.constant 0 : index
    %0 = vector.load %arg1[%c0, %c0_0] : memref<64x64xbf16, #tpu.memory_space<vmem>>, vector<64x64xbf16>
    %c0_1 = arith.constant 0 : index
    %c0_2 = arith.constant 0 : index
    %1 = vector.load %arg2[%c0_1, %c0_2] : memref<64x64xbf16, #tpu.memory_space<vmem>>, vector<64x64xbf16>
    %cst = arith.constant dense<0.000000e+00> : vector<64x64xf32>
    %2 = tpu.matmul %0, %1, %cst {dimension_numbers = #tpu.dot_dimension_numbers<[1], [0], [0], [1], [0, 0, 1, 1], [], []>} : vector<64x64xbf16>, vector<64x64xbf16>, vector<64x64xf32> -> vector<64x64xf32>
    %3 = vector.extract_strided_slice %2 {offsets = [0, 0], sizes = [64, 32], strides = [1, 1]} : vector<64x64xf32> to vector<64x32xf32>
    %c0_3 = arith.constant 0 : index
    %c0_4 = arith.constant 0 : index
    %4 = vector.load %arg3[%c0_3, %c0_4] : memref<1x32xf32, #tpu.memory_space<vmem>>, vector<1x32xf32>
    %5 = vector.broadcast %4 : vector<1x32xf32> to vector<64x32xf32>
    %6 = arith.addf %3, %5 : vector<64x32xf32>
    %cst_5 = arith.constant 0.000000e+00 : f32
    %7 = vector.broadcast %cst_5 : f32 to vector<64x32xf32>
    %8 = arith.cmpf oge, %6, %7 : vector<64x32xf32>
    %cst_6 = arith.constant 1.000000e-01 : f32
    %9 = vector.broadcast %cst_6 : f32 to vector<64x32xf32>
    %10 = arith.mulf %9, %6 : vector<64x32xf32>
    %11 = arith.select %8, %6, %10 : vector<64x32xi1>, vector<64x32xf32>
    %12 = arith.truncf %11 : vector<64x32xf32> to vector<64x32xbf16>
    %c0_7 = arith.constant 0 : index
    %c0_8 = arith.constant 0 : index
    %13 = vector.load %arg4[%c0_7, %c0_8] : memref<64x32xbf16, #tpu.memory_space<vmem>>, vector<64x32xbf16>
    tpu.vector_store %arg4[%c0_7, %c0_8], %12 {strides = array<i32>} : memref<64x32xbf16, #tpu.memory_space<vmem>>, vector<64x32xbf16>,
    %14 = vector.extract_strided_slice %2 {offsets = [0, 32], sizes = [64, 32], strides = [1, 1]} : vector<64x64xf32> to vector<64x32xf32>
    %15 = arith.truncf %14 : vector<64x32xf32> to vector<64x32xbf16>
    %c0_9 = arith.constant 0 : index
    %c0_10 = arith.constant 0 : index
    %16 = vector.load %arg5[%c0_9, %c0_10] : memref<64x32xbf16, #tpu.memory_space<vmem>>, vector<64x32xbf16>
    tpu.vector_store %arg5[%c0_9, %c0_10], %15 {strides = array<i32>} : memref<64x32xbf16, #tpu.memory_space<vmem>>, vector<64x32xbf16>,
    return
  }
  func.func @transform_0(%arg0: i32) -> (i32, i32) {
    %c0_i32 = arith.constant 0 : i32
    %c0_i32_0 = arith.constant 0 : i32
    return %arg0, %c0_i32 : i32, i32
  }
  func.func @transform_1(%arg0: i32) -> (i32, i32) {
    %c0_i32 = arith.constant 0 : i32
    %c0_i32_0 = arith.constant 0 : i32
    %c0_i32_1 = arith.constant 0 : i32
    return %c0_i32, %c0_i32_0 : i32, i32
  }
  func.func @transform_2(%arg0: i32) -> (i32, i32) {
    %c0_i32 = arith.constant 0 : i32
    %c0_i32_0 = arith.constant 0 : i32
    %c0_i32_1 = arith.constant 0 : i32
    return %c0_i32, %c0_i32_0 : i32, i32
  }
  func.func @transform_3(%arg0: i32) -> (i32, i32) {
    %c0_i32 = arith.constant 0 : i32
    %c0_i32_0 = arith.constant 0 : i32
    return %arg0, %c0_i32 : i32, i32
  }
  func.func @transform_4(%arg0: i32) -> (i32, i32) {
    %c0_i32 = arith.constant 0 : i32
    %c0_i32_0 = arith.constant 0 : i32
    return %arg0, %c0_i32 : i32, i32
  }
}

module attributes {stable_mosaic.version = 11 : i64} {
  func.func @kernel(%arg0: i32, %arg1: memref<64x64xbf16, #tpu.memory_space<vmem>>, %arg2: memref<64x128xbf16, #tpu.memory_space<vmem>>, %arg3: memref<1x128xf32, #tpu.memory_space<vmem>>, %arg4: memref<64x128xf32, #tpu.memory_space<vmem>>) attributes {dimension_semantics = [#tpu.dimension_semantics<parallel>], iteration_bounds = array<i64: 2>, scalar_prefetch = 0 : i64, scratch_operands = 0 : i64, tpu.core_type = #tpu.core_type<tc>, window_params = [{transform_indices = @transform_0, window_bounds = array<i64: 64, 64>}, {pipeline_mode = #tpu.pipeline_mode<synchronous>, transform_indices = @transform_1, window_bounds = array<i64: 64, 128>}, {pipeline_mode = #tpu.pipeline_mode<synchronous>, transform_indices = @transform_2, window_bounds = array<i64: 1, 128>}, {transform_indices = @transform_3, window_bounds = array<i64: 64, 128>}]} {
    %c0 = arith.constant 0 : index
    %c0_0 = arith.constant 0 : index
    %0 = vector.load %arg1[%c0, %c0_0] : memref<64x64xbf16, #tpu.memory_space<vmem>>, vector<64x64xbf16>
    %c0_1 = arith.constant 0 : index
    %c0_2 = arith.constant 0 : index
    %1 = vector.load %arg2[%c0_1, %c0_2] : memref<64x128xbf16, #tpu.memory_space<vmem>>, vector<64x128xbf16>
    %cst = arith.constant dense<0.000000e+00> : vector<64x128xf32>
    %2 = tpu.matmul %0, %1, %cst {dimension_numbers = #tpu.dot_dimension_numbers<[1], [0], [0], [1], [0, 0, 1, 1], [], []>} : vector<64x64xbf16>, vector<64x128xbf16>, vector<64x128xf32> -> vector<64x128xf32>
    %c0_3 = arith.constant 0 : index
    %c0_4 = arith.constant 0 : index
    %3 = vector.load %arg3[%c0_3, %c0_4] : memref<1x128xf32, #tpu.memory_space<vmem>>, vector<1x128xf32>
    %4 = vector.broadcast %3 : vector<1x128xf32> to vector<64x128xf32>
    %5 = arith.addf %2, %4 : vector<64x128xf32>
    %c0_5 = arith.constant 0 : index
    %c0_6 = arith.constant 0 : index
    %6 = vector.load %arg4[%c0_5, %c0_6] : memref<64x128xf32, #tpu.memory_space<vmem>>, vector<64x128xf32>
    tpu.vector_store %arg4[%c0_5, %c0_6], %5 {strides = array<i32>} : memref<64x128xf32, #tpu.memory_space<vmem>>, vector<64x128xf32>,
    return
  }
  func.func @transform_0(%arg0: i32) -> (i32, i32) {
    %c0_i32 = arith.constant 0 : i32
    %c0_i32_0 = arith.constant 0 : i32
    return %arg0, %c0_i32 : i32, i32
  }
  func.func @transform_1(%arg0: i32) -> (i32, i32) {
    %c0_i32 = arith.constant 0 : i32
    %c0_i32_0 = arith.constant 0 : i32
    %c0_i32_1 = arith.constant 0 : i32
    return %c0_i32, %c0_i32_0 : i32, i32
  }
  func.func @transform_2(%arg0: i32) -> (i32, i32) {
    %c0_i32 = arith.constant 0 : i32
    %c0_i32_0 = arith.constant 0 : i32
    %c0_i32_1 = arith.constant 0 : i32
    return %c0_i32, %c0_i32_0 : i32, i32
  }
  func.func @transform_3(%arg0: i32) -> (i32, i32) {
    %c0_i32 = arith.constant 0 : i32
    %c0_i32_0 = arith.constant 0 : i32
    return %arg0, %c0_i32 : i32, i32
  }
}

</mosaic_0001>

<bundles_post_ra>
// kernel: yolo_v2_netv2_pallas.11
= control target key start
LH: loop header
LB: loop body
LE: loop exit
PB: predicated region body
PF: predicated region fallthrough
CT: control target
= control target key end

     0   :  { %s482_s12 = smov 0   ;;  %s539_s0 = inlined_call_operand.vmem [shape: bf16[128,64], index: 0, kind: input, shape index: {}]   ;;  %s540_s1 = inlined_call_operand.vmem [shape: bf16[64,32], index: 1, kind: input, shape index: {}]   ;;  %s541_s2 = inlined_call_operand.vmem [shape: f32[1,32], index: 2, kind: input, shape index: {}]   ;;  %s542_s3 = inlined_call_operand.vmem [shape: bf16[128,32], index: 3, kind: output, shape index: {}]  }
   0x1 LB: > { %s378_s13 = sadd.s32 4294967295, %s460_s12   ;;  %p382_p0 = scmp.ge.s32.totalorder %s460_s12, 1  ;;  %s460_s12 = sphi %s482_s12, %s13_s12  }
   0x2   : > { %p138_p1 = scmp.lt.s32.totalorder %s460_s12, 3 }
   0x4   : > { %p139_p2 = pnand %p382_p0, %p138_p1 }
   0x5   : > { %s383_s16 = sshll.u32 (!%p139_p2), %s378_s13, 3 }
   0x6   : > { %142 = sbr.rel (%p139_p2) target bundleno = 177 (0xb1), region = 32  ;;  %p163_p3 = scmp.lt.s32.totalorder (!%p139_p2), %s383_s16, 15 }
   0xb   : > { %v432_v0 = vld [vmem:[%s540_s1 + $0x18] sm:$0xff]  ;;  %v431_v1 = vld [vmem:[%s540_s1 + $0x10] sm:$0xff]  ;;  %s544_s16 = smov (!%p163_p3, %s383_s16), 15  ;;  %v430_v2 = vld [vmem:[%s540_s1 + $0x8] sm:$0xff]  ;;  %vm239_vm0 = vcmask 523264   ;;  %vm313_vm3 = vcmask 257024  }
   0xc   : > { %256 = vmatpush.bf16.msra.mxu0 %v432_v0  ;;  %433 = vmatpush.bf16.msra.mxu1 %v432_v0  ;;  %s384_s21 = sshll.u32 %s544_s16, 2  ;;  %v429_v3 = vld [vmem:[%s540_s1] sm:$0xff] }
   0xd   : > { %434 = vmatpush.bf16.msra.mxu2 %v432_v0  ;;  %435 = vmatpush.bf16.msra.mxu3 %v432_v0  ;;  %s166_s26 = scalar_lea.vmem %s539_s0, %s384_s21  ;;  %v453_v8 = vld [vmem:[%s541_s2] ss:$0 sm:$0xff]  ;;  %s518_s4 = scalar_lea.vmem %s542_s3, %s384_s21 }
   0xe   : > { %v425_v4 = vld [vmem:[%s166_s26] sm:$0xff]  ;;  %v426_v5 = vld [vmem:[%s166_s26 + $0x8] sm:$0xff]  ;;  %v427_v6 = vld [vmem:[%s166_s26 + $0x10] sm:$0xff] }
   0xf   : > { %v428_v7 = vld [vmem:[%s166_s26 + $0x18] sm:$0xff] }
  0x10   : > { %257 = vmatpush.bf16.msra.mxu0 %v431_v1  ;;  %436 = vmatpush.bf16.msra.mxu1 %v431_v1 }
  0x11   : > { %437 = vmatpush.bf16.msra.mxu2 %v431_v1  ;;  %438 = vmatpush.bf16.msra.mxu3 %v431_v1 }
  0x14   : > { %258 = vmatpush.bf16.msra.mxu0 %v430_v2  ;;  %439 = vmatpush.bf16.msra.mxu1 %v430_v2 }
  0x15   : > { %440 = vmatpush.bf16.msra.mxu2 %v430_v2  ;;  %441 = vmatpush.bf16.msra.mxu3 %v430_v2 }
  0x18   : > { %259 = vmatpush.bf16.msra.mxu0 %v429_v3  ;;  %442 = vmatpush.bf16.msra.mxu1 %v429_v3 }
  0x19   : > { %443 = vmatpush.bf16.msra.mxu2 %v429_v3  ;;  %444 = vmatpush.bf16.msra.mxu3 %v429_v3 }
  0x1b   : > { %419 = vmatmul.msk.bf16.vlgmr.msra.gmra.mxu0 %vm239_vm0, %v425_v4  ;;  %420 = vmatmul.msk.bf16.vlgmr.msra.gmra.mxu1 %vm239_vm0, %v426_v5 }
  0x1c   : > { %421 = vmatmul.msk.bf16.vlgmr.msra.gmra.mxu2 %vm239_vm0, %v427_v6  ;;  %422 = vmatmul.msk.bf16.vlgmr.msra.gmra.mxu3 %vm239_vm0, %v428_v7 }
  0x98   : > { %v261_v9 = vpop.f32.mrf.mxu0  ;;  %v266_v10 = vpop.f32.mrf.mxu1 }
  0x99   : > { %v262_v11 = vadd.f32 %v453_v8, %v261_v9  ;;  %v267_v12 = vadd.f32 %v453_v8, %v266_v10 }
  0x9b   : > { %vm281_vm1 = vcmp.ge.f32.partialorder %v262_v11, 0.0  ;;  %v289_v13 = vmul.f32 0.1, %v262_v11  ;;  %vm283_vm2 = vcmp.ge.f32.partialorder %v267_v12, 0.0  ;;  %v291_v14 = vmul.f32 0.1, %v267_v12 }
  0x9d   : > { %v297_v15 = vsel %vm281_vm1, %v262_v11, %v289_v13  ;;  %v299_v16 = vsel %vm283_vm2, %v267_v12, %v291_v14 }
  0x9e   : > { %v305_v17 = vpack.c.bf16 %v297_v15, %v297_v15  ;;  %v307_v18 = vpack.c.bf16 %v299_v16, %v299_v16 }
  0x9f   : > { %v271_v19 = vpop.f32.mrf.mxu2  ;;  %v276_v20 = vpop.f32.mrf.mxu3 }
  0xa0   : > { %314 = vst.msk [vmem:[%s518_s4] sm:$0xf] %vm313_vm3, %v305_v17  ;;  %v272_v21 = vadd.f32 %v453_v8, %v271_v19  ;;  %v277_v22 = vadd.f32 %v453_v8, %v276_v20  ;;  %v263_v23 = vpop.f32.mrf.mxu0  ;;  %v268_v24 = vpop.f32.mrf.mxu1 }
  0xa1   : > { %316 = vst.msk [vmem:[%s518_s4 + $0x8] sm:$0xf] %vm313_vm3, %v307_v18  ;;  %v264_v25 = vadd.f32 %v453_v8, %v263_v23  ;;  %v269_v26 = vadd.f32 %v453_v8, %v268_v24 }
  0xa2   : > { %vm285_vm4 = vcmp.ge.f32.partialorder %v272_v21, 0.0  ;;  %v293_v27 = vmul.f32 0.1, %v272_v21  ;;  %vm287_vm5 = vcmp.ge.f32.partialorder %v277_v22, 0.0  ;;  %v295_v28 = vmul.f32 0.1, %v277_v22 }
  0xa3   : > { %vm282_vm6 = vcmp.ge.f32.partialorder %v264_v25, 0.0  ;;  %v290_v29 = vmul.f32 0.1, %v264_v25  ;;  %vm284_vm7 = vcmp.ge.f32.partialorder %v269_v26, 0.0  ;;  %v292_v30 = vmul.f32 0.1, %v269_v26 }
  0xa4   : > { %v301_v31 = vsel %vm285_vm4, %v272_v21, %v293_v27  ;;  %v303_v32 = vsel %vm287_vm5, %v277_v22, %v295_v28 }
  0xa5   : > { %v309_v33 = vpack.c.bf16 %v301_v31, %v301_v31  ;;  %v311_v34 = vpack.c.bf16 %v303_v32, %v303_v32  ;;  %v298_v35 = vsel %vm282_vm6, %v264_v25, %v290_v29  ;;  %v300_v36 = vsel %vm284_vm7, %v269_v26, %v292_v30 }
  0xa6   : > { %v306_v37 = vpack.c.bf16 %v298_v35, %v298_v35  ;;  %v308_v38 = vpack.c.bf16 %v300_v36, %v300_v36 }
  0xa7   : > { %318 = vst.msk [vmem:[%s518_s4 + $0x10] sm:$0xf] %vm313_vm3, %v309_v33  ;;  %v273_v39 = vpop.f32.mrf.mxu2  ;;  %v278_v40 = vpop.f32.mrf.mxu3 }
  0xa8   : > { %320 = vst.msk [vmem:[%s518_s4 + $0x18] sm:$0xf] %vm313_vm3, %v311_v34  ;;  %v274_v41 = vadd.f32 %v453_v8, %v273_v39  ;;  %v279_v42 = vadd.f32 %v453_v8, %v278_v40 }
  0xa9   : > { %315 = vst.msk [vmem:[%s518_s4 + $0x4] sm:$0xf] %vm313_vm3, %v306_v37 }
  0xaa   : > { %317 = vst.msk [vmem:[%s518_s4 + $0xc] sm:$0xf] %vm313_vm3, %v308_v38  ;;  %vm286_vm8 = vcmp.ge.f32.partialorder %v274_v41, 0.0  ;;  %v294_v43 = vmul.f32 0.1, %v274_v41  ;;  %vm288_vm9 = vcmp.ge.f32.partialorder %v279_v42, 0.0 }
  0xab   : > { %v296_v44 = vmul.f32 0.1, %v279_v42 }
  0xac   : > { %v302_v45 = vsel %vm286_vm8, %v274_v41, %v294_v43 }
  0xad   : > { %v310_v46 = vpack.c.bf16 %v302_v45, %v302_v45  ;;  %v304_v47 = vsel %vm288_vm9, %v279_v42, %v296_v44 }
  0xae   : > { %v312_v48 = vpack.c.bf16 %v304_v47, %v304_v47 }
  0xaf   : > { %319 = vst.msk [vmem:[%s518_s4 + $0x14] sm:$0xf] %vm313_vm3, %v310_v46 }
  0xb0   : > { %321 = vst.msk [vmem:[%s518_s4 + $0x1c] sm:$0xf] %vm313_vm3, %v312_v48 }
  0xb1 PF: > { %s13_s12 = sadd.s32 1, %s460_s12  }
  0xb2   : > { %p10_p4 = scmp.ge.s32.totalorder %s13_s12, 4  }
  0xb4   :  { %12 = sbr.rel (!%p10_p4) target bundleno = 1 (0x1), region = 62 }

// kernel: yolo_v2_netv2_pallas.14
= control target key start
LH: loop header
LB: loop body
LE: loop exit
PB: predicated region body
PF: predicated region fallthrough
CT: control target
= control target key end

     0   :  { %s905_s27 = smov 0   ;;  %s1013_s0 = inlined_call_operand.vmem [shape: bf16[128,32], index: 0, kind: input, shape index: {}]   ;;  %s1014_s1 = inlined_call_operand.vmem [shape: bf16[128,32], index: 1, kind: input, shape index: {}]   ;;  %s1015_s2 = inlined_call_operand.vmem [shape: bf16[32,32], index: 2, kind: input, shape index: {}]   ;;  %s1016_s3 = inlined_call_operand.vmem [shape: f32[1,32], index: 3, kind: input, shape index: {}]   ;;  %s1017_s4 = inlined_call_operand.vmem [shape: f32[1,32], index: 4, kind: input, shape index: {}]   ;;  %s1018_s5 = inlined_call_operand.vmem [shape: bf16[32,64], index: 5, kind: input, shape index: {}]   ;;  %s1019_s6 = inlined_call_operand.vmem [shape: bf16[32,64], index: 6, kind: input, shape index: {}]   ;;  %s1020_s7 = inlined_call_operand.vmem [shape: f32[1,64], index: 7, kind: input, shape index: {}]   ;;  %s1021_s8 = inlined_call_operand.vmem [shape: bf16[128,64], index: 8, kind: output, shape index: {}]  }
   0x1 LB: > { %s741_s28 = sadd.s32 4294967295, %s858_s27   ;;  %p745_p0 = scmp.ge.s32.totalorder %s858_s27, 1  ;;  %s858_s27 = sphi %s905_s27, %s18_s27  }
   0x2   : > { %p274_p1 = scmp.lt.s32.totalorder %s858_s27, 3 }
   0x4   : > { %p275_p2 = pnand %p745_p0, %p274_p1 }
   0x5   : > { %s746_s9 = sshll.u32 (!%p275_p2), %s741_s28, 3 }
   0x6   : > { %278 = sbr.rel (%p275_p2) target bundleno = 348 (0x15c), region = 52  ;;  %p314_p3 = scmp.lt.s32.totalorder (!%p275_p2), %s746_s9, 15 }
   0xb   : > { %v811_v0 = vld [vmem:[%s1015_s2 + $0x8] sm:$0xff]  ;;  %v810_v1 = vld [vmem:[%s1015_s2] sm:$0xff]  ;;  %s1023_s9 = smov (!%p314_p3, %s746_s9), 15  ;;  %vm380_vm0 = vcmask 261120  }
   0xc   : > { %835 = vmatpush.bf16.msra.mxu3 %v811_v0  ;;  %399 = vmatpush.bf16.msra.mxu0 %v811_v0  ;;  %s919_s12 = sshll.u32 %s1023_s9, 2  ;;  %v815_v7 = vld [vmem:[%s1019_s6 + $0x8] sm:$0xff]  ;;  %v942_v10 = vld [vmem:[%s1017_s4] ss:$0 sm:$0xff] }
   0xd   : > { %s317_s15 = scalar_lea.vmem %s1013_s0, %s919_s12  ;;  %s933_s18 = scalar_lea.vmem %s1014_s1, %s919_s12  ;;  %837 = vmatpush.bf16.msra.mxu1 %v815_v7  ;;  %v814_v16 = vld [vmem:[%s1019_s6] sm:$0xff]  ;;  %v813_v17 = vld [vmem:[%s1018_s5 + $0x8] sm:$0xff] }
   0xe   : > { %v807_v2 = vld [vmem:[%s317_s15 + $0x8] sm:$0xff]  ;;  %v806_v3 = vld [vmem:[%s317_s15] sm:$0xff]  ;;  %v808_v4 = vld [vmem:[%s317_s15 + $0x10] sm:$0xff]  ;;  %839 = vmatpush.bf16.msra.mxu2 %v813_v17 }
   0xf   : > { %v809_v5 = vld [vmem:[%s317_s15 + $0x18] sm:$0xff]  ;;  %v817_v6 = vld [vmem:[%s933_s18] sm:$0xff]   ;;  %v832_v11 = vld [vmem:[%s933_s18 + $0x8] sm:$0xff]   ;;  %s985_s15 = scalar_lea.vmem %s1021_s8, %s919_s12 }
  0x10   : > { %836 = vmatpush.bf16.msra.mxu3 %v810_v1  ;;  %400 = vmatpush.bf16.msra.mxu0 %v810_v1  ;;  %v818_v8 = vunpack.c.l.bf16 %v817_v6  ;;  %v819_v9 = vunpack.c.h.bf16 %v817_v6  ;;  %v822_v14 = vunpack.c.l.bf16 %v832_v11  ;;  %v823_v15 = vunpack.c.h.bf16 %v832_v11  ;;  %v812_v27 = vld [vmem:[%s1018_s5] sm:$0xff]  ;;  %v833_v31 = vld [vmem:[%s933_s18 + $0x10] sm:$0xff]   ;;  %v834_v49 = vld [vmem:[%s933_s18 + $0x18] sm:$0xff]  }
  0x11   : > { %838 = vmatpush.bf16.msra.mxu1 %v814_v16  ;;  %v826_v32 = vunpack.c.l.bf16 %v833_v31  ;;  %v827_v33 = vunpack.c.h.bf16 %v833_v31  ;;  %v849_v38 = vld [vmem:[%s1016_s3] ss:$0 sm:$0xff]  ;;  %v830_v52 = vunpack.c.l.bf16 %v834_v49  ;;  %v831_v53 = vunpack.c.h.bf16 %v834_v49 }
  0x12   : > { %v466_v12 = vadd.f32 %v942_v10, %v818_v8  ;;  %v467_v13 = vadd.f32 %v942_v10, %v819_v9  ;;  %v468_v20 = vadd.f32 %v942_v10, %v822_v14  ;;  %v469_v21 = vadd.f32 %v942_v10, %v823_v15  ;;  %840 = vmatpush.bf16.msra.mxu2 %v812_v27 }
  0x13   : > { %777 = vmatmul.msk.bf16.vlgmr.msra.gmra.mxu3 %vm380_vm0, %v807_v2  ;;  %776 = vmatmul.msk.bf16.vlgmr.msra.gmra.mxu0 %vm380_vm0, %v806_v3  ;;  %v470_v34 = vadd.f32 %v942_v10, %v826_v32  ;;  %v471_v35 = vadd.f32 %v942_v10, %v827_v33  ;;  %v472_v55 = vadd.f32 %v942_v10, %v830_v52 }
  0x14   : > { %544 = vmatpush.bf16.msrb.mxu0 %v815_v7  ;;  %v482_v18 = vmul.f32 0.1, %v466_v12  ;;  %v483_v19 = vmul.f32 0.1, %v467_v13  ;;  %vm474_vm1 = vcmp.ge.f32.partialorder %v466_v12, 0.0  ;;  %vm475_vm2 = vcmp.ge.f32.partialorder %v467_v13, 0.0 }
  0x15   : > { %v484_v24 = vmul.f32 0.1, %v468_v20  ;;  %v485_v25 = vmul.f32 0.1, %v469_v21  ;;  %vm476_vm3 = vcmp.ge.f32.partialorder %v468_v20, 0.0  ;;  %vm477_vm4 = vcmp.ge.f32.partialorder %v469_v21, 0.0 }
  0x16   : > { %v490_v22 = vsel %vm474_vm1, %v466_v12, %v482_v18  ;;  %v491_v23 = vsel %vm475_vm2, %v467_v13, %v483_v19  ;;  %v486_v36 = vmul.f32 0.1, %v470_v34  ;;  %v487_v37 = vmul.f32 0.1, %v471_v35 }
  0x17   : > { %v506_v26 = vpack.c.bf16 %v491_v23, %v490_v22  ;;  %v492_v28 = vsel %vm476_vm3, %v468_v20, %v484_v24  ;;  %v493_v29 = vsel %vm477_vm4, %v469_v21, %v485_v25  ;;  %vm478_vm5 = vcmp.ge.f32.partialorder %v470_v34, 0.0 }
  0x18   : > { %545 = vmatpush.bf16.msrb.mxu0 %v814_v16  ;;  %v507_v30 = vpack.c.bf16 %v493_v29, %v492_v28  ;;  %vm479_vm6 = vcmp.ge.f32.partialorder %v471_v35, 0.0  ;;  %v494_v40 = vsel %vm478_vm5, %v470_v34, %v486_v36  ;;  %v473_v58 = vadd.f32 %v942_v10, %v831_v53 }
  0x19   : > { %v495_v41 = vsel %vm479_vm6, %v471_v35, %v487_v37  ;;  %v488_v61 = vmul.f32 0.1, %v472_v55  ;;  %vm480_vm10 = vcmp.ge.f32.partialorder %v472_v55, 0.0 }
  0x1a   : > { %789 = vmatmul.msk.bf16.vlgmr.msra.gmra.mxu1 %vm380_vm0, %v507_v30  ;;  %v508_v43 = vpack.c.bf16 %v495_v41, %v494_v40  ;;  %vm481_vm11 = vcmp.ge.f32.partialorder %v473_v58, 0.0  ;;  %v489_v62 = vmul.f32 0.1, %v473_v58 }
  0x1b   : > { %v496_v0 = vsel %vm480_vm10, %v472_v55, %v488_v61 }
  0x1c   : > { %597 = vmatpush.bf16.msra.mxu0 %v813_v17  ;;  %v497_v1 = vsel %vm481_vm11, %v473_v58, %v489_v62 }
  0x20   : > { %598 = vmatpush.bf16.msra.mxu0 %v812_v27  ;;  %v978_v27 = vld [vmem:[%s1020_s7] ss:$0 sm:$0xff] }
  0x23   : > { %778 = vmatmul.msk.bf16.gmra.mxu3 %vm380_vm0, %v808_v4  ;;  %788 = vmatmul.msk.bf16.vlgmr.msrb.gmra.mxu0 %vm380_vm0, %v506_v26  ;;  %v509_v4 = vpack.c.bf16 %v497_v1, %v496_v0 }
  0x2a   : > { %790 = vmatmul.msk.bf16.gmra.mxu1 %vm380_vm0, %v508_v43 }
  0x33   : > { %779 = vmatmul.msk.bf16.gmra.mxu3 %vm380_vm0, %v809_v5 }
  0x3a   : > { %791 = vmatmul.msk.bf16.gmra.mxu1 %vm380_vm0, %v509_v4 }
  0x90   : > { %v402_v39 = vpop.f32.mrf.mxu0 }
  0x91   : > { %v403_v42 = vadd.f32 %v849_v38, %v402_v39 }
  0x93   : > { %v430_v45 = vmul.f32 0.1, %v403_v42  ;;  %vm422_vm7 = vcmp.ge.f32.partialorder %v403_v42, 0.0 }
  0x95   : > { %v438_v48 = vsel %vm422_vm7, %v403_v42, %v430_v45 }
  0x96   : > { %v407_v44 = vpop.f32.mrf.mxu3 }
  0x97   : > { %v408_v50 = vadd.f32 %v849_v38, %v407_v44  ;;  %v552_v29 = vpop.f32.mrf.mxu1 }
  0x98   : > { %v404_v46 = vpop.f32.mrf.mxu0 }
  0x99   : > { %v405_v47 = vadd.f32 %v849_v38, %v404_v46  ;;  %v432_v59 = vmul.f32 0.1, %v408_v50  ;;  %vm424_vm9 = vcmp.ge.f32.partialorder %v408_v50, 0.0 }
  0x9b   : > { %vm423_vm8 = vcmp.ge.f32.partialorder %v405_v47, 0.0  ;;  %v431_v51 = vmul.f32 0.1, %v405_v47  ;;  %v440_v2 = vsel %vm424_vm9, %v408_v50, %v432_v59 }
  0x9d   : > { %v439_v54 = vsel %vm423_vm8, %v405_v47, %v431_v51 }
  0x9e   : > { %v409_v56 = vpop.f32.mrf.mxu3  ;;  %v498_v57 = vpack.c.bf16 %v439_v54, %v438_v48 }
  0x9f   : > { %v410_v60 = vadd.f32 %v849_v38, %v409_v56  ;;  %v554_v37 = vpop.f32.mrf.mxu1 }
  0xa0   : > { %800 = vmatmul.msk.bf16.vlgmr.msra.gmra.mxu0 %vm380_vm0, %v498_v57  ;;  %v547_v24 = vpop.f32.mrf.mxu0 }
  0xa1   : > { %vm425_vm12 = vcmp.ge.f32.partialorder %v410_v60, 0.0  ;;  %v433_v63 = vmul.f32 0.1, %v410_v60 }
  0xa3   : > { %v441_v3 = vsel %vm425_vm12, %v410_v60, %v433_v63 }
  0xa4   : > { %v499_v5 = vpack.c.bf16 %v441_v3, %v440_v2 }
  0xa6   : > { %v412_v6 = vpop.f32.mrf.mxu3  ;;  %801 = vmatmul.msk.bf16.vlgmr.msra.gmra.mxu2 %vm380_vm0, %v499_v5 }
  0xa7   : > { %v413_v7 = vadd.f32 %v849_v38, %v412_v6  ;;  %v557_v49 = vpop.f32.mrf.mxu1 }
  0xa8   : > { %v549_v25 = vpop.f32.mrf.mxu0 }
  0xa9   : > { %v434_v9 = vmul.f32 0.1, %v413_v7  ;;  %vm426_vm13 = vcmp.ge.f32.partialorder %v413_v7, 0.0 }
  0xab   : > { %v442_v12 = vsel %vm426_vm13, %v413_v7, %v434_v9 }
  0xae   : > { %v414_v8 = vpop.f32.mrf.mxu3 }
  0xaf   : > { %v415_v10 = vadd.f32 %v849_v38, %v414_v8  ;;  %v559_v57 = vpop.f32.mrf.mxu1 }
  0xb1   : > { %vm427_vm14 = vcmp.ge.f32.partialorder %v415_v10, 0.0  ;;  %v435_v11 = vmul.f32 0.1, %v415_v10 }
  0xb3   : > { %v443_v13 = vsel %vm427_vm14, %v415_v10, %v435_v11 }
  0xb4   : > { %v500_v14 = vpack.c.bf16 %v443_v13, %v442_v12 }
  0xb6   : > { %v417_v15 = vpop.f32.mrf.mxu3  ;;  %802 = vmatmul.msk.bf16.gmra.mxu2 %vm380_vm0, %v500_v14 }
  0xb7   : > { %v418_v16 = vadd.f32 %v849_v38, %v417_v15  ;;  %v562_v1 = vpop.f32.mrf.mxu1 }
  0xb9   : > { %v436_v18 = vmul.f32 0.1, %v418_v16  ;;  %vm428_vm15 = vcmp.ge.f32.partialorder %v418_v16, 0.0 }
  0xbb   : > { %v444_v21 = vsel %vm428_vm15, %v418_v16, %v436_v18 }
  0xbe   : > { %v419_v17 = vpop.f32.mrf.mxu3 }
  0xbf   : > { %v420_v19 = vadd.f32 %v849_v38, %v419_v17  ;;  %v564_v9 = vpop.f32.mrf.mxu1 }
  0xc1   : > { %vm429_vm1 = vcmp.ge.f32.partialorder %v420_v19, 0.0  ;;  %v437_v20 = vmul.f32 0.1, %v420_v19 }
  0xc3   : > { %v445_v22 = vsel %vm429_vm1, %v420_v19, %v437_v20 }
  0xc4   : > { %v501_v23 = vpack.c.bf16 %v445_v22, %v444_v21 }
  0xc6   : > { %803 = vmatmul.msk.bf16.gmra.mxu2 %vm380_vm0, %v501_v23  ;;  %vm664_vm0 = vcmask 519168  }
 0x11d   : > { %v600_v26 = vpop.f32.mrf.mxu0 }
 0x11e   : > { %v601_v28 = vadd.f32 %v600_v26, %v547_v24 }
 0x120   : > { %v624_v30 = vadd.f32 %v978_v27, %v601_v28 }
 0x122   : > { %vm632_vm2 = vcmp.ge.f32.partialorder %v624_v30, 0.0  ;;  %v640_v31 = vmul.f32 0.1, %v624_v30 }
 0x124   : > { %v648_v32 = vsel %vm632_vm2, %v624_v30, %v640_v31 }
 0x125   : > { %v656_v33 = vpack.c.bf16 %v648_v32, %v648_v32  ;;  %v602_v34 = vpop.f32.mrf.mxu0 }
 0x126   : > { %v603_v35 = vadd.f32 %v602_v34, %v549_v25 }
 0x127   : > { %665 = vst.msk [vmem:[%s985_s15] sm:$0xf] %vm664_vm0, %v656_v33 }
 0x128   : > { %v625_v36 = vadd.f32 %v978_v27, %v603_v35 }
 0x129   : > { %v605_v38 = vpop.f32.mrf.mxu2 }
 0x12a   : > { %v606_v39 = vadd.f32 %v605_v38, %v552_v29  ;;  %vm633_vm3 = vcmp.ge.f32.partialorder %v625_v36, 0.0  ;;  %v641_v40 = vmul.f32 0.1, %v625_v36 }
 0x12c   : > { %v626_v41 = vadd.f32 %v978_v27, %v606_v39  ;;  %v649_v42 = vsel %vm633_vm3, %v625_v36, %v641_v40 }
 0x12d   : > { %v657_v43 = vpack.c.bf16 %v649_v42, %v649_v42 }
 0x12e   : > { %vm634_vm4 = vcmp.ge.f32.partialorder %v626_v41, 0.0  ;;  %v642_v44 = vmul.f32 0.1, %v626_v41 }
 0x12f   : > { %666 = vst.msk [vmem:[%s985_s15 + $0x4] sm:$0xf] %vm664_vm0, %v657_v43 }
 0x130   : > { %v650_v45 = vsel %vm634_vm4, %v626_v41, %v642_v44 }
 0x131   : > { %v658_v46 = vpack.c.bf16 %v650_v45, %v650_v45  ;;  %v607_v47 = vpop.f32.mrf.mxu2 }
 0x132   : > { %v608_v48 = vadd.f32 %v607_v47, %v554_v37 }
 0x133   : > { %667 = vst.msk [vmem:[%s985_s15 + $0x8] sm:$0xf] %vm664_vm0, %v658_v46 }
 0x134   : > { %v627_v50 = vadd.f32 %v978_v27, %v608_v48 }
 0x136   : > { %vm635_vm5 = vcmp.ge.f32.partialorder %v627_v50, 0.0  ;;  %v643_v51 = vmul.f32 0.1, %v627_v50 }
 0x138   : > { %v651_v52 = vsel %vm635_vm5, %v627_v50, %v643_v51 }
 0x139   : > { %v659_v53 = vpack.c.bf16 %v651_v52, %v651_v52  ;;  %v610_v54 = vpop.f32.mrf.mxu2 }
 0x13a   : > { %v611_v55 = vadd.f32 %v610_v54, %v557_v49 }
 0x13b   : > { %668 = vst.msk [vmem:[%s985_s15 + $0xc] sm:$0xf] %vm664_vm0, %v659_v53 }
 0x13c   : > { %v628_v56 = vadd.f32 %v978_v27, %v611_v55 }
 0x13e   : > { %vm636_vm6 = vcmp.ge.f32.partialorder %v628_v56, 0.0  ;;  %v644_v58 = vmul.f32 0.1, %v628_v56 }
 0x140   : > { %v652_v59 = vsel %vm636_vm6, %v628_v56, %v644_v58 }
 0x141   : > { %v660_v60 = vpack.c.bf16 %v652_v59, %v652_v59  ;;  %v612_v61 = vpop.f32.mrf.mxu2 }
 0x142   : > { %v613_v62 = vadd.f32 %v612_v61, %v559_v57 }
 0x143   : > { %669 = vst.msk [vmem:[%s985_s15 + $0x10] sm:$0xf] %vm664_vm0, %v660_v60 }
 0x144   : > { %v629_v63 = vadd.f32 %v978_v27, %v613_v62 }
 0x146   : > { %vm637_vm7 = vcmp.ge.f32.partialorder %v629_v63, 0.0  ;;  %v645_v0 = vmul.f32 0.1, %v629_v63 }
 0x148   : > { %v653_v2 = vsel %vm637_vm7, %v629_v63, %v645_v0 }
 0x149   : > { %v661_v3 = vpack.c.bf16 %v653_v2, %v653_v2  ;;  %v615_v4 = vpop.f32.mrf.mxu2 }
 0x14a   : > { %v616_v5 = vadd.f32 %v615_v4, %v562_v1 }
 0x14b   : > { %670 = vst.msk [vmem:[%s985_s15 + $0x14] sm:$0xf] %vm664_vm0, %v661_v3 }
 0x14c   : > { %v630_v6 = vadd.f32 %v978_v27, %v616_v5 }
 0x14e   : > { %vm638_vm8 = vcmp.ge.f32.partialorder %v630_v6, 0.0  ;;  %v646_v7 = vmul.f32 0.1, %v630_v6 }
 0x150   : > { %v654_v8 = vsel %vm638_vm8, %v630_v6, %v646_v7 }
 0x151   : > { %v662_v10 = vpack.c.bf16 %v654_v8, %v654_v8  ;;  %v617_v11 = vpop.f32.mrf.mxu2 }
 0x152   : > { %v618_v12 = vadd.f32 %v617_v11, %v564_v9 }
 0x153   : > { %671 = vst.msk [vmem:[%s985_s15 + $0x18] sm:$0xf] %vm664_vm0, %v662_v10 }
 0x154   : > { %v631_v13 = vadd.f32 %v978_v27, %v618_v12 }
 0x156   : > { %vm639_vm9 = vcmp.ge.f32.partialorder %v631_v13, 0.0  ;;  %v647_v14 = vmul.f32 0.1, %v631_v13 }
 0x158   : > { %v655_v15 = vsel %vm639_vm9, %v631_v13, %v647_v14 }
 0x159   : > { %v663_v16 = vpack.c.bf16 %v655_v15, %v655_v15 }
 0x15b   : > { %672 = vst.msk [vmem:[%s985_s15 + $0x1c] sm:$0xf] %vm664_vm0, %v663_v16 }
 0x15c PF: > { %s18_s27 = sadd.s32 1, %s858_s27  }
 0x15d   : > { %p15_p4 = scmp.ge.s32.totalorder %s18_s27, 4  }
 0x15f   :  { %17 = sbr.rel (!%p15_p4) target bundleno = 1 (0x1), region = 85 }

// kernel: yolo_v2_netv2_pallas.15
= control target key start
LH: loop header
LB: loop body
LE: loop exit
PB: predicated region body
PF: predicated region fallthrough
CT: control target
= control target key end

     0   :  { %s546_s12 = smov 0   ;;  %s613_s0 = inlined_call_operand.vmem [shape: bf16[128,64], index: 0, kind: input, shape index: {}]   ;;  %s614_s1 = inlined_call_operand.vmem [shape: bf16[64,64], index: 1, kind: input, shape index: {}]   ;;  %s615_s2 = inlined_call_operand.vmem [shape: f32[1,64], index: 2, kind: input, shape index: {}]   ;;  %s616_s3 = inlined_call_operand.vmem [shape: bf16[128,64], index: 3, kind: output, shape index: {}]  }
   0x1 LB: > { %s410_s13 = sadd.s32 4294967295, %s524_s12   ;;  %p414_p0 = scmp.ge.s32.totalorder %s524_s12, 1  ;;  %s524_s12 = sphi %s546_s12, %s13_s12  }
   0x2   : > { %p138_p1 = scmp.lt.s32.totalorder %s524_s12, 3 }
   0x4   : > { %p139_p2 = pnand %p414_p0, %p138_p1 }
   0x5   : > { %s415_s16 = sshll.u32 (!%p139_p2), %s410_s13, 3 }
   0x6   : > { %142 = sbr.rel (%p139_p2) target bundleno = 198 (0xc6), region = 32  ;;  %p163_p3 = scmp.lt.s32.totalorder (!%p139_p2), %s415_s16, 15 }
   0xb   : > { %v464_v0 = vld [vmem:[%s614_s1 + $0x18] sm:$0xff]  ;;  %v463_v1 = vld [vmem:[%s614_s1 + $0x10] sm:$0xff]  ;;  %s618_s16 = smov (!%p163_p3, %s415_s16), 15  ;;  %v462_v2 = vld [vmem:[%s614_s1 + $0x8] sm:$0xff]  ;;  %vm239_vm0 = vcmask 523264   ;;  %vm345_vm1 = vcmask 519168  }
   0xc   : > { %256 = vmatpush.bf16.msra.mxu0 %v464_v0  ;;  %465 = vmatpush.bf16.msra.mxu1 %v464_v0  ;;  %s416_s21 = sshll.u32 %s618_s16, 2  ;;  %v461_v3 = vld [vmem:[%s614_s1] sm:$0xff] }
   0xd   : > { %466 = vmatpush.bf16.msra.mxu2 %v464_v0  ;;  %467 = vmatpush.bf16.msra.mxu3 %v464_v0  ;;  %s574_s26 = scalar_lea.vmem %s613_s0, %s416_s21  ;;  %v485_v8 = vld [vmem:[%s615_s2] ss:$0 sm:$0xff]  ;;  %s591_s4 = scalar_lea.vmem %s616_s3, %s416_s21 }
   0xe   : > { %v457_v4 = vld [vmem:[%s574_s26] sm:$0xff]  ;;  %v458_v5 = vld [vmem:[%s574_s26 + $0x8] sm:$0xff]  ;;  %v459_v6 = vld [vmem:[%s574_s26 + $0x10] sm:$0xff] }
   0xf   : > { %v460_v7 = vld [vmem:[%s574_s26 + $0x18] sm:$0xff]  ;;  %v175_v39 = vld [vmem:[%s574_s26] sm:$0xff]   ;;  %v177_v42 = vld [vmem:[%s574_s26 + $0x8] sm:$0xff]  }
  0x10   : > { %257 = vmatpush.bf16.msra.mxu0 %v463_v1  ;;  %468 = vmatpush.bf16.msra.mxu1 %v463_v1  ;;  %v321_v45 = vunpack.c.l.bf16 %v175_v39  ;;  %v323_v47 = vunpack.c.l.bf16 %v177_v42  ;;  %v179_v56 = vld [vmem:[%s574_s26 + $0x10] sm:$0xff]   ;;  %v181_v59 = vld [vmem:[%s574_s26 + $0x18] sm:$0xff]  }
  0x11   : > { %469 = vmatpush.bf16.msra.mxu2 %v463_v1  ;;  %470 = vmatpush.bf16.msra.mxu3 %v463_v1  ;;  %v325_v0 = vunpack.c.l.bf16 %v179_v56 }
  0x14   : > { %258 = vmatpush.bf16.msra.mxu0 %v462_v2  ;;  %471 = vmatpush.bf16.msra.mxu1 %v462_v2 }
  0x15   : > { %472 = vmatpush.bf16.msra.mxu2 %v462_v2  ;;  %473 = vmatpush.bf16.msra.mxu3 %v462_v2  ;;  %v327_v2 = vunpack.c.l.bf16 %v181_v59 }
  0x18   : > { %259 = vmatpush.bf16.msra.mxu0 %v461_v3  ;;  %474 = vmatpush.bf16.msra.mxu1 %v461_v3 }
  0x19   : > { %475 = vmatpush.bf16.msra.mxu2 %v461_v3  ;;  %476 = vmatpush.bf16.msra.mxu3 %v461_v3 }
  0x1b   : > { %451 = vmatmul.msk.bf16.vlgmr.msra.gmra.mxu0 %vm239_vm0, %v457_v4  ;;  %452 = vmatmul.msk.bf16.vlgmr.msra.gmra.mxu1 %vm239_vm0, %v458_v5 }
  0x1c   : > { %453 = vmatmul.msk.bf16.vlgmr.msra.gmra.mxu2 %vm239_vm0, %v459_v6  ;;  %454 = vmatmul.msk.bf16.vlgmr.msra.gmra.mxu3 %vm239_vm0, %v460_v7 }
  0x98   : > { %v261_v9 = vpop.f32.mrf.mxu0  ;;  %v266_v10 = vpop.f32.mrf.mxu1 }
  0x99   : > { %v262_v11 = vadd.f32 %v485_v8, %v261_v9  ;;  %v267_v12 = vadd.f32 %v485_v8, %v266_v10 }
  0x9b   : > { %v281_v13 = vsub.f32 0.0, %v262_v11  ;;  %v283_v14 = vsub.f32 0.0, %v267_v12  ;;  %v324_v11 = vunpack.c.h.bf16 %v177_v42 }
  0x9d   : > { %v289_v15 = vmul.f32 1.442695, %v281_v13  ;;  %v293_v16 = vmul.f32 1.442695, %v283_v14 }
  0x9f   : > { %486 = vpow2.f32 %v289_v15  ;;  %v271_v17 = vpop.f32.mrf.mxu2  ;;  %v276_v18 = vpop.f32.mrf.mxu3 }
  0xa0   : > { %488 = vpow2.f32 %v293_v16  ;;  %v272_v19 = vadd.f32 %v485_v8, %v271_v17  ;;  %v277_v20 = vadd.f32 %v485_v8, %v276_v18  ;;  %v263_v21 = vpop.f32.mrf.mxu0  ;;  %v268_v22 = vpop.f32.mrf.mxu1  ;;  %v326_v18 = vunpack.c.h.bf16 %v179_v56 }
  0xa1   : > { %v264_v23 = vadd.f32 %v485_v8, %v263_v21  ;;  %v269_v24 = vadd.f32 %v485_v8, %v268_v22 }
  0xa2   : > { %v285_v25 = vsub.f32 0.0, %v272_v19  ;;  %v287_v26 = vsub.f32 0.0, %v277_v20 }
  0xa3   : > { %v282_v27 = vsub.f32 0.0, %v264_v23  ;;  %v284_v28 = vsub.f32 0.0, %v269_v24  ;;  %v328_v23 = vunpack.c.h.bf16 %v181_v59 }
  0xa4   : > { %v297_v29 = vmul.f32 1.442695, %v285_v25  ;;  %v301_v30 = vmul.f32 1.442695, %v287_v26 }
  0xa5   : > { %v487_v31 = vpop.eup %486  ;;  %v291_v34 = vmul.f32 1.442695, %v282_v27  ;;  %v295_v36 = vmul.f32 1.442695, %v284_v28 }
  0xa6   : > { %v489_v32 = vpop.eup %488  ;;  %v305_v33 = vadd.f32 1.0, %v487_v31  ;;  %490 = vpow2.f32 %v297_v29 }
  0xa7   : > { %v307_v35 = vadd.f32 1.0, %v489_v32  ;;  %492 = vpow2.f32 %v301_v30  ;;  %v273_v37 = vpop.f32.mrf.mxu2  ;;  %v278_v38 = vpop.f32.mrf.mxu3 }
  0xa8   : > { %494 = vrcp.f32 %v305_v33  ;;  %v274_v40 = vadd.f32 %v485_v8, %v273_v37  ;;  %v279_v41 = vadd.f32 %v485_v8, %v278_v38  ;;  %v322_v8 = vunpack.c.h.bf16 %v175_v39 }
  0xa9   : > { %496 = vrcp.f32 %v307_v35 }
  0xaa   : > { %498 = vpow2.f32 %v291_v34  ;;  %v286_v43 = vsub.f32 0.0, %v274_v40  ;;  %v288_v44 = vsub.f32 0.0, %v279_v41 }
  0xab   : > { %500 = vpow2.f32 %v295_v36 }
  0xac   : > { %v491_v46 = vpop.eup %490  ;;  %v299_v48 = vmul.f32 1.442695, %v286_v43  ;;  %v303_v51 = vmul.f32 1.442695, %v288_v44 }
  0xad   : > { %v493_v49 = vpop.eup %492  ;;  %v309_v50 = vadd.f32 1.0, %v491_v46 }
  0xae   : > { %v495_v52 = vpop.eup %494  ;;  %v311_v53 = vadd.f32 1.0, %v493_v49  ;;  %502 = vpow2.f32 %v299_v48 }
  0xaf   : > { %v497_v54 = vpop.eup %496  ;;  %v329_v55 = vmul.f32 %v495_v52, %v321_v45  ;;  %504 = vrcp.f32 %v309_v50 }
  0xb0   : > { %v499_v57 = vpop.eup %498  ;;  %v331_v58 = vmul.f32 %v497_v54, %v323_v47  ;;  %506 = vrcp.f32 %v311_v53 }
  0xb1   : > { %v501_v60 = vpop.eup %500  ;;  %v337_v61 = vpack.c.bf16 %v329_v55, %v329_v55  ;;  %v306_v62 = vadd.f32 1.0, %v499_v57  ;;  %508 = vpow2.f32 %v303_v51 }
  0xb2   : > { %v339_v63 = vpack.c.bf16 %v331_v58, %v331_v58  ;;  %v308_v1 = vadd.f32 1.0, %v501_v60 }
  0xb3   : > { %346 = vst.msk [vmem:[%s591_s4] sm:$0xf] %vm345_vm1, %v337_v61  ;;  %510 = vrcp.f32 %v306_v62 }
  0xb4   : > { %v503_v3 = vpop.eup %502  ;;  %348 = vst.msk [vmem:[%s591_s4 + $0x8] sm:$0xf] %vm345_vm1, %v339_v63  ;;  %512 = vrcp.f32 %v308_v1 }
  0xb5   : > { %v505_v4 = vpop.eup %504  ;;  %v310_v5 = vadd.f32 1.0, %v503_v3 }
  0xb6   : > { %v507_v6 = vpop.eup %506  ;;  %v333_v7 = vmul.f32 %v505_v4, %v325_v0 }
  0xb7   : > { %v509_v9 = vpop.eup %508  ;;  %v335_v10 = vmul.f32 %v507_v6, %v327_v2  ;;  %514 = vrcp.f32 %v310_v5 }
  0xb8   : > { %v341_v12 = vpack.c.bf16 %v333_v7, %v333_v7  ;;  %v312_v13 = vadd.f32 1.0, %v509_v9 }
  0xb9   : > { %v511_v14 = vpop.eup %510  ;;  %v343_v15 = vpack.c.bf16 %v335_v10, %v335_v10 }
  0xba   : > { %v513_v16 = vpop.eup %512  ;;  %350 = vst.msk [vmem:[%s591_s4 + $0x10] sm:$0xf] %vm345_vm1, %v341_v12  ;;  %v330_v17 = vmul.f32 %v511_v14, %v322_v8  ;;  %516 = vrcp.f32 %v312_v13 }
  0xbb   : > { %352 = vst.msk [vmem:[%s591_s4 + $0x18] sm:$0xf] %vm345_vm1, %v343_v15  ;;  %v332_v19 = vmul.f32 %v513_v16, %v324_v11 }
  0xbc   : > { %v338_v20 = vpack.c.bf16 %v330_v17, %v330_v17 }
  0xbd   : > { %v515_v21 = vpop.eup %514  ;;  %v340_v22 = vpack.c.bf16 %v332_v19, %v332_v19 }
  0xbe   : > { %347 = vst.msk [vmem:[%s591_s4 + $0x4] sm:$0xf] %vm345_vm1, %v338_v20  ;;  %v334_v24 = vmul.f32 %v515_v21, %v326_v18 }
  0xbf   : > { %349 = vst.msk [vmem:[%s591_s4 + $0xc] sm:$0xf] %vm345_vm1, %v340_v22 }
  0xc0   : > { %v517_v25 = vpop.eup %516  ;;  %v342_v26 = vpack.c.bf16 %v334_v24, %v334_v24 }
  0xc1   : > { %v336_v27 = vmul.f32 %v517_v25, %v328_v23 }
  0xc2   : > { %351 = vst.msk [vmem:[%s591_s4 + $0x14] sm:$0xf] %vm345_vm1, %v342_v26 }
  0xc3   : > { %v344_v28 = vpack.c.bf16 %v336_v27, %v336_v27 }
  0xc5   : > { %353 = vst.msk [vmem:[%s591_s4 + $0x1c] sm:$0xf] %vm345_vm1, %v344_v28 }
  0xc6 PF: > { %s13_s12 = sadd.s32 1, %s524_s12  }
  0xc7   : > { %p10_p4 = scmp.ge.s32.totalorder %s13_s12, 4  }
  0xc9   :  { %12 = sbr.rel (!%p10_p4) target bundleno = 1 (0x1), region = 62 }

// kernel: yolo_v2_netv2_pallas.16
= control target key start
LH: loop header
LB: loop body
LE: loop exit
PB: predicated region body
PF: predicated region fallthrough
CT: control target
= control target key end

     0   :  { %s622_s15 = smov 0   ;;  %s696_s0 = inlined_call_operand.vmem [shape: bf16[128,64], index: 0, kind: input, shape index: {}]   ;;  %s697_s1 = inlined_call_operand.vmem [shape: bf16[64,64], index: 1, kind: input, shape index: {}]   ;;  %s698_s2 = inlined_call_operand.vmem [shape: f32[1,32], index: 2, kind: input, shape index: {}]   ;;  %s699_s3 = inlined_call_operand.vmem [shape: bf16[128,32], index: 3, kind: output, shape index: {0}]   ;;  %s700_s4 = inlined_call_operand.vmem [shape: bf16[128,32], index: 4, kind: output, shape index: {1}]  }
   0x1 LB: > { %s509_s16 = sadd.s32 4294967295, %s594_s15   ;;  %p513_p0 = scmp.ge.s32.totalorder %s594_s15, 1  ;;  %s594_s15 = sphi %s622_s15, %s15_s15  }
   0x2   : > { %p166_p1 = scmp.lt.s32.totalorder %s594_s15, 3 }
   0x4   : > { %p167_p2 = pnand %p513_p0, %p166_p1 }
   0x5   : > { %s514_s19 = sshll.u32 (!%p167_p2), %s509_s16, 3  ;;  %s596_s6 = smov (!%p167_p2), 96  }
   0x6   : > { %170 = sbr.rel (%p167_p2) target bundleno = 288 (0x120), region = 32  ;;  %p198_p3 = scmp.lt.s32.totalorder (!%p167_p2), %s514_s19, 15 }
   0xb   : > { %v565_v0 = vld [vmem:[%s697_s1 + $0x18] sm:$0xff]  ;;  %v564_v1 = vld [vmem:[%s697_s1 + $0x10] sm:$0xff]  ;;  %s702_s19 = smov (!%p198_p3, %s514_s19), 15  ;;  %v563_v2 = vld [vmem:[%s697_s1 + $0x8] sm:$0xff]  ;;  %vm276_vm0 = vcmask 523264   ;;  %vm362_vm3 = vcmask 257024  }
   0xc   : > { %293 = vmatpush.bf16.msra.mxu0 %v565_v0  ;;  %566 = vmatpush.bf16.msra.mxu1 %v565_v0  ;;  %s639_s24 = sshll.u32 %s702_s19, 2  ;;  %v562_v3 = vld [vmem:[%s697_s1] sm:$0xff] }
   0xd   : > { %568 = vmatpush.bf16.msra.mxu3 %v565_v0  ;;  %567 = vmatpush.bf16.msra.mxu2 %v565_v0  ;;  %s201_s29 = scalar_lea.vmem %s696_s0, %s639_s24  ;;  %v587_v8 = vld [vmem:[%s698_s2] ss:$0 sm:$0xff]  ;;  %s657_s9 = scalar_lea.vmem %s699_s3, %s639_s24 }
   0xe   : > { %v558_v4 = vld [vmem:[%s201_s29] sm:$0xff]  ;;  %v559_v5 = vld [vmem:[%s201_s29 + $0x8] sm:$0xff]  ;;  %v561_v6 = vld [vmem:[%s201_s29 + $0x18] sm:$0xff]  ;;  %s213_s12 = scalar_lea.vmem %s700_s4, %s639_s24 }
   0xf   : > { %v560_v7 = vld [vmem:[%s201_s29 + $0x10] sm:$0xff] }
  0x10   : > { %294 = vmatpush.bf16.msra.mxu0 %v564_v1  ;;  %569 = vmatpush.bf16.msra.mxu1 %v564_v1 }
  0x11   : > { %571 = vmatpush.bf16.msra.mxu3 %v564_v1  ;;  %570 = vmatpush.bf16.msra.mxu2 %v564_v1 }
  0x14   : > { %295 = vmatpush.bf16.msra.mxu0 %v563_v2  ;;  %572 = vmatpush.bf16.msra.mxu1 %v563_v2 }
  0x15   : > { %574 = vmatpush.bf16.msra.mxu3 %v563_v2  ;;  %573 = vmatpush.bf16.msra.mxu2 %v563_v2 }
  0x18   : > { %296 = vmatpush.bf16.msra.mxu0 %v562_v3  ;;  %575 = vmatpush.bf16.msra.mxu1 %v562_v3 }
  0x19   : > { %577 = vmatpush.bf16.msra.mxu3 %v562_v3  ;;  %576 = vmatpush.bf16.msra.mxu2 %v562_v3 }
  0x1b   : > { %552 = vmatmul.msk.bf16.vlgmr.msra.gmra.mxu0 %vm276_vm0, %v558_v4  ;;  %553 = vmatmul.msk.bf16.vlgmr.msra.gmra.mxu1 %vm276_vm0, %v559_v5 }
  0x1c   : > { %555 = vmatmul.msk.bf16.vlgmr.msra.gmra.mxu3 %vm276_vm0, %v561_v6  ;;  %554 = vmatmul.msk.bf16.vlgmr.msra.gmra.mxu2 %vm276_vm0, %v560_v7 }
  0x98   : > { %v298_v9 = vpop.f32.mrf.mxu0  ;;  %v303_v10 = vpop.f32.mrf.mxu1 }
  0x99   : > { %v322_v11 = vadd.f32 %v587_v8, %v298_v9  ;;  %v324_v12 = vadd.f32 %v587_v8, %v303_v10  ;;  %v373_v13 = vpack.c.bf16 %v303_v10, %v303_v10  ;;  %v371_v14 = vpack.c.bf16 %v298_v9, %v298_v9 }
  0x9b   : > { %vm330_vm1 = vcmp.ge.f32.partialorder %v322_v11, 0.0  ;;  %v338_v15 = vmul.f32 0.1, %v322_v11  ;;  %vm332_vm2 = vcmp.ge.f32.partialorder %v324_v12, 0.0  ;;  %v340_v16 = vmul.f32 0.1, %v324_v12  ;;  %391 = vrot.lane.b32.xlu1 %v373_v13, %s596_s6  ;;  %387 = vrot.lane.b32.xlu0 %v371_v14, %s596_s6 }
  0x9d   : > { %v346_v17 = vsel %vm330_vm1, %v322_v11, %v338_v15  ;;  %v348_v18 = vsel %vm332_vm2, %v324_v12, %v340_v16 }
  0x9e   : > { %v354_v19 = vpack.c.bf16 %v346_v17, %v346_v17  ;;  %v356_v20 = vpack.c.bf16 %v348_v18, %v348_v18 }
  0x9f   : > { %v313_v21 = vpop.f32.mrf.mxu3  ;;  %v308_v22 = vpop.f32.mrf.mxu2 }
  0xa0   : > { %363 = vst.msk [vmem:[%s657_s9] sm:$0xf] %vm362_vm3, %v354_v19  ;;  %v328_v23 = vadd.f32 %v587_v8, %v313_v21  ;;  %v300_v24 = vpop.f32.mrf.mxu0  ;;  %v305_v25 = vpop.f32.mrf.mxu1  ;;  %v326_v26 = vadd.f32 %v587_v8, %v308_v22  ;;  %v375_v27 = vpack.c.bf16 %v308_v22, %v308_v22  ;;  %v377_v49 = vpack.c.bf16 %v313_v21, %v313_v21 }
  0xa1   : > { %365 = vst.msk [vmem:[%s657_s9 + $0x8] sm:$0xf] %vm362_vm3, %v356_v20  ;;  %v323_v28 = vadd.f32 %v587_v8, %v300_v24  ;;  %v372_v29 = vpack.c.bf16 %v300_v24, %v300_v24  ;;  %v325_v30 = vadd.f32 %v587_v8, %v305_v25  ;;  %v374_v31 = vpack.c.bf16 %v305_v25, %v305_v25 }
  0xa2   : > { %vm336_vm4 = vcmp.ge.f32.partialorder %v328_v23, 0.0  ;;  %v344_v32 = vmul.f32 0.1, %v328_v23  ;;  %vm334_vm5 = vcmp.ge.f32.partialorder %v326_v26, 0.0  ;;  %v342_v33 = vmul.f32 0.1, %v326_v26  ;;  %395 = vrot.lane.b32.xlu2 %v375_v27, %s596_s6 }
  0xa3   : > { %vm331_vm6 = vcmp.ge.f32.partialorder %v323_v28, 0.0  ;;  %v339_v34 = vmul.f32 0.1, %v323_v28  ;;  %vm333_vm7 = vcmp.ge.f32.partialorder %v325_v30, 0.0  ;;  %v341_v35 = vmul.f32 0.1, %v325_v30  ;;  %393 = vrot.lane.b32.xlu1 %v374_v31, %s596_s6  ;;  %389 = vrot.lane.b32.xlu0 %v372_v29, %s596_s6 }
  0xa4   : > { %v352_v36 = vsel %vm336_vm4, %v328_v23, %v344_v32  ;;  %v350_v37 = vsel %vm334_vm5, %v326_v26, %v342_v33 }
  0xa5   : > { %v360_v38 = vpack.c.bf16 %v352_v36, %v352_v36  ;;  %v347_v39 = vsel %vm331_vm6, %v323_v28, %v339_v34  ;;  %v349_v40 = vsel %vm333_vm7, %v325_v30, %v341_v35  ;;  %v358_v43 = vpack.c.bf16 %v350_v37, %v350_v37 }
  0xa6   : > { %v355_v41 = vpack.c.bf16 %v347_v39, %v347_v39  ;;  %v357_v42 = vpack.c.bf16 %v349_v40, %v349_v40 }
  0xa7   : > { %369 = vst.msk [vmem:[%s657_s9 + $0x18] sm:$0xf] %vm362_vm3, %v360_v38  ;;  %v315_v44 = vpop.f32.mrf.mxu3  ;;  %v310_v45 = vpop.f32.mrf.mxu2 }
  0xa8   : > { %364 = vst.msk [vmem:[%s657_s9 + $0x4] sm:$0xf] %vm362_vm3, %v355_v41  ;;  %v329_v46 = vadd.f32 %v587_v8, %v315_v44  ;;  %v327_v47 = vadd.f32 %v587_v8, %v310_v45  ;;  %v376_v48 = vpack.c.bf16 %v310_v45, %v310_v45  ;;  %v378_v50 = vpack.c.bf16 %v315_v44, %v315_v44 }
  0xa9   : > { %366 = vst.msk [vmem:[%s657_s9 + $0xc] sm:$0xf] %vm362_vm3, %v357_v42 }
  0xaa   : > { %vm337_vm8 = vcmp.ge.f32.partialorder %v329_v46, 0.0  ;;  %v345_v51 = vmul.f32 0.1, %v329_v46  ;;  %367 = vst.msk [vmem:[%s657_s9 + $0x10] sm:$0xf] %vm362_vm3, %v358_v43  ;;  %vm335_vm9 = vcmp.ge.f32.partialorder %v327_v47, 0.0  ;;  %397 = vrot.lane.b32.xlu2 %v376_v48, %s596_s6 }
  0xab   : > { %401 = vrot.lane.b32.xlu1 %v378_v50, %s596_s6  ;;  %399 = vrot.lane.b32.xlu0 %v377_v49, %s596_s6  ;;  %v343_v52 = vmul.f32 0.1, %v327_v47 }
  0xac   : > { %v353_v53 = vsel %vm337_vm8, %v329_v46, %v345_v51 }
  0xad   : > { %v361_v54 = vpack.c.bf16 %v353_v53, %v353_v53  ;;  %v351_v55 = vsel %vm335_vm9, %v327_v47, %v343_v52 }
  0xae   : > { %v359_v56 = vpack.c.bf16 %v351_v55, %v351_v55 }
  0xaf   : > { %370 = vst.msk [vmem:[%s657_s9 + $0x1c] sm:$0xf] %vm362_vm3, %v361_v54 }
  0xb0   : > { %368 = vst.msk [vmem:[%s657_s9 + $0x14] sm:$0xf] %vm362_vm3, %v359_v56 }
  0xfc   : > { %v396_v57 = vpop.permute.xlu2 %395 }
  0xfd   : > { %415 = vst.msk [vmem:[%s213_s12 + $0x10] sm:$0xf] %vm362_vm3, %v396_v57 }
 0x104   : > { %v398_v58 = vpop.permute.xlu2 %397 }
 0x105   : > { %416 = vst.msk [vmem:[%s213_s12 + $0x14] sm:$0xf] %vm362_vm3, %v398_v58 }
 0x10d   : > { %v392_v59 = vpop.permute.xlu1 %391  ;;  %v388_v60 = vpop.permute.xlu0 %387 }
 0x10e   : > { %413 = vst.msk [vmem:[%s213_s12 + $0x8] sm:$0xf] %vm362_vm3, %v392_v59 }
 0x10f   : > { %411 = vst.msk [vmem:[%s213_s12] sm:$0xf] %vm362_vm3, %v388_v60 }
 0x115   : > { %v394_v61 = vpop.permute.xlu1 %393  ;;  %v390_v62 = vpop.permute.xlu0 %389 }
 0x116   : > { %414 = vst.msk [vmem:[%s213_s12 + $0xc] sm:$0xf] %vm362_vm3, %v394_v61 }
 0x117   : > { %412 = vst.msk [vmem:[%s213_s12 + $0x4] sm:$0xf] %vm362_vm3, %v390_v62 }
 0x11d   : > { %v402_v63 = vpop.permute.xlu1 %401  ;;  %v400_v0 = vpop.permute.xlu0 %399 }
 0x11e   : > { %418 = vst.msk [vmem:[%s213_s12 + $0x1c] sm:$0xf] %vm362_vm3, %v402_v63 }
 0x11f   : > { %417 = vst.msk [vmem:[%s213_s12 + $0x18] sm:$0xf] %vm362_vm3, %v400_v0 }
 0x120 PF: > { %s15_s15 = sadd.s32 1, %s594_s15  }
 0x121   : > { %p12_p4 = scmp.ge.s32.totalorder %s15_s15, 4  }
 0x123   :  { %14 = sbr.rel (!%p12_p4) target bundleno = 1 (0x1), region = 74 }

// kernel: yolo_v2_netv2_pallas.21
= control target key start
LH: loop header
LB: loop body
LE: loop exit
PB: predicated region body
PF: predicated region fallthrough
CT: control target
= control target key end

     0   :  { %8 = vsyncpa [#allocation3], 0  ;;  %s665_s0 = inlined_call_operand.vmem [shape: bf16[128,64], index: 0, kind: input, shape index: {}]   ;;  %s666_s1 = inlined_call_operand.vmem [shape: bf16[64,128], index: 1, kind: input, shape index: {}]   ;;  %s667_s2 = inlined_call_operand.vmem [shape: f32[1,128], index: 2, kind: input, shape index: {}]   ;;  %s668_s3 = inlined_call_operand.hbm [shape: f32[128,128], index: 3, kind: output, shape index: {}]  }
   0x1   :  { %10 = vsyncpa [#allocation3 + $0x1], 0  ;;  %s562_s12 = smov 0   ;;  %s564_s13 = smov 0  }
   0x2   :  { %s566_s14 = smov 0   ;;  %s568_s15 = smov 0  }
   0x3 LB: > { %s583_s16 = sadd.s32 4294967295, %s538_s15   ;;  %s365_s17 = sadd.s32 4294967294, %s538_s15   ;;  %s538_s15 = sphi %s568_s15, %s674_s15   ;;  %s534_s14 = sphi %s566_s14, %s673_s14   ;;  %s530_s13 = sphi %s564_s13, %s672_s13   ;;  %s526_s12 = sphi %s562_s12, %s671_s12  }
   0x4   : > { %s587_s18 = sadd.s32 1, %s538_s15   ;;  %s91_s19 = sadd.s32 1, %s534_s14 }
   0x5   : > { %s88_s20 = ssub.s32 %s538_s15, %s587_s18  ;;  %p101_p0 = scmp.ne.s32.totalorder %s534_s14, %s530_s13 }
   0x6   : > { %p89_p1 = scmp.eq.s32.totalorder %s88_s20, 0  ;;  %p102_p2 = scmp.eq.s32.totalorder %s583_s16, 1 }
   0x7   : > { %p107_p3 = scmp.ne.s32.totalorder %s530_s13, %s526_s12  ;;  %p108_p4 = scmp.eq.s32.totalorder %s365_s17, 1 }
   0x8   : > { %s598_s21 = scalar_select %p89_p1, %s534_s14, %s91_s19  }
   0x9   : > { %p600_p5 = por %p102_p2, %p101_p0  ;;  %p604_p6 = por %p108_p4, %p107_p3 }
   0xa   : > { %p368_p7 = scmp.ge.s32.totalorder %s538_s15, 1  ;;  %p141_p8 = scmp.lt.s32.totalorder %s538_s15, 3 }
   0xc   : > { %p142_p9 = pnand %p368_p7, %p141_p8 }
   0xd   : > { %s370_s26 = sshll.u32 (!%p142_p9), %s583_s16, 3  ;;  %s162_s10 = sand.u32 (!%p142_p9), 1, %s530_s13  }
   0xe   : > { %145 = sbr.rel (%p142_p9) target bundleno = 183 (0xb7), region = 32  ;;  %p166_p10 = scmp.lt.s32.totalorder (!%p142_p9), %s370_s26, 15 }
   0xf   : > { %s369_s11 = sshll.u32 (!%p142_p9), %s162_s10, 6  ;;  %s421_s24 = sshll.u32 (!%p142_p9), %s583_s16, 6 }
  0x10   : > { %s164_s20 = scalar_lea.vmem (!%p142_p9), [#allocation2], %s369_s11  ;;  %s299_s27 = scalar_lea.hbm (!%p142_p9), %s668_s3, %s421_s24 }
  0x11   : > { %s300_s28 = sshll.u32 (!%p142_p9), %s164_s20, 4  ;;  %s302_s29 = sshll.u32 (!%p142_p9), %s299_s27, 4  ;;  %s301_s28 = int_to_ptr.vmem [resolvable:$true] %s300_s28  ;;  %s303_s29 = int_to_ptr.hbm [resolvable:$true] %s302_s29 }
  0x12   : > { %s288_s16 = scalar_lea.sflag (!%p142_p9), [#allocation3], %s162_s10  ;;  %s490_s30 = sshra.s32 (!%p142_p9), %s303_s29, 4  ;;  %s491_s30 = int_to_ptr.hbm [resolvable:$true] %s490_s30 }
  0x13   : > { %v420_v0 = vld [vmem:[%s666_s1 + $0x18] sm:$0xff]  ;;  %v419_v1 = vld [vmem:[%s666_s1 + $0x10] sm:$0xff]  ;;  %s676_s26 = smov (!%p166_p10, %s370_s26), 15  ;;  %v418_v2 = vld [vmem:[%s666_s1 + $0x8] sm:$0xff]  ;;  %vm237_vm0 = vcmask 523264   ;;  %s496_s7 = scalar_lea.hbm %s668_s3, 128 }
  0x14   : > { %254 = vmatpush.bf16.msra.mxu0 %v420_v0  ;;  %422 = vmatpush.bf16.msra.mxu1 %v420_v0  ;;  %s371_s4 = sshll.u32 %s676_s26, 2  ;;  %v417_v3 = vld [vmem:[%s666_s1] sm:$0xff]  ;;  %p497_p0 = scmp.lt.s32.totalorder %s491_s30, %s668_s3 }
  0x15   : > { %423 = vmatpush.bf16.msra.mxu2 %v420_v0  ;;  %424 = vmatpush.bf16.msra.mxu3 %v420_v0  ;;  %s169_s9 = scalar_lea.vmem %s665_s0, %s371_s4  ;;  %v475_v8 = vld [vmem:[%s667_s2] ss:$0 sm:$0xff]  ;;  %s492_s4 = scalar_lea.hbm %s491_s30, 64 }
  0x16   : > { %v413_v4 = vld [vmem:[%s169_s9] sm:$0xff]  ;;  %v414_v5 = vld [vmem:[%s169_s9 + $0x8] sm:$0xff]  ;;  %v415_v6 = vld [vmem:[%s169_s9 + $0x10] sm:$0xff]  ;;  %p493_p11 = scmp.ne.s32.totalorder %s491_s30, %s492_s4  ;;  %p498_p1 = scmp.lt.s32.totalorder %s496_s7, %s492_s4 }
  0x17   : > { %v416_v7 = vld [vmem:[%s169_s9 + $0x18] sm:$0xff] }
  0x18   : > { %255 = vmatpush.bf16.msra.mxu0 %v419_v1  ;;  %425 = vmatpush.bf16.msra.mxu1 %v419_v1  ;;  %p494_p12 = pnand %p493_p11, %p600_p5  ;;  %p499_p2 = por %p498_p1, %p497_p0 }
  0x19   : > { %426 = vmatpush.bf16.msra.mxu2 %v419_v1  ;;  %427 = vmatpush.bf16.msra.mxu3 %v419_v1 }
  0x1a   : > { %p495_p13 = pneg %p494_p12 }
  0x1c   : > { %256 = vmatpush.bf16.msra.mxu0 %v418_v2  ;;  %428 = vmatpush.bf16.msra.mxu1 %v418_v2  ;;  %p500_p3 = pnand %p499_p2, %p495_p13 }
  0x1d   : > { %429 = vmatpush.bf16.msra.mxu2 %v418_v2  ;;  %430 = vmatpush.bf16.msra.mxu3 %v418_v2 }
  0x20   : > { %257 = vmatpush.bf16.msra.mxu0 %v417_v3  ;;  %431 = vmatpush.bf16.msra.mxu1 %v417_v3 }
  0x21   : > { %432 = vmatpush.bf16.msra.mxu2 %v417_v3  ;;  %433 = vmatpush.bf16.msra.mxu3 %v417_v3 }
  0x23   : > { %404 = vmatmul.msk.bf16.vlgmr.msra.gmra.mxu0 %vm237_vm0, %v413_v4  ;;  %405 = vmatmul.msk.bf16.vlgmr.msra.gmra.mxu1 %vm237_vm0, %v414_v5 }
  0x24   : > { %406 = vmatmul.msk.bf16.vlgmr.msra.gmra.mxu2 %vm237_vm0, %v415_v6  ;;  %407 = vmatmul.msk.bf16.vlgmr.msra.gmra.mxu3 %vm237_vm0, %v416_v7 }
  0xa0   : > { %v259_v9 = vpop.f32.mrf.mxu0  ;;  %v264_v10 = vpop.f32.mrf.mxu1 }
  0xa1   : > { %v260_v11 = vadd.f32 %v475_v8, %v259_v9  ;;  %v265_v12 = vadd.f32 %v475_v8, %v264_v10 }
  0xa3   : > { %279 = vst [vmem:[%s164_s20] sm:$0xff] %v260_v11 }
  0xa4   : > { %281 = vst [vmem:[%s164_s20 + $0x10] sm:$0xff] %v265_v12 }
  0xa7   : > { %v269_v13 = vpop.f32.mrf.mxu2  ;;  %v274_v14 = vpop.f32.mrf.mxu3 }
  0xa8   : > { %v270_v15 = vadd.f32 %v475_v8, %v269_v13  ;;  %v275_v16 = vadd.f32 %v475_v8, %v274_v14  ;;  %v261_v17 = vpop.f32.mrf.mxu0  ;;  %v266_v18 = vpop.f32.mrf.mxu1 }
  0xa9   : > { %v262_v19 = vadd.f32 %v475_v8, %v261_v17  ;;  %v267_v20 = vadd.f32 %v475_v8, %v266_v18 }
  0xaa   : > { %283 = vst [vmem:[%s164_s20 + $0x20] sm:$0xff] %v270_v15 }
  0xab   : > { %285 = vst [vmem:[%s164_s20 + $0x30] sm:$0xff] %v275_v16 }
  0xac   : > { %280 = vst [vmem:[%s164_s20 + $0x8] sm:$0xff] %v262_v19 }
  0xad   : > { %282 = vst [vmem:[%s164_s20 + $0x18] sm:$0xff] %v267_v20 }
  0xaf   : > { %v271_v21 = vpop.f32.mrf.mxu2  ;;  %v276_v22 = vpop.f32.mrf.mxu3 }
  0xb0   : > { %v272_v23 = vadd.f32 %v475_v8, %v271_v21  ;;  %v277_v24 = vadd.f32 %v475_v8, %v276_v22 }
  0xb2   : > { %284 = vst [vmem:[%s164_s20 + $0x28] sm:$0xff] %v272_v23 }
  0xb3   : > { %286 = vst [vmem:[%s164_s20 + $0x38] sm:$0xff] %v277_v24 }
  0xb4   : > { %503 = shalt.err (!%p500_p3)
}
  0xb5   : > { %s540_s10 = smov 128   ;;  %s541_s11 = smov 8  }
  0xb6   : > { %434 = dma.vmem_to_hbm [thread:$0]  (%p600_p5), %s301_s28, 1024, %s303_s29, %s288_s16, %s540_s10, %s540_s10, %s541_s11  }
  0xb7 PF: > { %p440_p4 = scmp.ge.s32.totalorder %s538_s15, 2  ;;  %s317_s17 = sand.u32 1, %s526_s12  }
  0xb8   : > { %s318_s19 = scalar_lea.sflag [#allocation3], %s317_s17 }
  0xb9   : > { %p437_p7 = pnand %p440_p4, %p604_p6 }
  0xbb   : > { %p438_p8 = pneg %p437_p7 }
  0xbd   : > { %521 = dma.done.wait (%p438_p8), %s318_s19, 1024  }
  0xbe   : > { %523 = vsyncadd (%p438_p8), %s318_s19, 4294966272  ;;  %p13_p9 = scmp.ge.s32.totalorder %s587_s18, 4   ;;  %s671_s12 = smov %s530_s13 }
  0xbf   : > { %s672_s13 = smov %s534_s14  ;;  %s673_s14 = smov %s598_s21 }
  0xc0   : > { %s674_s15 = smov %s587_s18  ;;  %15 = sbr.rel (!%p13_p9) target bundleno = 3 (0x3), region = 67 }
  0xc5   :  { %324 = vsyncpa [#allocation3], 1 }
  0xc6   :  { %326 = vsyncpa [#allocation3 + $0x1], 1 }

// kernel: yolo_v2_netv2_pallas.13
= control target key start
LH: loop header
LB: loop body
LE: loop exit
PB: predicated region body
PF: predicated region fallthrough
CT: control target
= control target key end

     0   :  { %s2528_s18 = smov 0   ;;  %s3179_s0 = inlined_call_operand.vmem [shape: bf16[2,8,8,32], index: 0, kind: input, shape index: {}]   ;;  %s3180_s1 = inlined_call_operand.vmem [shape: bf16[32,32], index: 1, kind: input, shape index: {}]   ;;  %s3181_s2 = inlined_call_operand.vmem [shape: f32[1,32], index: 2, kind: input, shape index: {}]   ;;  %s3182_s3 = inlined_call_operand.vmem [shape: bf16[9,32,32], index: 3, kind: input, shape index: {}]   ;;  %s3183_s4 = inlined_call_operand.vmem [shape: f32[1,32], index: 4, kind: input, shape index: {}]   ;;  %s3184_s5 = inlined_call_operand.vmem [shape: bf16[2,8,8,32], index: 5, kind: output, shape index: {}]  }
   0x1 LB: > { %s2245_s19 = sadd.s32 4294967295, %s2495_s18   ;;  %p2249_p0 = scmp.ge.s32.totalorder %s2495_s18, 1  ;;  %s2495_s18 = sphi %s2528_s18, %s15_s18  }
   0x2   : > { %p187_p1 = scmp.lt.s32.totalorder %s2495_s18, 3 }
   0x4   : > { %p188_p2 = pnand %p2249_p0, %p187_p1 }
   0x5   : > { %p215_p3 = scmp.lt.s32.totalorder (!%p188_p2), %s2245_s19, 1 }
   0x6   : > { %191 = sbr.rel (%p188_p2) target bundleno = 518 (0x206), region = 40 }
   0xb   : > { %v2455_v0 = vld [vmem:[%s3180_s1 + $0x8] sm:$0xff]  ;;  %v2454_v1 = vld [vmem:[%s3180_s1] sm:$0xff]  ;;  %s3192_s19 = smov (!%p215_p3, %s2245_s19), 1  ;;  %vm303_vm0 = vcmask 261120   ;;  %vm233_vm1 = vcmask 253952   ;;  %vm226_vm2 = vcmask 257024  }
   0xc   : > { %322 = vmatpush.bf16.msra.mxu0 %v2455_v0  ;;  %2474 = vmatpush.bf16.msra.mxu2 %v2455_v0  ;;  %s2448_s24 = sshll.u32 %s3192_s19, 5  ;;  %v2497_v6 = vmov 0   ;;  %vm228_vm3 = vcmask 254976   ;;  %vm244_vm4 = vcmask 254977   ;;  %v2459_v7 = vld [vmem:[%s3182_s3 + $0x18] sm:$0xff]  ;;  %v2458_v8 = vld [vmem:[%s3182_s3 + $0x10] sm:$0xff] }
   0xd   : > { %s219_s27 = scalar_lea.vmem %s3179_s0, %s2448_s24  ;;  %227 = vst.msk [vmem:[#allocation2] sm:$0xf] %vm226_vm2, %v2497_v6  ;;  %676 = vmatpush.bf16.msra.mxu1 %v2459_v7  ;;  %2476 = vmatpush.bf16.msra.mxu3 %v2459_v7  ;;  %v2457_v9 = vld [vmem:[%s3182_s3 + $0x8] sm:$0xff]  ;;  %v2456_v10 = vld [vmem:[%s3182_s3] sm:$0xff]  ;;  %v2463_v16 = vld [vmem:[%s3182_s3 + $0x38] sm:$0xff]  ;;  %vm418_vm6 = vcmask 257025   ;;  %s3128_s26 = scalar_lea.vmem %s3184_s5, %s2448_s24 }
   0xe   : > { %v2450_v2 = vld [vmem:[%s219_s27] sm:$0xff]  ;;  %v2452_v3 = vld [vmem:[%s219_s27 + $0x10] sm:$0xff]  ;;  %v2451_v4 = vld [vmem:[%s219_s27 + $0x8] sm:$0xff]  ;;  %234 = vst.msk [vmem:[#allocation2] sm:$0x1] %vm233_vm1, %v2497_v6  ;;  %vm594_vm8 = vcmask 1042432  }
   0xf   : > { %v2453_v5 = vld [vmem:[%s219_s27 + $0x18] sm:$0xff]  ;;  %229 = vst.msk [vmem:[#allocation2 + $0x4] sm:$0x3] %vm228_vm3, %v2497_v6  ;;  %v2586_v11 = vld [vmem:[%s3181_s2] ss:$0 sm:$0xff]  ;;  %v2462_v23 = vld [vmem:[%s3182_s3 + $0x30] sm:$0xff] }
  0x10   : > { %323 = vmatpush.bf16.msra.mxu0 %v2454_v1  ;;  %2475 = vmatpush.bf16.msra.mxu2 %v2454_v1  ;;  %245 = vst.msk [vmem:[#allocation2 + $0x4] sm:$0x2] %vm244_vm4, %v2497_v6  ;;  %vm595_vm9 = vcmask 1046532   ;;  %vm451_vm12 = vsmask.f32 3328 }
  0x11   : > { %231 = vst.msk [vmem:[#allocation2 + $0x48] sm:$0xf] %vm226_vm2, %v2497_v6  ;;  %677 = vmatpush.bf16.msra.mxu1 %v2458_v8  ;;  %2477 = vmatpush.bf16.msra.mxu3 %v2458_v8  ;;  %vm2604_vm11 = vmor %vm594_vm8, %vm595_vm9  ;;  %vm452_vm13 = vsmask.f32 7440 }
  0x12   : > { %232 = vst.msk [vmem:[#allocation2 + $0x4c] sm:$0x3] %vm228_vm3, %v2497_v6  ;;  %vm2620_vm15 = vmor %vm451_vm12, %vm452_vm13 }
  0x13   : > { %2278 = vmatmul.msk.bf16.vlgmr.msra.gmra.mxu0 %vm303_vm0, %v2450_v2  ;;  %2280 = vmatmul.msk.bf16.vlgmr.msra.gmra.mxu2 %vm303_vm0, %v2452_v3  ;;  %235 = vst.msk [vmem:[#allocation2 + $0x8] sm:$0x1] %vm233_vm1, %v2497_v6 }
  0x14   : > { %236 = vst.msk [vmem:[#allocation2 + $0x10] sm:$0x1] %vm233_vm1, %v2497_v6  ;;  %741 = vmatpush.bf16.msrb.mxu2 %v2457_v9  ;;  %1172 = vmatpush.bf16.msrb.mxu0 %v2463_v16  ;;  %v570_v34 = vld [vmem:[#allocation2] sm:$0xe] }
  0x15   : > { %237 = vst.msk [vmem:[#allocation2 + $0x18] sm:$0x1] %vm233_vm1, %v2497_v6  ;;  %v435_v14 = vld [vmem:[#allocation2] sm:$0xf]  ;;  %v2282_v37 = vrot.slane %v570_v34, 9  ;;  %v776_v45 = vshrl.u32 %v570_v34, 16 }
  0x16   : > { %238 = vst.msk [vmem:[#allocation2 + $0x20] sm:$0x1] %vm233_vm1, %v2497_v6  ;;  %v455_v17 = vshrl.u32 %v435_v14, 16  ;;  %v458_v19 = vshll.u32 %v435_v14, 16  ;;  %v436_v29 = vld [vmem:[#allocation2 + $0x4] sm:$0x1] }
  0x17   : > { %239 = vst.msk [vmem:[#allocation2 + $0x28] sm:$0x1] %vm233_vm1, %v2497_v6  ;;  %v464_v36 = vshll.u32 %v436_v29, 16  ;;  %v599_v38 = vrot.slane %v436_v29, 5  ;;  %v779_v46 = vshll.u32 %v570_v34, 16  ;;  %v2614_v58 = vrot.slane %v776_v45, 5 }
  0x18   : > { %240 = vst.msk [vmem:[#allocation2 + $0x30] sm:$0x1] %vm233_vm1, %v2497_v6  ;;  %742 = vmatpush.bf16.msrb.mxu2 %v2456_v10  ;;  %v457_v26 = vrot.slane %v455_v17, 4  ;;  %v460_v30 = vrot.slane %v458_v19, 5  ;;  %1173 = vmatpush.bf16.msrb.mxu0 %v2462_v23  ;;  %v2465_v23 = vld [vmem:[%s3182_s3 + $0x48] sm:$0xff] }
  0x19   : > { %241 = vst.msk [vmem:[#allocation2 + $0x38] sm:$0x1] %vm233_vm1, %v2497_v6  ;;  %v466_v51 = vrot.slane %v464_v36, 5  ;;  %v600_v52 = vsel %vm2604_vm11, %v2282_v37, %v599_v38  ;;  %v2616_v59 = vrot.slane %v779_v46, 6  ;;  %1306 = vmatpush.bf16.msrb.mxu1 %v2465_v23 }
  0x1a   : > { %242 = vst.msk [vmem:[#allocation2 + $0x40] sm:$0x1] %vm233_vm1, %v2497_v6  ;;  %v461_v41 = vor.u32 %v460_v30, %v457_v26 }
  0x1b   : > { %246 = vst.msk [vmem:[#allocation2 + $0xc] sm:$0x2] %vm244_vm4, %v2497_v6 }
  0x1c   : > { %247 = vst.msk [vmem:[#allocation2 + $0x14] sm:$0x2] %vm244_vm4, %v2497_v6  ;;  %v462_v56 = vrot.slane %v461_v41, 4 }
  0x1d   : > { %248 = vst.msk [vmem:[#allocation2 + $0x1c] sm:$0x2] %vm244_vm4, %v2497_v6 }
  0x1e   : > { %249 = vst.msk [vmem:[#allocation2 + $0x24] sm:$0x2] %vm244_vm4, %v2497_v6  ;;  %v467_v10 = vsel %vm2620_vm15, %v462_v56, %v466_v51  ;;  %v2464_v56 = vld [vmem:[%s3182_s3 + $0x40] sm:$0xff] }
  0x1f   : > { %250 = vst.msk [vmem:[#allocation2 + $0x2c] sm:$0x2] %vm244_vm4, %v2497_v6  ;;  %v699_v36 = vunpack.c.l.b16 %v467_v10  ;;  %1307 = vmatpush.bf16.msrb.mxu1 %v2464_v56  ;;  %v782_v56 = vor.u32 %v2616_v59, %v2614_v58 }
  0x20   : > { %251 = vst.msk [vmem:[#allocation2 + $0x34] sm:$0x2] %vm244_vm4, %v2497_v6 }
  0x21   : > { %252 = vst.msk [vmem:[#allocation2 + $0x3c] sm:$0x2] %vm244_vm4, %v2497_v6 }
  0x22   : > { %253 = vst.msk [vmem:[#allocation2 + $0x44] sm:$0x2] %vm244_vm4, %v2497_v6 }
  0x23   : > { %2279 = vmatmul.msk.bf16.gmra.mxu0 %vm303_vm0, %v2451_v4  ;;  %2281 = vmatmul.msk.bf16.gmra.mxu2 %vm303_vm0, %v2453_v5  ;;  %243 = vst.msk [vmem:[#allocation2 + $0x48] sm:$0x1] %vm233_vm1, %v2497_v6  ;;  %v634_v4 = vunpack.c.l.b16 %v600_v52 }
  0x24   : > { %254 = vst.msk [vmem:[#allocation2 + $0x4c] sm:$0x2] %vm244_vm4, %v2497_v6 }
  0x90   : > { %v325_v12 = vpop.f32.mrf.mxu0 }
  0x91   : > { %v326_v13 = vadd.f32 %v2586_v11, %v325_v12 }
  0x93   : > { %vm345_vm5 = vcmp.ge.f32.partialorder %v326_v13, 0.0  ;;  %v353_v15 = vmul.f32 0.1, %v326_v13 }
  0x95   : > { %v361_v18 = vsel %vm345_vm5, %v326_v13, %v353_v15 }
  0x96   : > { %v369_v20 = vpack.c.bf16 %v361_v18, %v361_v18  ;;  %v335_v21 = vpop.f32.mrf.mxu2  ;;  %v2461_v18 = vld [vmem:[%s3182_s3 + $0x28] sm:$0xff] }
  0x97   : > { %v336_v22 = vadd.f32 %v2586_v11, %v335_v21  ;;  %966 = vmatpush.bf16.msrb.mxu3 %v2461_v18 }
  0x98   : > { %v385_v24 = vrot.slane %v369_v20, 7  ;;  %v327_v25 = vpop.f32.mrf.mxu0 }
  0x99   : > { %vm349_vm7 = vcmp.ge.f32.partialorder %v336_v22, 0.0  ;;  %v357_v27 = vmul.f32 0.1, %v336_v22  ;;  %v328_v28 = vadd.f32 %v2586_v11, %v327_v25 }
  0x9a   : > { %v386_v31 = vrot.slane %v385_v24, 4  ;;  %419 = vst.msk [vmem:[#allocation2 + $0x8] sm:$0xe] %vm418_vm6, %v385_v24 }
  0x9b   : > { %v365_v32 = vsel %vm349_vm7, %v336_v22, %v357_v27  ;;  %vm346_vm10 = vcmp.ge.f32.partialorder %v328_v28, 0.0  ;;  %v354_v33 = vmul.f32 0.1, %v328_v28 }
  0x9c   : > { %420 = vst.msk [vmem:[#allocation2 + $0xc] sm:$0x1] %vm233_vm1, %v386_v31  ;;  %v373_v35 = vpack.c.bf16 %v365_v32, %v365_v32 }
  0x9d   : > { %v362_v39 = vsel %vm346_vm10, %v328_v28, %v354_v33 }
  0x9e   : > { %v393_v42 = vrot.slane %v373_v35, 7  ;;  %v370_v43 = vpack.c.bf16 %v362_v39, %v362_v39  ;;  %v337_v44 = vpop.f32.mrf.mxu2 }
  0x9f   : > { %v338_v47 = vadd.f32 %v2586_v11, %v337_v44 }
  0xa0   : > { %v394_v48 = vrot.slane %v393_v42, 4  ;;  %427 = vst.msk [vmem:[#allocation2 + $0x28] sm:$0xe] %vm418_vm6, %v393_v42  ;;  %v387_v49 = vrot.slane %v370_v43, 7  ;;  %v330_v50 = vpop.f32.mrf.mxu0 }
  0xa1   : > { %vm350_vm14 = vcmp.ge.f32.partialorder %v338_v47, 0.0  ;;  %v358_v53 = vmul.f32 0.1, %v338_v47  ;;  %v331_v54 = vadd.f32 %v2586_v11, %v330_v50  ;;  %v571_v55 = vld [vmem:[#allocation2 + $0x8] sm:$0xe] }
  0xa2   : > { %428 = vst.msk [vmem:[#allocation2 + $0x2c] sm:$0x1] %vm233_vm1, %v394_v48  ;;  %v388_v57 = vrot.slane %v387_v49, 4  ;;  %v794_v60 = vshrl.u32 %v571_v55, 16  ;;  %v797_v0 = vshll.u32 %v571_v55, 16  ;;  %v2283_v3 = vrot.slane %v571_v55, 9 }
  0xa3   : > { %421 = vst.msk [vmem:[#allocation2 + $0x10] sm:$0xe] %vm418_vm6, %v387_v49  ;;  %v366_v62 = vsel %vm350_vm14, %v338_v47, %v358_v53  ;;  %vm347_vm3 = vcmp.ge.f32.partialorder %v331_v54, 0.0  ;;  %v355_v63 = vmul.f32 0.1, %v331_v54 }
  0xa4   : > { %422 = vst.msk [vmem:[#allocation2 + $0x14] sm:$0x1] %vm233_vm1, %v388_v57  ;;  %v374_v1 = vpack.c.bf16 %v366_v62, %v366_v62  ;;  %v438_v2 = vld [vmem:[#allocation2 + $0xc] sm:$0x1]  ;;  %v2626_v5 = vrot.slane %v794_v60, 5  ;;  %v2636_v21 = vrot.slane %v797_v0, 6 }
  0xa5   : > { %v363_v6 = vsel %vm347_vm3, %v331_v54, %v355_v63  ;;  %v478_v7 = vshll.u32 %v438_v2, 16  ;;  %v603_v8 = vrot.slane %v438_v2, 5  ;;  %v437_v9 = vld [vmem:[#allocation2 + $0x8] sm:$0xf]  ;;  %v2643_v32 = vld [vmem:[#allocation2 + $0xc] sm:$0x1] }
  0xa6   : > { %v997_v12 = vld [vmem:[#allocation2 + $0x8] sm:$0xf]  ;;  %v395_v13 = vrot.slane %v374_v1, 7  ;;  %v371_v14 = vpack.c.bf16 %v363_v6, %v363_v6  ;;  %v340_v15 = vpop.f32.mrf.mxu2  ;;  %v469_v16 = vshrl.u32 %v437_v9, 16  ;;  %v472_v17 = vshll.u32 %v437_v9, 16 }
  0xa7   : > { %v341_v19 = vadd.f32 %v2586_v11, %v340_v15  ;;  %v604_v20 = vsel %vm2604_vm11, %v2283_v3, %v603_v8  ;;  %v1014_v22 = vshrl.u32 %v997_v12, 16  ;;  %v480_v34 = vrot.slane %v478_v7, 5 }
  0xa8   : > { %v396_v24 = vrot.slane %v395_v13, 4  ;;  %429 = vst.msk [vmem:[#allocation2 + $0x30] sm:$0xe] %vm418_vm6, %v395_v13  ;;  %v389_v25 = vrot.slane %v371_v14, 7  ;;  %v332_v26 = vpop.f32.mrf.mxu0  ;;  %v635_v27 = vunpack.c.l.b16 %v604_v20  ;;  %v471_v28 = vrot.slane %v469_v16, 4 }
  0xa9   : > { %vm351_vm4 = vcmp.ge.f32.partialorder %v341_v19, 0.0  ;;  %v359_v29 = vmul.f32 0.1, %v341_v19  ;;  %v333_v30 = vadd.f32 %v2586_v11, %v332_v26  ;;  %v474_v31 = vrot.slane %v472_v17, 5 }
  0xaa   : > { %430 = vst.msk [vmem:[#allocation2 + $0x34] sm:$0x1] %vm233_vm1, %v396_v24  ;;  %v390_v33 = vrot.slane %v389_v25, 4  ;;  %v642_v35 = vpack.c.b16 %v635_v27, %v634_v4  ;;  %v999_v37 = vld [vmem:[#allocation2 + $0x10] sm:$0xf]  ;;  %v1016_v43 = vrot.slane %v1014_v22, 4 }
  0xab   : > { %423 = vst.msk [vmem:[#allocation2 + $0x18] sm:$0xe] %vm418_vm6, %v389_v25  ;;  %v367_v38 = vsel %vm351_vm4, %v341_v19, %v359_v29  ;;  %vm348_vm5 = vcmp.ge.f32.partialorder %v333_v30, 0.0  ;;  %v356_v39 = vmul.f32 0.1, %v333_v30  ;;  %v475_v41 = vor.u32 %v474_v31, %v471_v28 }
  0xac   : > { %424 = vst.msk [vmem:[#allocation2 + $0x1c] sm:$0x1] %vm233_vm1, %v390_v33  ;;  %v375_v42 = vpack.c.bf16 %v367_v38, %v367_v38  ;;  %2302 = vmatmul.msk.bf16.vlgmr.msra.gmra.mxu1 %vm303_vm0, %v642_v35  ;;  %v1017_v44 = vshll.u32 %v997_v12, 16  ;;  %v1023_v45 = vshll.u32 %v2643_v32, 16  ;;  %v1028_v48 = vshrl.u32 %v999_v37, 16 }
  0xad   : > { %v364_v46 = vsel %vm348_vm5, %v333_v30, %v356_v39  ;;  %v476_v47 = vrot.slane %v475_v41, 4  ;;  %v1031_v49 = vshll.u32 %v999_v37, 16  ;;  %v2650_v53 = vld [vmem:[#allocation2 + $0x14] sm:$0x1]  ;;  %v2659_v6 = vld [vmem:[#allocation2 + $0x10] sm:$0xe] }
  0xae   : > { %v397_v50 = vrot.slane %v375_v42, 7  ;;  %v372_v51 = vpack.c.bf16 %v364_v46, %v364_v46  ;;  %v342_v52 = vpop.f32.mrf.mxu2  ;;  %v1019_v54 = vrot.slane %v1017_v44, 5  ;;  %v1025_v55 = vrot.slane %v1023_v45, 5  ;;  %v440_v0 = vld [vmem:[#allocation2 + $0x14] sm:$0x1] }
  0xaf   : > { %v481_v57 = vsel %vm2620_vm15, %v476_v47, %v480_v34  ;;  %v343_v60 = vadd.f32 %v2586_v11, %v342_v52  ;;  %v1030_v62 = vrot.slane %v1028_v48, 4  ;;  %v1033_v63 = vrot.slane %v1031_v49, 5  ;;  %v439_v10 = vld [vmem:[#allocation2 + $0x10] sm:$0xf]  ;;  %v2678_v38 = vld [vmem:[#allocation2 + $0x2c] sm:$0x1] }
  0xb0   : > { %v398_v1 = vrot.slane %v397_v50, 4  ;;  %431 = vst.msk [vmem:[#allocation2 + $0x38] sm:$0xe] %vm418_vm6, %v397_v50  ;;  %v391_v2 = vrot.slane %v372_v51, 7  ;;  %v700_v3 = vunpack.c.l.b16 %v481_v57  ;;  %v1020_v4 = vor.u32 %v1019_v54, %v1016_v43  ;;  %v2680_v39 = vld [vmem:[#allocation2 + $0x28] sm:$0xe] }
  0xb1   : > { %vm352_vm7 = vcmp.ge.f32.partialorder %v343_v60, 0.0  ;;  %v360_v7 = vmul.f32 0.1, %v343_v60  ;;  %v1034_v8 = vor.u32 %v1033_v63, %v1030_v62  ;;  %v1037_v9 = vshll.u32 %v2650_v53, 16 }
  0xb2   : > { %432 = vst.msk [vmem:[#allocation2 + $0x3c] sm:$0x1] %vm233_vm1, %v398_v1  ;;  %v392_v11 = vrot.slane %v391_v2, 4  ;;  %v707_v12 = vpack.c.b16 %v700_v3, %v699_v36  ;;  %v1021_v13 = vrot.slane %v1020_v4, 4  ;;  %v2663_v14 = vld [vmem:[#allocation2 + $0x18] sm:$0xe] }
  0xb3   : > { %425 = vst.msk [vmem:[#allocation2 + $0x20] sm:$0xe] %vm418_vm6, %v391_v2  ;;  %v368_v15 = vsel %vm352_vm7, %v343_v60, %v360_v7  ;;  %v1035_v16 = vrot.slane %v1034_v8, 4  ;;  %v1039_v17 = vrot.slane %v1037_v9, 5  ;;  %v442_v18 = vld [vmem:[#allocation2 + $0x1c] sm:$0x1] }
  0xb4   : > { %426 = vst.msk [vmem:[#allocation2 + $0x24] sm:$0x1] %vm233_vm1, %v392_v11  ;;  %2314 = vmatmul.msk.bf16.vlgmr.msrb.gmra.mxu2 %vm303_vm0, %v707_v12  ;;  %v376_v19 = vpack.c.bf16 %v368_v15, %v368_v15  ;;  %v1026_v20 = vsel %vm2620_vm15, %v1021_v13, %v1025_v55  ;;  %v2284_v22 = vrot.slane %v2659_v6, 9  ;;  %v607_v23 = vrot.slane %v440_v0, 5  ;;  %v441_v31 = vld [vmem:[#allocation2 + $0x18] sm:$0xf] }
  0xb5   : > { %v1040_v24 = vsel %vm2620_vm15, %v1035_v16, %v1039_v17  ;;  %v1130_v25 = vunpack.c.l.b16 %v1026_v20  ;;  %v2285_v26 = vrot.slane %v2663_v14, 9  ;;  %v611_v27 = vrot.slane %v442_v18, 5  ;;  %v1001_v45 = vld [vmem:[#allocation2 + $0x18] sm:$0xf]  ;;  %v2683_v50 = vld [vmem:[#allocation2 + $0x1c] sm:$0x1] }
  0xb6   : > { %v399_v28 = vrot.slane %v376_v19, 7  ;;  %v1131_v29 = vunpack.c.l.b16 %v1040_v24  ;;  %v608_v30 = vsel %vm2604_vm11, %v2284_v22, %v607_v23  ;;  %v483_v33 = vshrl.u32 %v439_v10, 16  ;;  %v2460_v1 = vld [vmem:[%s3182_s3 + $0x20] sm:$0xff]  ;;  %v1203_v24 = vld [vmem:[#allocation2 + $0x8] sm:$0xe] }
  0xb7   : > { %v612_v34 = vsel %vm2604_vm11, %v2285_v26, %v611_v27  ;;  %v636_v35 = vunpack.c.l.b16 %v608_v30  ;;  %v486_v36 = vshll.u32 %v439_v10, 16  ;;  %v492_v37 = vshll.u32 %v440_v0, 16  ;;  %967 = vmatpush.bf16.msrb.mxu3 %v2460_v1  ;;  %v445_v1 = vld [vmem:[#allocation2 + $0x28] sm:$0xf] }
  0xb8   : > { %v400_v41 = vrot.slane %v399_v28, 4  ;;  %433 = vst.msk [vmem:[#allocation2 + $0x40] sm:$0xe] %vm418_vm6, %v399_v28  ;;  %v1138_v42 = vpack.c.b16 %v1131_v29, %v1130_v25  ;;  %v637_v43 = vunpack.c.l.b16 %v612_v34  ;;  %v485_v44 = vrot.slane %v483_v33, 4  ;;  %v1204_v29 = vld [vmem:[#allocation2 + $0x10] sm:$0xe] }
  0xb9   : > { %v488_v46 = vrot.slane %v486_v36, 5  ;;  %v494_v47 = vrot.slane %v492_v37, 5  ;;  %v497_v48 = vshrl.u32 %v441_v31, 16  ;;  %v500_v49 = vshll.u32 %v441_v31, 16 }
  0xba   : > { %434 = vst.msk [vmem:[#allocation2 + $0x44] sm:$0x1] %vm233_vm1, %v400_v41  ;;  %2346 = vmatmul.msk.bf16.vlgmr.msrb.gmra.mxu0 %vm303_vm0, %v1138_v42  ;;  %v643_v51 = vpack.c.b16 %v637_v43, %v636_v35  ;;  %v506_v52 = vshll.u32 %v442_v18, 16  ;;  %v2687_v54 = vld [vmem:[#allocation2 + $0x20] sm:$0xe]  ;;  %v2287_v55 = vrot.slane %v2680_v39, 9 }
  0xbb   : > { %v489_v57 = vor.u32 %v488_v46, %v485_v44  ;;  %v499_v60 = vrot.slane %v497_v48, 4  ;;  %v502_v62 = vrot.slane %v500_v49, 5  ;;  %v2692_v63 = vld [vmem:[#allocation2 + $0x24] sm:$0x1]  ;;  %v2286_v0 = vrot.slane %v2687_v54, 9 }
  0xbc   : > { %2303 = vmatmul.msk.bf16.gmra.mxu1 %vm303_vm0, %v643_v51  ;;  %v508_v2 = vrot.slane %v506_v52, 5  ;;  %v615_v3 = vrot.slane %v2692_v63, 5  ;;  %v619_v4 = vrot.slane %v2678_v38, 5  ;;  %v1003_v7 = vld [vmem:[#allocation2 + $0x20] sm:$0xf]  ;;  %v1042_v8 = vshrl.u32 %v1001_v45, 16 }
  0xbd   : > { %v490_v9 = vrot.slane %v489_v57, 4  ;;  %v503_v10 = vor.u32 %v502_v62, %v499_v60  ;;  %v1045_v11 = vshll.u32 %v1001_v45, 16  ;;  %v1051_v12 = vshll.u32 %v2683_v50, 16  ;;  %v2706_v16 = vld [vmem:[#allocation2 + $0x24] sm:$0x1] }
  0xbe   : > { %v616_v13 = vsel %vm2604_vm11, %v2286_v0, %v615_v3  ;;  %v620_v15 = vsel %vm2604_vm11, %v2287_v55, %v619_v4  ;;  %v1044_v17 = vrot.slane %v1042_v8, 4  ;;  %v1056_v18 = vshrl.u32 %v1003_v7, 16  ;;  %v2727_v8 = vld [vmem:[#allocation2 + $0x34] sm:$0x1] }
  0xbf   : > { %v495_v19 = vsel %vm2620_vm15, %v490_v9, %v494_v47  ;;  %v504_v20 = vrot.slane %v503_v10, 4  ;;  %v638_v22 = vunpack.c.l.b16 %v616_v13  ;;  %v639_v23 = vunpack.c.l.b16 %v620_v15  ;;  %v2467_v9 = vld [vmem:[%s3182_s3 + $0x58] sm:$0xff]  ;;  %v2734_v15 = vld [vmem:[#allocation2 + $0x30] sm:$0xe]  ;;  %v1011_v58 = vld [vmem:[#allocation2 + $0x40] sm:$0xf] }
  0xc0   : > { %v701_v25 = vunpack.c.l.b16 %v495_v19  ;;  %v1047_v26 = vrot.slane %v1045_v11, 5  ;;  %v1053_v27 = vrot.slane %v1051_v12, 5  ;;  %v1058_v28 = vrot.slane %v1056_v18, 4  ;;  %1536 = vmatpush.bf16.msra.mxu2 %v2467_v9 }
  0xc1   : > { %v509_v30 = vsel %vm2620_vm15, %v504_v20, %v508_v2  ;;  %v644_v31 = vpack.c.b16 %v639_v23, %v638_v22  ;;  %v1059_v33 = vshll.u32 %v1003_v7, 16  ;;  %v1065_v34 = vshll.u32 %v2706_v16, 16  ;;  %v2741_v22 = vld [vmem:[#allocation2 + $0x3c] sm:$0x1]  ;;  %v2469_v23 = vld [vmem:[%s3182_s3 + $0x68] sm:$0xff] }
  0xc2   : > { %v702_v35 = vunpack.c.l.b16 %v509_v30  ;;  %v1048_v36 = vor.u32 %v1047_v26, %v1044_v17  ;;  %v2350_v37 = vrot.slane %v1203_v24, 9  ;;  %v1229_v41 = vrot.slane %v2643_v32, 5  ;;  %v443_v32 = vld [vmem:[#allocation2 + $0x20] sm:$0xf] }
  0xc3   : > { %2304 = vmatmul.msk.bf16.vlgmr.msra.gmra.mxu3 %vm303_vm0, %v644_v31  ;;  %v1061_v42 = vrot.slane %v1059_v33, 5  ;;  %v1067_v43 = vrot.slane %v1065_v34, 5  ;;  %v2351_v44 = vrot.slane %v1204_v29, 9  ;;  %v1233_v45 = vrot.slane %v2650_v53, 5 }
  0xc4   : > { %v708_v46 = vpack.c.b16 %v702_v35, %v701_v25  ;;  %v1049_v47 = vrot.slane %v1048_v36, 4  ;;  %v1230_v48 = vsel %vm2604_vm11, %v2350_v37, %v1229_v41  ;;  %v1346_v49 = vshrl.u32 %v1203_v24, 16  ;;  %1743 = vmatpush.bf16.msra.mxu3 %v2469_v23  ;;  %v2749_v36 = vld [vmem:[#allocation2 + $0x38] sm:$0xe] }
  0xc5   : > { %v1062_v51 = vor.u32 %v1061_v42, %v1058_v28  ;;  %v1234_v52 = vsel %vm2604_vm11, %v2351_v44, %v1233_v45  ;;  %v1264_v55 = vunpack.c.l.b16 %v1230_v48  ;;  %v1349_v57 = vshll.u32 %v1203_v24, 16  ;;  %v1005_v28 = vld [vmem:[#allocation2 + $0x28] sm:$0xf]  ;;  %v1007_v48 = vld [vmem:[#allocation2 + $0x30] sm:$0xf] }
  0xc6   : > { %2315 = vmatmul.msk.bf16.gmra.mxu2 %vm303_vm0, %v708_v46  ;;  %v1054_v60 = vsel %vm2620_vm15, %v1049_v47, %v1053_v27  ;;  %v1265_v62 = vunpack.c.l.b16 %v1234_v52  ;;  %v2723_v53 = vrot.slane %v1346_v49, 5  ;;  %v1364_v0 = vshrl.u32 %v1204_v29, 16  ;;  %v2757_v47 = vld [vmem:[#allocation2 + $0x2c] sm:$0x1] }
  0xc7   : > { %v1063_v2 = vrot.slane %v1062_v51, 4  ;;  %v1132_v3 = vunpack.c.l.b16 %v1054_v60  ;;  %v2725_v4 = vrot.slane %v1349_v57, 6  ;;  %v1367_v7 = vshll.u32 %v1204_v29, 16 }
  0xc8   : > { %v1272_v10 = vpack.c.b16 %v1265_v62, %v1264_v55  ;;  %v2732_v11 = vrot.slane %v1364_v0, 5  ;;  %v511_v12 = vshrl.u32 %v443_v32, 16  ;;  %v514_v13 = vshll.u32 %v443_v32, 16  ;;  %v2762_v32 = vld [vmem:[#allocation2 + $0x18] sm:$0xe] }
  0xc9   : > { %v1068_v17 = vsel %vm2620_vm15, %v1063_v2, %v1067_v43  ;;  %v2738_v18 = vrot.slane %v1367_v7, 6  ;;  %v520_v19 = vshll.u32 %v2692_v63, 16  ;;  %v525_v20 = vshrl.u32 %v445_v1, 16 }
  0xca   : > { %v1133_v24 = vunpack.c.l.b16 %v1068_v17  ;;  %v513_v25 = vrot.slane %v511_v12, 4  ;;  %v516_v26 = vrot.slane %v514_v13, 5  ;;  %v528_v27 = vshll.u32 %v445_v1, 16  ;;  %v2766_v1 = vld [vmem:[#allocation2 + $0x34] sm:$0x1]  ;;  %v2471_v13 = vld [vmem:[%s3182_s3 + $0x78] sm:$0xff] }
  0xcb   : > { %v522_v29 = vrot.slane %v520_v19, 5  ;;  %v527_v30 = vrot.slane %v525_v20, 4  ;;  %v534_v31 = vshll.u32 %v2678_v38, 16  ;;  %v2288_v33 = vrot.slane %v2734_v15, 9  ;;  %v2466_v17 = vld [vmem:[%s3182_s3 + $0x50] sm:$0xff]  ;;  %v2473_v19 = vld [vmem:[%s3182_s3 + $0x88] sm:$0xff]  ;;  %1877 = vmatpush.bf16.msra.mxu0 %v2471_v13 }
  0xcc   : > { %v1139_v63 = vpack.c.b16 %v1133_v24, %v1132_v3  ;;  %2370 = vmatmul.msk.bf16.vlgmr.msrb.gmra.mxu1 %vm303_vm0, %v1272_v10  ;;  %v517_v34 = vor.u32 %v516_v26, %v513_v25  ;;  %v530_v35 = vrot.slane %v528_v27, 5  ;;  %v623_v37 = vrot.slane %v2727_v8, 5  ;;  %v2768_v3 = vld [vmem:[#allocation2 + $0x20] sm:$0xe]  ;;  %v447_v26 = vld [vmem:[#allocation2 + $0x30] sm:$0xf]  ;;  %1537 = vmatpush.bf16.msra.mxu2 %v2466_v17 }
  0xcd   : > { %v536_v41 = vrot.slane %v534_v31, 5  ;;  %v2289_v42 = vrot.slane %v2749_v36, 9  ;;  %v627_v43 = vrot.slane %v2741_v22, 5  ;;  %v1070_v44 = vshrl.u32 %v1005_v28, 16  ;;  %2107 = vmatpush.bf16.msra.mxu1 %v2473_v19  ;;  %v1009_v13 = vld [vmem:[#allocation2 + $0x38] sm:$0xf] }
  0xce   : > { %2347 = vmatmul.msk.bf16.gmra.mxu0 %vm303_vm0, %v1139_v63  ;;  %v518_v38 = vrot.slane %v517_v34, 4  ;;  %v531_v45 = vor.u32 %v530_v35, %v527_v30  ;;  %v624_v46 = vsel %vm2604_vm11, %v2288_v33, %v623_v37  ;;  %v1073_v49 = vshll.u32 %v1005_v28, 16 }
  0xcf   : > { %v628_v51 = vsel %vm2604_vm11, %v2289_v42, %v627_v43  ;;  %v640_v52 = vunpack.c.l.b16 %v624_v46  ;;  %v1072_v55 = vrot.slane %v1070_v44, 4  ;;  %v1079_v57 = vshll.u32 %v2757_v47, 16 }
  0xd0   : > { %v523_v60 = vsel %vm2620_vm15, %v518_v38, %v522_v29  ;;  %v532_v62 = vrot.slane %v531_v45, 4  ;;  %v641_v0 = vunpack.c.l.b16 %v628_v51  ;;  %v1075_v2 = vrot.slane %v1073_v49, 5  ;;  %v449_v38 = vld [vmem:[#allocation2 + $0x38] sm:$0xf] }
  0xd1   : > { %v703_v7 = vunpack.c.l.b16 %v523_v60  ;;  %v1081_v9 = vrot.slane %v1079_v57, 5  ;;  %v1084_v10 = vshrl.u32 %v1007_v48, 16  ;;  %v1087_v12 = vshll.u32 %v1007_v48, 16 }
  0xd2   : > { %v537_v20 = vsel %vm2620_vm15, %v532_v62, %v536_v41  ;;  %v645_v23 = vpack.c.b16 %v641_v0, %v640_v52  ;;  %v1076_v24 = vor.u32 %v1075_v2, %v1072_v55  ;;  %v1093_v25 = vshll.u32 %v2766_v1, 16 }
  0xd3   : > { %v704_v27 = vunpack.c.l.b16 %v537_v20  ;;  %v1086_v28 = vrot.slane %v1084_v10, 4  ;;  %v1089_v29 = vrot.slane %v1087_v12, 5  ;;  %v2352_v30 = vrot.slane %v2762_v32, 9  ;;  %v765_v12 = vld [vmem:[#allocation2 + $0xc] sm:$0x3] }
  0xd4   : > { %2305 = vmatmul.msk.bf16.gmra.mxu3 %vm303_vm0, %v645_v23  ;;  %v1077_v31 = vrot.slane %v1076_v24, 4  ;;  %v1095_v33 = vrot.slane %v1093_v25, 5  ;;  %v1237_v63 = vrot.slane %v2683_v50, 5  ;;  %v2353_v34 = vrot.slane %v2768_v3, 9 }
  0xd5   : > { %v709_v35 = vpack.c.b16 %v704_v27, %v703_v7  ;;  %v1090_v37 = vor.u32 %v1089_v29, %v1086_v28  ;;  %v1241_v41 = vrot.slane %v2706_v16, 5  ;;  %v539_v42 = vshrl.u32 %v447_v26, 16 }
  0xd6   : > { %v1082_v43 = vsel %vm2620_vm15, %v1077_v31, %v1081_v9  ;;  %v1238_v44 = vsel %vm2604_vm11, %v2352_v30, %v1237_v63  ;;  %v542_v45 = vshll.u32 %v447_v26, 16  ;;  %v548_v46 = vshll.u32 %v2727_v8, 16  ;;  %v764_v8 = vld [vmem:[#allocation2 + $0x4] sm:$0x3]  ;;  %v2470_v30 = vld [vmem:[%s3182_s3 + $0x70] sm:$0xff] }
  0xd7   : > { %2316 = vmatmul.msk.bf16.gmra.mxu2 %vm303_vm0, %v709_v35  ;;  %v1091_v50 = vrot.slane %v1090_v37, 4  ;;  %v1134_v48 = vunpack.c.l.b16 %v1082_v43  ;;  %v1242_v49 = vsel %vm2604_vm11, %v2353_v34, %v1241_v41  ;;  %v1266_v51 = vunpack.c.l.b16 %v1238_v44  ;;  %1878 = vmatpush.bf16.msra.mxu0 %v2470_v30 }
  0xd8   : > { %v1267_v16 = vunpack.c.l.b16 %v1242_v49  ;;  %v541_v52 = vrot.slane %v539_v42, 4  ;;  %v544_v55 = vrot.slane %v542_v45, 5  ;;  %v550_v57 = vrot.slane %v548_v46, 5  ;;  %v2816_v42 = vld [vmem:[#allocation2 + $0x3c] sm:$0x1] }
  0xd9   : > { %v1096_v60 = vsel %vm2620_vm15, %v1091_v50, %v1095_v33  ;;  %v553_v62 = vshrl.u32 %v449_v38, 16  ;;  %v556_v0 = vshll.u32 %v449_v38, 16  ;;  %v562_v2 = vshll.u32 %v2741_v22, 16 }
  0xda   : > { %v1135_v7 = vunpack.c.l.b16 %v1096_v60  ;;  %v1273_v9 = vpack.c.b16 %v1267_v16, %v1266_v51  ;;  %v545_v10 = vor.u32 %v544_v55, %v541_v52  ;;  %vm772_vm1 = vsmask.f32 2304  ;;  %v2821_v51 = vld [vmem:[#allocation2 + $0x44] sm:$0x1]  ;;  %v2823_v55 = vld [vmem:[#allocation2 + $0x28] sm:$0xe] }
  0xdb   : > { %v555_v17 = vrot.slane %v553_v62, 4  ;;  %v558_v19 = vrot.slane %v556_v0, 5  ;;  %v564_v20 = vrot.slane %v562_v2, 5  ;;  %vm773_vm6 = vsmask.f32 6416 }
  0xdc   : > { %v1140_v23 = vpack.c.b16 %v1135_v7, %v1134_v48  ;;  %2371 = vmatmul.msk.bf16.gmra.mxu1 %vm303_vm0, %v1273_v9  ;;  %v546_v24 = vrot.slane %v545_v10, 4  ;;  %v783_v25 = vrot.slane %v782_v56, 4  ;;  %v785_v22 = vshrl.u32 %v764_v8, 16  ;;  %vm2812_vm8 = vmor %vm772_vm1, %vm773_vm6  ;;  %v2828_v2 = vld [vmem:[#allocation2 + $0x30] sm:$0xe] }
  0xdd   : > { %v559_v26 = vor.u32 %v558_v19, %v555_v17  ;;  %v788_v27 = vshll.u32 %v764_v8, 16  ;;  %v800_v28 = vor.u32 %v2636_v21, %v2626_v5  ;;  %v803_v29 = vshrl.u32 %v765_v12, 16 }
  0xde   : > { %2348 = vmatmul.msk.bf16.gmra.mxu0 %vm303_vm0, %v1140_v23  ;;  %v551_v31 = vsel %vm2620_vm15, %v546_v24, %v550_v57  ;;  %v787_v33 = vrot.slane %v785_v22, 5  ;;  %v806_v63 = vshll.u32 %v765_v12, 16  ;;  %v1098_v59 = vshrl.u32 %v1009_v13, 16  ;;  %v1337_v12 = vld [vmem:[#allocation2 + $0xc] sm:$0x3] }
  0xdf   : > { %v560_v56 = vrot.slane %v559_v26, 4  ;;  %v705_v34 = vunpack.c.l.b16 %v551_v31  ;;  %v790_v35 = vrot.slane %v788_v27, 6  ;;  %v801_v37 = vrot.slane %v800_v28, 4 }
  0xe0   : > { %v805_v21 = vrot.slane %v803_v29, 5  ;;  %v808_v41 = vrot.slane %v806_v63, 6  ;;  %v1100_v43 = vrot.slane %v1098_v59, 4  ;;  %v1101_v44 = vshll.u32 %v1009_v13, 16 }
  0xe1   : > { %v565_v38 = vsel %vm2620_vm15, %v560_v56, %v564_v20  ;;  %v791_v45 = vor.u32 %v790_v35, %v787_v33  ;;  %v1107_v46 = vshll.u32 %v2816_v42, 16  ;;  %v1112_v50 = vshrl.u32 %v1011_v58, 16  ;;  %v1338_v33 = vld [vmem:[#allocation2 + $0x14] sm:$0x3] }
  0xe2   : > { %v706_v48 = vunpack.c.l.b16 %v565_v38  ;;  %v809_v49 = vor.u32 %v808_v41, %v805_v21  ;;  %v1103_v16 = vrot.slane %v1101_v44, 5  ;;  %v1115_v52 = vshll.u32 %v1011_v58, 16 }
  0xe3   : > { %v792_v57 = vsel %vm2812_vm8, %v783_v25, %v791_v45  ;;  %v1109_v60 = vrot.slane %v1107_v46, 5  ;;  %v1114_v62 = vrot.slane %v1112_v50, 4  ;;  %v1121_v0 = vshll.u32 %v2821_v51, 16 }
  0xe4   : > { %v710_v8 = vpack.c.b16 %v706_v48, %v705_v34  ;;  %v810_v7 = vsel %vm2812_vm8, %v801_v37, %v809_v49  ;;  %v924_v9 = vunpack.c.l.b16 %v792_v57  ;;  %v1104_v10 = vor.u32 %v1103_v16, %v1100_v43  ;;  %v766_v37 = vld [vmem:[#allocation2 + $0x14] sm:$0x3]  ;;  %v767_v16 = vld [vmem:[#allocation2 + $0x1c] sm:$0x3] }
  0xe5   : > { %v925_v13 = vunpack.c.l.b16 %v810_v7  ;;  %v1117_v17 = vrot.slane %v1115_v52, 5  ;;  %v1123_v19 = vrot.slane %v1121_v0, 5  ;;  %v2354_v20 = vrot.slane %v2823_v55, 9  ;;  %v2855_v0 = vld [vmem:[#allocation2 + $0x10] sm:$0xe] }
  0xe6   : > { %v1105_v23 = vrot.slane %v1104_v10, 4  ;;  %v1245_v24 = vrot.slane %v2757_v47, 5  ;;  %v2355_v25 = vrot.slane %v2828_v2, 9  ;;  %v1249_v22 = vrot.slane %v2766_v1, 5 }
  0xe7   : > { %2317 = vmatmul.msk.bf16.gmra.mxu2 %vm303_vm0, %v710_v8  ;;  %v932_v26 = vpack.c.b16 %v925_v13, %v924_v9  ;;  %v1118_v27 = vor.u32 %v1117_v17, %v1114_v62  ;;  %v1352_v28 = vor.u32 %v2725_v4, %v2723_v53  ;;  %v1355_v29 = vshrl.u32 %v1337_v12, 16  ;;  %v2468_v8 = vld [vmem:[%s3182_s3 + $0x60] sm:$0xff]  ;;  %v2860_v13 = vld [vmem:[#allocation2 + $0x14] sm:$0x1] }
  0xe8   : > { %v1110_v30 = vsel %vm2620_vm15, %v1105_v23, %v1109_v60  ;;  %v1246_v31 = vsel %vm2604_vm11, %v2354_v20, %v1245_v24  ;;  %v1250_v47 = vsel %vm2604_vm11, %v2355_v25, %v1249_v22  ;;  %v1358_v63 = vshll.u32 %v1337_v12, 16  ;;  %1744 = vmatpush.bf16.msra.mxu3 %v2468_v8  ;;  %v2472_v23 = vld [vmem:[%s3182_s3 + $0x80] sm:$0xff] }
  0xe9   : > { %2330 = vmatmul.msk.bf16.vlgmr.msrb.gmra.mxu3 %vm303_vm0, %v932_v26  ;;  %v1119_v1 = vrot.slane %v1118_v27, 4  ;;  %v1136_v58 = vunpack.c.l.b16 %v1110_v30  ;;  %v1268_v59 = vunpack.c.l.b16 %v1246_v31  ;;  %v1269_v56 = vunpack.c.l.b16 %v1250_v47  ;;  %v2870_v26 = vld [vmem:[#allocation2 + $0x1c] sm:$0x1]  ;;  %v2872_v27 = vld [vmem:[#allocation2 + $0x18] sm:$0xe]  ;;  %2108 = vmatpush.bf16.msra.mxu1 %v2472_v23 }
  0xea   : > { %v1353_v34 = vrot.slane %v1352_v28, 4  ;;  %v1357_v53 = vrot.slane %v1355_v29, 5  ;;  %v1360_v4 = vrot.slane %v1358_v63, 6  ;;  %v1370_v35 = vor.u32 %v2738_v18, %v2732_v11  ;;  %v2875_v47 = vld [vmem:[#allocation2 + $0x38] sm:$0xe] }
  0xeb   : > { %v1124_v21 = vsel %vm2620_vm15, %v1119_v1, %v1123_v19  ;;  %v1274_v41 = vpack.c.b16 %v1269_v56, %v1268_v59  ;;  %v1373_v43 = vshrl.u32 %v1338_v33, 16  ;;  %v1376_v44 = vshll.u32 %v1338_v33, 16 }
  0xec   : > { %v1137_v38 = vunpack.c.l.b16 %v1124_v21  ;;  %v1361_v45 = vor.u32 %v1360_v4, %v1357_v53  ;;  %v1371_v46 = vrot.slane %v1370_v35, 4  ;;  %v812_v50 = vshrl.u32 %v2659_v6, 16  ;;  %v2880_v4 = vld [vmem:[#allocation2 + $0x40] sm:$0xe] }
  0xed   : > { %2372 = vmatmul.msk.bf16.gmra.mxu1 %vm303_vm0, %v1274_v41  ;;  %v1375_v48 = vrot.slane %v1373_v43, 5  ;;  %v1378_v49 = vrot.slane %v1376_v44, 6  ;;  %v815_v52 = vshll.u32 %v2659_v6, 16  ;;  %v821_v11 = vshrl.u32 %v766_v37, 16  ;;  %v1339_v43 = vld [vmem:[#allocation2 + $0x1c] sm:$0x3] }
  0xee   : > { %v1141_v18 = vpack.c.b16 %v1137_v38, %v1136_v58  ;;  %v1362_v57 = vsel %vm2812_vm8, %v1353_v34, %v1361_v45  ;;  %v814_v60 = vrot.slane %v812_v50, 5  ;;  %v824_v62 = vshll.u32 %v766_v37, 16 }
  0xef   : > { %v1379_v7 = vor.u32 %v1378_v49, %v1375_v48  ;;  %v1494_v9 = vunpack.c.l.b16 %v1362_v57  ;;  %v817_v10 = vrot.slane %v815_v52, 6  ;;  %v823_v12 = vrot.slane %v821_v11, 5 }
  0xf0   : > { %2349 = vmatmul.msk.bf16.gmra.mxu0 %vm303_vm0, %v1141_v18  ;;  %v826_v6 = vrot.slane %v824_v62, 6  ;;  %v830_v17 = vshrl.u32 %v2663_v14, 16  ;;  %v833_v19 = vshll.u32 %v2663_v14, 16  ;;  %v839_v20 = vshrl.u32 %v767_v16, 16 }
  0xf1   : > { %v1380_v24 = vsel %vm2812_vm8, %v1371_v46, %v1379_v7  ;;  %v818_v25 = vor.u32 %v817_v10, %v814_v60  ;;  %v842_v22 = vshll.u32 %v767_v16, 16  ;;  %v2406_v28 = vrot.slane %v2855_v0, 9  ;;  %v1340_v7 = vld [vmem:[#allocation2 + $0x24] sm:$0x3] }
  0xf2   : > { %v1495_v29 = vunpack.c.l.b16 %v1380_v24  ;;  %v827_v30 = vor.u32 %v826_v6, %v823_v12  ;;  %v832_v14 = vrot.slane %v830_v17, 5  ;;  %v835_v31 = vrot.slane %v833_v19, 6 }
  0xf3   : > { %v819_v33 = vrot.slane %v818_v25, 4  ;;  %v841_v63 = vrot.slane %v839_v20, 5  ;;  %v844_v1 = vrot.slane %v842_v22, 6  ;;  %v1800_v58 = vrot.slane %v2860_v13, 5  ;;  %v768_v22 = vld [vmem:[#allocation2 + $0x24] sm:$0x3] }
  0xf4   : > { %v1502_v59 = vpack.c.b16 %v1495_v29, %v1494_v9  ;;  %v836_v56 = vor.u32 %v835_v31, %v832_v14  ;;  %v2407_v34 = vrot.slane %v2872_v27, 9  ;;  %v1804_v53 = vrot.slane %v2870_v26, 5 }
  0xf5   : > { %v828_v35 = vsel %vm2812_vm8, %v819_v33, %v827_v30  ;;  %v845_v37 = vor.u32 %v844_v1, %v841_v63  ;;  %v1801_v21 = vsel %vm2604_vm11, %v2406_v28, %v1800_v58  ;;  %v2356_v41 = vrot.slane %v2875_v47, 9 }
  0xf6   : > { %v837_v44 = vrot.slane %v836_v56, 4  ;;  %v926_v38 = vunpack.c.l.b16 %v828_v35  ;;  %v1805_v45 = vsel %vm2604_vm11, %v2407_v34, %v1804_v53  ;;  %v1835_v46 = vunpack.c.l.b16 %v1801_v21  ;;  %v769_v53 = vld [vmem:[#allocation2 + $0x2c] sm:$0x3] }
  0xf7   : > { %2386 = vmatmul.msk.bf16.vlgmr.msra.gmra.mxu2 %vm303_vm0, %v1502_v59  ;;  %v1836_v50 = vunpack.c.l.b16 %v1805_v45  ;;  %v1253_v48 = vrot.slane %v2816_v42, 5  ;;  %v2357_v49 = vrot.slane %v2880_v4, 9  ;;  %v1257_v16 = vrot.slane %v2821_v51, 5 }
  0xf8   : > { %v846_v52 = vsel %vm2812_vm8, %v837_v44, %v845_v37  ;;  %v1382_v11 = vshrl.u32 %v2762_v32, 16  ;;  %v1385_v18 = vshll.u32 %v2762_v32, 16  ;;  %v1391_v57 = vshrl.u32 %v1339_v43, 16 }
  0xf9   : > { %v927_v60 = vunpack.c.l.b16 %v846_v52  ;;  %v1843_v62 = vpack.c.b16 %v1836_v50, %v1835_v46  ;;  %v1254_v8 = vsel %vm2604_vm11, %v2356_v41, %v1253_v48  ;;  %v1258_v42 = vsel %vm2604_vm11, %v2357_v49, %v1257_v16  ;;  %v2914_v49 = vld [vmem:[#allocation2 + $0x24] sm:$0x1]  ;;  %v2916_v16 = vld [vmem:[#allocation2 + $0x2c] sm:$0x1] }
  0xfa   : > { %v1270_v9 = vunpack.c.l.b16 %v1254_v8  ;;  %v1271_v10 = vunpack.c.l.b16 %v1258_v42  ;;  %v1384_v51 = vrot.slane %v1382_v11, 5  ;;  %v1387_v12 = vrot.slane %v1385_v18, 6 }
  0xfb   : > { %v933_v6 = vpack.c.b16 %v927_v60, %v926_v38  ;;  %v1393_v17 = vrot.slane %v1391_v57, 5  ;;  %v1394_v19 = vshll.u32 %v1339_v43, 16  ;;  %v1400_v20 = vshrl.u32 %v2768_v3, 16  ;;  %v2918_v60 = vld [vmem:[#allocation2 + $0x28] sm:$0xe] }
  0xfc   : > { %v1275_v32 = vpack.c.b16 %v1271_v10, %v1270_v9  ;;  %v1388_v23 = vor.u32 %v1387_v12, %v1384_v51  ;;  %v1403_v24 = vshll.u32 %v2768_v3, 16  ;;  %v1409_v25 = vshrl.u32 %v1340_v7, 16 }
  0xfd   : > { %2331 = vmatmul.msk.bf16.gmra.mxu3 %vm303_vm0, %v933_v6  ;;  %v1396_v28 = vrot.slane %v1394_v19, 6  ;;  %v1402_v29 = vrot.slane %v1400_v20, 5  ;;  %v1412_v30 = vshll.u32 %v1340_v7, 16  ;;  %v848_v14 = vshrl.u32 %v2687_v54, 16  ;;  %v1908_v20 = vld [vmem:[#allocation2 + $0x14] sm:$0x3] }
  0xfe   : > { %2373 = vmatmul.msk.bf16.gmra.mxu1 %vm303_vm0, %v1275_v32  ;;  %v1389_v31 = vrot.slane %v1388_v23, 4  ;;  %v1405_v33 = vrot.slane %v1403_v24, 6  ;;  %v1411_v63 = vrot.slane %v1409_v25, 5  ;;  %v851_v1 = vshll.u32 %v2687_v54, 16  ;;  %v2912_v54 = vld [vmem:[#allocation2 + $0x20] sm:$0xe] }
  0xff   : > { %v1397_v58 = vor.u32 %v1396_v28, %v1393_v17  ;;  %v1414_v59 = vrot.slane %v1412_v30, 6  ;;  %v850_v56 = vrot.slane %v848_v14, 5  ;;  %v857_v3 = vshrl.u32 %v768_v22, 16 }
 0x100   : > { %2426 = vmatmul.msk.bf16.vlgmr.msra.gmra.mxu0 %vm303_vm0, %v1843_v62  ;;  %v1406_v34 = vor.u32 %v1405_v33, %v1402_v29  ;;  %v853_v35 = vrot.slane %v851_v1, 6  ;;  %v860_v37 = vshll.u32 %v768_v22, 16  ;;  %v866_v21 = vshrl.u32 %v2680_v39, 16 }
 0x101   : > { %v1398_v41 = vsel %vm2812_vm8, %v1389_v31, %v1397_v58  ;;  %v1415_v43 = vor.u32 %v1414_v59, %v1411_v63  ;;  %v859_v44 = vrot.slane %v857_v3, 5  ;;  %v869_v38 = vshll.u32 %v2680_v39, 16  ;;  %v1909_v63 = vld [vmem:[#allocation2 + $0x1c] sm:$0x3] }
 0x102   : > { %v1407_v45 = vrot.slane %v1406_v34, 4  ;;  %v1496_v46 = vunpack.c.l.b16 %v1398_v41  ;;  %v854_v50 = vor.u32 %v853_v35, %v850_v56  ;;  %v862_v48 = vrot.slane %v860_v37, 6 }
 0x103   : > { %v868_v52 = vrot.slane %v866_v21, 5  ;;  %v871_v11 = vrot.slane %v869_v38, 6  ;;  %v875_v18 = vshrl.u32 %v769_v53, 16  ;;  %v878_v57 = vshll.u32 %v769_v53, 16 }
 0x104   : > { %v1416_v62 = vsel %vm2812_vm8, %v1407_v45, %v1415_v43  ;;  %v855_v39 = vrot.slane %v854_v50, 4  ;;  %v863_v8 = vor.u32 %v862_v48, %v859_v44  ;;  %v2408_v42 = vrot.slane %v2912_v54, 9  ;;  %v1341_v44 = vld [vmem:[#allocation2 + $0x2c] sm:$0x3] }
 0x105   : > { %v1497_v7 = vunpack.c.l.b16 %v1416_v62  ;;  %v872_v9 = vor.u32 %v871_v11, %v868_v52  ;;  %v877_v10 = vrot.slane %v875_v18, 5  ;;  %v880_v51 = vrot.slane %v878_v57, 6 }
 0x106   : > { %v864_v12 = vsel %vm2812_vm8, %v855_v39, %v863_v8  ;;  %v1808_v6 = vrot.slane %v2914_v49, 5  ;;  %v2409_v17 = vrot.slane %v2918_v60, 9  ;;  %v1812_v19 = vrot.slane %v2916_v16, 5 }
 0x107   : > { %v1503_v32 = vpack.c.b16 %v1497_v7, %v1496_v46  ;;  %v873_v23 = vrot.slane %v872_v9, 4  ;;  %v881_v24 = vor.u32 %v880_v51, %v877_v10  ;;  %v928_v25 = vunpack.c.l.b16 %v864_v12 }
 0x108   : > { %v1809_v22 = vsel %vm2604_vm11, %v2408_v42, %v1808_v6  ;;  %v1813_v28 = vsel %vm2604_vm11, %v2409_v17, %v1812_v19  ;;  %v1917_v29 = vshrl.u32 %v2855_v0, 16  ;;  %v1920_v30 = vshll.u32 %v2855_v0, 16  ;;  %v1342_v42 = vld [vmem:[#allocation2 + $0x34] sm:$0x3] }
 0x109   : > { %2387 = vmatmul.msk.bf16.gmra.mxu2 %vm303_vm0, %v1503_v32  ;;  %v882_v14 = vsel %vm2812_vm8, %v873_v23, %v881_v24  ;;  %v1837_v31 = vunpack.c.l.b16 %v1809_v22  ;;  %v1838_v33 = vunpack.c.l.b16 %v1813_v28  ;;  %v1926_v1 = vshrl.u32 %v1908_v20, 16  ;;  %v770_v22 = vld [vmem:[#allocation2 + $0x34] sm:$0x3] }
 0x10a   : > { %v929_v58 = vunpack.c.l.b16 %v882_v14  ;;  %v1919_v59 = vrot.slane %v1917_v29, 5  ;;  %v1922_v56 = vrot.slane %v1920_v30, 6  ;;  %v1929_v3 = vshll.u32 %v1908_v20, 16 }
 0x10b   : > { %v1844_v34 = vpack.c.b16 %v1838_v33, %v1837_v31  ;;  %v1928_v53 = vrot.slane %v1926_v1, 5  ;;  %v1935_v35 = vshrl.u32 %v2872_v27, 16  ;;  %v1938_v37 = vshll.u32 %v2872_v27, 16 }
 0x10c   : > { %v934_v0 = vpack.c.b16 %v929_v58, %v928_v25  ;;  %v1923_v21 = vor.u32 %v1922_v56, %v1919_v59  ;;  %v1931_v41 = vrot.slane %v1929_v3, 6  ;;  %v1944_v43 = vshrl.u32 %v1909_v63, 16  ;;  %v771_v3 = vld [vmem:[#allocation2 + $0x3c] sm:$0x3] }
 0x10d   : > { %v1937_v38 = vrot.slane %v1935_v35, 5  ;;  %v1940_v45 = vrot.slane %v1938_v37, 6  ;;  %v1947_v46 = vshll.u32 %v1909_v63, 16  ;;  %v1418_v50 = vshrl.u32 %v2823_v55, 16 }
 0x10e   : > { %2332 = vmatmul.msk.bf16.gmra.mxu3 %vm303_vm0, %v934_v0  ;;  %v1924_v48 = vrot.slane %v1923_v21, 4  ;;  %v1932_v52 = vor.u32 %v1931_v41, %v1928_v53  ;;  %v1946_v11 = vrot.slane %v1944_v43, 5  ;;  %v1421_v18 = vshll.u32 %v2823_v55, 16  ;;  %v2953_v21 = vld [vmem:[#allocation2 + $0x30] sm:$0xe] }
 0x10f   : > { %v1941_v57 = vor.u32 %v1940_v45, %v1937_v38  ;;  %v1949_v62 = vrot.slane %v1947_v46, 6  ;;  %v1420_v27 = vrot.slane %v1418_v50, 5  ;;  %v1427_v39 = vshrl.u32 %v1341_v44, 16 }
 0x110   : > { %2427 = vmatmul.msk.bf16.gmra.mxu0 %vm303_vm0, %v1844_v34  ;;  %v1933_v8 = vsel %vm2812_vm8, %v1924_v48, %v1932_v52  ;;  %v1423_v7 = vrot.slane %v1421_v18, 6  ;;  %v1430_v9 = vshll.u32 %v1341_v44, 16  ;;  %v1436_v10 = vshrl.u32 %v2828_v2, 16  ;;  %v2958_v48 = vld [vmem:[#allocation2 + $0x34] sm:$0x1] }
 0x111   : > { %v1942_v51 = vrot.slane %v1941_v57, 4  ;;  %v1950_v12 = vor.u32 %v1949_v62, %v1946_v11  ;;  %v2065_v6 = vunpack.c.l.b16 %v1933_v8  ;;  %v1429_v17 = vrot.slane %v1427_v39, 5  ;;  %v2962_v57 = vld [vmem:[#allocation2 + $0x3c] sm:$0x1] }
 0x112   : > { %v1424_v19 = vor.u32 %v1423_v7, %v1420_v27  ;;  %v1432_v55 = vrot.slane %v1430_v9, 6  ;;  %v1438_v20 = vrot.slane %v1436_v10, 5  ;;  %v1439_v32 = vshll.u32 %v2828_v2, 16 }
 0x113   : > { %v1951_v23 = vsel %vm2812_vm8, %v1942_v51, %v1950_v12  ;;  %v1445_v24 = vshrl.u32 %v1342_v42, 16  ;;  %v1448_v25 = vshll.u32 %v1342_v42, 16  ;;  %v884_v28 = vshrl.u32 %v2734_v15, 16 }
 0x114   : > { %v2066_v29 = vunpack.c.l.b16 %v1951_v23  ;;  %v1425_v30 = vrot.slane %v1424_v19, 4  ;;  %v1433_v14 = vor.u32 %v1432_v55, %v1429_v17  ;;  %v1441_v31 = vrot.slane %v1439_v32, 6  ;;  %v1910_v19 = vld [vmem:[#allocation2 + $0x24] sm:$0x3] }
 0x115   : > { %v1447_v33 = vrot.slane %v1445_v24, 5  ;;  %v1450_v63 = vrot.slane %v1448_v25, 6  ;;  %v886_v1 = vrot.slane %v884_v28, 5  ;;  %v887_v58 = vshll.u32 %v2734_v15, 16  ;;  %v1911_v28 = vld [vmem:[#allocation2 + $0x2c] sm:$0x3] }
 0x116   : > { %v2073_v59 = vpack.c.b16 %v2066_v29, %v2065_v6  ;;  %v1434_v2 = vsel %vm2812_vm8, %v1425_v30, %v1433_v14  ;;  %v1442_v56 = vor.u32 %v1441_v31, %v1438_v20  ;;  %v893_v34 = vshrl.u32 %v770_v22, 16 }
 0x117   : > { %v1451_v53 = vor.u32 %v1450_v63, %v1447_v33  ;;  %v1498_v35 = vunpack.c.l.b16 %v1434_v2  ;;  %v889_v37 = vrot.slane %v887_v58, 6  ;;  %v896_v0 = vshll.u32 %v770_v22, 16 }
 0x118   : > { %2442 = vmatmul.msk.bf16.vlgmr.msra.gmra.mxu1 %vm303_vm0, %v2073_v59  ;;  %v1443_v41 = vrot.slane %v1442_v56, 4  ;;  %v895_v43 = vrot.slane %v893_v34, 5  ;;  %v902_v44 = vshrl.u32 %v2749_v36, 16  ;;  %v905_v15 = vshll.u32 %v2749_v36, 16  ;;  %v2965_v36 = vld [vmem:[#allocation2 + $0x38] sm:$0xe] }
 0x119   : > { %v890_v38 = vor.u32 %v889_v37, %v886_v1  ;;  %v898_v45 = vrot.slane %v896_v0, 6  ;;  %v911_v46 = vshrl.u32 %v771_v3, 16  ;;  %v914_v50 = vshll.u32 %v771_v3, 16 }
 0x11a   : > { %v1452_v52 = vsel %vm2812_vm8, %v1443_v41, %v1451_v53  ;;  %v904_v11 = vrot.slane %v902_v44, 5  ;;  %v907_v18 = vrot.slane %v905_v15, 6  ;;  %v2410_v62 = vrot.slane %v2953_v21, 9 }
 0x11b   : > { %v1499_v27 = vunpack.c.l.b16 %v1452_v52  ;;  %v891_v39 = vrot.slane %v890_v38, 4  ;;  %v899_v8 = vor.u32 %v898_v45, %v895_v43  ;;  %v913_v42 = vrot.slane %v911_v46, 5 }
 0x11c   : > { %v908_v7 = vor.u32 %v907_v18, %v904_v11  ;;  %v916_v9 = vrot.slane %v914_v50, 6  ;;  %v1816_v10 = vrot.slane %v2958_v48, 5  ;;  %v2411_v51 = vrot.slane %v2965_v36, 9  ;;  %v1344_v11 = vld [vmem:[#allocation2 + $0x44] sm:$0x3] }
 0x11d   : > { %v1504_v12 = vpack.c.b16 %v1499_v27, %v1498_v35  ;;  %v900_v6 = vsel %vm2812_vm8, %v891_v39, %v899_v8  ;;  %v1820_v17 = vrot.slane %v2962_v57, 5  ;;  %v1953_v55 = vshrl.u32 %v2912_v54, 16  ;;  %v1343_v35 = vld [vmem:[#allocation2 + $0x3c] sm:$0x3] }
 0x11e   : > { %v909_v20 = vrot.slane %v908_v7, 4  ;;  %v917_v32 = vor.u32 %v916_v9, %v913_v42  ;;  %v930_v23 = vunpack.c.l.b16 %v900_v6  ;;  %v1817_v24 = vsel %vm2604_vm11, %v2410_v62, %v1816_v10  ;;  %v1568_v9 = vld [vmem:[#allocation2 + $0x10] sm:$0xf] }
 0x11f   : > { %2388 = vmatmul.msk.bf16.gmra.mxu2 %vm303_vm0, %v1504_v12  ;;  %v1821_v25 = vsel %vm2604_vm11, %v2411_v51, %v1820_v17  ;;  %v1839_v22 = vunpack.c.l.b16 %v1817_v24  ;;  %v1955_v29 = vrot.slane %v1953_v55, 5  ;;  %v1956_v30 = vshll.u32 %v2912_v54, 16 }
 0x120   : > { %v918_v14 = vsel %vm2812_vm8, %v909_v20, %v917_v32  ;;  %v1840_v31 = vunpack.c.l.b16 %v1821_v25  ;;  %v1962_v33 = vshrl.u32 %v1910_v19, 16  ;;  %v1965_v63 = vshll.u32 %v1910_v19, 16 }
 0x121   : > { %v931_v1 = vunpack.c.l.b16 %v918_v14  ;;  %v1958_v58 = vrot.slane %v1956_v30, 6  ;;  %v1971_v59 = vshrl.u32 %v2918_v60, 16  ;;  %v1974_v2 = vshll.u32 %v2918_v60, 16 }
 0x122   : > { %v1845_v56 = vpack.c.b16 %v1840_v31, %v1839_v22  ;;  %v1964_v3 = vrot.slane %v1962_v33, 5  ;;  %v1967_v34 = vrot.slane %v1965_v63, 6  ;;  %v1980_v53 = vshrl.u32 %v1911_v28, 16 }
 0x123   : > { %v935_v37 = vpack.c.b16 %v931_v1, %v930_v23  ;;  %v1959_v0 = vor.u32 %v1958_v58, %v1955_v29  ;;  %v1973_v54 = vrot.slane %v1971_v59, 5  ;;  %v1976_v41 = vrot.slane %v1974_v2, 6  ;;  %v1570_v23 = vld [vmem:[#allocation2 + $0x18] sm:$0xf]  ;;  %v2994_v1 = vld [vmem:[#allocation2 + $0x44] sm:$0x1] }
 0x124   : > { %2428 = vmatmul.msk.bf16.gmra.mxu0 %vm303_vm0, %v1845_v56  ;;  %v1968_v43 = vor.u32 %v1967_v34, %v1964_v3  ;;  %v1982_v44 = vrot.slane %v1980_v53, 5  ;;  %v1983_v15 = vshll.u32 %v1911_v28, 16  ;;  %v1454_v38 = vshrl.u32 %v2875_v47, 16  ;;  %v2998_v56 = vld [vmem:[#allocation2 + $0x40] sm:$0xe] }
 0x125   : > { %2333 = vmatmul.msk.bf16.gmra.mxu3 %vm303_vm0, %v935_v37  ;;  %v1960_v45 = vrot.slane %v1959_v0, 4  ;;  %v1977_v60 = vor.u32 %v1976_v41, %v1973_v54  ;;  %v1457_v46 = vshll.u32 %v2875_v47, 16  ;;  %v1463_v50 = vshrl.u32 %v1343_v35, 16  ;;  %v3000_v3 = vld [vmem:[#allocation2 + $0x48] sm:$0xe] }
 0x126   : > { %v1985_v52 = vrot.slane %v1983_v15, 6  ;;  %v1456_v18 = vrot.slane %v1454_v38, 5  ;;  %v1466_v62 = vshll.u32 %v1343_v35, 16  ;;  %v1472_v27 = vshrl.u32 %v2880_v4, 16  ;;  %v3002_v37 = vld [vmem:[#allocation2 + $0x4c] sm:$0x1] }
 0x127   : > { %v1969_v39 = vsel %vm2812_vm8, %v1960_v45, %v1968_v43  ;;  %v1978_v8 = vrot.slane %v1977_v60, 4  ;;  %v1459_v42 = vrot.slane %v1457_v46, 6  ;;  %v1465_v7 = vrot.slane %v1463_v50, 5 }
 0x128   : > { %v1986_v10 = vor.u32 %v1985_v52, %v1982_v44  ;;  %v2067_v51 = vunpack.c.l.b16 %v1969_v39  ;;  %v1468_v12 = vrot.slane %v1466_v62, 6  ;;  %v1474_v6 = vrot.slane %v1472_v27, 5 }
 0x129   : > { %v1460_v17 = vor.u32 %v1459_v42, %v1456_v18  ;;  %v1475_v47 = vshll.u32 %v2880_v4, 16  ;;  %v1481_v19 = vshrl.u32 %v1344_v11, 16  ;;  %v1484_v55 = vshll.u32 %v1344_v11, 16 }
 0x12a   : > { %v1987_v20 = vsel %vm2812_vm8, %v1978_v8, %v1986_v10  ;;  %v1469_v32 = vor.u32 %v1468_v12, %v1465_v7  ;;  %v1585_v24 = vshrl.u32 %v1568_v9, 16  ;;  %v1588_v25 = vshll.u32 %v1568_v9, 16  ;;  %v1913_v7 = vld [vmem:[#allocation2 + $0x3c] sm:$0x3] }
 0x12b   : > { %v2068_v22 = vunpack.c.l.b16 %v1987_v20  ;;  %v1461_v28 = vrot.slane %v1460_v17, 4  ;;  %v1477_v29 = vrot.slane %v1475_v47, 6  ;;  %v1483_v30 = vrot.slane %v1481_v19, 5 }
 0x12c   : > { %v1486_v14 = vrot.slane %v1484_v55, 6  ;;  %v1587_v31 = vrot.slane %v1585_v24, 4  ;;  %v1590_v33 = vrot.slane %v1588_v25, 5  ;;  %v1594_v63 = vshll.u32 %v2860_v13, 16 }
 0x12d   : > { %v2074_v4 = vpack.c.b16 %v2068_v22, %v2067_v51  ;;  %v1470_v58 = vsel %vm2812_vm8, %v1461_v28, %v1469_v32  ;;  %v1478_v59 = vor.u32 %v1477_v29, %v1474_v6  ;;  %v1599_v2 = vshrl.u32 %v1570_v23, 16 }
 0x12e   : > { %v1487_v34 = vor.u32 %v1486_v14, %v1483_v30  ;;  %v1500_v53 = vunpack.c.l.b16 %v1470_v58  ;;  %v1591_v35 = vor.u32 %v1590_v33, %v1587_v31  ;;  %v1602_v54 = vshll.u32 %v1570_v23, 16  ;;  %v1572_v23 = vld [vmem:[#allocation2 + $0x20] sm:$0xf]  ;;  %v1574_v31 = vld [vmem:[#allocation2 + $0x28] sm:$0xf] }
 0x12f   : > { %2443 = vmatmul.msk.bf16.gmra.mxu1 %vm303_vm0, %v2074_v4  ;;  %v1479_v13 = vrot.slane %v1478_v59, 4  ;;  %v1601_v0 = vrot.slane %v1599_v2, 4  ;;  %v1608_v41 = vshll.u32 %v2870_v26, 16  ;;  %v2412_v44 = vrot.slane %v2998_v56, 9  ;;  %v1912_v26 = vld [vmem:[#allocation2 + $0x34] sm:$0x3] }
 0x130   : > { %v1592_v43 = vrot.slane %v1591_v35, 4  ;;  %v1824_v15 = vrot.slane %v2994_v1, 5  ;;  %v2413_v38 = vrot.slane %v3000_v3, 9  ;;  %v1596_v60 = vrot.slane %v1594_v63, 5 }
 0x131   : > { %v1488_v45 = vsel %vm2812_vm8, %v1479_v13, %v1487_v34  ;;  %v1604_v46 = vrot.slane %v1602_v54, 5  ;;  %v1828_v50 = vrot.slane %v3002_v37, 5  ;;  %v1610_v11 = vrot.slane %v1608_v41, 5 }
 0x132   : > { %v1501_v52 = vunpack.c.l.b16 %v1488_v45  ;;  %v1825_v18 = vsel %vm2604_vm11, %v2412_v44, %v1824_v15  ;;  %v1989_v62 = vshrl.u32 %v2953_v21, 16  ;;  %v1597_v27 = vsel %vm2620_vm15, %v1592_v43, %v1596_v60  ;;  %v1914_v15 = vld [vmem:[#allocation2 + $0x44] sm:$0x3] }
 0x133   : > { %v1605_v39 = vor.u32 %v1604_v46, %v1601_v0  ;;  %v1829_v8 = vsel %vm2604_vm11, %v2413_v38, %v1828_v50  ;;  %v1841_v42 = vunpack.c.l.b16 %v1825_v18  ;;  %v1992_v12 = vshll.u32 %v2953_v21, 16  ;;  %v3030_v38 = vpop.f32.mrf.mxu1 }
 0x134   : > { %v1505_v9 = vpack.c.b16 %v1501_v52, %v1500_v53  ;;  %v1842_v10 = vunpack.c.l.b16 %v1829_v8  ;;  %v1991_v51 = vrot.slane %v1989_v62, 5  ;;  %v1998_v17 = vshrl.u32 %v1912_v26, 16 }
 0x135   : > { %v1606_v6 = vrot.slane %v1605_v39, 4  ;;  %v2001_v47 = vshll.u32 %v1912_v26, 16  ;;  %v2007_v19 = vshrl.u32 %v2965_v36, 16  ;;  %v1994_v20 = vrot.slane %v1992_v12, 6 }
 0x136   : > { %2389 = vmatmul.msk.bf16.gmra.mxu2 %vm303_vm0, %v1505_v9  ;;  %v1846_v55 = vpack.c.b16 %v1842_v10, %v1841_v42  ;;  %v2010_v32 = vshll.u32 %v2965_v36, 16  ;;  %v2016_v40 = vshrl.u32 %v1913_v7, 16  ;;  %v2000_v25 = vrot.slane %v1998_v17, 5  ;;  %v1915_v10 = vld [vmem:[#allocation2 + $0x4c] sm:$0x3] }
 0x137   : > { %v1611_v24 = vsel %vm2620_vm15, %v1606_v6, %v1610_v11  ;;  %v2003_v22 = vrot.slane %v2001_v47, 6  ;;  %v2009_v28 = vrot.slane %v2007_v19, 5  ;;  %v1701_v21 = vunpack.c.l.b16 %v1597_v27 }
 0x138   : > { %v1702_v29 = vunpack.c.l.b16 %v1611_v24  ;;  %2429 = vmatmul.msk.bf16.gmra.mxu0 %vm303_vm0, %v1846_v55  ;;  %v1995_v30 = vor.u32 %v1994_v20, %v1991_v51  ;;  %v2012_v14 = vrot.slane %v2010_v32, 6  ;;  %v2018_v63 = vrot.slane %v2016_v40, 5  ;;  %v1576_v32 = vld [vmem:[#allocation2 + $0x30] sm:$0xf] }
 0x139   : > { %v2004_v33 = vor.u32 %v2003_v22, %v2000_v25  ;;  %v2019_v4 = vshll.u32 %v1913_v7, 16  ;;  %v1613_v58 = vshrl.u32 %v1572_v23, 16  ;;  %v1616_v34 = vshll.u32 %v1572_v23, 16 }
 0x13a   : > { %v1709_v36 = vpack.c.b16 %v1702_v29, %v1701_v21  ;;  %v1996_v59 = vrot.slane %v1995_v30, 4  ;;  %v2013_v2 = vor.u32 %v2012_v14, %v2009_v28  ;;  %v1622_v13 = vshll.u32 %v2914_v49, 16 }
 0x13b   : > { %v2021_v53 = vrot.slane %v2019_v4, 6  ;;  %v1615_v35 = vrot.slane %v1613_v58, 4  ;;  %v1627_v0 = vshrl.u32 %v1574_v31, 16  ;;  %v1618_v43 = vrot.slane %v1616_v34, 5  ;;  %v3044_v4 = vpop.f32.mrf.mxu1 }
 0x13c   : > { %2402 = vmatmul.msk.bf16.vlgmr.msra.gmra.mxu3 %vm303_vm0, %v1709_v36  ;;  %v2005_v54 = vsel %vm2812_vm8, %v1996_v59, %v2004_v33  ;;  %v2014_v41 = vrot.slane %v2013_v2, 4  ;;  %v1630_v44 = vshll.u32 %v1574_v31, 16  ;;  %v1624_v46 = vrot.slane %v1622_v13, 5  ;;  %v1578_v31 = vld [vmem:[#allocation2 + $0x38] sm:$0xf] }
 0x13d   : > { %v2022_v45 = vor.u32 %v2021_v53, %v2018_v63  ;;  %v2069_v60 = vunpack.c.l.b16 %v2005_v54  ;;  %v1629_v50 = vrot.slane %v1627_v0, 4  ;;  %v1619_v52 = vor.u32 %v1618_v43, %v1615_v35 }
 0x13e   : > { %v1632_v11 = vrot.slane %v1630_v44, 5  ;;  %v1636_v49 = vshll.u32 %v2916_v16, 16  ;;  %v2025_v18 = vshrl.u32 %v2998_v56, 16  ;;  %v2028_v62 = vshll.u32 %v2998_v56, 16 }
 0x13f   : > { %v2023_v26 = vsel %vm2812_vm8, %v2014_v41, %v2022_v45  ;;  %v2034_v27 = vshrl.u32 %v1914_v15, 16  ;;  %v2037_v39 = vshll.u32 %v1914_v15, 16  ;;  %v1620_v42 = vrot.slane %v1619_v52, 4 }
 0x140   : > { %v2070_v8 = vunpack.c.l.b16 %v2023_v26  ;;  %v1633_v7 = vor.u32 %v1632_v11, %v1629_v50  ;;  %v1638_v9 = vrot.slane %v1636_v49, 5  ;;  %v2027_v51 = vrot.slane %v2025_v18, 5  ;;  %v1580_v18 = vld [vmem:[#allocation2 + $0x40] sm:$0xf]  ;;  %v1582_v26 = vld [vmem:[#allocation2 + $0x48] sm:$0xf] }
 0x141   : > { %v2030_v12 = vrot.slane %v2028_v62, 6  ;;  %v2036_v6 = vrot.slane %v2034_v27, 5  ;;  %v1625_v16 = vsel %vm2620_vm15, %v1620_v42, %v1624_v46  ;;  %v2039_v19 = vrot.slane %v2037_v39, 6 }
 0x142   : > { %v2075_v17 = vpack.c.b16 %v2070_v8, %v2069_v60  ;;  %v1634_v47 = vrot.slane %v1633_v7, 4  ;;  %v2043_v20 = vshrl.u32 %v3000_v3, 16  ;;  %v2046_v56 = vshll.u32 %v3000_v3, 16 }
 0x143   : > { %v2031_v55 = vor.u32 %v2030_v12, %v2027_v51  ;;  %v1703_v23 = vunpack.c.l.b16 %v1625_v16  ;;  %v2052_v24 = vshrl.u32 %v1915_v10, 16  ;;  %v2055_v25 = vshll.u32 %v1915_v10, 16  ;;  %v3055_v62 = vpop.f32.mrf.mxu1 }
 0x144   : > { %2444 = vmatmul.msk.bf16.gmra.mxu1 %vm303_vm0, %v2075_v17  ;;  %v1639_v40 = vsel %vm2620_vm15, %v1634_v47, %v1638_v9  ;;  %v2040_v28 = vor.u32 %v2039_v19, %v2036_v6  ;;  %v2045_v21 = vrot.slane %v2043_v20, 5  ;;  %v2048_v29 = vrot.slane %v2046_v56, 6 }
 0x145   : > { %v2032_v22 = vrot.slane %v2031_v55, 4  ;;  %v2054_v30 = vrot.slane %v2052_v24, 5  ;;  %v2057_v14 = vrot.slane %v2055_v25, 6  ;;  %v1641_v33 = vshrl.u32 %v1576_v32, 16  ;;  %v744_v24 = vpop.f32.mrf.mxu2 }
 0x146   : > { %v1644_v63 = vshll.u32 %v1576_v32, 16  ;;  %v2049_v3 = vor.u32 %v2048_v29, %v2045_v21  ;;  %v3046_v58 = vpop.f32.mrf.mxu3  ;;  %v1704_v36 = vunpack.c.l.b16 %v1639_v40  ;;  %v1655_v35 = vshrl.u32 %v1578_v31, 16  ;;  %v1175_v29 = vpop.f32.mrf.mxu0 }
 0x147   : > { %v2058_v59 = vor.u32 %v2057_v14, %v2054_v30  ;;  %v1643_v2 = vrot.slane %v1641_v33, 4  ;;  %v1658_v13 = vshll.u32 %v1578_v31, 16  ;;  %v2041_v54 = vsel %vm2812_vm8, %v2032_v22, %v2040_v28 }
 0x148   : > { %v2050_v34 = vrot.slane %v2049_v3, 4  ;;  %v1646_v53 = vrot.slane %v1644_v63, 5  ;;  %v1710_v0 = vpack.c.b16 %v1704_v36, %v1703_v23  ;;  %v1657_v43 = vrot.slane %v1655_v35, 4 }
 0x149   : > { %v1660_v44 = vrot.slane %v1658_v13, 5  ;;  %v1664_v15 = vshll.u32 %v2962_v57, 16  ;;  %v1650_v60 = vshll.u32 %v2958_v48, 16  ;;  %v2071_v50 = vunpack.c.l.b16 %v2041_v54 }
 0x14a   : > { %v2059_v41 = vsel %vm2812_vm8, %v2050_v34, %v2058_v59  ;;  %v1647_v45 = vor.u32 %v1646_v53, %v1643_v2  ;;  %v1669_v57 = vshrl.u32 %v1580_v18, 16  ;;  %v1672_v7 = vshll.u32 %v1580_v18, 16 }
 0x14b   : > { %v1661_v46 = vor.u32 %v1660_v44, %v1657_v43  ;;  %v2072_v52 = vunpack.c.l.b16 %v2059_v41  ;;  %v1666_v49 = vrot.slane %v1664_v15, 5  ;;  %v1652_v27 = vrot.slane %v1650_v60, 5  ;;  %v3064_v55 = vpop.f32.mrf.mxu1 }
 0x14c   : > { %2403 = vmatmul.msk.bf16.gmra.mxu3 %vm303_vm0, %v1710_v0  ;;  %v1648_v5 = vrot.slane %v1647_v45, 4  ;;  %v1683_v48 = vshrl.u32 %v1582_v26, 16  ;;  %v1686_v9 = vshll.u32 %v1582_v26, 16  ;;  %v1671_v12 = vrot.slane %v1669_v57, 4 }
 0x14d   : > { %v1662_v11 = vrot.slane %v1661_v46, 4  ;;  %v2076_v8 = vpack.c.b16 %v2072_v52, %v2071_v50  ;;  %v1674_v6 = vrot.slane %v1672_v7, 5  ;;  %v1678_v56 = vshll.u32 %v2994_v1, 16  ;;  %v746_v63 = vpop.f32.mrf.mxu2 }
 0x14e   : > { %v3057_v39 = vpop.f32.mrf.mxu3  ;;  %v1653_v10 = vsel %vm2620_vm15, %v1648_v5, %v1652_v27  ;;  %v1685_v17 = vrot.slane %v1683_v48, 4  ;;  %v1688_v16 = vrot.slane %v1686_v9, 5  ;;  %v1692_v40 = vshll.u32 %v3002_v37, 16  ;;  %v1177_v36 = vpop.f32.mrf.mxu0 }
 0x14f   : > { %v1667_v42 = vsel %vm2620_vm15, %v1662_v11, %v1666_v49  ;;  %v1705_v47 = vunpack.c.l.b16 %v1653_v10  ;;  %v1675_v20 = vor.u32 %v1674_v6, %v1671_v12  ;;  %v1680_v22 = vrot.slane %v1678_v56, 5 }
 0x150   : > { %v1706_v51 = vunpack.c.l.b16 %v1667_v42  ;;  %v1689_v32 = vor.u32 %v1688_v16, %v1685_v17  ;;  %v1694_v21 = vrot.slane %v1692_v40, 5  ;;  %v745_v7 = vadd.f32 %v744_v24, %v3030_v38 }
 0x151   : > { %v1676_v25 = vrot.slane %v1675_v20, 4  ;;  %v747_v17 = vadd.f32 %v746_v63, %v3044_v4 }
 0x152   : > { %v1711_v19 = vpack.c.b16 %v1706_v51, %v1705_v47  ;;  %v1690_v28 = vrot.slane %v1689_v32, 4 }
 0x153   : > { %v1681_v30 = vsel %vm2620_vm15, %v1676_v25, %v1680_v22  ;;  %v1309_v1 = vpop.f32.mrf.mxu1 }
 0x154   : > { %2445 = vmatmul.msk.bf16.gmra.mxu1 %vm303_vm0, %v2076_v8  ;;  %v1695_v14 = vsel %vm2620_vm15, %v1690_v28, %v1694_v21  ;;  %v1707_v37 = vunpack.c.l.b16 %v1681_v30  ;;  %v3120_v28 = vld [vmem:[%s3183_s4] ss:$0 sm:$0xff] }
 0x155   : > { %v1708_v33 = vunpack.c.l.b16 %v1695_v14  ;;  %v749_v34 = vpop.f32.mrf.mxu2 }
 0x156   : > { %v1180_v53 = vpop.f32.mrf.mxu0  ;;  %v750_v38 = vadd.f32 %v749_v34, %v3055_v62 }
 0x157   : > { %v3068_v23 = vpop.f32.mrf.mxu3  ;;  %v1712_v3 = vpack.c.b16 %v1708_v33, %v1707_v37 }
 0x15b   : > { %v1311_v59 = vpop.f32.mrf.mxu1 }
 0x15c   : > { %2404 = vmatmul.msk.bf16.gmra.mxu3 %vm303_vm0, %v1711_v19 }
 0x15d   : > { %v751_v0 = vpop.f32.mrf.mxu2 }
 0x15e   : > { %v3078_v54 = vpop.f32.mrf.mxu0  ;;  %v752_v62 = vadd.f32 %v751_v0, %v3064_v55 }
 0x15f   : > { %v3075_v31 = vpop.f32.mrf.mxu3 }
 0x163   : > { %v1314_v35 = vpop.f32.mrf.mxu1 }
 0x165   : > { %v3082_v43 = vpop.f32.mrf.mxu2 }
 0x166   : > { %v3084_v44 = vpop.f32.mrf.mxu0  ;;  %v755_v0 = vadd.f32 %v3082_v43, %v3046_v58 }
 0x16b   : > { %v3080_v61 = vpop.f32.mrf.mxu1 }
 0x16c   : > { %2405 = vmatmul.msk.bf16.gmra.mxu3 %vm303_vm0, %v1712_v3  ;;  %v969_v2 = vpop.f32.mrf.mxu3 }
 0x16d   : > { %v3088_v60 = vpop.f32.mrf.mxu2  ;;  %v989_v9 = vadd.f32 %v969_v2, %v745_v7 }
 0x16e   : > { %v3090_v46 = vpop.f32.mrf.mxu0 }
 0x16f   : > { %v1195_v6 = vadd.f32 %v1175_v29, %v989_v9 }
 0x171   : > { %v1329_v47 = vadd.f32 %v1309_v1, %v1195_v6 }
 0x173   : > { %v3086_v15 = vpop.f32.mrf.mxu1 }
 0x174   : > { %v971_v13 = vpop.f32.mrf.mxu3 }
 0x175   : > { %v3096_v11 = vpop.f32.mrf.mxu2  ;;  %v990_v16 = vadd.f32 %v971_v13, %v747_v17 }
 0x176   : > { %v3098_v49 = vpop.f32.mrf.mxu0 }
 0x177   : > { %v1196_v40 = vadd.f32 %v1177_v36, %v990_v16 }
 0x179   : > { %v1330_v4 = vadd.f32 %v1311_v59, %v1196_v40 }
 0x17b   : > { %v3092_v50 = vpop.f32.mrf.mxu1 }
 0x17d   : > { %v3104_v5 = vpop.f32.mrf.mxu2 }
 0x17e   : > { %v3106_v27 = vpop.f32.mrf.mxu0 }
 0x180   : > { %v974_v41 = vpop.f32.mrf.mxu3 }
 0x181   : > { %v991_v21 = vadd.f32 %v974_v41, %v750_v38 }
 0x183   : > { %v3100_v18 = vpop.f32.mrf.mxu1  ;;  %v1197_v33 = vadd.f32 %v1180_v53, %v991_v21 }
 0x185   : > { %v1539_v42 = vpop.f32.mrf.mxu2 }
 0x186   : > { %v1880_v48 = vpop.f32.mrf.mxu0  ;;  %v1559_v20 = vadd.f32 %v1539_v42, %v1329_v47  ;;  %v1331_v42 = vadd.f32 %v1314_v35, %v1197_v33 }
 0x188   : > { %v976_v45 = vpop.f32.mrf.mxu3 }
 0x189   : > { %v992_v41 = vadd.f32 %v976_v45, %v752_v62 }
 0x18b   : > { %v3108_v8 = vpop.f32.mrf.mxu1 }
 0x18d   : > { %v1541_v12 = vpop.f32.mrf.mxu2 }
 0x18e   : > { %v1882_v19 = vpop.f32.mrf.mxu0  ;;  %v1560_v30 = vadd.f32 %v1541_v12, %v1330_v4 }
 0x191   : > { %v3094_v52 = vpop.f32.mrf.mxu3 }
 0x192   : > { %v993_v47 = vadd.f32 %v3094_v52, %v755_v0 }
 0x195   : > { %v2110_v10 = vpop.f32.mrf.mxu1  ;;  %v1544_v22 = vpop.f32.mrf.mxu2 }
 0x196   : > { %v1885_v1 = vpop.f32.mrf.mxu0  ;;  %v1561_v7 = vadd.f32 %v1544_v22, %v1331_v42  ;;  %v757_v22 = vadd.f32 %v3088_v60, %v3057_v39 }
 0x199   : > { %v3102_v26 = vpop.f32.mrf.mxu3 }
 0x19a   : > { %v994_v21 = vadd.f32 %v3102_v26, %v757_v22  ;;  %v760_v26 = vadd.f32 %v3096_v11, %v3068_v23 }
 0x19c   : > { %v1200_v39 = vadd.f32 %v3090_v46, %v994_v21 }
 0x19d   : > { %v2112_v56 = vpop.f32.mrf.mxu1  ;;  %v1546_v34 = vpop.f32.mrf.mxu2 }
 0x19e   : > { %v1887_v55 = vpop.f32.mrf.mxu0  ;;  %v1334_v62 = vadd.f32 %v3092_v50, %v1200_v39 }
 0x1a8   : > { %v3110_v57 = vpop.f32.mrf.mxu3 }
 0x1ac   : > { %v2115_v36 = vpop.f32.mrf.mxu1 }
 0x1b0   : > { %v3113_v51 = vpop.f32.mrf.mxu3 }
 0x1b4   : > { %v2117_v35 = vpop.f32.mrf.mxu1 }
 0x1bf   : > { %v1746_v32 = vpop.f32.mrf.mxu3 }
 0x1c0   : > { %v1766_v25 = vadd.f32 %v1746_v32, %v1559_v20 }
 0x1c2   : > { %v1900_v24 = vadd.f32 %v1880_v48, %v1766_v25  ;;  %v1199_v25 = vadd.f32 %v3084_v44, %v993_v47 }
 0x1c4   : > { %v2130_v29 = vadd.f32 %v2110_v10, %v1900_v24  ;;  %v1198_v10 = vadd.f32 %v3078_v54, %v992_v41  ;;  %v1333_v4 = vadd.f32 %v3086_v15, %v1199_v25 }
 0x1c6   : > { %v2142_v14 = vadd.f32 %v3120_v28, %v2130_v29 }
 0x1c7   : > { %v1748_v37 = vpop.f32.mrf.mxu3 }
 0x1c8   : > { %vm2150_vm0 = vcmp.ge.f32.partialorder %v2142_v14, 0.0  ;;  %v2158_v63 = vmul.f32 0.1, %v2142_v14  ;;  %v1767_v3 = vadd.f32 %v1748_v37, %v1560_v30  ;;  %v2120_v30 = vpop.f32.mrf.mxu1 }
 0x1ca   : > { %v2166_v59 = vsel %vm2150_vm0, %v2142_v14, %v2158_v63  ;;  %v1901_v2 = vadd.f32 %v1882_v19, %v1767_v3  ;;  %v1332_v19 = vadd.f32 %v3080_v61, %v1198_v10  ;;  %v1890_v61 = vpop.f32.mrf.mxu0 }
 0x1cb   : > { %v2174_v13 = vpack.c.bf16 %v2166_v59, %v2166_v59 }
 0x1cc   : > { %v2131_v53 = vadd.f32 %v2112_v56, %v1901_v2  ;;  %v1549_v56 = vpop.f32.mrf.mxu2  ;;  %v1562_v54 = vadd.f32 %v1546_v34, %v1332_v19 }
 0x1cd   : > { %2182 = vst.msk [vmem:[%s3128_s26] sm:$0xf] %vm226_vm2, %v2174_v13  ;;  %v1563_v14 = vadd.f32 %v1549_v56, %v1333_v4 }
 0x1ce   : > { %v2143_v48 = vadd.f32 %v3120_v28, %v2131_v53 }
 0x1cf   : > { %v1751_v9 = vpop.f32.mrf.mxu3 }
 0x1d0   : > { %vm2151_vm9 = vcmp.ge.f32.partialorder %v2143_v48, 0.0  ;;  %v2159_v12 = vmul.f32 0.1, %v2143_v48  ;;  %v1768_v6 = vadd.f32 %v1751_v9, %v1561_v7  ;;  %v2122_v13 = vpop.f32.mrf.mxu1 }
 0x1d2   : > { %v2167_v17 = vsel %vm2151_vm9, %v2143_v48, %v2159_v12  ;;  %v1902_v45 = vadd.f32 %v1885_v1, %v1768_v6  ;;  %v1892_v2 = vpop.f32.mrf.mxu0 }
 0x1d3   : > { %v2175_v16 = vpack.c.bf16 %v2167_v17, %v2167_v17 }
 0x1d4   : > { %v2132_v20 = vadd.f32 %v2115_v36, %v1902_v45  ;;  %v1551_v1 = vpop.f32.mrf.mxu2  ;;  %v995_v36 = vadd.f32 %v3110_v57, %v760_v26  ;;  %v762_v57 = vadd.f32 %v3104_v5, %v3075_v31 }
 0x1d5   : > { %2183 = vst.msk [vmem:[%s3128_s26 + $0x4] sm:$0xf] %vm226_vm2, %v2175_v16  ;;  %v1564_v34 = vadd.f32 %v1551_v1, %v1334_v62 }
 0x1d6   : > { %v2144_v32 = vadd.f32 %v3120_v28, %v2132_v20  ;;  %v1201_v42 = vadd.f32 %v3098_v49, %v995_v36  ;;  %v996_v9 = vadd.f32 %v3113_v51, %v762_v57 }
 0x1d7   : > { %v1753_v40 = vpop.f32.mrf.mxu3 }
 0x1d8   : > { %vm2152_vm10 = vcmp.ge.f32.partialorder %v2144_v32, 0.0  ;;  %v2160_v58 = vmul.f32 0.1, %v2144_v32  ;;  %v1769_v43 = vadd.f32 %v1753_v40, %v1562_v54  ;;  %v1335_v10 = vadd.f32 %v3100_v18, %v1201_v42  ;;  %v2125_v45 = vpop.f32.mrf.mxu1 }
 0x1d9   : > { %v1202_v17 = vadd.f32 %v3106_v27, %v996_v9 }
 0x1da   : > { %v2168_v52 = vsel %vm2152_vm10, %v2144_v32, %v2160_v58  ;;  %v1903_v38 = vadd.f32 %v1887_v55, %v1769_v43  ;;  %v1895_v55 = vpop.f32.mrf.mxu0 }
 0x1db   : > { %v2176_v24 = vpack.c.bf16 %v2168_v52, %v2168_v52  ;;  %v1336_v18 = vadd.f32 %v3108_v8, %v1202_v17 }
 0x1dc   : > { %v2133_v29 = vadd.f32 %v2117_v35, %v1903_v38  ;;  %v1554_v53 = vpop.f32.mrf.mxu2 }
 0x1dd   : > { %2184 = vst.msk [vmem:[%s3128_s26 + $0x8] sm:$0xf] %vm226_vm2, %v2176_v24  ;;  %v1565_v6 = vadd.f32 %v1554_v53, %v1335_v10 }
 0x1de   : > { %v2145_v44 = vadd.f32 %v3120_v28, %v2133_v29 }
 0x1df   : > { %v1756_v37 = vpop.f32.mrf.mxu3 }
 0x1e0   : > { %vm2153_vm11 = vcmp.ge.f32.partialorder %v2145_v44, 0.0  ;;  %v2161_v60 = vmul.f32 0.1, %v2145_v44  ;;  %v1770_v33 = vadd.f32 %v1756_v37, %v1563_v14  ;;  %v2127_v43 = vpop.f32.mrf.mxu1 }
 0x1e2   : > { %v2169_v63 = vsel %vm2153_vm11, %v2145_v44, %v2161_v60  ;;  %v1904_v15 = vadd.f32 %v1890_v61, %v1770_v33  ;;  %v1897_v40 = vpop.f32.mrf.mxu0 }
 0x1e3   : > { %v2177_v3 = vpack.c.bf16 %v2169_v63, %v2169_v63 }
 0x1e4   : > { %v2134_v59 = vadd.f32 %v2120_v30, %v1904_v15  ;;  %v1556_v51 = vpop.f32.mrf.mxu2 }
 0x1e5   : > { %2185 = vst.msk [vmem:[%s3128_s26 + $0xc] sm:$0xf] %vm226_vm2, %v2177_v3  ;;  %v1566_v20 = vadd.f32 %v1556_v51, %v1336_v18 }
 0x1e6   : > { %v2146_v46 = vadd.f32 %v3120_v28, %v2134_v59 }
 0x1e7   : > { %v1758_v41 = vpop.f32.mrf.mxu3 }
 0x1e8   : > { %vm2154_vm12 = vcmp.ge.f32.partialorder %v2146_v46, 0.0  ;;  %v2162_v23 = vmul.f32 0.1, %v2146_v46  ;;  %v1771_v11 = vadd.f32 %v1758_v41, %v1564_v34 }
 0x1ea   : > { %v2170_v50 = vsel %vm2154_vm12, %v2146_v46, %v2162_v23  ;;  %v1905_v7 = vadd.f32 %v1892_v2, %v1771_v11 }
 0x1eb   : > { %v2178_v48 = vpack.c.bf16 %v2170_v50, %v2170_v50 }
 0x1ec   : > { %v2135_v12 = vadd.f32 %v2122_v13, %v1905_v7 }
 0x1ed   : > { %2186 = vst.msk [vmem:[%s3128_s26 + $0x10] sm:$0xf] %vm226_vm2, %v2178_v48 }
 0x1ee   : > { %v2147_v49 = vadd.f32 %v3120_v28, %v2135_v12 }
 0x1ef   : > { %v1761_v0 = vpop.f32.mrf.mxu3 }
 0x1f0   : > { %vm2155_vm13 = vcmp.ge.f32.partialorder %v2147_v49, 0.0  ;;  %v2163_v31 = vmul.f32 0.1, %v2147_v49  ;;  %v1772_v5 = vadd.f32 %v1761_v0, %v1565_v6 }
 0x1f2   : > { %v2171_v35 = vsel %vm2155_vm13, %v2147_v49, %v2163_v31  ;;  %v1906_v16 = vadd.f32 %v1895_v55, %v1772_v5 }
 0x1f3   : > { %v2179_v47 = vpack.c.bf16 %v2171_v35, %v2171_v35 }
 0x1f4   : > { %v2136_v19 = vadd.f32 %v2125_v45, %v1906_v16 }
 0x1f5   : > { %2187 = vst.msk [vmem:[%s3128_s26 + $0x14] sm:$0xf] %vm226_vm2, %v2179_v47 }
 0x1f6   : > { %v2148_v56 = vadd.f32 %v3120_v28, %v2136_v19 }
 0x1f7   : > { %v1763_v54 = vpop.f32.mrf.mxu3 }
 0x1f8   : > { %vm2156_vm14 = vcmp.ge.f32.partialorder %v2148_v56, 0.0  ;;  %v2164_v27 = vmul.f32 0.1, %v2148_v56  ;;  %v1773_v32 = vadd.f32 %v1763_v54, %v1566_v20 }
 0x1fa   : > { %v2172_v25 = vsel %vm2156_vm14, %v2148_v56, %v2164_v27  ;;  %v1907_v58 = vadd.f32 %v1897_v40, %v1773_v32 }
 0x1fb   : > { %v2180_v22 = vpack.c.bf16 %v2172_v25, %v2172_v25 }
 0x1fc   : > { %v2137_v52 = vadd.f32 %v2127_v43, %v1907_v58 }
 0x1fd   : > { %2188 = vst.msk [vmem:[%s3128_s26 + $0x18] sm:$0xf] %vm226_vm2, %v2180_v22 }
 0x1fe   : > { %v2149_v8 = vadd.f32 %v3120_v28, %v2137_v52 }
 0x200   : > { %vm2157_vm15 = vcmp.ge.f32.partialorder %v2149_v8, 0.0  ;;  %v2165_v38 = vmul.f32 0.1, %v2149_v8 }
 0x202   : > { %v2173_v61 = vsel %vm2157_vm15, %v2149_v8, %v2165_v38 }
 0x203   : > { %v2181_v24 = vpack.c.bf16 %v2173_v61, %v2173_v61 }
 0x205   : > { %2189 = vst.msk [vmem:[%s3128_s26 + $0x1c] sm:$0xf] %vm226_vm2, %v2181_v24 }
 0x206 PF: > { %s15_s18 = sadd.s32 1, %s2495_s18  }
 0x207   : > { %p12_p4 = scmp.ge.s32.totalorder %s15_s18, 4  }
 0x209   :  { %14 = sbr.rel (!%p12_p4) target bundleno = 1 (0x1), region = 81 }

// kernel: yolo_v2_netv2_pallas.12
= control target key start
LH: loop header
LB: loop body
LE: loop exit
PB: predicated region body
PF: predicated region fallthrough
CT: control target
= control target key end

     0   :  { %s2886_s15 = smov 0   ;;  %s4212_s0 = inlined_call_operand.vmem [shape: bf16[2,8,8,32], index: 0, kind: input, shape index: {}]   ;;  %s4213_s1 = inlined_call_operand.vmem [shape: bf16[4,32,64], index: 1, kind: input, shape index: {}]   ;;  %s4214_s2 = inlined_call_operand.vmem [shape: f32[1,32], index: 2, kind: input, shape index: {}]   ;;  %s4215_s3 = inlined_call_operand.vmem [shape: bf16[2,8,8,32], index: 3, kind: output, shape index: {0}]   ;;  %s4216_s4 = inlined_call_operand.vmem [shape: bf16[2,8,8,32], index: 4, kind: output, shape index: {1}]  }
   0x1 LB: > { %s2736_s16 = sadd.s32 4294967295, %s2857_s15   ;;  %p2740_p0 = scmp.ge.s32.totalorder %s2857_s15, 1  ;;  %s2857_s15 = sphi %s2886_s15, %s15_s15  }
   0x2   : > { %p165_p1 = scmp.lt.s32.totalorder %s2857_s15, 3 }
   0x4   : > { %p166_p2 = pnand %p2740_p0, %p165_p1 }
   0x6   : > { %169 = sbr.rel (%p166_p2) target bundleno = 567 (0x237), region = 32 }
   0xb   : > { %v2837_v0 = vld [vmem:[%s4213_s1 + $0x28] sm:$0xff]  ;;  %v2835_v1 = vld [vmem:[%s4213_s1 + $0x18] sm:$0xff]  ;;  %vm213_vm0 = vcmask 257024   ;;  %vm215_vm1 = vcmask 254976   ;;  %p196_p3 = scmp.lt.s32.totalorder %s2736_s16, 1  ;;  %v2836_v3 = vld [vmem:[%s4213_s1 + $0x20] sm:$0xff] }
   0xc   : > { %v2833_v2 = vld [vmem:[%s4213_s1 + $0x8] sm:$0xff]  ;;  %2431 = vmatpush.bf16.msra.mxu2 %v2837_v0  ;;  %2296 = vmatpush.bf16.msra.mxu0 %v2835_v1  ;;  %v2859_v4 = vmov 4048220490   ;;  %vm224_vm2 = vcmask 253952   ;;  %vm237_vm3 = vcmask 254977   ;;  %vm299_vm4 = vcmask 257025  }
   0xd   : > { %214 = vst.msk [vmem:[#allocation2] sm:$0xf] %vm213_vm0, %v2859_v4  ;;  %2361 = vmatpush.bf16.msra.mxu1 %v2833_v2  ;;  %s4324_s16 = smov (!%p196_p3, %s2736_s16), 1  ;;  %vm388_vm5 = vcmask 1046528   ;;  %vm509_vm6 = vcmask 1045504   ;;  %vm630_vm7 = vcmask 1044480  }
   0xe   : > { %216 = vst.msk [vmem:[#allocation2 + $0x4] sm:$0x3] %vm215_vm1, %v2859_v4  ;;  %s2920_s25 = sshll.u32 %s4324_s16, 5  ;;  %vm751_vm8 = vcmask 1043456   ;;  %vm2277_vm9 = vcmask 261120   ;;  %s2860_s13 = smov 96  }
   0xf   : > { %217 = vst.msk [vmem:[#allocation2 + $0x8] sm:$0xf] %vm213_vm0, %v2859_v4  ;;  %s2932_s28 = scalar_lea.vmem %s4212_s0, %s2920_s25  ;;  %s4165_s17 = scalar_lea.vmem %s4215_s3, %s2920_s25 }
  0x10   : > { %218 = vst.msk [vmem:[#allocation2 + $0xc] sm:$0x3] %vm215_vm1, %v2859_v4  ;;  %2432 = vmatpush.bf16.msra.mxu2 %v2836_v3  ;;  %v2943_v5 = vld [vmem:[%s2932_s28] sm:$0xf]  ;;  %v2946_v6 = vld [vmem:[%s2932_s28 + $0x4] sm:$0xf]  ;;  %s210_s20 = scalar_lea.vmem %s4216_s4, %s2920_s25 }
  0x11   : > { %220 = vst.msk [vmem:[#allocation2 + $0x50] sm:$0xf] %vm213_vm0, %v2859_v4  ;;  %v2951_v7 = vld [vmem:[%s2932_s28 + $0x8] sm:$0xf]  ;;  %v2954_v8 = vld [vmem:[%s2932_s28 + $0xc] sm:$0xf] }
  0x12   : > { %221 = vst.msk [vmem:[#allocation2 + $0x54] sm:$0x3] %vm215_vm1, %v2859_v4  ;;  %v2959_v9 = vld [vmem:[%s2932_s28 + $0x10] sm:$0xf]  ;;  %v2962_v10 = vld [vmem:[%s2932_s28 + $0x14] sm:$0xf] }
  0x13   : > { %222 = vst.msk [vmem:[#allocation2 + $0x58] sm:$0xf] %vm213_vm0, %v2859_v4  ;;  %v2967_v11 = vld [vmem:[%s2932_s28 + $0x18] sm:$0xf]  ;;  %v266_v12 = vrot.slane %v2943_v5, 7  ;;  %v268_v13 = vrot.slane %v2946_v6, 7 }
  0x14   : > { %223 = vst.msk [vmem:[#allocation2 + $0x5c] sm:$0x3] %vm215_vm1, %v2859_v4  ;;  %v2978_v16 = vld [vmem:[%s2932_s28 + $0x1c] sm:$0xf]  ;;  %v270_v17 = vrot.slane %v2951_v7, 7  ;;  %v272_v18 = vrot.slane %v2954_v8, 7 }
  0x15   : > { %225 = vst.msk [vmem:[#allocation2] sm:$0x1] %vm224_vm2, %v2859_v4  ;;  %v328_v15 = vld [vmem:[#allocation2 + $0x4] sm:$0x1]  ;;  %v274_v21 = vrot.slane %v2959_v9, 7  ;;  %v276_v22 = vrot.slane %v2962_v10, 7 }
  0x16   : > { %226 = vst.msk [vmem:[#allocation2 + $0x8] sm:$0x1] %vm224_vm2, %v2859_v4  ;;  %v352_v24 = vunpack.c.l.bf16 %v328_v15  ;;  %v2991_v25 = vld [vmem:[#allocation2] sm:$0xe]  ;;  %v2997_v26 = vrot.slane %v266_v12, 4  ;;  %v3001_v27 = vrot.slane %v268_v13, 4 }
  0x17   : > { %227 = vst.msk [vmem:[#allocation2 + $0x10] sm:$0x1] %vm224_vm2, %v2859_v4  ;;  %v329_v20 = vld [vmem:[#allocation2 + $0xc] sm:$0x1]  ;;  %v278_v28 = vrot.slane %v2967_v11, 7  ;;  %v280_v29 = vrot.slane %v2978_v16, 7  ;;  %v485_v38 = vunpack.c.l.bf16 %v2991_v25 }
  0x18   : > { %228 = vst.msk [vmem:[#allocation2 + $0x18] sm:$0x1] %vm224_vm2, %v2859_v4  ;;  %v353_v33 = vunpack.c.l.bf16 %v329_v20  ;;  %v3012_v34 = vrot.slane %v270_v17, 4  ;;  %v3016_v35 = vrot.slane %v272_v18, 4  ;;  %v462_v37 = vld [vmem:[#allocation2 + $0x8] sm:$0xe] }
  0x19   : > { %229 = vst.msk [vmem:[#allocation2 + $0x20] sm:$0x1] %vm224_vm2, %v2859_v4  ;;  %v338_v30 = vld [vmem:[#allocation2 + $0x54] sm:$0x1]  ;;  %v3023_v39 = vrot.slane %v274_v21, 4  ;;  %v390_v42 = vrot.slane %v352_v24, 1  ;;  %v486_v48 = vunpack.c.l.bf16 %v462_v37 }
  0x1a   : > { %230 = vst.msk [vmem:[#allocation2 + $0x28] sm:$0x1] %vm224_vm2, %v2859_v4  ;;  %v362_v36 = vunpack.c.l.bf16 %v338_v30  ;;  %v393_v47 = vrot.slane %v353_v33, 1  ;;  %v510_v51 = vrot.slane %v485_v38, 2  ;;  %v3036_v56 = vld [vmem:[#allocation2 + $0x50] sm:$0xe] }
  0x1b   : > { %231 = vst.msk [vmem:[#allocation2 + $0x30] sm:$0x1] %vm224_vm2, %v2859_v4  ;;  %v339_v31 = vld [vmem:[#allocation2 + $0x5c] sm:$0x1]  ;;  %v3040_v58 = vld [vmem:[#allocation2 + $0x58] sm:$0xe]  ;;  %v495_v59 = vunpack.c.l.bf16 %v3036_v56 }
  0x1c   : > { %232 = vst.msk [vmem:[#allocation2 + $0x38] sm:$0x1] %vm224_vm2, %v2859_v4  ;;  %v2973_v14 = vld [vmem:[#allocation2] sm:$0xf]  ;;  %v363_v40 = vunpack.c.l.bf16 %v339_v31  ;;  %v420_v50 = vrot.slane %v362_v36, 1  ;;  %v511_v60 = vrot.slane %v352_v24, 2  ;;  %v4219_v63 = vunpack.c.l.bf16 %v3040_v58 }
  0x1d   : > { %233 = vst.msk [vmem:[#allocation2 + $0x40] sm:$0x1] %vm224_vm2, %v2859_v4  ;;  %v2984_v19 = vld [vmem:[#allocation2 + $0x8] sm:$0xf]  ;;  %v340_v23 = vunpack.c.l.bf16 %v2973_v14  ;;  %v513_v0 = vrot.slane %v486_v48, 2  ;;  %v514_v1 = vrot.slane %v353_v33, 2 }
  0x1e   : > { %234 = vst.msk [vmem:[#allocation2 + $0x48] sm:$0x1] %vm224_vm2, %v2859_v4  ;;  %v341_v32 = vunpack.c.l.bf16 %v2984_v19  ;;  %v423_v55 = vrot.slane %v363_v40, 1  ;;  %v541_v15 = vrot.slane %v362_v36, 2  ;;  %v540_v24 = vrot.slane %v495_v59, 2 }
  0x1f   : > { %235 = vst.msk [vmem:[#allocation2 + $0x50] sm:$0x1] %vm224_vm2, %v2859_v4  ;;  %v389_v41 = vrot.slane %v340_v23, 1  ;;  %v543_v25 = vrot.slane %v4219_v63, 2  ;;  %v544_v30 = vrot.slane %v363_v40, 2  ;;  %v631_v31 = vrot.slane %v485_v38, 3 }
  0x20   : > { %236 = vst.msk [vmem:[#allocation2 + $0x58] sm:$0x1] %vm224_vm2, %v2859_v4  ;;  %v392_v46 = vrot.slane %v341_v32, 1  ;;  %v634_v33 = vrot.slane %v486_v48, 3  ;;  %v3091_v38 = vsel %vm509_vm6, %v540_v24, %v541_v15 }
  0x21   : > { %238 = vst.msk [vmem:[#allocation2 + $0x4] sm:$0x2] %vm237_vm3, %v2859_v4  ;;  %v391_v53 = vsel %vm388_vm5, %v389_v41, %v390_v42  ;;  %v3094_v40 = vsel %vm509_vm6, %v543_v25, %v544_v30 }
  0x22   : > { %239 = vst.msk [vmem:[#allocation2 + $0xc] sm:$0x2] %vm237_vm3, %v2859_v4  ;;  %v394_v62 = vsel %vm388_vm5, %v392_v46, %v393_v47  ;;  %v437_v14 = vmax.f32 %v340_v23, %v391_v53  ;;  %v512_v23 = vsel %vm509_vm6, %v510_v51, %v511_v60 }
  0x23   : > { %240 = vst.msk [vmem:[#allocation2 + $0x14] sm:$0x2] %vm237_vm3, %v2859_v4 }
  0x24   : > { %241 = vst.msk [vmem:[#allocation2 + $0x1c] sm:$0x2] %vm237_vm3, %v2859_v4  ;;  %v558_v41 = vmax.f32 %v437_v14, %v512_v23 }
  0x25   : > { %242 = vst.msk [vmem:[#allocation2 + $0x24] sm:$0x2] %vm237_vm3, %v2859_v4 }
  0x26   : > { %243 = vst.msk [vmem:[#allocation2 + $0x2c] sm:$0x2] %vm237_vm3, %v2859_v4  ;;  %v326_v43 = vld [vmem:[#allocation2 + $0x50] sm:$0xf] }
  0x27   : > { %244 = vst.msk [vmem:[#allocation2 + $0x34] sm:$0x2] %vm237_vm3, %v2859_v4  ;;  %v327_v44 = vld [vmem:[#allocation2 + $0x58] sm:$0xf]  ;;  %v350_v45 = vunpack.c.l.bf16 %v326_v43  ;;  %v3099_v43 = vld [vmem:[#allocation2] sm:$0xc] }
  0x28   : > { %245 = vst.msk [vmem:[#allocation2 + $0x3c] sm:$0x2] %vm237_vm3, %v2859_v4  ;;  %v351_v49 = vunpack.c.l.bf16 %v327_v44  ;;  %v3031_v52 = vld [vmem:[#allocation2 + $0x4] sm:$0x3]  ;;  %v3101_v44 = vld [vmem:[#allocation2 + $0x8] sm:$0xc] }
  0x29   : > { %246 = vst.msk [vmem:[#allocation2 + $0x44] sm:$0x2] %vm237_vm3, %v2859_v4  ;;  %v419_v54 = vrot.slane %v350_v45, 1  ;;  %v4218_v61 = vunpack.c.l.bf16 %v3031_v52  ;;  %v3048_v2 = vld [vmem:[#allocation2 + $0xc] sm:$0x3] }
  0x2a   : > { %247 = vst.msk [vmem:[#allocation2 + $0x4c] sm:$0x2] %vm237_vm3, %v2859_v4  ;;  %v422_v57 = vrot.slane %v351_v49, 1  ;;  %v4217_v19 = vunpack.c.l.bf16 %v3048_v2 }
  0x2b   : > { %248 = vst.msk [vmem:[#allocation2 + $0x54] sm:$0x2] %vm237_vm3, %v2859_v4  ;;  %v421_v3 = vsel %vm388_vm5, %v419_v54, %v420_v50  ;;  %v632_v5 = vrot.slane %v4218_v61, 3 }
  0x2c   : > { %249 = vst.msk [vmem:[#allocation2 + $0x5c] sm:$0x2] %vm237_vm3, %v2859_v4  ;;  %v424_v20 = vsel %vm388_vm5, %v422_v57, %v423_v55  ;;  %v438_v4 = vmax.f32 %v341_v32, %v394_v62  ;;  %v635_v36 = vrot.slane %v4217_v19, 3  ;;  %v279_v32 = vrot.slane %v278_v28, 4 }
  0x2d   : > { %300 = vst.msk [vmem:[#allocation2 + $0x10] sm:$0xe] %vm299_vm4, %v266_v12  ;;  %v515_v12 = vsel %vm509_vm6, %v513_v0, %v514_v1  ;;  %v3079_v37 = vmax.f32 %v350_v45, %v421_v3  ;;  %v3081_v6 = vmax.f32 %v351_v49, %v424_v20  ;;  %v633_v42 = vsel %vm630_vm7, %v631_v31, %v632_v5 }
  0x2e   : > { %301 = vst.msk [vmem:[#allocation2 + $0x14] sm:$0x1] %vm224_vm2, %v2997_v26  ;;  %v277_v26 = vrot.slane %v276_v22, 4  ;;  %v636_v45 = vsel %vm630_vm7, %v634_v33, %v635_v36 }
  0x2f   : > { %302 = vst.msk [vmem:[#allocation2 + $0x18] sm:$0xe] %vm299_vm4, %v268_v13  ;;  %v3085_v13 = vrot.slane %v280_v29, 4 }
  0x30   : > { %303 = vst.msk [vmem:[#allocation2 + $0x1c] sm:$0x1] %vm224_vm2, %v3001_v27  ;;  %v559_v27 = vmax.f32 %v438_v4, %v515_v12 }
  0x31   : > { %304 = vst.msk [vmem:[#allocation2 + $0x20] sm:$0xe] %vm299_vm4, %v270_v17 }
  0x32   : > { %305 = vst.msk [vmem:[#allocation2 + $0x24] sm:$0x1] %vm224_vm2, %v3012_v34  ;;  %v3106_v7 = vld [vmem:[#allocation2 + $0x54] sm:$0x3] }
  0x33   : > { %306 = vst.msk [vmem:[#allocation2 + $0x28] sm:$0xe] %vm299_vm4, %v272_v18  ;;  %v3108_v17 = vld [vmem:[#allocation2 + $0x5c] sm:$0x3] }
  0x34   : > { %307 = vst.msk [vmem:[#allocation2 + $0x2c] sm:$0x1] %vm224_vm2, %v3016_v35  ;;  %v318_v34 = vld [vmem:[#allocation2 + $0x10] sm:$0xf]  ;;  %v3125_v35 = vmax.f32 %v558_v41, %v633_v42 }
  0x35   : > { %v3113_v46 = vld [vmem:[#allocation2 + $0x10] sm:$0xe]  ;;  %308 = vst.msk [vmem:[#allocation2 + $0x30] sm:$0xe] %vm299_vm4, %v274_v21  ;;  %v330_v18 = vld [vmem:[#allocation2 + $0x14] sm:$0x1]  ;;  %v342_v48 = vunpack.c.l.bf16 %v318_v34  ;;  %v3133_v21 = vmax.f32 %v559_v27, %v636_v45 }
  0x36   : > { %v487_v49 = vunpack.c.l.bf16 %v3113_v46  ;;  %v3123_v50 = vld [vmem:[#allocation2 + $0x14] sm:$0x3]  ;;  %309 = vst.msk [vmem:[#allocation2 + $0x34] sm:$0x1] %vm224_vm2, %v3023_v39  ;;  %v319_v53 = vld [vmem:[#allocation2 + $0x18] sm:$0xf]  ;;  %v354_v54 = vunpack.c.l.bf16 %v330_v18 }
  0x37   : > { %v3130_v55 = vld [vmem:[#allocation2 + $0x18] sm:$0xe]  ;;  %310 = vst.msk [vmem:[#allocation2 + $0x38] sm:$0xe] %vm299_vm4, %v276_v22  ;;  %v331_v60 = vld [vmem:[#allocation2 + $0x1c] sm:$0x1]  ;;  %v343_v62 = vunpack.c.l.bf16 %v319_v53  ;;  %v608_v4 = vunpack.c.l.bf16 %v3123_v50 }
  0x38   : > { %v395_v0 = vrot.slane %v342_v48, 1  ;;  %v488_v1 = vunpack.c.l.bf16 %v3130_v55  ;;  %v516_v39 = vrot.slane %v487_v49, 2  ;;  %311 = vst.msk [vmem:[#allocation2 + $0x3c] sm:$0x1] %vm224_vm2, %v277_v26  ;;  %v320_v3 = vld [vmem:[#allocation2 + $0x20] sm:$0xf]  ;;  %v355_v14 = vunpack.c.l.bf16 %v331_v60 }
  0x39   : > { %v396_v15 = vrot.slane %v354_v54, 1  ;;  %v517_v20 = vrot.slane %v354_v54, 2  ;;  %312 = vst.msk [vmem:[#allocation2 + $0x40] sm:$0xe] %vm299_vm4, %v278_v28  ;;  %v332_v10 = vld [vmem:[#allocation2 + $0x24] sm:$0x1]  ;;  %v344_v22 = vunpack.c.l.bf16 %v320_v3 }
  0x3a   : > { %v398_v25 = vrot.slane %v343_v62, 1  ;;  %v519_v30 = vrot.slane %v488_v1, 2  ;;  %313 = vst.msk [vmem:[#allocation2 + $0x44] sm:$0x1] %vm224_vm2, %v279_v32  ;;  %v321_v23 = vld [vmem:[#allocation2 + $0x28] sm:$0xf]  ;;  %v356_v31 = vunpack.c.l.bf16 %v332_v10 }
  0x3b   : > { %v397_v5 = vsel %vm388_vm5, %v395_v0, %v396_v15  ;;  %v399_v12 = vrot.slane %v355_v14, 1  ;;  %v3153_v33 = vsel %vm509_vm6, %v516_v39, %v517_v20  ;;  %314 = vst.msk [vmem:[#allocation2 + $0x48] sm:$0xe] %vm299_vm4, %v280_v29  ;;  %v333_v11 = vld [vmem:[#allocation2 + $0x2c] sm:$0x1]  ;;  %v345_v28 = vunpack.c.l.bf16 %v321_v23 }
  0x3c   : > { %v401_v36 = vrot.slane %v344_v22, 1  ;;  %v3158_v26 = vmax.f32 %v342_v48, %v397_v5  ;;  %v520_v41 = vrot.slane %v355_v14, 2  ;;  %315 = vst.msk [vmem:[#allocation2 + $0x4c] sm:$0x1] %vm224_vm2, %v3085_v13  ;;  %v322_v32 = vld [vmem:[#allocation2 + $0x30] sm:$0xf]  ;;  %v357_v27 = vunpack.c.l.bf16 %v333_v11 }
  0x3d   : > { %v400_v42 = vsel %vm388_vm5, %v398_v25, %v399_v12  ;;  %v402_v45 = vrot.slane %v356_v31, 1  ;;  %v523_v34 = vrot.slane %v356_v31, 2  ;;  %v334_v18 = vld [vmem:[#allocation2 + $0x34] sm:$0x1]  ;;  %v346_v53 = vunpack.c.l.bf16 %v322_v32  ;;  %v3165_v29 = vld [vmem:[#allocation2 + $0x20] sm:$0xe] }
  0x3e   : > { %v404_v16 = vrot.slane %v345_v28, 1  ;;  %v3163_v54 = vmax.f32 %v343_v62, %v400_v42  ;;  %v3168_v48 = vsel %vm509_vm6, %v519_v30, %v520_v41  ;;  %v323_v60 = vld [vmem:[#allocation2 + $0x38] sm:$0xf]  ;;  %v358_v0 = vunpack.c.l.bf16 %v334_v18  ;;  %v3171_v3 = vld [vmem:[#allocation2 + $0x28] sm:$0xe] }
  0x3f   : > { %v403_v13 = vsel %vm388_vm5, %v401_v36, %v402_v45  ;;  %v405_v39 = vrot.slane %v357_v27, 1  ;;  %v489_v14 = vunpack.c.l.bf16 %v3165_v29  ;;  %v335_v15 = vld [vmem:[#allocation2 + $0x3c] sm:$0x1]  ;;  %v347_v20 = vunpack.c.l.bf16 %v323_v60  ;;  %v3176_v62 = vld [vmem:[#allocation2 + $0x30] sm:$0xe] }
  0x40   : > { %v407_v10 = vrot.slane %v346_v53, 1  ;;  %v3174_v25 = vmax.f32 %v344_v22, %v403_v13  ;;  %v490_v23 = vunpack.c.l.bf16 %v3171_v3  ;;  %v324_v30 = vld [vmem:[#allocation2 + $0x40] sm:$0xf]  ;;  %v359_v31 = vunpack.c.l.bf16 %v335_v15  ;;  %v3180_v11 = vld [vmem:[#allocation2 + $0x38] sm:$0xe] }
  0x41   : > { %v406_v5 = vsel %vm388_vm5, %v404_v16, %v405_v39  ;;  %v408_v12 = vrot.slane %v358_v0, 1  ;;  %v491_v36 = vunpack.c.l.bf16 %v3176_v62  ;;  %v336_v41 = vld [vmem:[#allocation2 + $0x44] sm:$0x1]  ;;  %v348_v32 = vunpack.c.l.bf16 %v324_v30  ;;  %v3185_v22 = vld [vmem:[#allocation2 + $0x40] sm:$0xe] }
  0x42   : > { %v410_v42 = vrot.slane %v347_v20, 1  ;;  %v3183_v45 = vmax.f32 %v345_v28, %v406_v5  ;;  %v492_v18 = vunpack.c.l.bf16 %v3180_v11  ;;  %v325_v60 = vld [vmem:[#allocation2 + $0x48] sm:$0xf]  ;;  %v360_v13 = vunpack.c.l.bf16 %v336_v41 }
  0x43   : > { %v409_v15 = vsel %vm388_vm5, %v407_v10, %v408_v12  ;;  %v411_v19 = vrot.slane %v359_v31, 1  ;;  %v3189_v16 = vld [vmem:[#allocation2 + $0x48] sm:$0xe]  ;;  %v493_v39 = vunpack.c.l.bf16 %v3185_v22  ;;  %v337_v57 = vld [vmem:[#allocation2 + $0x4c] sm:$0x1]  ;;  %v349_v61 = vunpack.c.l.bf16 %v325_v60 }
  0x44   : > { %v413_v51 = vrot.slane %v348_v32, 1  ;;  %v3192_v30 = vmax.f32 %v346_v53, %v409_v15  ;;  %v494_v28 = vunpack.c.l.bf16 %v3189_v16  ;;  %v361_v5 = vunpack.c.l.bf16 %v337_v57 }
  0x45   : > { %v412_v8 = vsel %vm388_vm5, %v410_v42, %v411_v19  ;;  %v414_v47 = vrot.slane %v360_v13, 1  ;;  %v522_v41 = vrot.slane %v489_v14, 2  ;;  %v416_v10 = vrot.slane %v349_v61, 1 }
  0x46   : > { %v3198_v12 = vmax.f32 %v347_v20, %v412_v8  ;;  %v525_v24 = vrot.slane %v490_v23, 2  ;;  %v526_v63 = vrot.slane %v357_v27, 2  ;;  %v417_v53 = vrot.slane %v361_v5, 1 }
  0x47   : > { %v415_v60 = vsel %vm388_vm5, %v413_v51, %v414_v47  ;;  %v3204_v15 = vsel %vm509_vm6, %v522_v41, %v523_v34  ;;  %v528_v19 = vrot.slane %v491_v36, 2  ;;  %v529_v8 = vrot.slane %v358_v0, 2  ;;  %v3225_v0 = vld [vmem:[#allocation2 + $0x1c] sm:$0x3] }
  0x48   : > { %v3208_v57 = vmax.f32 %v348_v32, %v415_v60  ;;  %v3211_v42 = vsel %vm509_vm6, %v525_v24, %v526_v63  ;;  %v531_v20 = vrot.slane %v492_v18, 2  ;;  %v418_v27 = vsel %vm388_vm5, %v416_v10, %v417_v53  ;;  %v3227_v32 = vld [vmem:[#allocation2 + $0x24] sm:$0x3]  ;;  %v3239_v60 = vld [vmem:[#allocation2 + $0x2c] sm:$0x3] }
  0x49   : > { %v532_v9 = vrot.slane %v359_v31, 2  ;;  %v534_v47 = vrot.slane %v493_v39, 2  ;;  %v535_v51 = vrot.slane %v360_v13, 2  ;;  %v3218_v34 = vmax.f32 %v349_v61, %v418_v27  ;;  %v3241_v53 = vld [vmem:[#allocation2 + $0x34] sm:$0x3] }
  0x4a   : > { %v3221_v41 = vsel %vm509_vm6, %v528_v19, %v529_v8  ;;  %v537_v63 = vrot.slane %v494_v28, 2  ;;  %v538_v24 = vrot.slane %v361_v5, 2  ;;  %v560_v61 = vmax.f32 %v3158_v26, %v3153_v33  ;;  %v3243_v5 = vld [vmem:[#allocation2 + $0x3c] sm:$0x3]  ;;  %v3252_v26 = vld [vmem:[#allocation2 + $0x44] sm:$0x3] }
  0x4b   : > { %v3230_v10 = vsel %vm509_vm6, %v531_v20, %v532_v9  ;;  %v3233_v31 = vsel %vm509_vm6, %v534_v47, %v535_v51  ;;  %v561_v13 = vmax.f32 %v3163_v54, %v3168_v48  ;;  %v562_v9 = vmax.f32 %v3174_v25, %v3204_v15  ;;  %v3254_v54 = vld [vmem:[#allocation2 + $0x4c] sm:$0x3] }
  0x4c   : > { %v539_v19 = vsel %vm509_vm6, %v537_v63, %v538_v24  ;;  %v563_v8 = vmax.f32 %v3183_v45, %v3211_v42  ;;  %v564_v33 = vmax.f32 %v3192_v30, %v3221_v41  ;;  %v565_v48 = vmax.f32 %v3198_v12, %v3230_v10 }
  0x4d   : > { %v566_v20 = vmax.f32 %v3208_v57, %v3233_v31  ;;  %v567_v27 = vmax.f32 %v3218_v34, %v539_v19  ;;  %v609_v25 = vunpack.c.l.bf16 %v3225_v0  ;;  %v610_v15 = vunpack.c.l.bf16 %v3227_v32 }
  0x4e   : > { %v611_v45 = vunpack.c.l.bf16 %v3239_v60  ;;  %v612_v30 = vunpack.c.l.bf16 %v3241_v53  ;;  %v613_v42 = vunpack.c.l.bf16 %v3243_v5  ;;  %v614_v47 = vunpack.c.l.bf16 %v3252_v26 }
  0x4f   : > { %v615_v51 = vunpack.c.l.bf16 %v3254_v54  ;;  %v637_v12 = vrot.slane %v487_v49, 3  ;;  %v638_v57 = vrot.slane %v608_v4, 3  ;;  %v640_v34 = vrot.slane %v488_v1, 3 }
  0x50   : > { %v641_v41 = vrot.slane %v609_v25, 3  ;;  %v643_v63 = vrot.slane %v489_v14, 3  ;;  %v644_v24 = vrot.slane %v610_v15, 3  ;;  %v646_v46 = vrot.slane %v490_v23, 3 }
  0x51   : > { %v639_v10 = vsel %vm630_vm7, %v637_v12, %v638_v57  ;;  %v647_v49 = vrot.slane %v611_v45, 3  ;;  %v649_v55 = vrot.slane %v491_v36, 3  ;;  %v650_v29 = vrot.slane %v612_v30, 3 }
  0x52   : > { %v642_v1 = vsel %vm630_vm7, %v640_v34, %v641_v41  ;;  %v645_v31 = vsel %vm630_vm7, %v643_v63, %v644_v24  ;;  %v652_v14 = vrot.slane %v492_v18, 3  ;;  %v653_v3 = vrot.slane %v613_v42, 3  ;;  %v705_v24 = vld [vmem:[#allocation2 + $0x10] sm:$0xc] }
  0x53   : > { %v648_v19 = vsel %vm630_vm7, %v646_v46, %v647_v49  ;;  %v655_v23 = vrot.slane %v493_v39, 3  ;;  %v656_v62 = vrot.slane %v614_v47, 3  ;;  %v651_v36 = vsel %vm630_vm7, %v649_v55, %v650_v29  ;;  %v706_v46 = vld [vmem:[#allocation2 + $0x18] sm:$0xc]  ;;  %v708_v29 = vld [vmem:[#allocation2 + $0x28] sm:$0xc] }
  0x54   : > { %v658_v12 = vrot.slane %v494_v28, 3  ;;  %v659_v11 = vrot.slane %v615_v51, 3  ;;  %v661_v18 = vrot.slane %v495_v59, 3  ;;  %v654_v57 = vsel %vm630_vm7, %v652_v14, %v653_v3  ;;  %v707_v59 = vld [vmem:[#allocation2 + $0x20] sm:$0xc] }
  0x55   : > { %v657_v34 = vsel %vm630_vm7, %v655_v23, %v656_v62  ;;  %v4237_v22 = vunpack.c.l.bf16 %v3106_v7  ;;  %v4238_v41 = vunpack.c.l.bf16 %v3040_v58  ;;  %v4239_v28 = vunpack.c.l.bf16 %v3108_v17  ;;  %v709_v62 = vld [vmem:[#allocation2 + $0x30] sm:$0xc] }
  0x56   : > { %v660_v16 = vsel %vm630_vm7, %v658_v12, %v659_v11  ;;  %v3316_v55 = vmax.f32 %v560_v61, %v639_v10  ;;  %v3318_v56 = vmax.f32 %v561_v13, %v642_v1  ;;  %v3321_v3 = vmax.f32 %v562_v9, %v645_v31  ;;  %v711_v12 = vld [vmem:[#allocation2 + $0x40] sm:$0xc]  ;;  %v712_v13 = vld [vmem:[#allocation2 + $0x48] sm:$0xc]  ;;  %v713_v1 = vld [vmem:[#allocation2 + $0x50] sm:$0xc] }
  0x57   : > { %v662_v39 = vrot.slane %v4237_v22, 3  ;;  %v664_v63 = vrot.slane %v4238_v41, 3  ;;  %v665_v49 = vrot.slane %v4239_v28, 3  ;;  %v3323_v23 = vmax.f32 %v563_v8, %v648_v19  ;;  %v710_v22 = vld [vmem:[#allocation2 + $0x38] sm:$0xc] }
  0x58   : > { %v3325_v58 = vmax.f32 %v564_v33, %v651_v36  ;;  %v686_v41 = vmax.f32 %v565_v48, %v654_v57  ;;  %v687_v61 = vmax.f32 %v566_v20, %v657_v34  ;;  %v688_v10 = vmax.f32 %v567_v27, %v660_v16  ;;  %v714_v28 = vld [vmem:[#allocation2 + $0x58] sm:$0xc] }
  0x59   : > { %v663_v14 = vsel %vm630_vm7, %v661_v18, %v662_v39  ;;  %v666_v11 = vsel %vm630_vm7, %v664_v63, %v665_v49  ;;  %v4240_v18 = vmax.f32 %v3079_v37, %v3091_v38  ;;  %v4241_v8 = vmax.f32 %v3081_v6, %v3094_v40 }
  0x5a   : > { %v729_v31 = vunpack.c.l.bf16 %v705_v24  ;;  %v730_v19 = vunpack.c.l.bf16 %v706_v46  ;;  %v731_v36 = vunpack.c.l.bf16 %v707_v59  ;;  %v732_v39 = vunpack.c.l.bf16 %v708_v29 }
  0x5b   : > { %v689_v9 = vmax.f32 %v4240_v18, %v663_v14  ;;  %v3334_v33 = vmax.f32 %v4241_v8, %v666_v11  ;;  %v733_v63 = vunpack.c.l.bf16 %v709_v62  ;;  %v734_v48 = vunpack.c.l.bf16 %v710_v22 }
  0x5c   : > { %v735_v20 = vunpack.c.l.bf16 %v711_v12  ;;  %v736_v27 = vunpack.c.l.bf16 %v712_v13  ;;  %v737_v57 = vunpack.c.l.bf16 %v713_v1  ;;  %v738_v34 = vunpack.c.l.bf16 %v714_v28 }
  0x5d   : > { %v4242_v16 = vunpack.c.l.bf16 %v3099_v43  ;;  %v4243_v38 = vunpack.c.l.bf16 %v3031_v52  ;;  %v4244_v6 = vunpack.c.l.bf16 %v3101_v44  ;;  %v4245_v24 = vunpack.c.l.bf16 %v3048_v2 }
  0x5e   : > { %v758_v59 = vrot.slane %v729_v31, 4  ;;  %v759_v29 = vrot.slane %v608_v4, 4  ;;  %v761_v14 = vrot.slane %v730_v19, 4  ;;  %v762_v43 = vrot.slane %v609_v25, 4 }
  0x5f   : > { %v752_v37 = vrot.slane %v4242_v16, 4  ;;  %v753_v49 = vrot.slane %v4243_v38, 4  ;;  %v755_v40 = vrot.slane %v4244_v6, 4  ;;  %v756_v46 = vrot.slane %v4245_v24, 4 }
  0x60   : > { %v764_v22 = vrot.slane %v731_v36, 4  ;;  %v765_v52 = vrot.slane %v610_v15, 4  ;;  %v760_v12 = vsel %vm751_vm8, %v758_v59, %v759_v29  ;;  %v767_v2 = vrot.slane %v732_v39, 4 }
  0x61   : > { %v754_v62 = vsel %vm751_vm8, %v752_v37, %v753_v49  ;;  %v757_v44 = vsel %vm751_vm8, %v755_v40, %v756_v46  ;;  %v768_v11 = vrot.slane %v611_v45, 4  ;;  %v763_v50 = vsel %vm751_vm8, %v761_v14, %v762_v43 }
  0x62   : > { %v766_v4 = vsel %vm751_vm8, %v764_v22, %v765_v52  ;;  %v770_v13 = vrot.slane %v733_v63, 4  ;;  %v771_v0 = vrot.slane %v612_v30, 4  ;;  %v773_v32 = vrot.slane %v734_v48, 4 }
  0x63   : > { %v769_v25 = vsel %vm751_vm8, %v767_v2, %v768_v11  ;;  %v774_v15 = vrot.slane %v613_v42, 4  ;;  %v776_v1 = vrot.slane %v735_v20, 4  ;;  %v777_v60 = vrot.slane %v614_v47, 4 }
  0x64   : > { %v772_v28 = vsel %vm751_vm8, %v770_v13, %v771_v0  ;;  %v779_v45 = vrot.slane %v736_v27, 4  ;;  %v780_v18 = vrot.slane %v615_v51, 4  ;;  %v782_v53 = vrot.slane %v737_v57, 4 }
  0x65   : > { %v775_v8 = vsel %vm751_vm8, %v773_v32, %v774_v15  ;;  %v4246_v30 = vunpack.c.l.bf16 %v3106_v7  ;;  %v785_v19 = vrot.slane %v738_v34, 4  ;;  %v778_v5 = vsel %vm751_vm8, %v776_v1, %v777_v60 }
  0x66   : > { %v781_v42 = vsel %vm751_vm8, %v779_v45, %v780_v18  ;;  %v4247_v36 = vunpack.c.l.bf16 %v3108_v17  ;;  %v800_v26 = vmax.f32 %v3125_v35, %v754_v62  ;;  %v801_v54 = vmax.f32 %v3133_v21, %v757_v44  ;;  %v3398_v45 = vld [vmem:[#allocation2] sm:$0xf]  ;;  %v3400_v18 = vld [vmem:[#allocation2 + $0x8] sm:$0xf] }
  0x67   : > { %v783_v31 = vrot.slane %v4246_v30, 4  ;;  %v802_v51 = vmax.f32 %v3316_v55, %v760_v12  ;;  %v803_v63 = vmax.f32 %v3318_v56, %v763_v50  ;;  %v804_v48 = vmax.f32 %v3321_v3, %v766_v4 }
  0x68   : > { %v786_v39 = vrot.slane %v4247_v36, 4  ;;  %v805_v20 = vmax.f32 %v3323_v23, %v769_v25  ;;  %v806_v27 = vmax.f32 %v3325_v58, %v772_v28  ;;  %v807_v17 = vmax.f32 %v686_v41, %v775_v8  ;;  %v3402_v8 = vld [vmem:[#allocation2 + $0x50] sm:$0xf]  ;;  %v3413_v36 = vld [vmem:[#allocation2 + $0xc] sm:$0x1] }
  0x69   : > { %v784_v47 = vsel %vm751_vm8, %v782_v53, %v783_v31  ;;  %v808_v57 = vmax.f32 %v687_v61, %v778_v5  ;;  %v809_v34 = vmax.f32 %v688_v10, %v781_v42  ;;  %v833_v37 = vmax.f32 %v800_v26, %v801_v54  ;;  %v3409_v5 = vld [vmem:[#allocation2 + $0x58] sm:$0xf]  ;;  %v3411_v42 = vld [vmem:[#allocation2 + $0x4] sm:$0x1] }
  0x6a   : > { %v787_v7 = vsel %vm751_vm8, %v785_v19, %v786_v39  ;;  %v810_v35 = vmax.f32 %v689_v9, %v784_v47  ;;  %v834_v21 = vmax.f32 %v801_v54, %v802_v51  ;;  %v835_v38 = vmax.f32 %v802_v51, %v803_v63  ;;  %v3415_v39 = vld [vmem:[#allocation2 + $0x54] sm:$0x1] }
  0x6b   : > { %v811_v16 = vmax.f32 %v3334_v33, %v787_v7  ;;  %v836_v55 = vmax.f32 %v803_v63, %v804_v48  ;;  %v837_v49 = vmax.f32 %v804_v48, %v805_v20  ;;  %v838_v56 = vmax.f32 %v805_v20, %v806_v27 }
  0x6c   : > { %v839_v6 = vmax.f32 %v806_v27, %v807_v17  ;;  %v840_v40 = vmax.f32 %v807_v17, %v808_v57  ;;  %v858_v24 = vmax.f32 %v833_v37, %v802_v51  ;;  %v859_v3 = vmax.f32 %v834_v21, %v803_v63 }
  0x6d   : > { %v860_v46 = vmax.f32 %v835_v38, %v804_v48  ;;  %v861_v23 = vmax.f32 %v836_v55, %v805_v20  ;;  %v862_v59 = vmax.f32 %v837_v49, %v806_v27  ;;  %v863_v58 = vmax.f32 %v838_v56, %v807_v17  ;;  %v3442_v49 = vld [vmem:[#allocation2 + $0x8] sm:$0xe] }
  0x6e   : > { %v864_v41 = vmax.f32 %v839_v6, %v808_v57  ;;  %v865_v61 = vmax.f32 %v840_v40, %v809_v34  ;;  %v883_v10 = vmax.f32 %v858_v24, %v803_v63  ;;  %v884_v9 = vmax.f32 %v859_v3, %v804_v48  ;;  %v3421_v63 = vld [vmem:[#allocation2 + $0x5c] sm:$0x1]  ;;  %v3449_v3 = vld [vmem:[#allocation2 + $0x50] sm:$0xe] }
  0x6f   : > { %v885_v29 = vmax.f32 %v860_v46, %v805_v20  ;;  %v886_v33 = vmax.f32 %v861_v23, %v806_v27  ;;  %v887_v14 = vmax.f32 %v862_v59, %v807_v17  ;;  %v888_v62 = vmax.f32 %v863_v58, %v808_v57  ;;  %v3451_v46 = vld [vmem:[#allocation2 + $0x58] sm:$0xe] }
  0x70   : > { %v889_v43 = vmax.f32 %v864_v41, %v809_v34  ;;  %v890_v22 = vmax.f32 %v865_v61, %v810_v35  ;;  %v908_v52 = vmax.f32 %v883_v10, %v804_v48  ;;  %v909_v44 = vmax.f32 %v884_v9, %v805_v20 }
  0x71   : > { %v910_v12 = vmax.f32 %v885_v29, %v806_v27  ;;  %v911_v2 = vmax.f32 %v886_v33, %v807_v17  ;;  %v912_v11 = vmax.f32 %v887_v14, %v808_v57  ;;  %v913_v50 = vmax.f32 %v888_v62, %v809_v34 }
  0x72   : > { %v914_v4 = vmax.f32 %v889_v43, %v810_v35  ;;  %v915_v13 = vmax.f32 %v890_v22, %v811_v16  ;;  %v3384_v0 = vpack.c.bf16 %v908_v52, %v908_v52  ;;  %v3386_v25 = vpack.c.bf16 %v909_v44, %v909_v44  ;;  %v3432_v16 = vld [vmem:[#allocation2] sm:$0xe]  ;;  %v3466_v22 = vld [vmem:[#allocation2 + $0x4] sm:$0x3] }
  0x73   : > { %v3388_v32 = vpack.c.bf16 %v910_v12, %v910_v12  ;;  %v3390_v15 = vpack.c.bf16 %v911_v2, %v911_v2  ;;  %v3392_v1 = vpack.c.bf16 %v912_v11, %v912_v11  ;;  %v3394_v28 = vpack.c.bf16 %v913_v50, %v913_v50 }
  0x74   : > { %4248 = vst [vmem:[#allocation3_spill] sm:$0xff] %v3384_v0  ;;  %v3396_v60 = vpack.c.bf16 %v914_v4, %v914_v4  ;;  %v3404_v53 = vpack.c.bf16 %v915_v13, %v915_v13  ;;  %v932_v30 = vrot.slane %v3384_v0, 7  ;;  %v934_v31 = vrot.slane %v3386_v25, 7 }
  0x75   : > { %4249 = vst [vmem:[#allocation4_spill] sm:$0xff] %v3386_v25  ;;  %v936_v19 = vrot.slane %v3388_v32, 7  ;;  %v938_v26 = vrot.slane %v3390_v15, 7  ;;  %v940_v47 = vrot.slane %v3392_v1, 7  ;;  %v942_v54 = vrot.slane %v3394_v28, 7 }
  0x76   : > { %4250 = vst [vmem:[#allocation5_spill] sm:$0xff] %v3388_v32  ;;  %v944_v51 = vrot.slane %v3396_v60, 7  ;;  %v933_v7 = vrot.slane %v932_v30, 4  ;;  %v935_v48 = vrot.slane %v934_v31, 4  ;;  %v946_v27 = vrot.slane %v3404_v53, 7 }
  0x77   : > { %4251 = vst [vmem:[#allocation6_spill] sm:$0xff] %v3390_v15  ;;  %v937_v20 = vrot.slane %v936_v19, 4  ;;  %v939_v17 = vrot.slane %v938_v26, 4  ;;  %v941_v57 = vrot.slane %v940_v47, 4  ;;  %v943_v34 = vrot.slane %v942_v54, 4 }
  0x78   : > { %4252 = vst [vmem:[#allocation7_spill] sm:$0xff] %v3392_v1  ;;  %v3429_v35 = vrot.slane %v944_v51, 4  ;;  %v3436_v37 = vrot.slane %v946_v27, 4  ;;  %v1004_v21 = vunpack.c.l.bf16 %v3398_v45  ;;  %v1005_v38 = vunpack.c.l.bf16 %v3400_v18 }
  0x79   : > { %4253 = vst [vmem:[#allocation8_spill] sm:$0xff] %v3394_v28  ;;  %v1014_v55 = vunpack.c.l.bf16 %v3402_v8  ;;  %v1015_v56 = vunpack.c.l.bf16 %v3409_v5  ;;  %v1016_v6 = vunpack.c.l.bf16 %v3411_v42  ;;  %v1017_v40 = vunpack.c.l.bf16 %v3413_v36 }
  0x7a   : > { %4254 = vst [vmem:[#allocation9_spill] sm:$0xff] %v3396_v60  ;;  %v4224_v24 = vunpack.c.l.bf16 %v3415_v39  ;;  %v4223_v23 = vunpack.c.l.bf16 %v3421_v63  ;;  %v1052_v59 = vrot.slane %v1004_v21, 1  ;;  %v1055_v58 = vrot.slane %v1005_v38, 1 }
  0x7b   : > { %4255 = vst [vmem:[#allocation10_spill] sm:$0xff] %v3404_v53  ;;  %v1082_v41 = vrot.slane %v1014_v55, 1  ;;  %v1053_v61 = vrot.slane %v1016_v6, 1  ;;  %v1056_v10 = vrot.slane %v1017_v40, 1  ;;  %v1085_v29 = vrot.slane %v1015_v56, 1 }
  0x7c   : > { %964 = vst.msk [vmem:[#allocation2 + $0x10] sm:$0xe] %vm299_vm4, %v932_v30  ;;  %v1083_v9 = vrot.slane %v4224_v24, 1  ;;  %v1086_v33 = vrot.slane %v4223_v23, 1  ;;  %v4222_v14 = vunpack.c.l.bf16 %v3432_v16  ;;  %v4221_v62 = vunpack.c.l.bf16 %v3442_v49 }
  0x7d   : > { %966 = vst.msk [vmem:[#allocation2 + $0x18] sm:$0xe] %vm299_vm4, %v934_v31  ;;  %v1054_v44 = vsel %vm388_vm5, %v1052_v59, %v1053_v61  ;;  %v1057_v12 = vsel %vm388_vm5, %v1055_v58, %v1056_v10 }
  0x7e   : > { %965 = vst.msk [vmem:[#allocation2 + $0x14] sm:$0x1] %vm224_vm2, %v933_v7  ;;  %v1084_v2 = vsel %vm388_vm5, %v1082_v41, %v1083_v9  ;;  %v1087_v45 = vsel %vm388_vm5, %v1085_v29, %v1086_v33  ;;  %v3477_v18 = vmax.f32 %v1004_v21, %v1054_v44  ;;  %v3479_v8 = vmax.f32 %v1005_v38, %v1057_v12 }
  0x7f   : > { %967 = vst.msk [vmem:[#allocation2 + $0x1c] sm:$0x1] %vm224_vm2, %v935_v48  ;;  %v3486_v5 = vmax.f32 %v1014_v55, %v1084_v2  ;;  %v3488_v42 = vmax.f32 %v1015_v56, %v1087_v45  ;;  %v1173_v56 = vrot.slane %v1016_v6, 2  ;;  %v1176_v29 = vrot.slane %v1017_v40, 2 }
  0x80   : > { %968 = vst.msk [vmem:[#allocation2 + $0x20] sm:$0xe] %vm299_vm4, %v936_v19 }
  0x81   : > { %969 = vst.msk [vmem:[#allocation2 + $0x24] sm:$0x1] %vm224_vm2, %v937_v20 }
  0x82   : > { %970 = vst.msk [vmem:[#allocation2 + $0x28] sm:$0xe] %vm299_vm4, %v938_v26 }
  0x83   : > { %971 = vst.msk [vmem:[#allocation2 + $0x2c] sm:$0x1] %vm224_vm2, %v939_v17  ;;  %v982_v52 = vld [vmem:[#allocation2 + $0x10] sm:$0xf] }
  0x84   : > { %v3472_v11 = vld [vmem:[#allocation2 + $0x10] sm:$0xe]  ;;  %972 = vst.msk [vmem:[#allocation2 + $0x30] sm:$0xe] %vm299_vm4, %v940_v47  ;;  %v983_v4 = vld [vmem:[#allocation2 + $0x18] sm:$0xf]  ;;  %v1006_v13 = vunpack.c.l.bf16 %v982_v52 }
  0x85   : > { %v3481_v30 = vld [vmem:[#allocation2 + $0x18] sm:$0xe]  ;;  %973 = vst.msk [vmem:[#allocation2 + $0x34] sm:$0x1] %vm224_vm2, %v941_v57  ;;  %v3484_v31 = vld [vmem:[#allocation2 + $0x14] sm:$0x1]  ;;  %v1007_v19 = vunpack.c.l.bf16 %v983_v4  ;;  %v4220_v26 = vunpack.c.l.bf16 %v3472_v11  ;;  %v4271_v53 = vunpack.c.l.bf16 %v3472_v11 }
  0x86   : > { %v3491_v47 = vld [vmem:[#allocation2 + $0xc] sm:$0x3]  ;;  %974 = vst.msk [vmem:[#allocation2 + $0x38] sm:$0xe] %vm299_vm4, %v942_v54  ;;  %v3496_v7 = vld [vmem:[#allocation2 + $0x1c] sm:$0x1]  ;;  %v1018_v48 = vunpack.c.l.bf16 %v3484_v31  ;;  %v4227_v17 = vunpack.c.l.bf16 %v3481_v30  ;;  %v4273_v60 = vunpack.c.l.bf16 %v3481_v30 }
  0x87   : > { %v1058_v20 = vrot.slane %v1006_v13, 1  ;;  %v1172_v57 = vrot.slane %v4222_v14, 2  ;;  %975 = vst.msk [vmem:[#allocation2 + $0x3c] sm:$0x1] %vm224_vm2, %v943_v34  ;;  %v984_v21 = vld [vmem:[#allocation2 + $0x20] sm:$0xf]  ;;  %v1019_v38 = vunpack.c.l.bf16 %v3496_v7 }
  0x88   : > { %v1061_v55 = vrot.slane %v1007_v19, 1  ;;  %976 = vst.msk [vmem:[#allocation2 + $0x40] sm:$0xe] %vm299_vm4, %v944_v51  ;;  %v3508_v54 = vld [vmem:[#allocation2 + $0x24] sm:$0x1]  ;;  %v1008_v58 = vunpack.c.l.bf16 %v984_v21  ;;  %v1059_v41 = vrot.slane %v1018_v48, 1 }
  0x89   : > { %v1175_v34 = vrot.slane %v4221_v62, 2  ;;  %977 = vst.msk [vmem:[#allocation2 + $0x44] sm:$0x1] %vm224_vm2, %v3429_v35  ;;  %v985_v6 = vld [vmem:[#allocation2 + $0x28] sm:$0xf]  ;;  %v4226_v10 = vunpack.c.l.bf16 %v3508_v54  ;;  %v1062_v51 = vrot.slane %v1019_v38, 1  ;;  %v3521_v9 = vsel %vm509_vm6, %v1172_v57, %v1173_v56 }
  0x8a   : > { %978 = vst.msk [vmem:[#allocation2 + $0x48] sm:$0xe] %vm299_vm4, %v946_v27  ;;  %v3528_v33 = vld [vmem:[#allocation2 + $0x2c] sm:$0x1]  ;;  %v1009_v52 = vunpack.c.l.bf16 %v985_v6  ;;  %v1060_v35 = vsel %vm388_vm5, %v1058_v20, %v1059_v41  ;;  %v1064_v44 = vrot.slane %v1008_v58, 1  ;;  %v1178_v12 = vrot.slane %v4220_v26, 2 }
  0x8b   : > { %979 = vst.msk [vmem:[#allocation2 + $0x4c] sm:$0x1] %vm224_vm2, %v3436_v37  ;;  %v986_v2 = vld [vmem:[#allocation2 + $0x30] sm:$0xf]  ;;  %v4225_v36 = vunpack.c.l.bf16 %v3528_v33  ;;  %v1063_v40 = vsel %vm388_vm5, %v1061_v55, %v1062_v51  ;;  %v1065_v27 = vrot.slane %v4226_v10, 1  ;;  %v3539_v4 = vmax.f32 %v1006_v13, %v1060_v35 }
  0x8c   : > { %v998_v45 = vld [vmem:[#allocation2 + $0x34] sm:$0x1]  ;;  %v1010_v57 = vunpack.c.l.bf16 %v986_v2  ;;  %v1067_v20 = vrot.slane %v1009_v52, 1  ;;  %v3541_v21 = vmax.f32 %v1007_v19, %v1063_v40  ;;  %v3543_v56 = vld [vmem:[#allocation2 + $0x20] sm:$0xe]  ;;  %v3546_v41 = vsel %vm509_vm6, %v1175_v34, %v1176_v29 }
  0x8d   : > { %v987_v37 = vld [vmem:[#allocation2 + $0x38] sm:$0xf]  ;;  %v1022_v6 = vunpack.c.l.bf16 %v998_v45  ;;  %v1066_v26 = vsel %vm388_vm5, %v1064_v44, %v1065_v27  ;;  %v1068_v55 = vrot.slane %v4225_v36, 1  ;;  %v3551_v51 = vld [vmem:[#allocation2 + $0x28] sm:$0xe]  ;;  %v1298_v15 = vrot.slane %v4271_v53, 3 }
  0x8e   : > { %v999_v35 = vld [vmem:[#allocation2 + $0x3c] sm:$0x1]  ;;  %v1011_v2 = vunpack.c.l.bf16 %v987_v37  ;;  %v1070_v19 = vrot.slane %v1010_v57, 1  ;;  %v3554_v40 = vmax.f32 %v1008_v58, %v1066_v26  ;;  %v3556_v61 = vld [vmem:[#allocation2 + $0x30] sm:$0xe]  ;;  %v4258_v7 = vunpack.c.l.bf16 %v3551_v51 }
  0x8f   : > { %v988_v29 = vld [vmem:[#allocation2 + $0x40] sm:$0xf]  ;;  %v1023_v45 = vunpack.c.l.bf16 %v999_v35  ;;  %v1069_v44 = vsel %vm388_vm5, %v1067_v20, %v1068_v55  ;;  %v1071_v27 = vrot.slane %v1022_v6, 1  ;;  %v3560_v62 = vld [vmem:[#allocation2 + $0x38] sm:$0xe]  ;;  %v1181_v55 = vrot.slane %v4227_v17, 2 }
  0x90   : > { %v1000_v14 = vld [vmem:[#allocation2 + $0x44] sm:$0x1]  ;;  %v1012_v23 = vunpack.c.l.bf16 %v988_v29  ;;  %v1073_v50 = vrot.slane %v1011_v2, 1  ;;  %v3563_v37 = vmax.f32 %v1009_v52, %v1069_v44  ;;  %v3565_v26 = vld [vmem:[#allocation2 + $0x40] sm:$0xe]  ;;  %v1301_v32 = vrot.slane %v4273_v60, 3 }
  0x91   : > { %v989_v24 = vld [vmem:[#allocation2 + $0x48] sm:$0xf]  ;;  %v1024_v43 = vunpack.c.l.bf16 %v1000_v14  ;;  %v1072_v35 = vsel %vm388_vm5, %v1070_v19, %v1071_v27  ;;  %v1074_v36 = vrot.slane %v1023_v45, 1  ;;  %v1179_v14 = vrot.slane %v1018_v48, 2 }
  0x92   : > { %v3569_v20 = vld [vmem:[#allocation2 + $0x48] sm:$0xe]  ;;  %v1001_v34 = vld [vmem:[#allocation2 + $0x4c] sm:$0x1]  ;;  %v1013_v59 = vunpack.c.l.bf16 %v989_v24  ;;  %v1076_v10 = vrot.slane %v1012_v23, 1  ;;  %v3572_v29 = vmax.f32 %v1010_v57, %v1072_v35  ;;  %v1182_v24 = vrot.slane %v1019_v38, 2 }
  0x93   : > { %v4228_v52 = vunpack.c.l.bf16 %v3569_v20  ;;  %v1025_v44 = vunpack.c.l.bf16 %v1001_v34  ;;  %v1075_v13 = vsel %vm388_vm5, %v1073_v50, %v1074_v36  ;;  %v1077_v58 = vrot.slane %v1024_v43, 1 }
  0x94   : > { %v1079_v19 = vrot.slane %v1013_v59, 1  ;;  %v3578_v27 = vmax.f32 %v1011_v2, %v1075_v13  ;;  %v3586_v34 = vsel %vm509_vm6, %v1178_v12, %v1179_v14  ;;  %v4256_v50 = vunpack.c.l.bf16 %v3543_v56 }
  0x95   : > { %v1078_v57 = vsel %vm388_vm5, %v1076_v10, %v1077_v58  ;;  %v1080_v35 = vrot.slane %v1025_v44, 1  ;;  %v3593_v48 = vsel %vm509_vm6, %v1181_v55, %v1182_v24  ;;  %v4257_v13 = vunpack.c.l.bf16 %v3508_v54 }
  0x96   : > { %v1184_v36 = vrot.slane %v4256_v50, 2  ;;  %v3590_v31 = vmax.f32 %v1012_v23, %v1078_v57  ;;  %v1187_v38 = vrot.slane %v4258_v7, 2  ;;  %v4259_v58 = vunpack.c.l.bf16 %v3528_v33 }
  0x97   : > { %v1185_v2 = vrot.slane %v4257_v13, 2  ;;  %v1081_v10 = vsel %vm388_vm5, %v1079_v19, %v1080_v35  ;;  %v4260_v14 = vunpack.c.l.bf16 %v3556_v61  ;;  %v1191_v50 = vrot.slane %v1022_v6, 2 }
  0x98   : > { %v1188_v12 = vrot.slane %v4259_v58, 2  ;;  %v3604_v23 = vmax.f32 %v1013_v59, %v1081_v10  ;;  %v4261_v54 = vunpack.c.l.bf16 %v3560_v62  ;;  %v1194_v57 = vrot.slane %v1023_v45, 2 }
  0x99   : > { %v1190_v17 = vrot.slane %v4260_v14, 2  ;;  %v3607_v55 = vsel %vm509_vm6, %v1184_v36, %v1185_v2  ;;  %v4262_v33 = vunpack.c.l.bf16 %v3565_v26  ;;  %v1197_v7 = vrot.slane %v1024_v43, 2 }
  0x9a   : > { %v1193_v24 = vrot.slane %v4261_v54, 2  ;;  %v3612_v13 = vsel %vm509_vm6, %v1187_v38, %v1188_v12  ;;  %v1199_v6 = vrot.slane %v4228_v52, 2  ;;  %v1200_v36 = vrot.slane %v1025_v44, 2 }
  0x9b   : > { %v3615_v19 = vsel %vm509_vm6, %v1190_v17, %v1191_v50  ;;  %v1196_v35 = vrot.slane %v4262_v33, 2  ;;  %v4263_v2 = vunpack.c.l.bf16 %v3449_v3  ;;  %v4264_v17 = vunpack.c.l.bf16 %v3415_v39  ;;  %v3644_v39 = vld [vmem:[#allocation2 + $0x14] sm:$0x3] }
  0x9c   : > { %v3620_v59 = vsel %vm509_vm6, %v1193_v24, %v1194_v57  ;;  %v4265_v58 = vunpack.c.l.bf16 %v3451_v46  ;;  %v4266_v43 = vunpack.c.l.bf16 %v3421_v63  ;;  %v3636_v50 = vsel %vm509_vm6, %v1199_v6, %v1200_v36  ;;  %v3646_v57 = vld [vmem:[#allocation2 + $0x1c] sm:$0x3]  ;;  %v3648_v33 = vld [vmem:[#allocation2 + $0x54] sm:$0x3]  ;;  %v3660_v36 = vld [vmem:[#allocation2 + $0x24] sm:$0x3] }
  0x9d   : > { %v1202_v45 = vrot.slane %v4263_v2, 2  ;;  %v3627_v38 = vsel %vm509_vm6, %v1196_v35, %v1197_v7  ;;  %v1203_v10 = vrot.slane %v4264_v17, 2  ;;  %v3662_v2 = vld [vmem:[#allocation2 + $0x2c] sm:$0x3]  ;;  %v3664_v17 = vld [vmem:[#allocation2 + $0x34] sm:$0x3]  ;;  %v4269_v44 = vunpack.c.l.bf16 %v3442_v49 }
  0x9e   : > { %v1205_v12 = vrot.slane %v4265_v58, 2  ;;  %v1206_v14 = vrot.slane %v4266_v43, 2  ;;  %v3674_v43 = vld [vmem:[#allocation2 + $0x3c] sm:$0x3]  ;;  %v3678_v6 = vld [vmem:[#allocation2 + $0x4c] sm:$0x3]  ;;  %v4270_v52 = vunpack.c.l.bf16 %v3491_v47  ;;  %v4272_v58 = vunpack.c.l.bf16 %v3644_v39 }
  0x9f   : > { %v3651_v63 = vsel %vm509_vm6, %v1202_v45, %v1203_v10  ;;  %v3686_v24 = vld [vmem:[#allocation2 + $0x5c] sm:$0x3]  ;;  %v4267_v10 = vunpack.c.l.bf16 %v3432_v16  ;;  %v1295_v1 = vrot.slane %v4269_v44, 3  ;;  %v4275_v49 = vunpack.c.l.bf16 %v3543_v56 }
  0xa0   : > { %v3654_v35 = vsel %vm509_vm6, %v1205_v12, %v1206_v14  ;;  %v3676_v14 = vld [vmem:[#allocation2 + $0x44] sm:$0x3]  ;;  %v4268_v12 = vunpack.c.l.bf16 %v3466_v22  ;;  %v1296_v7 = vrot.slane %v4270_v52, 3  ;;  %v1299_v45 = vrot.slane %v4272_v58, 3 }
  0xa1   : > { %v1292_v28 = vrot.slane %v4267_v10, 3  ;;  %v4274_v10 = vunpack.c.l.bf16 %v3646_v57  ;;  %v1304_v44 = vrot.slane %v4275_v49, 3  ;;  %v4276_v25 = vunpack.c.l.bf16 %v3660_v36 }
  0xa2   : > { %v1293_v54 = vrot.slane %v4268_v12, 3  ;;  %v1297_v11 = vsel %vm630_vm7, %v1295_v1, %v1296_v7  ;;  %v1300_v53 = vsel %vm630_vm7, %v1298_v15, %v1299_v45  ;;  %v4277_v58 = vunpack.c.l.bf16 %v3551_v51 }
  0xa3   : > { %v1302_v12 = vrot.slane %v4274_v10, 3  ;;  %v1305_v52 = vrot.slane %v4276_v25, 3  ;;  %v4278_v60 = vunpack.c.l.bf16 %v3662_v2  ;;  %v4279_v56 = vunpack.c.l.bf16 %v3556_v61 }
  0xa4   : > { %v1294_v16 = vsel %vm630_vm7, %v1292_v28, %v1293_v54  ;;  %v1307_v0 = vrot.slane %v4277_v58, 3  ;;  %v4280_v49 = vunpack.c.l.bf16 %v3664_v17  ;;  %v4281_v15 = vunpack.c.l.bf16 %v3560_v62 }
  0xa5   : > { %v1308_v30 = vrot.slane %v4278_v60, 3  ;;  %v1303_v28 = vsel %vm630_vm7, %v1301_v32, %v1302_v12  ;;  %v1306_v54 = vsel %vm630_vm7, %v1304_v44, %v1305_v52  ;;  %v1310_v10 = vrot.slane %v4279_v56, 3 }
  0xa6   : > { %v1311_v25 = vrot.slane %v4280_v49, 3  ;;  %v1313_v7 = vrot.slane %v4281_v15, 3  ;;  %v4282_v51 = vunpack.c.l.bf16 %v3674_v43  ;;  %v4283_v58 = vunpack.c.l.bf16 %v3565_v26 }
  0xa7   : > { %v1309_v1 = vsel %vm630_vm7, %v1307_v0, %v1308_v30  ;;  %v4284_v12 = vunpack.c.l.bf16 %v3676_v14  ;;  %v4285_v44 = vunpack.c.l.bf16 %v3569_v20  ;;  %v4286_v56 = vunpack.c.l.bf16 %v3678_v6 }
  0xa8   : > { %v1314_v45 = vrot.slane %v4282_v51, 3  ;;  %v1316_v60 = vrot.slane %v4283_v58, 3  ;;  %v1312_v32 = vsel %vm630_vm7, %v1310_v10, %v1311_v25  ;;  %v4287_v30 = vunpack.c.l.bf16 %v3449_v3  ;;  %v1364_v3 = vld [vmem:[#allocation2] sm:$0xc] }
  0xa9   : > { %v1317_v61 = vrot.slane %v4284_v12, 3  ;;  %v1319_v52 = vrot.slane %v4285_v44, 3  ;;  %v1320_v0 = vrot.slane %v4286_v56, 3  ;;  %v4288_v15 = vunpack.c.l.bf16 %v3648_v33 }
  0xaa   : > { %v1315_v62 = vsel %vm630_vm7, %v1313_v7, %v1314_v45  ;;  %v1322_v49 = vrot.slane %v4287_v30, 3  ;;  %v4289_v51 = vunpack.c.l.bf16 %v3451_v46  ;;  %v4290_v20 = vunpack.c.l.bf16 %v3686_v24  ;;  %v1365_v45 = vld [vmem:[#allocation2 + $0x8] sm:$0xc] }
  0xab   : > { %v1323_v26 = vrot.slane %v4288_v15, 3  ;;  %v1318_v25 = vsel %vm630_vm7, %v1316_v60, %v1317_v61  ;;  %v1321_v58 = vsel %vm630_vm7, %v1319_v52, %v1320_v0  ;;  %v4291_v44 = vmax.f32 %v3477_v18, %v3521_v9  ;;  %v1366_v9 = vld [vmem:[#allocation2 + $0x10] sm:$0xc]  ;;  %v1368_v0 = vld [vmem:[#allocation2 + $0x20] sm:$0xc] }
  0xac   : > { %v1325_v10 = vrot.slane %v4289_v51, 3  ;;  %v1326_v12 = vrot.slane %v4290_v20, 3  ;;  %v4292_v46 = vmax.f32 %v3479_v8, %v3546_v41  ;;  %v4293_v60 = vmax.f32 %v3539_v4, %v3586_v34 }
  0xad   : > { %v3759_v7 = vmax.f32 %v4291_v44, %v1294_v16  ;;  %v1324_v56 = vsel %vm630_vm7, %v1322_v49, %v1323_v26  ;;  %v4294_v52 = vmax.f32 %v3541_v21, %v3593_v48  ;;  %v1367_v16 = vld [vmem:[#allocation2 + $0x18] sm:$0xc]  ;;  %v4295_v8 = vmax.f32 %v3554_v40, %v3607_v55 }
  0xae   : > { %v3765_v30 = vmax.f32 %v4292_v46, %v1297_v11  ;;  %v3770_v61 = vmax.f32 %v4293_v60, %v1300_v53  ;;  %v1327_v49 = vsel %vm630_vm7, %v1325_v10, %v1326_v12  ;;  %v4296_v4 = vmax.f32 %v3563_v37, %v3612_v13  ;;  %v1369_v11 = vld [vmem:[#allocation2 + $0x28] sm:$0xc]  ;;  %v1370_v53 = vld [vmem:[#allocation2 + $0x30] sm:$0xc] }
  0xaf   : > { %v3775_v18 = vmax.f32 %v4294_v52, %v1303_v28  ;;  %v3781_v41 = vmax.f32 %v4295_v8, %v1306_v54  ;;  %v4297_v21 = vmax.f32 %v3572_v29, %v3615_v19  ;;  %v1371_v28 = vld [vmem:[#allocation2 + $0x38] sm:$0xc]  ;;  %v4298_v15 = vmax.f32 %v3578_v27, %v3620_v59  ;;  %v1372_v54 = vld [vmem:[#allocation2 + $0x40] sm:$0xc]  ;;  %v1374_v27 = vld [vmem:[#allocation2 + $0x50] sm:$0xc] }
  0xb0   : > { %v3786_v34 = vmax.f32 %v4296_v4, %v1309_v1  ;;  %v4299_v40 = vmax.f32 %v3590_v31, %v3627_v38  ;;  %v4300_v37 = vmax.f32 %v3604_v23, %v3636_v50  ;;  %v4301_v29 = vmax.f32 %v3486_v5, %v3651_v63  ;;  %v1373_v1 = vld [vmem:[#allocation2 + $0x48] sm:$0xc]  ;;  %v1375_v31 = vld [vmem:[#allocation2 + $0x58] sm:$0xc] }
  0xb1   : > { %v3791_v48 = vmax.f32 %v4297_v21, %v1312_v32  ;;  %v3796_v26 = vmax.f32 %v4298_v15, %v1315_v62  ;;  %v4302_v59 = vmax.f32 %v3488_v42, %v3654_v35  ;;  %v1388_v38 = vunpack.c.l.bf16 %v1364_v3 }
  0xb2   : > { %v3801_v55 = vmax.f32 %v4299_v40, %v1318_v25  ;;  %v3806_v13 = vmax.f32 %v4300_v37, %v1321_v58  ;;  %v3811_v19 = vmax.f32 %v4301_v29, %v1324_v56  ;;  %v1389_v62 = vunpack.c.l.bf16 %v1365_v45 }
  0xb3   : > { %v3816_v32 = vmax.f32 %v4302_v59, %v1327_v49  ;;  %v1390_v51 = vunpack.c.l.bf16 %v1366_v9  ;;  %v1391_v23 = vunpack.c.l.bf16 %v1367_v16  ;;  %v1392_v50 = vunpack.c.l.bf16 %v1368_v0 }
  0xb4   : > { %v1393_v10 = vunpack.c.l.bf16 %v1369_v11  ;;  %v1394_v25 = vunpack.c.l.bf16 %v1370_v53  ;;  %v1395_v58 = vunpack.c.l.bf16 %v1371_v28  ;;  %v1396_v5 = vunpack.c.l.bf16 %v1372_v54 }
  0xb5   : > { %v1397_v63 = vunpack.c.l.bf16 %v1373_v1  ;;  %v1398_v20 = vunpack.c.l.bf16 %v1374_v27  ;;  %v1399_v12 = vunpack.c.l.bf16 %v1375_v31  ;;  %v1412_v44 = vrot.slane %v1388_v38, 4 }
  0xb6   : > { %v4303_v56 = vunpack.c.l.bf16 %v3466_v22  ;;  %v1415_v42 = vrot.slane %v1389_v62, 4  ;;  %v4304_v35 = vunpack.c.l.bf16 %v3491_v47  ;;  %v1418_v3 = vrot.slane %v1390_v51, 4 }
  0xb7   : > { %v4305_v45 = vunpack.c.l.bf16 %v3644_v39  ;;  %v1421_v9 = vrot.slane %v1391_v23, 4  ;;  %v4306_v0 = vunpack.c.l.bf16 %v3646_v57  ;;  %v1424_v8 = vrot.slane %v1392_v50, 4 }
  0xb8   : > { %v1413_v46 = vrot.slane %v4303_v56, 4  ;;  %v1416_v60 = vrot.slane %v4304_v35, 4  ;;  %v4307_v4 = vunpack.c.l.bf16 %v3660_v36  ;;  %v1427_v47 = vrot.slane %v1393_v10, 4 }
  0xb9   : > { %v1419_v52 = vrot.slane %v4305_v45, 4  ;;  %v1422_v49 = vrot.slane %v4306_v0, 4  ;;  %v4308_v53 = vunpack.c.l.bf16 %v3662_v2  ;;  %v1430_v40 = vrot.slane %v1394_v25, 4 }
  0xba   : > { %v1414_v16 = vsel %vm751_vm8, %v1412_v44, %v1413_v46  ;;  %v1425_v21 = vrot.slane %v4307_v4, 4  ;;  %v1417_v22 = vsel %vm751_vm8, %v1415_v42, %v1416_v60  ;;  %v4309_v57 = vunpack.c.l.bf16 %v3664_v17 }
  0xbb   : > { %v1420_v11 = vsel %vm751_vm8, %v1418_v3, %v1419_v52  ;;  %v1428_v28 = vrot.slane %v4308_v53, 4  ;;  %v1423_v39 = vsel %vm751_vm8, %v1421_v9, %v1422_v49  ;;  %v1433_v36 = vrot.slane %v1395_v58, 4 }
  0xbc   : > { %v1426_v15 = vsel %vm751_vm8, %v1424_v8, %v1425_v21  ;;  %v1431_v37 = vrot.slane %v4309_v57, 4  ;;  %v4310_v54 = vunpack.c.l.bf16 %v3674_v43  ;;  %v1436_v27 = vrot.slane %v1396_v5, 4  ;;  %v2834_v43 = vld [vmem:[%s4213_s1 + $0x10] sm:$0xff] }
  0xbd   : > { %v1429_v29 = vsel %vm751_vm8, %v1427_v47, %v1428_v28  ;;  %v4311_v2 = vunpack.c.l.bf16 %v3676_v14  ;;  %v1439_v38 = vrot.slane %v1397_v63, 4  ;;  %v4312_v62 = vunpack.c.l.bf16 %v3678_v6  ;;  %v2832_v14 = vld [vmem:[%s4213_s1] sm:$0xff]  ;;  %v2839_v6 = vld [vmem:[%s4213_s1 + $0x38] sm:$0xff]  ;;  %2297 = vmatpush.bf16.msra.mxu0 %v2834_v43 }
  0xbe   : > { %v1434_v1 = vrot.slane %v4310_v54, 4  ;;  %v1432_v59 = vsel %vm751_vm8, %v1430_v40, %v1431_v37  ;;  %v1442_v17 = vrot.slane %v1398_v20, 4  ;;  %v4313_v50 = vunpack.c.l.bf16 %v3648_v33  ;;  %2362 = vmatpush.bf16.msra.mxu1 %v2832_v14  ;;  %2517 = vmatpush.bf16.msra.mxu3 %v2839_v6  ;;  %v3891_v14 = vld [vmem:[#allocation2] sm:$0xf]  ;;  %v3893_v6 = vld [vmem:[#allocation2 + $0x8] sm:$0xf] }
  0xbf   : > { %v1437_v31 = vrot.slane %v4311_v2, 4  ;;  %v1440_v51 = vrot.slane %v4312_v62, 4  ;;  %v1445_v25 = vrot.slane %v1399_v12, 4  ;;  %v4314_v33 = vunpack.c.l.bf16 %v3686_v24 }
  0xc0   : > { %v1435_v23 = vsel %vm751_vm8, %v1433_v36, %v1434_v1  ;;  %v1443_v10 = vrot.slane %v4313_v50, 4  ;;  %v1460_v20 = vmax.f32 %v3759_v7, %v1414_v16  ;;  %v1461_v44 = vmax.f32 %v3765_v30, %v1417_v22 }
  0xc1   : > { %v1438_v58 = vsel %vm751_vm8, %v1436_v27, %v1437_v31  ;;  %v1441_v5 = vsel %vm751_vm8, %v1439_v38, %v1440_v51  ;;  %v1446_v63 = vrot.slane %v4314_v33, 4  ;;  %v1462_v56 = vmax.f32 %v3770_v61, %v1420_v11 }
  0xc2   : > { %v1444_v12 = vsel %vm751_vm8, %v1442_v17, %v1443_v10  ;;  %v1463_v46 = vmax.f32 %v3775_v18, %v1423_v39  ;;  %v1464_v35 = vmax.f32 %v3781_v41, %v1426_v15  ;;  %v1465_v60 = vmax.f32 %v3786_v34, %v1429_v29  ;;  %v2838_v18 = vld [vmem:[%s4213_s1 + $0x30] sm:$0xff] }
  0xc3   : > { %v1447_v42 = vsel %vm751_vm8, %v1445_v25, %v1446_v63  ;;  %v1466_v24 = vmax.f32 %v3791_v48, %v1432_v59  ;;  %v1467_v7 = vmax.f32 %v3796_v26, %v1435_v23  ;;  %v1468_v3 = vmax.f32 %v3801_v55, %v1438_v58  ;;  %2518 = vmatpush.bf16.msra.mxu3 %v2838_v18 }
  0xc4   : > { %v1469_v30 = vmax.f32 %v3806_v13, %v1441_v5  ;;  %v1470_v61 = vmax.f32 %v3811_v19, %v1444_v12  ;;  %v1471_v41 = vmax.f32 %v3816_v32, %v1447_v42  ;;  %v1493_v45 = vmax.f32 %v1460_v20, %v1461_v44  ;;  %v2828_v20 = vld [vmem:[%s2932_s28] sm:$0xff] }
  0xc5   : > { %v1494_v34 = vmax.f32 %v1461_v44, %v1462_v56  ;;  %v1495_v52 = vmax.f32 %v1462_v56, %v1463_v46  ;;  %v1496_v48 = vmax.f32 %v1463_v46, %v1464_v35  ;;  %v1497_v9 = vmax.f32 %v1464_v35, %v1465_v60  ;;  %v1652_v12 = vld [vmem:[#allocation2 + $0x4] sm:$0x1]  ;;  %v3900_v44 = vld [vmem:[#allocation2 + $0xc] sm:$0x1]  ;;  %2787 = vmatmul.msk.bf16.vlgmr.msra.gmra.mxu1 %vm2277_vm9, %v2828_v20 }
  0xc6   : > { %v1498_v16 = vmax.f32 %v1465_v60, %v1466_v24  ;;  %v1499_v26 = vmax.f32 %v1466_v24, %v1467_v7  ;;  %v1500_v0 = vmax.f32 %v1467_v7, %v1468_v3  ;;  %v1518_v55 = vmax.f32 %v1493_v45, %v1462_v56  ;;  %v3902_v56 = vld [vmem:[#allocation2] sm:$0xe]  ;;  %v3920_v45 = vld [vmem:[#allocation2 + $0x8] sm:$0xe] }
  0xc7   : > { %v1519_v49 = vmax.f32 %v1494_v34, %v1463_v46  ;;  %v1520_v13 = vmax.f32 %v1495_v52, %v1464_v35  ;;  %v1521_v8 = vmax.f32 %v1496_v48, %v1465_v60  ;;  %v1522_v19 = vmax.f32 %v1497_v9, %v1466_v24  ;;  %v4315_v34 = vld [vmem:[#allocation3_spill] sm:$0xff]  ;;  %v4316_v48 = vld [vmem:[#allocation4_spill] sm:$0xff] }
  0xc8   : > { %v1523_v4 = vmax.f32 %v1498_v16, %v1467_v7  ;;  %v1524_v21 = vmax.f32 %v1499_v26, %v1468_v3  ;;  %v1525_v22 = vmax.f32 %v1500_v0, %v1469_v30  ;;  %v1543_v11 = vmax.f32 %v1518_v55, %v1463_v46  ;;  %v3928_v0 = vld [vmem:[#allocation2 + $0x4] sm:$0x3]  ;;  %v3930_v55 = vld [vmem:[#allocation2 + $0xc] sm:$0x3] }
  0xc9   : > { %v1544_v47 = vmax.f32 %v1519_v49, %v1464_v35  ;;  %v1545_v32 = vmax.f32 %v1520_v13, %v1465_v60  ;;  %v1546_v53 = vmax.f32 %v1521_v8, %v1466_v24  ;;  %v1547_v28 = vmax.f32 %v1522_v19, %v1467_v7 }
  0xca   : > { %v1548_v39 = vmax.f32 %v1523_v4, %v1468_v3  ;;  %v1549_v15 = vmax.f32 %v1524_v21, %v1469_v30  ;;  %v1550_v40 = vmax.f32 %v1525_v22, %v1470_v61  ;;  %v1568_v57 = vmax.f32 %v1543_v11, %v1464_v35  ;;  %v3935_v4 = vld [vmem:[#allocation2] sm:$0xc]  ;;  %v3937_v21 = vld [vmem:[#allocation2 + $0x8] sm:$0xc] }
  0xcb   : > { %v1569_v37 = vmax.f32 %v1544_v47, %v1465_v60  ;;  %v1570_v29 = vmax.f32 %v1545_v32, %v1466_v24  ;;  %v1571_v36 = vmax.f32 %v1546_v53, %v1467_v7  ;;  %v1572_v54 = vmax.f32 %v1547_v28, %v1468_v3 }
  0xcc   : > { %v1573_v1 = vmax.f32 %v1548_v39, %v1469_v30  ;;  %v1574_v27 = vmax.f32 %v1549_v15, %v1470_v61  ;;  %v1575_v59 = vmax.f32 %v1550_v40, %v1471_v41  ;;  %v1576_v2 = vpack.c.bf16 %v1568_v57, %v1568_v57 }
  0xcd   : > { %v1577_v31 = vpack.c.bf16 %v1569_v37, %v1569_v37  ;;  %v3878_v38 = vpack.c.bf16 %v1570_v29, %v1570_v29  ;;  %v3880_v62 = vpack.c.bf16 %v1571_v36, %v1571_v36  ;;  %v3882_v51 = vpack.c.bf16 %v1572_v54, %v1572_v54 }
  0xce   : > { %v3884_v23 = vpack.c.bf16 %v1573_v1, %v1573_v1  ;;  %v3886_v17 = vpack.c.bf16 %v1574_v27, %v1574_v27  ;;  %v3888_v50 = vpack.c.bf16 %v1575_v59, %v1575_v59  ;;  %v1592_v10 = vrot.slane %v1576_v2, 7 }
  0xcf   : > { %v1594_v25 = vrot.slane %v1577_v31, 7  ;;  %v1596_v43 = vrot.slane %v3878_v38, 7  ;;  %v1598_v58 = vrot.slane %v3880_v62, 7  ;;  %v1600_v5 = vrot.slane %v3882_v51, 7 }
  0xd0   : > { %v1602_v33 = vrot.slane %v3884_v23, 7  ;;  %v1604_v63 = vrot.slane %v3886_v17, 7  ;;  %v1593_v46 = vrot.slane %v1592_v10, 4  ;;  %v1606_v60 = vrot.slane %v3888_v50, 7  ;;  %1624 = vst.msk [vmem:[#allocation2 + $0x10] sm:$0xe] %vm299_vm4, %v1592_v10 }
  0xd1   : > { %v1595_v42 = vrot.slane %v1594_v25, 4  ;;  %v1597_v35 = vrot.slane %v1596_v43, 4  ;;  %v1599_v24 = vrot.slane %v1598_v58, 4  ;;  %v1601_v7 = vrot.slane %v1600_v5, 4  ;;  %1626 = vst.msk [vmem:[#allocation2 + $0x18] sm:$0xe] %vm299_vm4, %v1594_v25 }
  0xd2   : > { %v3908_v3 = vrot.slane %v1602_v33, 4  ;;  %v3912_v30 = vrot.slane %v1604_v63, 4  ;;  %v3917_v61 = vrot.slane %v1606_v60, 4  ;;  %1625 = vst.msk [vmem:[#allocation2 + $0x14] sm:$0x1] %vm224_vm2, %v1593_v46  ;;  %v2389_v18 = vunpack.c.l.b16 %v1576_v2 }
  0xd3   : > { %v2390_v41 = vunpack.c.l.b16 %v1577_v31  ;;  %1627 = vst.msk [vmem:[#allocation2 + $0x1c] sm:$0x1] %vm224_vm2, %v1595_v42  ;;  %v2253_v52 = vunpack.c.l.b16 %v4315_v34  ;;  %v2254_v9 = vunpack.c.l.b16 %v4316_v48  ;;  %v1664_v16 = vunpack.c.l.bf16 %v3891_v14 }
  0xd4   : > { %v1665_v26 = vunpack.c.l.bf16 %v3893_v6  ;;  %1628 = vst.msk [vmem:[#allocation2 + $0x20] sm:$0xe] %vm299_vm4, %v1596_v43  ;;  %v1676_v13 = vunpack.c.l.bf16 %v1652_v12  ;;  %v1677_v8 = vunpack.c.l.bf16 %v3900_v44  ;;  %v1808_v19 = vunpack.c.l.bf16 %v3902_v56 }
  0xd5   : > { %v2397_v49 = vpack.c.b16 %v2390_v41, %v2389_v18  ;;  %1629 = vst.msk [vmem:[#allocation2 + $0x24] sm:$0x1] %vm224_vm2, %v1597_v35  ;;  %v2261_v22 = vpack.c.b16 %v2254_v9, %v2253_v52  ;;  %v1712_v11 = vrot.slane %v1664_v16, 1  ;;  %v1809_v32 = vunpack.c.l.bf16 %v3920_v45 }
  0xd6   : > { %v1715_v47 = vrot.slane %v1665_v26, 1  ;;  %1630 = vst.msk [vmem:[#allocation2 + $0x28] sm:$0xe] %vm299_vm4, %v1598_v58  ;;  %v1713_v53 = vrot.slane %v1676_v13, 1  ;;  %v1716_v28 = vrot.slane %v1677_v8, 1  ;;  %v1832_v39 = vrot.slane %v1808_v19, 2 }
  0xd7   : > { %2803 = vmatmul.msk.bf16.vlgmr.msra.gmra.mxu2 %vm2277_vm9, %v2397_v49  ;;  %v1833_v15 = vrot.slane %v1676_v13, 2  ;;  %1631 = vst.msk [vmem:[#allocation2 + $0x2c] sm:$0x1] %vm224_vm2, %v1599_v24  ;;  %2759 = vmatmul.msk.bf16.vlgmr.msra.gmra.mxu0 %vm2277_vm9, %v2261_v22  ;;  %v1642_v40 = vld [vmem:[#allocation2 + $0x10] sm:$0xf]  ;;  %v1928_v37 = vunpack.c.l.bf16 %v3928_v0  ;;  %v1929_v29 = vunpack.c.l.bf16 %v3930_v55  ;;  %v2048_v36 = vunpack.c.l.bf16 %v3935_v4 }
  0xd8   : > { %v3947_v57 = vld [vmem:[#allocation2 + $0x10] sm:$0xe]  ;;  %v2049_v54 = vunpack.c.l.bf16 %v3937_v21  ;;  %1632 = vst.msk [vmem:[#allocation2 + $0x30] sm:$0xe] %vm299_vm4, %v1600_v5  ;;  %v1643_v1 = vld [vmem:[#allocation2 + $0x18] sm:$0xf]  ;;  %v1666_v27 = vunpack.c.l.bf16 %v1642_v40  ;;  %v1714_v59 = vsel %vm388_vm5, %v1712_v11, %v1713_v53  ;;  %v1717_v2 = vsel %vm388_vm5, %v1715_v47, %v1716_v28 }
  0xd9   : > { %v3956_v31 = vld [vmem:[#allocation2 + $0x18] sm:$0xe]  ;;  %v1810_v10 = vunpack.c.l.bf16 %v3947_v57  ;;  %1633 = vst.msk [vmem:[#allocation2 + $0x34] sm:$0x1] %vm224_vm2, %v1601_v7  ;;  %v1654_v25 = vld [vmem:[#allocation2 + $0x14] sm:$0x1]  ;;  %v1667_v43 = vunpack.c.l.bf16 %v1643_v1  ;;  %v3960_v14 = vmax.f32 %v1664_v16, %v1714_v59  ;;  %v3962_v6 = vmax.f32 %v1665_v26, %v1717_v2 }
  0xda   : > { %v1811_v58 = vunpack.c.l.bf16 %v3956_v31  ;;  %v3965_v5 = vld [vmem:[#allocation2 + $0x14] sm:$0x3]  ;;  %1634 = vst.msk [vmem:[#allocation2 + $0x38] sm:$0xe] %vm299_vm4, %v1602_v33  ;;  %v1655_v20 = vld [vmem:[#allocation2 + $0x1c] sm:$0x1]  ;;  %v1678_v12 = vunpack.c.l.bf16 %v1654_v25  ;;  %v3971_v46 = vsel %vm509_vm6, %v1832_v39, %v1833_v15 }
  0xdb   : > { %v1718_v44 = vrot.slane %v1666_v27, 1  ;;  %v1835_v42 = vrot.slane %v1809_v32, 2  ;;  %1635 = vst.msk [vmem:[#allocation2 + $0x3c] sm:$0x1] %vm224_vm2, %v3908_v3  ;;  %v1644_v35 = vld [vmem:[#allocation2 + $0x20] sm:$0xf]  ;;  %v1679_v24 = vunpack.c.l.bf16 %v1655_v20  ;;  %v1880_v41 = vmax.f32 %v3960_v14, %v3971_v46 }
  0xdc   : > { %v1721_v7 = vrot.slane %v1667_v43, 1  ;;  %v1836_v18 = vrot.slane %v1677_v8, 2  ;;  %1636 = vst.msk [vmem:[#allocation2 + $0x40] sm:$0xe] %vm299_vm4, %v1604_v63  ;;  %v1656_v33 = vld [vmem:[#allocation2 + $0x24] sm:$0x1]  ;;  %v1668_v34 = vunpack.c.l.bf16 %v1644_v35  ;;  %v1930_v9 = vunpack.c.l.bf16 %v3965_v5 }
  0xdd   : > { %v1719_v52 = vrot.slane %v1678_v12, 1  ;;  %v1838_v48 = vrot.slane %v1810_v10, 2  ;;  %1637 = vst.msk [vmem:[#allocation2 + $0x44] sm:$0x1] %vm224_vm2, %v3912_v30  ;;  %v1645_v3 = vld [vmem:[#allocation2 + $0x28] sm:$0xf]  ;;  %v1680_v16 = vunpack.c.l.bf16 %v1656_v33 }
  0xde   : > { %v1722_v26 = vrot.slane %v1679_v24, 1  ;;  %v3988_v49 = vsel %vm509_vm6, %v1835_v42, %v1836_v18  ;;  %v1839_v13 = vrot.slane %v1678_v12, 2  ;;  %1638 = vst.msk [vmem:[#allocation2 + $0x48] sm:$0xe] %vm299_vm4, %v1606_v60  ;;  %v1657_v63 = vld [vmem:[#allocation2 + $0x2c] sm:$0x1]  ;;  %v1669_v8 = vunpack.c.l.bf16 %v1645_v3 }
  0xdf   : > { %v1720_v22 = vsel %vm388_vm5, %v1718_v44, %v1719_v52  ;;  %v1724_v11 = vrot.slane %v1668_v34, 1  ;;  %v1841_v47 = vrot.slane %v1811_v58, 2  ;;  %1639 = vst.msk [vmem:[#allocation2 + $0x4c] sm:$0x1] %vm224_vm2, %v3917_v61  ;;  %v1681_v30 = vunpack.c.l.bf16 %v1657_v63  ;;  %v1788_v15 = vld [vmem:[#allocation2 + $0x20] sm:$0xe] }
  0xe0   : > { %v1723_v53 = vsel %vm388_vm5, %v1721_v7, %v1722_v26  ;;  %v1725_v28 = vrot.slane %v1680_v16, 1  ;;  %v1762_v39 = vmax.f32 %v1666_v27, %v1720_v22  ;;  %v1727_v40 = vrot.slane %v1669_v8, 1  ;;  %v1789_v1 = vld [vmem:[#allocation2 + $0x28] sm:$0xe]  ;;  %v4001_v42 = vld [vmem:[#allocation2 + $0x1c] sm:$0x3] }
  0xe1   : > { %v1763_v60 = vmax.f32 %v1667_v43, %v1723_v53  ;;  %v1812_v59 = vunpack.c.l.bf16 %v1788_v15  ;;  %v1840_v2 = vsel %vm509_vm6, %v1838_v48, %v1839_v13  ;;  %v1728_v20 = vrot.slane %v1681_v30, 1  ;;  %v4003_v27 = vld [vmem:[#allocation2 + $0x24] sm:$0x3]  ;;  %v2829_v33 = vld [vmem:[%s2932_s28 + $0x8] sm:$0xff]  ;;  %v2028_v57 = vld [vmem:[#allocation2 + $0x20] sm:$0xc] }
  0xe2   : > { %v1726_v25 = vsel %vm388_vm5, %v1724_v11, %v1725_v28  ;;  %v1813_v12 = vunpack.c.l.bf16 %v1789_v1  ;;  %v1842_v44 = vrot.slane %v1679_v24, 2  ;;  %v1845_v7 = vrot.slane %v1680_v16, 2  ;;  %v1909_v26 = vld [vmem:[#allocation2 + $0x2c] sm:$0x3]  ;;  %2788 = vmatmul.msk.bf16.gmra.mxu1 %vm2277_vm9, %v2829_v33  ;;  %v2026_v1 = vld [vmem:[#allocation2 + $0x10] sm:$0xc] }
  0xe3   : > { %v1764_v61 = vmax.f32 %v1668_v34, %v1726_v25  ;;  %v1844_v35 = vrot.slane %v1812_v59, 2  ;;  %v1848_v18 = vrot.slane %v1681_v30, 2  ;;  %v1729_v43 = vsel %vm388_vm5, %v1727_v40, %v1728_v20  ;;  %v2027_v20 = vld [vmem:[#allocation2 + $0x18] sm:$0xc] }
  0xe4   : > { %v1843_v52 = vsel %vm509_vm6, %v1841_v47, %v1842_v44  ;;  %v1847_v3 = vrot.slane %v1813_v12, 2  ;;  %v1881_v48 = vmax.f32 %v3962_v6, %v3988_v49  ;;  %v1765_v13 = vmax.f32 %v1669_v8, %v1729_v43 }
  0xe5   : > { %v1846_v24 = vsel %vm509_vm6, %v1844_v35, %v1845_v7  ;;  %v1882_v63 = vmax.f32 %v1762_v39, %v1840_v2  ;;  %v1883_v34 = vmax.f32 %v1763_v60, %v1843_v52  ;;  %v1931_v11 = vunpack.c.l.bf16 %v4001_v42 }
  0xe6   : > { %v1849_v16 = vsel %vm509_vm6, %v1847_v3, %v1848_v18  ;;  %v1884_v22 = vmax.f32 %v1764_v61, %v1846_v24  ;;  %v1932_v30 = vunpack.c.l.bf16 %v4003_v27  ;;  %v1933_v53 = vunpack.c.l.bf16 %v1909_v26 }
  0xe7   : > { %v1885_v47 = vmax.f32 %v1765_v13, %v1849_v16  ;;  %v1952_v6 = vrot.slane %v1808_v19, 3  ;;  %v1953_v49 = vrot.slane %v1928_v37, 3  ;;  %v1955_v8 = vrot.slane %v1809_v32, 3 }
  0xe8   : > { %v1956_v28 = vrot.slane %v1929_v29, 3  ;;  %v1958_v39 = vrot.slane %v1810_v10, 3  ;;  %v1959_v15 = vrot.slane %v1930_v9, 3  ;;  %v1961_v56 = vrot.slane %v1811_v58, 3  ;;  %v2029_v58 = vld [vmem:[#allocation2 + $0x28] sm:$0xc] }
  0xe9   : > { %v1954_v40 = vsel %vm630_vm7, %v1952_v6, %v1953_v49  ;;  %v1962_v19 = vrot.slane %v1931_v11, 3  ;;  %v1964_v60 = vrot.slane %v1812_v59, 3  ;;  %v1965_v2 = vrot.slane %v1932_v30, 3  ;;  %v2830_v6 = vld [vmem:[%s2932_s28 + $0x10] sm:$0xff] }
  0xea   : > { %v1957_v45 = vsel %vm630_vm7, %v1955_v8, %v1956_v28  ;;  %v1960_v32 = vsel %vm630_vm7, %v1958_v39, %v1959_v15  ;;  %v1967_v25 = vrot.slane %v1813_v12, 3  ;;  %v1968_v44 = vrot.slane %v1933_v53, 3  ;;  %v1658_v28 = vld [vmem:[#allocation2 + $0x34] sm:$0x1]  ;;  %v1659_v39 = vld [vmem:[#allocation2 + $0x3c] sm:$0x1] }
  0xeb   : > { %v1963_v10 = vsel %vm630_vm7, %v1961_v56, %v1962_v19  ;;  %v2000_v42 = vmax.f32 %v1880_v41, %v1954_v40  ;;  %v2001_v31 = vmax.f32 %v1881_v48, %v1957_v45  ;;  %v1966_v59 = vsel %vm630_vm7, %v1964_v60, %v1965_v2  ;;  %v4317_v56 = vld [vmem:[#allocation5_spill] sm:$0xff]  ;;  %v4318_v60 = vld [vmem:[#allocation6_spill] sm:$0xff] }
  0xec   : > { %v2002_v61 = vmax.f32 %v1882_v63, %v1960_v32  ;;  %v2003_v35 = vmax.f32 %v1883_v34, %v1963_v10  ;;  %v2050_v7 = vunpack.c.l.bf16 %v2026_v1  ;;  %v1969_v18 = vsel %vm630_vm7, %v1967_v25, %v1968_v44  ;;  %v1790_v1 = vld [vmem:[#allocation2 + $0x30] sm:$0xe] }
  0xed   : > { %v2004_v27 = vmax.f32 %v1884_v22, %v1966_v59  ;;  %v2051_v12 = vunpack.c.l.bf16 %v2027_v20  ;;  %v2052_v33 = vunpack.c.l.bf16 %v2028_v57  ;;  %v2005_v43 = vmax.f32 %v1885_v47, %v1969_v18  ;;  %v1647_v47 = vld [vmem:[#allocation2 + $0x38] sm:$0xf] }
  0xee   : > { %v2053_v52 = vunpack.c.l.bf16 %v2029_v58  ;;  %v2072_v3 = vrot.slane %v2048_v36, 4  ;;  %v2073_v14 = vrot.slane %v1928_v37, 4  ;;  %v2075_v46 = vrot.slane %v2049_v54, 4  ;;  %v1791_v20 = vld [vmem:[#allocation2 + $0x38] sm:$0xe] }
  0xef   : > { %v2076_v41 = vrot.slane %v1929_v29, 4  ;;  %v2078_v48 = vrot.slane %v2050_v7, 4  ;;  %v2079_v26 = vrot.slane %v1930_v9, 4  ;;  %v2081_v24 = vrot.slane %v2051_v12, 4 }
  0xf0   : > { %v2074_v13 = vsel %vm751_vm8, %v2072_v3, %v2073_v14  ;;  %v2082_v63 = vrot.slane %v1931_v11, 4  ;;  %v2084_v4 = vrot.slane %v2052_v33, 4  ;;  %v2085_v37 = vrot.slane %v1932_v30, 4  ;;  %v1646_v11 = vld [vmem:[#allocation2 + $0x30] sm:$0xf] }
  0xf1   : > { %v2077_v36 = vsel %vm751_vm8, %v2075_v46, %v2076_v41  ;;  %v2080_v0 = vsel %vm751_vm8, %v2078_v48, %v2079_v26  ;;  %v2087_v21 = vrot.slane %v2053_v52, 4  ;;  %v2088_v55 = vrot.slane %v1933_v53, 4  ;;  %v1911_v3 = vld [vmem:[#allocation2 + $0x3c] sm:$0x3] }
  0xf2   : > { %v2083_v54 = vsel %vm751_vm8, %v2081_v24, %v2082_v63  ;;  %v2120_v29 = vmax.f32 %v2000_v42, %v2074_v13  ;;  %v2121_v34 = vmax.f32 %v2001_v31, %v2077_v36  ;;  %v2086_v5 = vsel %vm751_vm8, %v2084_v4, %v2085_v37  ;;  %2789 = vmatmul.msk.bf16.gmra.mxu1 %vm2277_vm9, %v2830_v6 }
  0xf3   : > { %v4053_v9 = vmax.f32 %v2002_v61, %v2080_v0  ;;  %v4055_v16 = vmax.f32 %v2003_v35, %v2083_v54  ;;  %v2391_v22 = vunpack.c.l.b16 %v3878_v38  ;;  %v2089_v49 = vsel %vm751_vm8, %v2087_v21, %v2088_v55  ;;  %v2030_v21 = vld [vmem:[#allocation2 + $0x30] sm:$0xc]  ;;  %v2031_v54 = vld [vmem:[#allocation2 + $0x38] sm:$0xc] }
  0xf4   : > { %v4060_v30 = vmax.f32 %v2004_v27, %v2086_v5  ;;  %v2153_v8 = vmax.f32 %v2120_v29, %v2121_v34  ;;  %v2392_v53 = vunpack.c.l.b16 %v3880_v62  ;;  %v4063_v15 = vmax.f32 %v2005_v43, %v2089_v49  ;;  %v1910_v27 = vld [vmem:[#allocation2 + $0x34] sm:$0x3] }
  0xf5   : > { %v2154_v40 = vmax.f32 %v2121_v34, %v4053_v9  ;;  %v2255_v19 = vunpack.c.l.b16 %v4317_v56  ;;  %v2256_v38 = vunpack.c.l.b16 %v4318_v60  ;;  %v1670_v2 = vunpack.c.l.bf16 %v1646_v11 }
  0xf6   : > { %v2178_v45 = vmax.f32 %v2153_v8, %v4053_v9  ;;  %v2398_v32 = vpack.c.b16 %v2392_v53, %v2391_v22  ;;  %v1671_v25 = vunpack.c.l.bf16 %v1647_v47  ;;  %v1682_v10 = vunpack.c.l.bf16 %v1658_v28 }
  0xf7   : > { %v2179_v62 = vmax.f32 %v2154_v40, %v4055_v16  ;;  %v2262_v57 = vpack.c.b16 %v2256_v38, %v2255_v19  ;;  %v1683_v44 = vunpack.c.l.bf16 %v1659_v39  ;;  %v1730_v31 = vrot.slane %v1670_v2, 1 }
  0xf8   : > { %v2203_v42 = vmax.f32 %v2178_v45, %v4055_v16  ;;  %2804 = vmatmul.msk.bf16.gmra.mxu2 %vm2277_vm9, %v2398_v32  ;;  %v1733_v58 = vrot.slane %v1671_v25, 1  ;;  %v1814_v59 = vunpack.c.l.bf16 %v1790_v1  ;;  %v1731_v35 = vrot.slane %v1682_v10, 1 }
  0xf9   : > { %v2204_v61 = vmax.f32 %v2179_v62, %v4060_v30  ;;  %2760 = vmatmul.msk.bf16.gmra.mxu0 %vm2277_vm9, %v2262_v57  ;;  %v1734_v7 = vrot.slane %v1683_v44, 1  ;;  %v1815_v18 = vunpack.c.l.bf16 %v1791_v20  ;;  %v1851_v43 = vrot.slane %v1682_v10, 2  ;;  %v1648_v62 = vld [vmem:[#allocation2 + $0x40] sm:$0xf]  ;;  %v1649_v57 = vld [vmem:[#allocation2 + $0x48] sm:$0xf] }
  0xfa   : > { %v2228_v12 = vmax.f32 %v2203_v42, %v4060_v30  ;;  %v1850_v33 = vrot.slane %v1814_v59, 2  ;;  %v1854_v52 = vrot.slane %v1683_v44, 2  ;;  %v1732_v46 = vsel %vm388_vm5, %v1730_v31, %v1731_v35  ;;  %v2831_v10 = vld [vmem:[%s2932_s28 + $0x18] sm:$0xff]  ;;  %v4319_v42 = vld [vmem:[#allocation7_spill] sm:$0xff]  ;;  %v1661_v35 = vld [vmem:[#allocation2 + $0x4c] sm:$0x1] }
  0xfb   : > { %v2229_v14 = vmax.f32 %v2204_v61, %v4063_v15  ;;  %v1735_v41 = vsel %vm388_vm5, %v1733_v58, %v1734_v7  ;;  %v1853_v48 = vrot.slane %v1815_v18, 2  ;;  %v1766_v13 = vmax.f32 %v1670_v2, %v1732_v46  ;;  %v4320_v58 = vld [vmem:[#allocation8_spill] sm:$0xff]  ;;  %v1660_v61 = vld [vmem:[#allocation2 + $0x44] sm:$0x1] }
  0xfc   : > { %v2236_v26 = vpack.c.bf16 %v2228_v12, %v2228_v12  ;;  %v1767_v24 = vmax.f32 %v1671_v25, %v1735_v41  ;;  %v1852_v63 = vsel %vm509_vm6, %v1850_v33, %v1851_v43  ;;  %v1934_v0 = vunpack.c.l.bf16 %v1910_v27  ;;  %v1793_v27 = vld [vmem:[#allocation2 + $0x48] sm:$0xe] }
  0xfd   : > { %v2237_v4 = vpack.c.bf16 %v2229_v14, %v2229_v14  ;;  %v1855_v36 = vsel %vm509_vm6, %v1853_v48, %v1854_v52  ;;  %v1935_v37 = vunpack.c.l.bf16 %v1911_v3  ;;  %v1886_v29 = vmax.f32 %v1766_v13, %v1852_v63 }
  0xfe   : > { %v2475_v55 = vunpack.c.l.b16 %v2236_v26  ;;  %v1887_v34 = vmax.f32 %v1767_v24, %v1855_v36  ;;  %v1970_v5 = vrot.slane %v1814_v59, 3  ;;  %v1971_v11 = vrot.slane %v1934_v0, 3 }
  0xff   : > { %v2476_v22 = vunpack.c.l.b16 %v2237_v4  ;;  %v1973_v47 = vrot.slane %v1815_v18, 3  ;;  %v1974_v6 = vrot.slane %v1935_v37, 3  ;;  %v2054_v49 = vunpack.c.l.bf16 %v2030_v21  ;;  %v1792_v18 = vld [vmem:[#allocation2 + $0x40] sm:$0xe] }
 0x100   : > { %v2055_v8 = vunpack.c.l.bf16 %v2031_v54  ;;  %v2091_v53 = vrot.slane %v1934_v0, 4  ;;  %v2094_v28 = vrot.slane %v1935_v37, 4  ;;  %v1972_v40 = vsel %vm630_vm7, %v1970_v5, %v1971_v11  ;;  %v1912_v37 = vld [vmem:[#allocation2 + $0x44] sm:$0x3] }
 0x101   : > { %v2483_v39 = vpack.c.b16 %v2476_v22, %v2475_v55  ;;  %v1975_v56 = vsel %vm630_vm7, %v1973_v47, %v1974_v6  ;;  %v2155_v19 = vmax.f32 %v4053_v9, %v4055_v16  ;;  %v2006_v60 = vmax.f32 %v1886_v29, %v1972_v40  ;;  %v2032_v6 = vld [vmem:[#allocation2 + $0x40] sm:$0xc] }
 0x102   : > { %v2007_v38 = vmax.f32 %v1887_v34, %v1975_v56  ;;  %v2090_v1 = vrot.slane %v2054_v49, 4  ;;  %v2093_v45 = vrot.slane %v2055_v8, 4  ;;  %v2156_v32 = vmax.f32 %v4055_v16, %v4060_v30  ;;  %2790 = vmatmul.msk.bf16.gmra.mxu1 %vm2277_vm9, %v2831_v10  ;;  %v1913_v34 = vld [vmem:[#allocation2 + $0x4c] sm:$0x3] }
 0x103   : > { %2819 = vmatmul.msk.bf16.vlgmr.msra.gmra.mxu3 %vm2277_vm9, %v2483_v39  ;;  %v2180_v2 = vmax.f32 %v2155_v19, %v4060_v30  ;;  %v2393_v25 = vunpack.c.l.b16 %v3882_v51  ;;  %v2394_v20 = vunpack.c.l.b16 %v3884_v23  ;;  %v2257_v31 = vunpack.c.l.b16 %v4319_v42  ;;  %v2033_v39 = vld [vmem:[#allocation2 + $0x48] sm:$0xc] }
 0x104   : > { %v2092_v9 = vsel %vm751_vm8, %v2090_v1, %v2091_v53  ;;  %v2095_v44 = vsel %vm751_vm8, %v2093_v45, %v2094_v28  ;;  %v2258_v59 = vunpack.c.l.b16 %v4320_v58  ;;  %v2181_v51 = vmax.f32 %v2156_v32, %v4063_v15 }
 0x105   : > { %v4096_v16 = vmax.f32 %v2006_v60, %v2092_v9  ;;  %v4098_v7 = vmax.f32 %v2007_v38, %v2095_v44  ;;  %v2205_v23 = vmax.f32 %v2180_v2, %v4063_v15  ;;  %v2399_v12 = vpack.c.b16 %v2394_v20, %v2393_v25 }
 0x106   : > { %v2263_v33 = vpack.c.b16 %v2258_v59, %v2257_v31  ;;  %v1672_v43 = vunpack.c.l.bf16 %v1648_v62  ;;  %v1673_v52 = vunpack.c.l.bf16 %v1649_v57  ;;  %v1684_v46 = vunpack.c.l.bf16 %v1660_v61 }
 0x107   : > { %v2206_v3 = vmax.f32 %v2181_v51, %v4096_v16  ;;  %v2230_v14 = vmax.f32 %v2205_v23, %v4096_v16  ;;  %v1685_v41 = vunpack.c.l.bf16 %v1661_v35  ;;  %v1816_v13 = vunpack.c.l.bf16 %v1792_v18  ;;  %v1650_v18 = vld [vmem:[#allocation2 + $0x50] sm:$0xf] }
 0x108   : > { %2805 = vmatmul.msk.bf16.gmra.mxu2 %vm2277_vm9, %v2399_v12  ;;  %v1736_v48 = vrot.slane %v1672_v43, 1  ;;  %v1739_v26 = vrot.slane %v1673_v52, 1  ;;  %v1817_v24 = vunpack.c.l.bf16 %v1793_v27  ;;  %v1737_v36 = vrot.slane %v1684_v46, 1  ;;  %v1651_v27 = vld [vmem:[#allocation2 + $0x58] sm:$0xf] }
 0x109   : > { %v2231_v63 = vmax.f32 %v2206_v3, %v4098_v7  ;;  %v2238_v4 = vpack.c.bf16 %v2230_v14, %v2230_v14  ;;  %2761 = vmatmul.msk.bf16.gmra.mxu0 %vm2277_vm9, %v2263_v33  ;;  %v1740_v0 = vrot.slane %v1685_v41, 1  ;;  %v1856_v21 = vrot.slane %v1816_v13, 2 }
 0x10a   : > { %v1857_v54 = vrot.slane %v1684_v46, 2  ;;  %v1859_v55 = vrot.slane %v1817_v24, 2  ;;  %v1860_v29 = vrot.slane %v1685_v41, 2  ;;  %v1738_v11 = vsel %vm388_vm5, %v1736_v48, %v1737_v36  ;;  %v4321_v41 = vld [vmem:[#allocation9_spill] sm:$0xff] }
 0x10b   : > { %v2239_v5 = vpack.c.bf16 %v2231_v63, %v2231_v63  ;;  %v2477_v22 = vunpack.c.l.b16 %v2238_v4  ;;  %v1741_v47 = vsel %vm388_vm5, %v1739_v26, %v1740_v0  ;;  %v1768_v49 = vmax.f32 %v1672_v43, %v1738_v11  ;;  %v1794_v26 = vld [vmem:[#allocation2 + $0x50] sm:$0xe] }
 0x10c   : > { %v1769_v8 = vmax.f32 %v1673_v52, %v1741_v47  ;;  %v1858_v53 = vsel %vm509_vm6, %v1856_v21, %v1857_v54  ;;  %v1861_v28 = vsel %vm509_vm6, %v1859_v55, %v1860_v29  ;;  %v1936_v56 = vunpack.c.l.bf16 %v1912_v37  ;;  %v1662_v52 = vld [vmem:[#allocation2 + $0x54] sm:$0x1]  ;;  %v1795_v21 = vld [vmem:[#allocation2 + $0x58] sm:$0xe] }
 0x10d   : > { %v2478_v40 = vunpack.c.l.b16 %v2239_v5  ;;  %v1937_v19 = vunpack.c.l.bf16 %v1913_v34  ;;  %v1976_v60 = vrot.slane %v1816_v13, 3  ;;  %v1888_v38 = vmax.f32 %v1768_v49, %v1858_v53 }
 0x10e   : > { %v1889_v1 = vmax.f32 %v1769_v8, %v1861_v28  ;;  %v1979_v45 = vrot.slane %v1817_v24, 3  ;;  %v2056_v32 = vunpack.c.l.bf16 %v2032_v6  ;;  %v1977_v25 = vrot.slane %v1936_v56, 3  ;;  %v4322_v24 = vld [vmem:[#allocation10_spill] sm:$0xff]  ;;  %v1914_v6 = vld [vmem:[#allocation2 + $0x54] sm:$0x3] }
 0x10f   : > { %v2484_v2 = vpack.c.b16 %v2478_v40, %v2477_v22  ;;  %v1980_v20 = vrot.slane %v1937_v19, 3  ;;  %v2057_v62 = vunpack.c.l.bf16 %v2033_v39  ;;  %v2097_v10 = vrot.slane %v1936_v56, 4  ;;  %v1915_v39 = vld [vmem:[#allocation2 + $0x5c] sm:$0x3] }
 0x110   : > { %v2096_v57 = vrot.slane %v2056_v32, 4  ;;  %v2100_v9 = vrot.slane %v1937_v19, 4  ;;  %v2157_v44 = vmax.f32 %v4060_v30, %v4063_v15  ;;  %v1978_v42 = vsel %vm630_vm7, %v1976_v60, %v1977_v25 }
 0x111   : > { %v1981_v31 = vsel %vm630_vm7, %v1979_v45, %v1980_v20  ;;  %v2099_v58 = vrot.slane %v2057_v62, 4  ;;  %v2158_v59 = vmax.f32 %v4063_v15, %v4096_v16  ;;  %v2008_v61 = vmax.f32 %v1888_v38, %v1978_v42  ;;  %v1663_v15 = vld [vmem:[#allocation2 + $0x5c] sm:$0x1]  ;;  %v2034_v38 = vld [vmem:[#allocation2 + $0x50] sm:$0xc] }
 0x112   : > { %v2009_v35 = vmax.f32 %v1889_v1, %v1981_v31  ;;  %v2098_v51 = vsel %vm751_vm8, %v2096_v57, %v2097_v10  ;;  %v2182_v23 = vmax.f32 %v2157_v44, %v4096_v16  ;;  %v2395_v33 = vunpack.c.l.b16 %v3886_v17  ;;  %v2035_v10 = vld [vmem:[#allocation2 + $0x58] sm:$0xc] }
 0x113   : > { %2820 = vmatmul.msk.bf16.gmra.mxu3 %vm2277_vm9, %v2484_v2  ;;  %v2101_v30 = vsel %vm751_vm8, %v2099_v58, %v2100_v9  ;;  %v2183_v12 = vmax.f32 %v2158_v59, %v4098_v7  ;;  %v2396_v43 = vunpack.c.l.b16 %v3888_v50  ;;  %v4125_v3 = vmax.f32 %v2008_v61, %v2098_v51 }
 0x114   : > { %v4127_v14 = vmax.f32 %v2009_v35, %v2101_v30  ;;  %v2207_v46 = vmax.f32 %v2182_v23, %v4098_v7  ;;  %v2259_v48 = vunpack.c.l.b16 %v4321_v41  ;;  %v2260_v63 = vunpack.c.l.b16 %v4322_v24 }
 0x115   : > { %v2400_v13 = vpack.c.b16 %v2396_v43, %v2395_v33  ;;  %v1674_v4 = vunpack.c.l.bf16 %v1650_v18  ;;  %v1675_v36 = vunpack.c.l.bf16 %v1651_v27  ;;  %v2208_v17 = vmax.f32 %v2183_v12, %v4125_v3 }
 0x116   : > { %v2232_v50 = vmax.f32 %v2207_v46, %v4125_v3  ;;  %v1686_v0 = vunpack.c.l.bf16 %v1662_v52  ;;  %v1687_v37 = vunpack.c.l.bf16 %v1663_v15  ;;  %v2264_v54 = vpack.c.b16 %v2260_v63, %v2259_v48 }
 0x117   : > { %v1742_v55 = vrot.slane %v1674_v4, 1  ;;  %v1745_v29 = vrot.slane %v1675_v36, 1  ;;  %v1818_v34 = vunpack.c.l.bf16 %v1794_v26  ;;  %v2233_v5 = vmax.f32 %v2208_v17, %v4127_v14 }
 0x118   : > { %v2240_v22 = vpack.c.bf16 %v2232_v50, %v2232_v50  ;;  %2806 = vmatmul.msk.bf16.gmra.mxu2 %vm2277_vm9, %v2400_v13  ;;  %v1743_v11 = vrot.slane %v1686_v0, 1  ;;  %v1746_v47 = vrot.slane %v1687_v37, 1  ;;  %v1819_v49 = vunpack.c.l.bf16 %v1795_v21 }
 0x119   : > { %2762 = vmatmul.msk.bf16.gmra.mxu0 %vm2277_vm9, %v2264_v54  ;;  %v1862_v8 = vrot.slane %v1818_v34, 2  ;;  %v1863_v53 = vrot.slane %v1686_v0, 2  ;;  %v1866_v28 = vrot.slane %v1687_v37, 2  ;;  %v2241_v40 = vpack.c.bf16 %v2233_v5, %v2233_v5 }
 0x11a   : > { %v2479_v56 = vunpack.c.l.b16 %v2240_v22  ;;  %v1744_v19 = vsel %vm388_vm5, %v1742_v55, %v1743_v11  ;;  %v1747_v60 = vsel %vm388_vm5, %v1745_v29, %v1746_v47  ;;  %v1865_v2 = vrot.slane %v1819_v49, 2 }
 0x11b   : > { %v1770_v1 = vmax.f32 %v1674_v4, %v1744_v19  ;;  %v1771_v45 = vmax.f32 %v1675_v36, %v1747_v60  ;;  %v1864_v32 = vsel %vm509_vm6, %v1862_v8, %v1863_v53  ;;  %v2480_v25 = vunpack.c.l.b16 %v2241_v40 }
 0x11c   : > { %v1938_v20 = vunpack.c.l.bf16 %v1914_v6  ;;  %v1939_v62 = vunpack.c.l.bf16 %v1915_v39  ;;  %v1982_v57 = vrot.slane %v1818_v34, 3  ;;  %v1867_v9 = vsel %vm509_vm6, %v1865_v2, %v1866_v28  ;;  %v4157_v6 = vld [vmem:[%s4214_s2] ss:$0 sm:$0xff] }
 0x11d   : > { %v1890_v44 = vmax.f32 %v1770_v1, %v1864_v32  ;;  %v1985_v42 = vrot.slane %v1819_v49, 3  ;;  %v2058_v31 = vunpack.c.l.bf16 %v2034_v38  ;;  %v2485_v58 = vpack.c.b16 %v2480_v25, %v2479_v56 }
 0x11e   : > { %v1891_v59 = vmax.f32 %v1771_v45, %v1867_v9  ;;  %v1983_v61 = vrot.slane %v1938_v20, 3  ;;  %v1986_v35 = vrot.slane %v1939_v62, 3  ;;  %v2059_v51 = vunpack.c.l.bf16 %v2035_v10 }
 0x11f   : > { %v2102_v23 = vrot.slane %v2058_v31, 4  ;;  %v2103_v18 = vrot.slane %v1938_v20, 4  ;;  %v2106_v27 = vrot.slane %v1939_v62, 4  ;;  %v2159_v33 = vmax.f32 %v4096_v16, %v4098_v7 }
 0x120   : > { %v1984_v30 = vsel %vm630_vm7, %v1982_v57, %v1983_v61  ;;  %v1987_v12 = vsel %vm630_vm7, %v1985_v42, %v1986_v35  ;;  %v2160_v43 = vmax.f32 %v4098_v7, %v4125_v3  ;;  %v2105_v41 = vrot.slane %v2059_v51, 4 }
 0x121   : > { %v2010_v52 = vmax.f32 %v1890_v44, %v1984_v30  ;;  %v2011_v15 = vmax.f32 %v1891_v59, %v1987_v12  ;;  %v2104_v46 = vsel %vm751_vm8, %v2102_v23, %v2103_v18  ;;  %v2184_v48 = vmax.f32 %v2159_v33, %v4125_v3 }
 0x122   : > { %v2185_v26 = vmax.f32 %v2160_v43, %v4127_v14  ;;  %v2107_v13 = vsel %vm751_vm8, %v2105_v41, %v2106_v27 }
 0x123   : > { %2821 = vmatmul.msk.bf16.gmra.mxu3 %vm2277_vm9, %v2485_v58  ;;  %v2130_v24 = vmax.f32 %v2010_v52, %v2104_v46  ;;  %v2131_v63 = vmax.f32 %v2011_v15, %v2107_v13  ;;  %v2209_v16 = vmax.f32 %v2184_v48, %v4127_v14 }
 0x125   : > { %v2210_v4 = vmax.f32 %v2185_v26, %v2130_v24  ;;  %v2234_v36 = vmax.f32 %v2209_v16, %v2130_v24 }
 0x127   : > { %v2235_v7 = vmax.f32 %v2210_v4, %v2131_v63  ;;  %v2242_v17 = vpack.c.bf16 %v2234_v36, %v2234_v36 }
 0x129   : > { %v2243_v50 = vpack.c.bf16 %v2235_v7, %v2235_v7  ;;  %v2481_v0 = vunpack.c.l.b16 %v2242_v17 }
 0x12b   : > { %v2482_v37 = vunpack.c.l.b16 %v2243_v50 }
 0x12d   : > { %v2486_v21 = vpack.c.b16 %v2482_v37, %v2481_v0 }
 0x133   : > { %2822 = vmatmul.msk.bf16.gmra.mxu3 %vm2277_vm9, %v2486_v21 }
 0x142   : > { %v2364_v3 = vpop.f32.mrf.mxu1 }
 0x14a   : > { %v2366_v29 = vpop.f32.mrf.mxu1 }
 0x154   : > { %v2299_v54 = vpop.f32.mrf.mxu0 }
 0x155   : > { %v2365_v22 = vadd.f32 %v2364_v3, %v2299_v54 }
 0x15a   : > { %v2434_v55 = vpop.f32.mrf.mxu2 }
 0x15b   : > { %v2454_v11 = vadd.f32 %v2434_v55, %v2365_v22 }
 0x15c   : > { %v2301_v34 = vpop.f32.mrf.mxu0 }
 0x15d   : > { %v2367_v28 = vadd.f32 %v2366_v29, %v2301_v34 }
 0x15f   : > { %v2369_v14 = vpop.f32.mrf.mxu1 }
 0x162   : > { %v2436_v5 = vpop.f32.mrf.mxu2 }
 0x163   : > { %v2455_v19 = vadd.f32 %v2436_v5, %v2367_v28 }
 0x167   : > { %v2371_v38 = vpop.f32.mrf.mxu1 }
 0x16f   : > { %v2374_v59 = vpop.f32.mrf.mxu1 }
 0x176   : > { %v2304_v47 = vpop.f32.mrf.mxu0 }
 0x177   : > { %v2370_v2 = vadd.f32 %v2369_v14, %v2304_v47  ;;  %v2376_v48 = vpop.f32.mrf.mxu1 }
 0x17b   : > { %v2439_v53 = vpop.f32.mrf.mxu2 }
 0x17c   : > { %v2456_v10 = vadd.f32 %v2439_v53, %v2370_v2 }
 0x17e   : > { %v2306_v32 = vpop.f32.mrf.mxu0 }
 0x17f   : > { %v2372_v35 = vadd.f32 %v2371_v38, %v2306_v32  ;;  %v2379_v21 = vpop.f32.mrf.mxu1 }
 0x183   : > { %v2441_v57 = vpop.f32.mrf.mxu2 }
 0x184   : > { %v2457_v30 = vadd.f32 %v2441_v57, %v2372_v35 }
 0x186   : > { %v2520_v49 = vpop.f32.mrf.mxu3  ;;  %v2309_v61 = vpop.f32.mrf.mxu0 }
 0x187   : > { %v2540_v8 = vadd.f32 %v2520_v49, %v2454_v11  ;;  %v2375_v52 = vadd.f32 %v2374_v59, %v2309_v61  ;;  %v2381_v28 = vpop.f32.mrf.mxu1 }
 0x189   : > { %v2552_v39 = vadd.f32 %v4157_v6, %v2540_v8  ;;  %v2600_v40 = vpack.c.bf16 %v2540_v8, %v2540_v8 }
 0x18b   : > { %vm2560_vm10 = vcmp.ge.f32.partialorder %v2552_v39, 0.0  ;;  %v2568_v56 = vmul.f32 0.1, %v2552_v39  ;;  %2616 = vrot.lane.b32.xlu0 %v2600_v40, %s2860_s13  ;;  %v2444_v27 = vpop.f32.mrf.mxu2 }
 0x18c   : > { %v2458_v13 = vadd.f32 %v2444_v27, %v2375_v52 }
 0x18d   : > { %v2576_v60 = vsel %vm2560_vm10, %v2552_v39, %v2568_v56 }
 0x18e   : > { %v2584_v1 = vpack.c.bf16 %v2576_v60, %v2576_v60  ;;  %v2522_v45 = vpop.f32.mrf.mxu3  ;;  %v2311_v26 = vpop.f32.mrf.mxu0 }
 0x18f   : > { %v2541_v25 = vadd.f32 %v2522_v45, %v2455_v19  ;;  %v2377_v17 = vadd.f32 %v2376_v48, %v2311_v26 }
 0x190   : > { %2592 = vst.msk [vmem:[%s4165_s17] sm:$0xf] %vm213_vm0, %v2584_v1 }
 0x191   : > { %v2553_v20 = vadd.f32 %v4157_v6, %v2541_v25  ;;  %v2601_v62 = vpack.c.bf16 %v2541_v25, %v2541_v25 }
 0x193   : > { %vm2561_vm11 = vcmp.ge.f32.partialorder %v2553_v20, 0.0  ;;  %v2569_v9 = vmul.f32 0.1, %v2553_v20  ;;  %2618 = vrot.lane.b32.xlu0 %v2601_v62, %s2860_s13  ;;  %v2446_v4 = vpop.f32.mrf.mxu2 }
 0x194   : > { %v2459_v54 = vadd.f32 %v2446_v4, %v2377_v17 }
 0x195   : > { %v2577_v44 = vsel %vm2561_vm11, %v2553_v20, %v2569_v9 }
 0x196   : > { %v2585_v42 = vpack.c.bf16 %v2577_v44, %v2577_v44  ;;  %v2525_v31 = vpop.f32.mrf.mxu3  ;;  %v2314_v3 = vpop.f32.mrf.mxu0 }
 0x197   : > { %v2542_v58 = vadd.f32 %v2525_v31, %v2456_v10  ;;  %v2380_v5 = vadd.f32 %v2379_v21, %v2314_v3 }
 0x198   : > { %2593 = vst.msk [vmem:[%s4165_s17 + $0x4] sm:$0xf] %vm213_vm0, %v2585_v42 }
 0x199   : > { %v2554_v51 = vadd.f32 %v4157_v6, %v2542_v58  ;;  %v2602_v23 = vpack.c.bf16 %v2542_v58, %v2542_v58 }
 0x19b   : > { %vm2562_vm12 = vcmp.ge.f32.partialorder %v2554_v51, 0.0  ;;  %v2570_v18 = vmul.f32 0.1, %v2554_v51  ;;  %2620 = vrot.lane.b32.xlu1 %v2602_v23, %s2860_s13  ;;  %v2449_v11 = vpop.f32.mrf.mxu2 }
 0x19c   : > { %v2460_v49 = vadd.f32 %v2449_v11, %v2380_v5 }
 0x19d   : > { %v2578_v12 = vsel %vm2562_vm12, %v2554_v51, %v2570_v18 }
 0x19e   : > { %v2586_v33 = vpack.c.bf16 %v2578_v12, %v2578_v12  ;;  %v2527_v43 = vpop.f32.mrf.mxu3  ;;  %v2316_v40 = vpop.f32.mrf.mxu0 }
 0x19f   : > { %v2543_v15 = vadd.f32 %v2527_v43, %v2457_v30  ;;  %v2382_v60 = vadd.f32 %v2381_v28, %v2316_v40 }
 0x1a0   : > { %2594 = vst.msk [vmem:[%s4165_s17 + $0x8] sm:$0xf] %vm213_vm0, %v2586_v33 }
 0x1a1   : > { %v2555_v46 = vadd.f32 %v4157_v6, %v2543_v15  ;;  %v2603_v41 = vpack.c.bf16 %v2543_v15, %v2543_v15 }
 0x1a3   : > { %vm2563_vm13 = vcmp.ge.f32.partialorder %v2555_v46, 0.0  ;;  %v2571_v24 = vmul.f32 0.1, %v2555_v46  ;;  %2622 = vrot.lane.b32.xlu1 %v2603_v41, %s2860_s13  ;;  %v2451_v45 = vpop.f32.mrf.mxu2 }
 0x1a4   : > { %v2461_v2 = vadd.f32 %v2451_v45, %v2382_v60 }
 0x1a5   : > { %v2579_v63 = vsel %vm2563_vm13, %v2555_v46, %v2571_v24 }
 0x1a6   : > { %v2587_v16 = vpack.c.bf16 %v2579_v63, %v2579_v63  ;;  %v2530_v36 = vpop.f32.mrf.mxu3 }
 0x1a7   : > { %v2544_v7 = vadd.f32 %v2530_v36, %v2458_v13 }
 0x1a8   : > { %2595 = vst.msk [vmem:[%s4165_s17 + $0xc] sm:$0xf] %vm213_vm0, %v2587_v16 }
 0x1a9   : > { %v2556_v50 = vadd.f32 %v4157_v6, %v2544_v7  ;;  %v2604_v0 = vpack.c.bf16 %v2544_v7, %v2544_v7 }
 0x1ab   : > { %vm2564_vm14 = vcmp.ge.f32.partialorder %v2556_v50, 0.0  ;;  %v2572_v37 = vmul.f32 0.1, %v2556_v50  ;;  %2624 = vrot.lane.b32.xlu2 %v2604_v0, %s2860_s13 }
 0x1ad   : > { %v2580_v55 = vsel %vm2564_vm14, %v2556_v50, %v2572_v37 }
 0x1ae   : > { %v2588_v29 = vpack.c.bf16 %v2580_v55, %v2580_v55  ;;  %v2532_v34 = vpop.f32.mrf.mxu3 }
 0x1af   : > { %v2545_v22 = vadd.f32 %v2532_v34, %v2459_v54 }
 0x1b0   : > { %2596 = vst.msk [vmem:[%s4165_s17 + $0x10] sm:$0xf] %vm213_vm0, %v2588_v29 }
 0x1b1   : > { %v2557_v14 = vadd.f32 %v4157_v6, %v2545_v22  ;;  %v2605_v47 = vpack.c.bf16 %v2545_v22, %v2545_v22 }
 0x1b3   : > { %vm2565_vm15 = vcmp.ge.f32.partialorder %v2557_v14, 0.0  ;;  %v2573_v8 = vmul.f32 0.1, %v2557_v14  ;;  %2626 = vrot.lane.b32.xlu2 %v2605_v47, %s2860_s13 }
 0x1b5   : > { %v2581_v53 = vsel %vm2565_vm15, %v2557_v14, %v2573_v8 }
 0x1b6   : > { %v2589_v39 = vpack.c.bf16 %v2581_v53, %v2581_v53  ;;  %v2535_v56 = vpop.f32.mrf.mxu3 }
 0x1b7   : > { %v2546_v19 = vadd.f32 %v2535_v56, %v2460_v49 }
 0x1b8   : > { %2597 = vst.msk [vmem:[%s4165_s17 + $0x14] sm:$0xf] %vm213_vm0, %v2589_v39 }
 0x1b9   : > { %v2558_v38 = vadd.f32 %v4157_v6, %v2546_v19  ;;  %v2606_v1 = vpack.c.bf16 %v2546_v19, %v2546_v19 }
 0x1bb   : > { %vm2566_vm1 = vcmp.ge.f32.partialorder %v2558_v38, 0.0  ;;  %v2574_v32 = vmul.f32 0.1, %v2558_v38  ;;  %2628 = vrot.lane.b32.xlu0 %v2606_v1, %s2860_s13 }
 0x1bd   : > { %v2582_v25 = vsel %vm2566_vm1, %v2558_v38, %v2574_v32 }
 0x1be   : > { %v2590_v20 = vpack.c.bf16 %v2582_v25, %v2582_v25  ;;  %v2537_v62 = vpop.f32.mrf.mxu3 }
 0x1bf   : > { %v2547_v57 = vadd.f32 %v2537_v62, %v2461_v2 }
 0x1c0   : > { %2598 = vst.msk [vmem:[%s4165_s17 + $0x18] sm:$0xf] %vm213_vm0, %v2590_v20 }
 0x1c1   : > { %v2559_v10 = vadd.f32 %v4157_v6, %v2547_v57  ;;  %v2607_v9 = vpack.c.bf16 %v2547_v57, %v2547_v57 }
 0x1c3   : > { %vm2567_vm2 = vcmp.ge.f32.partialorder %v2559_v10, 0.0  ;;  %v2575_v44 = vmul.f32 0.1, %v2559_v10  ;;  %2630 = vrot.lane.b32.xlu1 %v2607_v9, %s2860_s13 }
 0x1c5   : > { %v2583_v42 = vsel %vm2567_vm2, %v2559_v10, %v2575_v44 }
 0x1c6   : > { %v2591_v31 = vpack.c.bf16 %v2583_v42, %v2583_v42 }
 0x1c8   : > { %2599 = vst.msk [vmem:[%s4165_s17 + $0x1c] sm:$0xf] %vm213_vm0, %v2591_v31 }
 0x1fd   : > { %v2617_v58 = vpop.permute.xlu0 %2616 }
 0x1fe   : > { %2640 = vst.msk [vmem:[%s210_s20] sm:$0xf] %vm213_vm0, %v2617_v58 }
 0x205   : > { %v2619_v59 = vpop.permute.xlu0 %2618  ;;  %v2625_v61 = vpop.permute.xlu2 %2624 }
 0x206   : > { %2641 = vst.msk [vmem:[%s210_s20 + $0x4] sm:$0xf] %vm213_vm0, %v2619_v59 }
 0x207   : > { %2644 = vst.msk [vmem:[%s210_s20 + $0x10] sm:$0xf] %vm213_vm0, %v2625_v61 }
 0x20d   : > { %v2621_v6 = vpop.permute.xlu1 %2620  ;;  %v2627_v35 = vpop.permute.xlu2 %2626 }
 0x20e   : > { %2642 = vst.msk [vmem:[%s210_s20 + $0x8] sm:$0xf] %vm213_vm0, %v2621_v6 }
 0x20f   : > { %2645 = vst.msk [vmem:[%s210_s20 + $0x14] sm:$0xf] %vm213_vm0, %v2627_v35 }
 0x215   : > { %v2623_v51 = vpop.permute.xlu1 %2622 }
 0x216   : > { %2643 = vst.msk [vmem:[%s210_s20 + $0xc] sm:$0xf] %vm213_vm0, %v2623_v51 }
 0x22d   : > { %v2629_v23 = vpop.permute.xlu0 %2628 }
 0x22e   : > { %2646 = vst.msk [vmem:[%s210_s20 + $0x18] sm:$0xf] %vm213_vm0, %v2629_v23 }
 0x235   : > { %v2631_v18 = vpop.permute.xlu1 %2630 }
 0x236   : > { %2647 = vst.msk [vmem:[%s210_s20 + $0x1c] sm:$0xf] %vm213_vm0, %v2631_v18 }
 0x237 PF: > { %s15_s15 = sadd.s32 1, %s2857_s15  }
 0x238   : > { %p12_p4 = scmp.ge.s32.totalorder %s15_s15, 4  }
 0x23a   :  { %14 = sbr.rel (!%p12_p4) target bundleno = 1 (0x1), region = 79 }

</bundles_post_ra>
